<compile_context>
chip_gen: v7x
topology: tpu7x:2x2x1
jax: 0.10.0
libtpu: 0.0.40
codegen_flags: <defaults>
</compile_context>

<pallas_src>
import math
import functools

import jax
import jax.numpy as jnp
from jax import lax
from jax.experimental import pallas as pl
from jax.experimental.pallas import tpu as pltpu


# -----------------------------------------------------------------------------
# Pallas kernel: fused 3x3 conv (same padding) + bias + ReLU + PixelShuffle(r)
# -----------------------------------------------------------------------------
def _conv3x3_relu_ps_kernel(x_top_ref, x_mid_ref, x_bot_ref, w_ref, b_ref,
                            o_ref, xpad_ref, patches_ref, *, r, cn):
    # x_top_ref: (1, 1, W, Cin)      halo row above the tile (clamped at h==0)
    # x_mid_ref: (1, TH, W, Cin)     the tile's own rows
    # x_bot_ref: (1, 1, W, Cin)      halo row below the tile (clamped at last)
    # w_ref:     (9*Cin, Cout)       im2col weights, rows (kh, kw, cin),
    #                                columns permuted to (i, j, cn)
    # b_ref:     (1, Cout)           f32 bias, same column order
    # o_ref:     (1, TH, r, W*r*cn)  conv+ReLU+PixelShuffle output tile
    # xpad_ref:    VMEM (TH+2, W+2, Cin)  zero-padded tile scratch
    # patches_ref: VMEM (TH, W, 9*Cin)    im2col patches scratch
    _, TH, W, Cin = x_mid_ref.shape
    dt = x_mid_ref.dtype
    ht = pl.program_id(1)
    nh = pl.num_programs(1)

    # ---- assemble the zero-padded tile in VMEM scratch (no concat chains) ---
    xpad_ref[:, 0:1, :] = jnp.zeros((TH + 2, 1, Cin), dt)          # left col
    xpad_ref[:, W + 1:W + 2, :] = jnp.zeros((TH + 2, 1, Cin), dt)  # right col
    top = jnp.where(ht == 0, jnp.zeros((1, W, Cin), dt), x_top_ref[0])
    bot = jnp.where(ht == nh - 1, jnp.zeros((1, W, Cin), dt), x_bot_ref[0])
    xpad_ref[0:1, 1:W + 1, :] = top                                # top halo
    xpad_ref[TH + 1:TH + 2, 1:W + 1, :] = bot                      # bottom halo
    xpad_ref[1:TH + 1, 1:W + 1, :] = x_mid_ref[0]                  # interior

    # ---- im2col into scratch, in the compute dtype (no f32 upcast) ----------
    # TODO(synk): for Cin < 128, lane-pack the input as (TH, W*Cin) and build
    # the kw taps with pltpu.roll(shift=+/-Cin, axis=-1) + edge masks so the
    # tap copies become lane-dense instead of Cin(=8)-of-128-lane sparse.
    for kh in range(3):
        for kw in range(3):
            c0 = (kh * 3 + kw) * Cin
            patches_ref[:, :, c0:c0 + Cin] = xpad_ref[kh:kh + TH, kw:kw + W, :]

    # ---- single MXU matmul (K = 9*Cin), f32 accumulation ---------------------
    lhs = patches_ref[...].reshape(TH * W, 9 * Cin)
    acc = jnp.dot(lhs, w_ref[...], preferred_element_type=jnp.float32)
    acc = jnp.maximum(acc + b_ref[...], 0.0)                       # bias + ReLU

    # ---- fused PixelShuffle: one relayout + one lane-dense store -------------
    # acc columns are ordered (i, j, c):  (TH*W, r*r*cn) -> (TH, r, W*r*cn)
    y = acc.astype(o_ref.dtype).reshape(TH, W, r, r * cn)
    y = jnp.transpose(y, (0, 2, 1, 3)).reshape(TH, r, W * r * cn)
    o_ref[0] = y


# -----------------------------------------------------------------------------
# Tile-size / VMEM-budget helpers
# -----------------------------------------------------------------------------
def _default_vmem_limit_bytes():
    """~3/4 of the chip's physical VMEM (v5e/v6e: ~96 MiB, v7x: 48 MiB)."""
    cap = 64 << 20
    try:
        cap = int(pltpu.get_tpu_info().vmem_capacity_bytes)
    except Exception:
        pass
    return int(min(cap * 3 // 4, 100 << 20))


def _choose_tile_h(H, W, Cin, Cout, r, itemsize, budget_bytes):
    """Largest row-tile (divisor of H, prefer multiple of 8) within budget."""
    cn = Cout // (r * r)
    per_row = (3 * W * Cin * itemsize                 # input tile (dbuf + halo)
               + (W + 2) * Cin * itemsize             # padded-tile scratch
               + 9 * W * Cin * itemsize               # im2col scratch
               + 3 * W * Cout * 4                     # f32 acc + relayout temps
               + 2 * r * W * r * cn * itemsize)       # output tile (2x buffered)
    fixed = 2 * (9 * Cin * Cout + Cout) * itemsize + (1 << 20)
    max_th = max(1, (budget_bytes - fixed) // max(per_row, 1))
    divs = [d for d in range(1, H + 1) if H % d == 0 and d <= max_th]
    mult8 = [d for d in divs if d % 8 == 0]
    return max(mult8) if mult8 else max(divs)


# -----------------------------------------------------------------------------
# Wrapper: one UpsampleBlock stage
# -----------------------------------------------------------------------------
def conv3x3_relu_pixelshuffle(x_nhwc, w_packed, b_packed, r, *, tile_h=None,
                              vmem_limit_bytes=None):
    """Fused conv3x3(pad=1) + ReLU + PixelShuffle(r).

    x_nhwc:   (B, H, W, Cin)
    w_packed: (9*Cin, Cout)  from _pack_conv_params
    b_packed: (1, Cout)      f32
    returns:  (B, H*r, W*r, Cout // r**2) NHWC
    """
    B, H, W, Cin = x_nhwc.shape
    Cout = w_packed.shape[1]
    Cn = Cout // (r * r)

    if vmem_limit_bytes is None:
        vmem_limit_bytes = _default_vmem_limit_bytes()
    if tile_h is None:
        tile_h = _choose_tile_h(H, W, Cin, Cout, r,
                                jnp.dtype(x_nhwc.dtype).itemsize,
                                vmem_limit_bytes // 2)
    if H % tile_h != 0:
        raise ValueError(f"tile_h={tile_h} must divide H={H}")
    TH = int(tile_h)
    HT = H // TH

    kernel = functools.partial(_conv3x3_relu_ps_kernel, r=r, cn=Cn)
    out = pl.pallas_call(
        kernel,
        out_shape=jax.ShapeDtypeStruct((B, H, r, W * r * Cn), x_nhwc.dtype),
        grid=(B, HT),
        in_specs=[
            # halo row above the tile (row index clamped at the image top)
            pl.BlockSpec((1, 1, W, Cin),
                         lambda b, h: (b, jnp.maximum(h * TH - 1, 0), 0, 0)),
            # the tile's own TH rows
            pl.BlockSpec((1, TH, W, Cin), lambda b, h: (b, h, 0, 0)),
            # halo row below the tile (row index clamped at the image bottom)
            pl.BlockSpec((1, 1, W, Cin),
                         lambda b, h: (b, jnp.minimum((h + 1) * TH, H - 1), 0, 0)),
            # weights / bias: constant index_map -> fetched once, stay resident
            pl.BlockSpec((9 * Cin, Cout), lambda b, h: (0, 0)),
            pl.BlockSpec((1, Cout), lambda b, h: (0, 0)),
        ],
        out_specs=pl.BlockSpec((1, TH, r, W * r * Cn),
                               lambda b, h: (b, h, 0, 0)),
        scratch_shapes=[
            pltpu.VMEM((TH + 2, W + 2, Cin), x_nhwc.dtype),
            pltpu.VMEM((TH, W, 9 * Cin), x_nhwc.dtype),
        ],
        compiler_params=pltpu.CompilerParams(
            dimension_semantics=("parallel", "parallel"),
            vmem_limit_bytes=int(vmem_limit_bytes)),
    )(x_nhwc, x_nhwc, x_nhwc, w_packed, b_packed)
    # (B, H, r, W*r*Cn) -> (B, H*r, W*r, Cn) is a contiguous (free) reshape.
    return out.reshape(B, H * r, W * r, Cn)


# -----------------------------------------------------------------------------
# Host-side parameter packing (pure layout plumbing, done once per call)
# -----------------------------------------------------------------------------
def _pack_conv_params(w_hwio, b, r):
    """(3,3,Cin,Cout) HWIO weights + (Cout,) bias -> kernel layout.

    Rows follow the in-kernel im2col order (kh, kw, cin).  Columns are permuted
    from the PyTorch PixelShuffle order  cout = cn*r*r + i*r + j  to (i, j, cn)
    so the kernel's output store *is* the pixel shuffle.
    """
    kh, kw, cin, cout = w_hwio.shape
    cn = cout // (r * r)
    w2 = w_hwio.reshape(kh * kw * cin, cn, r, r)          # rows, (cn, i, j)
    w2 = jnp.transpose(w2, (0, 2, 3, 1)).reshape(kh * kw * cin, cout)
    b2 = jnp.transpose(b.reshape(cn, r, r), (1, 2, 0)).reshape(1, cout)
    return w2, b2.astype(jnp.float32)


# -----------------------------------------------------------------------------
# UpsampleBlock parameters + forward (multi_scale=None path of the nn.Module)
# -----------------------------------------------------------------------------
def make_upsample_params(key, n_channels, scale, dtype=jnp.float32):
    """Deterministic synthetic parameters; shapes follow nn.Conv2d in the module."""
    params = []
    if scale in (2, 4, 8):
        r = 2
        n_stages = int(math.log(scale, 2))
        cout = 4 * n_channels
    elif scale == 3:
        r = 3
        n_stages = 1
        cout = 9 * n_channels
    else:
        raise ValueError("unsupported scale")
    for _ in range(n_stages):
        kw_key, kb_key, key = jax.random.split(key, 3)
        fan_in = n_channels * 9
        bound = 1.0 / math.sqrt(fan_in)
        # stored as (3, 3, Cin, Cout) HWIO, matching nn.Conv2d(n, cout, 3, 1, 1)
        w = jax.random.uniform(kw_key, (3, 3, n_channels, cout),
                               dtype, -bound, bound)
        b = jax.random.uniform(kb_key, (cout,), dtype, -bound, bound)
        params.append((w, b))
    return params, r


def upsample_block_forward(x_nchw, params, r, compute_dtype=jnp.float32,
                           tile_h=None):
    """Equivalent of UpsampleBlock(multi_scale=None).forward(x). NCHW in/out.

    compute_dtype=bf16 stores activations / weights / im2col patches in bf16
    (halves HBM and VMEM traffic on every generation, incl. v5e, since the op
    is bandwidth-bound) while the kernel still accumulates in f32.
    """
    x = jnp.transpose(x_nchw, (0, 2, 3, 1)).astype(compute_dtype)   # -> NHWC
    for (w, b) in params:
        w2, b2 = _pack_conv_params(w.astype(compute_dtype), b, r)
        x = conv3x3_relu_pixelshuffle(x, w2, b2, r, tile_h=tile_h)  # fused stage
    return jnp.transpose(x, (0, 3, 1, 2))                           # -> NCHW


# -----------------------------------------------------------------------------
# Pure-JAX reference (NCHW, mirrors the PyTorch module exactly)
# -----------------------------------------------------------------------------
def reference_forward(x_nchw, params, r):
    x = x_nchw
    for (w, b) in params:
        w_oihw = jnp.transpose(w, (3, 2, 0, 1))  # (Cout, Cin, 3, 3)
        y = lax.conv_general_dilated(
            x, w_oihw, window_strides=(1, 1), padding=((1, 1), (1, 1)),
            dimension_numbers=("NCHW", "OIHW", "NCHW"))
        y = y + b[None, :, None, None]
        y = jnp.maximum(y, 0.0)
        B, C, H, W = y.shape
        Cn = C // (r * r)
        y = y.reshape(B, Cn, r, r, H, W)
        y = jnp.transpose(y, (0, 1, 4, 2, 5, 3))
        x = y.reshape(B, Cn, H * r, W * r)
    return x


# -----------------------------------------------------------------------------
if __name__ == "__main__":
    key = jax.random.PRNGKey(0)
    kx, kp = jax.random.split(key)

    n_channels, scale = 8, 4          # UpsampleBlock(n_channels=8, scale=4): 2 stages
    B, H, W = 2, 16, 16
    x = jax.random.normal(kx, (B, n_channels, H, W), jnp.float32)   # NCHW

    params, r = make_upsample_params(kp, n_channels, scale)
    ref = reference_forward(x, params, r)

    fwd = jax.jit(upsample_block_forward,
                  static_argnames=("r", "compute_dtype", "tile_h"))

    # f32 path with explicit H-tiling (tile_h=8 -> multiple row tiles per image,
    # exercising the halo logic); exact check against the XLA conv reference.
    out = jax.block_until_ready(fwd(x, params, r=r, tile_h=8))
    assert out.shape == (B, n_channels, H * scale, W * scale), out.shape
    assert jnp.allclose(out, ref, atol=5e-4, rtol=5e-4), \
        float(jnp.max(jnp.abs(out - ref)))

    # bf16 storage / f32 accumulate path, auto tile size: loose check.
    out_bf16 = jax.block_until_ready(fwd(x, params, r=r,
                                         compute_dtype=jnp.bfloat16))
    out_bf16 = out_bf16.astype(jnp.float32)
    assert jnp.allclose(out_bf16, ref, atol=1e-1, rtol=1e-1), \
        float(jnp.max(jnp.abs(out_bf16 - ref)))

    print("KERNEL_OK")
</pallas_src>

<mosaic_0001>
module attributes {stable_mosaic.version = 11 : i64} {
  func.func @_conv3x3_relu_ps_kernel(%arg0: i32, %arg1: i32, %arg2: memref<1x1x16x8xf32, #tpu.memory_space<vmem>>, %arg3: memref<1x8x16x8xf32, #tpu.memory_space<vmem>>, %arg4: memref<1x1x16x8xf32, #tpu.memory_space<vmem>>, %arg5: memref<72x32xf32, #tpu.memory_space<vmem>>, %arg6: memref<1x32xf32, #tpu.memory_space<vmem>>, %arg7: memref<1x8x2x256xf32, #tpu.memory_space<vmem>>, %arg8: memref<10x18x8xf32, #tpu.memory_space<vmem>>, %arg9: memref<8x16x72xf32, #tpu.memory_space<vmem>>) attributes {dimension_semantics = [#tpu.dimension_semantics<parallel>, #tpu.dimension_semantics<parallel>], iteration_bounds = array<i64: 2, 2>, scalar_prefetch = 0 : i64, scratch_operands = 2 : i64, tpu.core_type = #tpu.core_type<tc>, window_params = [{transform_indices = @transform_0, window_bounds = array<i64: 1, 1, 16, 8>}, {transform_indices = @transform_1, window_bounds = array<i64: 1, 8, 16, 8>}, {transform_indices = @transform_2, window_bounds = array<i64: 1, 1, 16, 8>}, {pipeline_mode = #tpu.pipeline_mode<synchronous>, transform_indices = @transform_3, window_bounds = array<i64: 72, 32>}, {pipeline_mode = #tpu.pipeline_mode<synchronous>, transform_indices = @transform_4, window_bounds = array<i64: 1, 32>}, {transform_indices = @transform_5, window_bounds = array<i64: 1, 8, 2, 256>}]} {
    %cst = arith.constant 0.000000e+00 : f32
    %0 = vector.broadcast %cst : f32 to vector<10x1x8xf32>
    %c0 = arith.constant 0 : index
    %c0_0 = arith.constant 0 : index
    %c0_1 = arith.constant 0 : index
    %1 = vector.load %arg8[%c0, %c0_0, %c0_1] : memref<10x18x8xf32, #tpu.memory_space<vmem>>, vector<10x1x8xf32>
    tpu.vector_store %arg8[%c0, %c0_0, %c0_1], %0 {strides = array<i32>} : memref<10x18x8xf32, #tpu.memory_space<vmem>>, vector<10x1x8xf32>,
    %cst_2 = arith.constant 0.000000e+00 : f32
    %2 = vector.broadcast %cst_2 : f32 to vector<10x1x8xf32>
    %c0_3 = arith.constant 0 : index
    %c17 = arith.constant 17 : index
    %c0_4 = arith.constant 0 : index
    %3 = vector.load %arg8[%c0_3, %c17, %c0_4] : memref<10x18x8xf32, #tpu.memory_space<vmem>>, vector<10x1x8xf32>
    tpu.vector_store %arg8[%c0_3, %c17, %c0_4], %2 {strides = array<i32>} : memref<10x18x8xf32, #tpu.memory_space<vmem>>, vector<10x1x8xf32>,
    %c0_i32 = arith.constant 0 : i32
    %4 = arith.cmpi eq, %arg1, %c0_i32 : i32
    %cst_5 = arith.constant 0.000000e+00 : f32
    %5 = vector.broadcast %cst_5 : f32 to vector<1x16x8xf32>
    %c0_6 = arith.constant 0 : index
    %c0_7 = arith.constant 0 : index
    %c0_8 = arith.constant 0 : index
    %c0_9 = arith.constant 0 : index
    %6 = vector.load %arg2[%c0_6, %c0_7, %c0_8, %c0_9] : memref<1x1x16x8xf32, #tpu.memory_space<vmem>>, vector<1x1x16x8xf32>
    %7 = vector.shape_cast %6 : vector<1x1x16x8xf32> to vector<1x16x8xf32>
    %8 = arith.select %4, %5, %7 : vector<1x16x8xf32>
    %c1_i32 = arith.constant 1 : i32
    %9 = arith.cmpi eq, %arg1, %c1_i32 : i32
    %cst_10 = arith.constant 0.000000e+00 : f32
    %10 = vector.broadcast %cst_10 : f32 to vector<1x16x8xf32>
    %c0_11 = arith.constant 0 : index
    %c0_12 = arith.constant 0 : index
    %c0_13 = arith.constant 0 : index
    %c0_14 = arith.constant 0 : index
    %11 = vector.load %arg4[%c0_11, %c0_12, %c0_13, %c0_14] : memref<1x1x16x8xf32, #tpu.memory_space<vmem>>, vector<1x1x16x8xf32>
    %12 = vector.shape_cast %11 : vector<1x1x16x8xf32> to vector<1x16x8xf32>
    %13 = arith.select %9, %10, %12 : vector<1x16x8xf32>
    %c0_15 = arith.constant 0 : index
    %c1 = arith.constant 1 : index
    %c0_16 = arith.constant 0 : index
    %14 = vector.load %arg8[%c0_15, %c1, %c0_16] : memref<10x18x8xf32, #tpu.memory_space<vmem>>, vector<1x16x8xf32>
    tpu.vector_store %arg8[%c0_15, %c1, %c0_16], %8 {strides = array<i32>} : memref<10x18x8xf32, #tpu.memory_space<vmem>>, vector<1x16x8xf32>,
    %c9 = arith.constant 9 : index
    %c1_17 = arith.constant 1 : index
    %c0_18 = arith.constant 0 : index
    %15 = vector.load %arg8[%c9, %c1_17, %c0_18] : memref<10x18x8xf32, #tpu.memory_space<vmem>>, vector<1x16x8xf32>
    tpu.vector_store %arg8[%c9, %c1_17, %c0_18], %13 {strides = array<i32>} : memref<10x18x8xf32, #tpu.memory_space<vmem>>, vector<1x16x8xf32>,
    %c0_19 = arith.constant 0 : index
    %c0_20 = arith.constant 0 : index
    %c0_21 = arith.constant 0 : index
    %c0_22 = arith.constant 0 : index
    %16 = vector.load %arg3[%c0_19, %c0_20, %c0_21, %c0_22] : memref<1x8x16x8xf32, #tpu.memory_space<vmem>>, vector<1x8x16x8xf32>
    %17 = vector.shape_cast %16 : vector<1x8x16x8xf32> to vector<8x16x8xf32>
    %c1_23 = arith.constant 1 : index
    %c1_24 = arith.constant 1 : index
    %c0_25 = arith.constant 0 : index
    %18 = vector.load %arg8[%c1_23, %c1_24, %c0_25] : memref<10x18x8xf32, #tpu.memory_space<vmem>>, vector<8x16x8xf32>
    tpu.vector_store %arg8[%c1_23, %c1_24, %c0_25], %17 {strides = array<i32>} : memref<10x18x8xf32, #tpu.memory_space<vmem>>, vector<8x16x8xf32>,
    %c0_26 = arith.constant 0 : index
    %c0_27 = arith.constant 0 : index
    %c0_28 = arith.constant 0 : index
    %19 = vector.load %arg8[%c0_26, %c0_27, %c0_28] : memref<10x18x8xf32, #tpu.memory_space<vmem>>, vector<8x16x8xf32>
    %c0_29 = arith.constant 0 : index
    %c0_30 = arith.constant 0 : index
    %c0_31 = arith.constant 0 : index
    %20 = vector.load %arg9[%c0_29, %c0_30, %c0_31] : memref<8x16x72xf32, #tpu.memory_space<vmem>>, vector<8x16x8xf32>
    tpu.vector_store %arg9[%c0_29, %c0_30, %c0_31], %19 {strides = array<i32>} : memref<8x16x72xf32, #tpu.memory_space<vmem>>, vector<8x16x8xf32>,
    %c0_32 = arith.constant 0 : index
    %c1_33 = arith.constant 1 : index
    %c0_34 = arith.constant 0 : index
    %21 = vector.load %arg8[%c0_32, %c1_33, %c0_34] : memref<10x18x8xf32, #tpu.memory_space<vmem>>, vector<8x16x8xf32>
    %c0_35 = arith.constant 0 : index
    %c0_36 = arith.constant 0 : index
    %c8 = arith.constant 8 : index
    %22 = vector.load %arg9[%c0_35, %c0_36, %c8] : memref<8x16x72xf32, #tpu.memory_space<vmem>>, vector<8x16x8xf32>
    tpu.vector_store %arg9[%c0_35, %c0_36, %c8], %21 {strides = array<i32>} : memref<8x16x72xf32, #tpu.memory_space<vmem>>, vector<8x16x8xf32>,
    %c0_37 = arith.constant 0 : index
    %c2 = arith.constant 2 : index
    %c0_38 = arith.constant 0 : index
    %23 = vector.load %arg8[%c0_37, %c2, %c0_38] : memref<10x18x8xf32, #tpu.memory_space<vmem>>, vector<8x16x8xf32>
    %c0_39 = arith.constant 0 : index
    %c0_40 = arith.constant 0 : index
    %c16 = arith.constant 16 : index
    %24 = vector.load %arg9[%c0_39, %c0_40, %c16] : memref<8x16x72xf32, #tpu.memory_space<vmem>>, vector<8x16x8xf32>
    tpu.vector_store %arg9[%c0_39, %c0_40, %c16], %23 {strides = array<i32>} : memref<8x16x72xf32, #tpu.memory_space<vmem>>, vector<8x16x8xf32>,
    %c1_41 = arith.constant 1 : index
    %c0_42 = arith.constant 0 : index
    %c0_43 = arith.constant 0 : index
    %25 = vector.load %arg8[%c1_41, %c0_42, %c0_43] : memref<10x18x8xf32, #tpu.memory_space<vmem>>, vector<8x16x8xf32>
    %c0_44 = arith.constant 0 : index
    %c0_45 = arith.constant 0 : index
    %c24 = arith.constant 24 : index
    %26 = vector.load %arg9[%c0_44, %c0_45, %c24] : memref<8x16x72xf32, #tpu.memory_space<vmem>>, vector<8x16x8xf32>
    tpu.vector_store %arg9[%c0_44, %c0_45, %c24], %25 {strides = array<i32>} : memref<8x16x72xf32, #tpu.memory_space<vmem>>, vector<8x16x8xf32>,
    %c1_46 = arith.constant 1 : index
    %c1_47 = arith.constant 1 : index
    %c0_48 = arith.constant 0 : index
    %27 = vector.load %arg8[%c1_46, %c1_47, %c0_48] : memref<10x18x8xf32, #tpu.memory_space<vmem>>, vector<8x16x8xf32>
    %c0_49 = arith.constant 0 : index
    %c0_50 = arith.constant 0 : index
    %c32 = arith.constant 32 : index
    %28 = vector.load %arg9[%c0_49, %c0_50, %c32] : memref<8x16x72xf32, #tpu.memory_space<vmem>>, vector<8x16x8xf32>
    tpu.vector_store %arg9[%c0_49, %c0_50, %c32], %27 {strides = array<i32>} : memref<8x16x72xf32, #tpu.memory_space<vmem>>, vector<8x16x8xf32>,
    %c1_51 = arith.constant 1 : index
    %c2_52 = arith.constant 2 : index
    %c0_53 = arith.constant 0 : index
    %29 = vector.load %arg8[%c1_51, %c2_52, %c0_53] : memref<10x18x8xf32, #tpu.memory_space<vmem>>, vector<8x16x8xf32>
    %c0_54 = arith.constant 0 : index
    %c0_55 = arith.constant 0 : index
    %c40 = arith.constant 40 : index
    %30 = vector.load %arg9[%c0_54, %c0_55, %c40] : memref<8x16x72xf32, #tpu.memory_space<vmem>>, vector<8x16x8xf32>
    tpu.vector_store %arg9[%c0_54, %c0_55, %c40], %29 {strides = array<i32>} : memref<8x16x72xf32, #tpu.memory_space<vmem>>, vector<8x16x8xf32>,
    %c2_56 = arith.constant 2 : index
    %c0_57 = arith.constant 0 : index
    %c0_58 = arith.constant 0 : index
    %31 = vector.load %arg8[%c2_56, %c0_57, %c0_58] : memref<10x18x8xf32, #tpu.memory_space<vmem>>, vector<8x16x8xf32>
    %c0_59 = arith.constant 0 : index
    %c0_60 = arith.constant 0 : index
    %c48 = arith.constant 48 : index
    %32 = vector.load %arg9[%c0_59, %c0_60, %c48] : memref<8x16x72xf32, #tpu.memory_space<vmem>>, vector<8x16x8xf32>
    tpu.vector_store %arg9[%c0_59, %c0_60, %c48], %31 {strides = array<i32>} : memref<8x16x72xf32, #tpu.memory_space<vmem>>, vector<8x16x8xf32>,
    %c2_61 = arith.constant 2 : index
    %c1_62 = arith.constant 1 : index
    %c0_63 = arith.constant 0 : index
    %33 = vector.load %arg8[%c2_61, %c1_62, %c0_63] : memref<10x18x8xf32, #tpu.memory_space<vmem>>, vector<8x16x8xf32>
    %c0_64 = arith.constant 0 : index
    %c0_65 = arith.constant 0 : index
    %c56 = arith.constant 56 : index
    %34 = vector.load %arg9[%c0_64, %c0_65, %c56] : memref<8x16x72xf32, #tpu.memory_space<vmem>>, vector<8x16x8xf32>
    tpu.vector_store %arg9[%c0_64, %c0_65, %c56], %33 {strides = array<i32>} : memref<8x16x72xf32, #tpu.memory_space<vmem>>, vector<8x16x8xf32>,
    %c2_66 = arith.constant 2 : index
    %c2_67 = arith.constant 2 : index
    %c0_68 = arith.constant 0 : index
    %35 = vector.load %arg8[%c2_66, %c2_67, %c0_68] : memref<10x18x8xf32, #tpu.memory_space<vmem>>, vector<8x16x8xf32>
    %c0_69 = arith.constant 0 : index
    %c0_70 = arith.constant 0 : index
    %c64 = arith.constant 64 : index
    %36 = vector.load %arg9[%c0_69, %c0_70, %c64] : memref<8x16x72xf32, #tpu.memory_space<vmem>>, vector<8x16x8xf32>
    tpu.vector_store %arg9[%c0_69, %c0_70, %c64], %35 {strides = array<i32>} : memref<8x16x72xf32, #tpu.memory_space<vmem>>, vector<8x16x8xf32>,
    %c0_71 = arith.constant 0 : index
    %c0_72 = arith.constant 0 : index
    %c0_73 = arith.constant 0 : index
    %37 = vector.load %arg9[%c0_71, %c0_72, %c0_73] : memref<8x16x72xf32, #tpu.memory_space<vmem>>, vector<8x16x72xf32>
    %38 = vector.shape_cast %37 : vector<8x16x72xf32> to vector<128x72xf32>
    %c0_74 = arith.constant 0 : index
    %c0_75 = arith.constant 0 : index
    %39 = vector.load %arg5[%c0_74, %c0_75] : memref<72x32xf32, #tpu.memory_space<vmem>>, vector<72x32xf32>
    %cst_76 = arith.constant dense<0.000000e+00> : vector<128x32xf32>
    %40 = tpu.matmul %38, %39, %cst_76 {dimension_numbers = #tpu.dot_dimension_numbers<[1], [0], [0], [1], [0, 0, 1, 1], [], []>} : vector<128x72xf32>, vector<72x32xf32>, vector<128x32xf32> -> vector<128x32xf32>
    %c0_77 = arith.constant 0 : index
    %c0_78 = arith.constant 0 : index
    %41 = vector.load %arg6[%c0_77, %c0_78] : memref<1x32xf32, #tpu.memory_space<vmem>>, vector<1x32xf32>
    %42 = vector.broadcast %41 : vector<1x32xf32> to vector<128x32xf32>
    %43 = arith.addf %40, %42 : vector<128x32xf32>
    %cst_79 = arith.constant 0.000000e+00 : f32
    %44 = vector.broadcast %cst_79 : f32 to vector<128x32xf32>
    %45 = arith.maximumf %43, %44 : vector<128x32xf32>
    %46 = vector.shape_cast %45 : vector<128x32xf32> to vector<8x16x2x16xf32>
    %47 = tpu.transpose %46, [0, 2, 1, 3] : vector<8x16x2x16xf32> -> vector<8x2x16x16xf32>
    %48 = vector.shape_cast %47 : vector<8x2x16x16xf32> to vector<8x2x256xf32>
    %c0_80 = arith.constant 0 : index
    %c0_81 = arith.constant 0 : index
    %c0_82 = arith.constant 0 : index
    %c0_83 = arith.constant 0 : index
    %49 = vector.load %arg7[%c0_80, %c0_81, %c0_82, %c0_83] : memref<1x8x2x256xf32, #tpu.memory_space<vmem>>, vector<1x8x2x256xf32>
    %50 = vector.shape_cast %49 : vector<1x8x2x256xf32> to vector<8x2x256xf32>
    %51 = vector.shape_cast %48 : vector<8x2x256xf32> to vector<1x8x2x256xf32>
    tpu.vector_store %arg7[%c0_80, %c0_81, %c0_82, %c0_83], %51 {strides = array<i32>} : memref<1x8x2x256xf32, #tpu.memory_space<vmem>>, vector<1x8x2x256xf32>,
    return
  }
  func.func @transform_0(%arg0: i32, %arg1: i32) -> (i32, i32, i32, i32) {
    %c8_i32 = arith.constant 8 : i32
    %0 = arith.muli %arg1, %c8_i32 : i32
    %c1_i32 = arith.constant 1 : i32
    %1 = arith.subi %0, %c1_i32 : i32
    %c0_i32 = arith.constant 0 : i32
    %2 = arith.maxsi %1, %c0_i32 : i32
    %c0_i32_0 = arith.constant 0 : i32
    %c0_i32_1 = arith.constant 0 : i32
    %c0_i32_2 = arith.constant 0 : i32
    return %arg0, %2, %c0_i32_0, %c0_i32_1 : i32, i32, i32, i32
  }
  func.func @transform_1(%arg0: i32, %arg1: i32) -> (i32, i32, i32, i32) {
    %c0_i32 = arith.constant 0 : i32
    %c0_i32_0 = arith.constant 0 : i32
    %c0_i32_1 = arith.constant 0 : i32
    return %arg0, %arg1, %c0_i32, %c0_i32_0 : i32, i32, i32, i32
  }
  func.func @transform_2(%arg0: i32, %arg1: i32) -> (i32, i32, i32, i32) {
    %c1_i32 = arith.constant 1 : i32
    %0 = arith.addi %arg1, %c1_i32 : i32
    %c8_i32 = arith.constant 8 : i32
    %1 = arith.muli %0, %c8_i32 : i32
    %c15_i32 = arith.constant 15 : i32
    %2 = arith.minsi %1, %c15_i32 : i32
    %c0_i32 = arith.constant 0 : i32
    %c0_i32_0 = arith.constant 0 : i32
    %c0_i32_1 = arith.constant 0 : i32
    return %arg0, %2, %c0_i32, %c0_i32_0 : i32, i32, i32, i32
  }
  func.func @transform_3(%arg0: i32, %arg1: i32) -> (i32, i32) {
    %c0_i32 = arith.constant 0 : i32
    %c0_i32_0 = arith.constant 0 : i32
    %c0_i32_1 = arith.constant 0 : i32
    return %c0_i32, %c0_i32_0 : i32, i32
  }
  func.func @transform_4(%arg0: i32, %arg1: i32) -> (i32, i32) {
    %c0_i32 = arith.constant 0 : i32
    %c0_i32_0 = arith.constant 0 : i32
    %c0_i32_1 = arith.constant 0 : i32
    return %c0_i32, %c0_i32_0 : i32, i32
  }
  func.func @transform_5(%arg0: i32, %arg1: i32) -> (i32, i32, i32, i32) {
    %c0_i32 = arith.constant 0 : i32
    %c0_i32_0 = arith.constant 0 : i32
    %c0_i32_1 = arith.constant 0 : i32
    return %arg0, %arg1, %c0_i32, %c0_i32_0 : i32, i32, i32, i32
  }
}

module attributes {stable_mosaic.version = 11 : i64} {
  func.func @_conv3x3_relu_ps_kernel(%arg0: i32, %arg1: i32, %arg2: memref<1x1x32x8xf32, #tpu.memory_space<vmem>>, %arg3: memref<1x8x32x8xf32, #tpu.memory_space<vmem>>, %arg4: memref<1x1x32x8xf32, #tpu.memory_space<vmem>>, %arg5: memref<72x32xf32, #tpu.memory_space<vmem>>, %arg6: memref<1x32xf32, #tpu.memory_space<vmem>>, %arg7: memref<1x8x2x512xf32, #tpu.memory_space<vmem>>, %arg8: memref<10x34x8xf32, #tpu.memory_space<vmem>>, %arg9: memref<8x32x72xf32, #tpu.memory_space<vmem>>) attributes {dimension_semantics = [#tpu.dimension_semantics<parallel>, #tpu.dimension_semantics<parallel>], iteration_bounds = array<i64: 2, 4>, scalar_prefetch = 0 : i64, scratch_operands = 2 : i64, tpu.core_type = #tpu.core_type<tc>, window_params = [{transform_indices = @transform_0, window_bounds = array<i64: 1, 1, 32, 8>}, {transform_indices = @transform_1, window_bounds = array<i64: 1, 8, 32, 8>}, {transform_indices = @transform_2, window_bounds = array<i64: 1, 1, 32, 8>}, {pipeline_mode = #tpu.pipeline_mode<synchronous>, transform_indices = @transform_3, window_bounds = array<i64: 72, 32>}, {pipeline_mode = #tpu.pipeline_mode<synchronous>, transform_indices = @transform_4, window_bounds = array<i64: 1, 32>}, {transform_indices = @transform_5, window_bounds = array<i64: 1, 8, 2, 512>}]} {
    %cst = arith.constant 0.000000e+00 : f32
    %0 = vector.broadcast %cst : f32 to vector<10x1x8xf32>
    %c0 = arith.constant 0 : index
    %c0_0 = arith.constant 0 : index
    %c0_1 = arith.constant 0 : index
    %1 = vector.load %arg8[%c0, %c0_0, %c0_1] : memref<10x34x8xf32, #tpu.memory_space<vmem>>, vector<10x1x8xf32>
    tpu.vector_store %arg8[%c0, %c0_0, %c0_1], %0 {strides = array<i32>} : memref<10x34x8xf32, #tpu.memory_space<vmem>>, vector<10x1x8xf32>,
    %cst_2 = arith.constant 0.000000e+00 : f32
    %2 = vector.broadcast %cst_2 : f32 to vector<10x1x8xf32>
    %c0_3 = arith.constant 0 : index
    %c33 = arith.constant 33 : index
    %c0_4 = arith.constant 0 : index
    %3 = vector.load %arg8[%c0_3, %c33, %c0_4] : memref<10x34x8xf32, #tpu.memory_space<vmem>>, vector<10x1x8xf32>
    tpu.vector_store %arg8[%c0_3, %c33, %c0_4], %2 {strides = array<i32>} : memref<10x34x8xf32, #tpu.memory_space<vmem>>, vector<10x1x8xf32>,
    %c0_i32 = arith.constant 0 : i32
    %4 = arith.cmpi eq, %arg1, %c0_i32 : i32
    %cst_5 = arith.constant 0.000000e+00 : f32
    %5 = vector.broadcast %cst_5 : f32 to vector<1x32x8xf32>
    %c0_6 = arith.constant 0 : index
    %c0_7 = arith.constant 0 : index
    %c0_8 = arith.constant 0 : index
    %c0_9 = arith.constant 0 : index
    %6 = vector.load %arg2[%c0_6, %c0_7, %c0_8, %c0_9] : memref<1x1x32x8xf32, #tpu.memory_space<vmem>>, vector<1x1x32x8xf32>
    %7 = vector.shape_cast %6 : vector<1x1x32x8xf32> to vector<1x32x8xf32>
    %8 = arith.select %4, %5, %7 : vector<1x32x8xf32>
    %c3_i32 = arith.constant 3 : i32
    %9 = arith.cmpi eq, %arg1, %c3_i32 : i32
    %cst_10 = arith.constant 0.000000e+00 : f32
    %10 = vector.broadcast %cst_10 : f32 to vector<1x32x8xf32>
    %c0_11 = arith.constant 0 : index
    %c0_12 = arith.constant 0 : index
    %c0_13 = arith.constant 0 : index
    %c0_14 = arith.constant 0 : index
    %11 = vector.load %arg4[%c0_11, %c0_12, %c0_13, %c0_14] : memref<1x1x32x8xf32, #tpu.memory_space<vmem>>, vector<1x1x32x8xf32>
    %12 = vector.shape_cast %11 : vector<1x1x32x8xf32> to vector<1x32x8xf32>
    %13 = arith.select %9, %10, %12 : vector<1x32x8xf32>
    %c0_15 = arith.constant 0 : index
    %c1 = arith.constant 1 : index
    %c0_16 = arith.constant 0 : index
    %14 = vector.load %arg8[%c0_15, %c1, %c0_16] : memref<10x34x8xf32, #tpu.memory_space<vmem>>, vector<1x32x8xf32>
    tpu.vector_store %arg8[%c0_15, %c1, %c0_16], %8 {strides = array<i32>} : memref<10x34x8xf32, #tpu.memory_space<vmem>>, vector<1x32x8xf32>,
    %c9 = arith.constant 9 : index
    %c1_17 = arith.constant 1 : index
    %c0_18 = arith.constant 0 : index
    %15 = vector.load %arg8[%c9, %c1_17, %c0_18] : memref<10x34x8xf32, #tpu.memory_space<vmem>>, vector<1x32x8xf32>
    tpu.vector_store %arg8[%c9, %c1_17, %c0_18], %13 {strides = array<i32>} : memref<10x34x8xf32, #tpu.memory_space<vmem>>, vector<1x32x8xf32>,
    %c0_19 = arith.constant 0 : index
    %c0_20 = arith.constant 0 : index
    %c0_21 = arith.constant 0 : index
    %c0_22 = arith.constant 0 : index
    %16 = vector.load %arg3[%c0_19, %c0_20, %c0_21, %c0_22] : memref<1x8x32x8xf32, #tpu.memory_space<vmem>>, vector<1x8x32x8xf32>
    %17 = vector.shape_cast %16 : vector<1x8x32x8xf32> to vector<8x32x8xf32>
    %c1_23 = arith.constant 1 : index
    %c1_24 = arith.constant 1 : index
    %c0_25 = arith.constant 0 : index
    %18 = vector.load %arg8[%c1_23, %c1_24, %c0_25] : memref<10x34x8xf32, #tpu.memory_space<vmem>>, vector<8x32x8xf32>
    tpu.vector_store %arg8[%c1_23, %c1_24, %c0_25], %17 {strides = array<i32>} : memref<10x34x8xf32, #tpu.memory_space<vmem>>, vector<8x32x8xf32>,
    %c0_26 = arith.constant 0 : index
    %c0_27 = arith.constant 0 : index
    %c0_28 = arith.constant 0 : index
    %19 = vector.load %arg8[%c0_26, %c0_27, %c0_28] : memref<10x34x8xf32, #tpu.memory_space<vmem>>, vector<8x32x8xf32>
    %c0_29 = arith.constant 0 : index
    %c0_30 = arith.constant 0 : index
    %c0_31 = arith.constant 0 : index
    %20 = vector.load %arg9[%c0_29, %c0_30, %c0_31] : memref<8x32x72xf32, #tpu.memory_space<vmem>>, vector<8x32x8xf32>
    tpu.vector_store %arg9[%c0_29, %c0_30, %c0_31], %19 {strides = array<i32>} : memref<8x32x72xf32, #tpu.memory_space<vmem>>, vector<8x32x8xf32>,
    %c0_32 = arith.constant 0 : index
    %c1_33 = arith.constant 1 : index
    %c0_34 = arith.constant 0 : index
    %21 = vector.load %arg8[%c0_32, %c1_33, %c0_34] : memref<10x34x8xf32, #tpu.memory_space<vmem>>, vector<8x32x8xf32>
    %c0_35 = arith.constant 0 : index
    %c0_36 = arith.constant 0 : index
    %c8 = arith.constant 8 : index
    %22 = vector.load %arg9[%c0_35, %c0_36, %c8] : memref<8x32x72xf32, #tpu.memory_space<vmem>>, vector<8x32x8xf32>
    tpu.vector_store %arg9[%c0_35, %c0_36, %c8], %21 {strides = array<i32>} : memref<8x32x72xf32, #tpu.memory_space<vmem>>, vector<8x32x8xf32>,
    %c0_37 = arith.constant 0 : index
    %c2 = arith.constant 2 : index
    %c0_38 = arith.constant 0 : index
    %23 = vector.load %arg8[%c0_37, %c2, %c0_38] : memref<10x34x8xf32, #tpu.memory_space<vmem>>, vector<8x32x8xf32>
    %c0_39 = arith.constant 0 : index
    %c0_40 = arith.constant 0 : index
    %c16 = arith.constant 16 : index
    %24 = vector.load %arg9[%c0_39, %c0_40, %c16] : memref<8x32x72xf32, #tpu.memory_space<vmem>>, vector<8x32x8xf32>
    tpu.vector_store %arg9[%c0_39, %c0_40, %c16], %23 {strides = array<i32>} : memref<8x32x72xf32, #tpu.memory_space<vmem>>, vector<8x32x8xf32>,
    %c1_41 = arith.constant 1 : index
    %c0_42 = arith.constant 0 : index
    %c0_43 = arith.constant 0 : index
    %25 = vector.load %arg8[%c1_41, %c0_42, %c0_43] : memref<10x34x8xf32, #tpu.memory_space<vmem>>, vector<8x32x8xf32>
    %c0_44 = arith.constant 0 : index
    %c0_45 = arith.constant 0 : index
    %c24 = arith.constant 24 : index
    %26 = vector.load %arg9[%c0_44, %c0_45, %c24] : memref<8x32x72xf32, #tpu.memory_space<vmem>>, vector<8x32x8xf32>
    tpu.vector_store %arg9[%c0_44, %c0_45, %c24], %25 {strides = array<i32>} : memref<8x32x72xf32, #tpu.memory_space<vmem>>, vector<8x32x8xf32>,
    %c1_46 = arith.constant 1 : index
    %c1_47 = arith.constant 1 : index
    %c0_48 = arith.constant 0 : index
    %27 = vector.load %arg8[%c1_46, %c1_47, %c0_48] : memref<10x34x8xf32, #tpu.memory_space<vmem>>, vector<8x32x8xf32>
    %c0_49 = arith.constant 0 : index
    %c0_50 = arith.constant 0 : index
    %c32 = arith.constant 32 : index
    %28 = vector.load %arg9[%c0_49, %c0_50, %c32] : memref<8x32x72xf32, #tpu.memory_space<vmem>>, vector<8x32x8xf32>
    tpu.vector_store %arg9[%c0_49, %c0_50, %c32], %27 {strides = array<i32>} : memref<8x32x72xf32, #tpu.memory_space<vmem>>, vector<8x32x8xf32>,
    %c1_51 = arith.constant 1 : index
    %c2_52 = arith.constant 2 : index
    %c0_53 = arith.constant 0 : index
    %29 = vector.load %arg8[%c1_51, %c2_52, %c0_53] : memref<10x34x8xf32, #tpu.memory_space<vmem>>, vector<8x32x8xf32>
    %c0_54 = arith.constant 0 : index
    %c0_55 = arith.constant 0 : index
    %c40 = arith.constant 40 : index
    %30 = vector.load %arg9[%c0_54, %c0_55, %c40] : memref<8x32x72xf32, #tpu.memory_space<vmem>>, vector<8x32x8xf32>
    tpu.vector_store %arg9[%c0_54, %c0_55, %c40], %29 {strides = array<i32>} : memref<8x32x72xf32, #tpu.memory_space<vmem>>, vector<8x32x8xf32>,
    %c2_56 = arith.constant 2 : index
    %c0_57 = arith.constant 0 : index
    %c0_58 = arith.constant 0 : index
    %31 = vector.load %arg8[%c2_56, %c0_57, %c0_58] : memref<10x34x8xf32, #tpu.memory_space<vmem>>, vector<8x32x8xf32>
    %c0_59 = arith.constant 0 : index
    %c0_60 = arith.constant 0 : index
    %c48 = arith.constant 48 : index
    %32 = vector.load %arg9[%c0_59, %c0_60, %c48] : memref<8x32x72xf32, #tpu.memory_space<vmem>>, vector<8x32x8xf32>
    tpu.vector_store %arg9[%c0_59, %c0_60, %c48], %31 {strides = array<i32>} : memref<8x32x72xf32, #tpu.memory_space<vmem>>, vector<8x32x8xf32>,
    %c2_61 = arith.constant 2 : index
    %c1_62 = arith.constant 1 : index
    %c0_63 = arith.constant 0 : index
    %33 = vector.load %arg8[%c2_61, %c1_62, %c0_63] : memref<10x34x8xf32, #tpu.memory_space<vmem>>, vector<8x32x8xf32>
    %c0_64 = arith.constant 0 : index
    %c0_65 = arith.constant 0 : index
    %c56 = arith.constant 56 : index
    %34 = vector.load %arg9[%c0_64, %c0_65, %c56] : memref<8x32x72xf32, #tpu.memory_space<vmem>>, vector<8x32x8xf32>
    tpu.vector_store %arg9[%c0_64, %c0_65, %c56], %33 {strides = array<i32>} : memref<8x32x72xf32, #tpu.memory_space<vmem>>, vector<8x32x8xf32>,
    %c2_66 = arith.constant 2 : index
    %c2_67 = arith.constant 2 : index
    %c0_68 = arith.constant 0 : index
    %35 = vector.load %arg8[%c2_66, %c2_67, %c0_68] : memref<10x34x8xf32, #tpu.memory_space<vmem>>, vector<8x32x8xf32>
    %c0_69 = arith.constant 0 : index
    %c0_70 = arith.constant 0 : index
    %c64 = arith.constant 64 : index
    %36 = vector.load %arg9[%c0_69, %c0_70, %c64] : memref<8x32x72xf32, #tpu.memory_space<vmem>>, vector<8x32x8xf32>
    tpu.vector_store %arg9[%c0_69, %c0_70, %c64], %35 {strides = array<i32>} : memref<8x32x72xf32, #tpu.memory_space<vmem>>, vector<8x32x8xf32>,
    %c0_71 = arith.constant 0 : index
    %c0_72 = arith.constant 0 : index
    %c0_73 = arith.constant 0 : index
    %37 = vector.load %arg9[%c0_71, %c0_72, %c0_73] : memref<8x32x72xf32, #tpu.memory_space<vmem>>, vector<8x32x72xf32>
    %38 = vector.shape_cast %37 : vector<8x32x72xf32> to vector<256x72xf32>
    %c0_74 = arith.constant 0 : index
    %c0_75 = arith.constant 0 : index
    %39 = vector.load %arg5[%c0_74, %c0_75] : memref<72x32xf32, #tpu.memory_space<vmem>>, vector<72x32xf32>
    %cst_76 = arith.constant dense<0.000000e+00> : vector<256x32xf32>
    %40 = tpu.matmul %38, %39, %cst_76 {dimension_numbers = #tpu.dot_dimension_numbers<[1], [0], [0], [1], [0, 0, 1, 1], [], []>} : vector<256x72xf32>, vector<72x32xf32>, vector<256x32xf32> -> vector<256x32xf32>
    %c0_77 = arith.constant 0 : index
    %c0_78 = arith.constant 0 : index
    %41 = vector.load %arg6[%c0_77, %c0_78] : memref<1x32xf32, #tpu.memory_space<vmem>>, vector<1x32xf32>
    %42 = vector.broadcast %41 : vector<1x32xf32> to vector<256x32xf32>
    %43 = arith.addf %40, %42 : vector<256x32xf32>
    %cst_79 = arith.constant 0.000000e+00 : f32
    %44 = vector.broadcast %cst_79 : f32 to vector<256x32xf32>
    %45 = arith.maximumf %43, %44 : vector<256x32xf32>
    %46 = vector.shape_cast %45 : vector<256x32xf32> to vector<8x32x2x16xf32>
    %47 = tpu.transpose %46, [0, 2, 1, 3] : vector<8x32x2x16xf32> -> vector<8x2x32x16xf32>
    %48 = vector.shape_cast %47 : vector<8x2x32x16xf32> to vector<8x2x512xf32>
    %c0_80 = arith.constant 0 : index
    %c0_81 = arith.constant 0 : index
    %c0_82 = arith.constant 0 : index
    %c0_83 = arith.constant 0 : index
    %49 = vector.load %arg7[%c0_80, %c0_81, %c0_82, %c0_83] : memref<1x8x2x512xf32, #tpu.memory_space<vmem>>, vector<1x8x2x512xf32>
    %50 = vector.shape_cast %49 : vector<1x8x2x512xf32> to vector<8x2x512xf32>
    %51 = vector.shape_cast %48 : vector<8x2x512xf32> to vector<1x8x2x512xf32>
    tpu.vector_store %arg7[%c0_80, %c0_81, %c0_82, %c0_83], %51 {strides = array<i32>} : memref<1x8x2x512xf32, #tpu.memory_space<vmem>>, vector<1x8x2x512xf32>,
    return
  }
  func.func @transform_0(%arg0: i32, %arg1: i32) -> (i32, i32, i32, i32) {
    %c8_i32 = arith.constant 8 : i32
    %0 = arith.muli %arg1, %c8_i32 : i32
    %c1_i32 = arith.constant 1 : i32
    %1 = arith.subi %0, %c1_i32 : i32
    %c0_i32 = arith.constant 0 : i32
    %2 = arith.maxsi %1, %c0_i32 : i32
    %c0_i32_0 = arith.constant 0 : i32
    %c0_i32_1 = arith.constant 0 : i32
    %c0_i32_2 = arith.constant 0 : i32
    return %arg0, %2, %c0_i32_0, %c0_i32_1 : i32, i32, i32, i32
  }
  func.func @transform_1(%arg0: i32, %arg1: i32) -> (i32, i32, i32, i32) {
    %c0_i32 = arith.constant 0 : i32
    %c0_i32_0 = arith.constant 0 : i32
    %c0_i32_1 = arith.constant 0 : i32
    return %arg0, %arg1, %c0_i32, %c0_i32_0 : i32, i32, i32, i32
  }
  func.func @transform_2(%arg0: i32, %arg1: i32) -> (i32, i32, i32, i32) {
    %c1_i32 = arith.constant 1 : i32
    %0 = arith.addi %arg1, %c1_i32 : i32
    %c8_i32 = arith.constant 8 : i32
    %1 = arith.muli %0, %c8_i32 : i32
    %c31_i32 = arith.constant 31 : i32
    %2 = arith.minsi %1, %c31_i32 : i32
    %c0_i32 = arith.constant 0 : i32
    %c0_i32_0 = arith.constant 0 : i32
    %c0_i32_1 = arith.constant 0 : i32
    return %arg0, %2, %c0_i32, %c0_i32_0 : i32, i32, i32, i32
  }
  func.func @transform_3(%arg0: i32, %arg1: i32) -> (i32, i32) {
    %c0_i32 = arith.constant 0 : i32
    %c0_i32_0 = arith.constant 0 : i32
    %c0_i32_1 = arith.constant 0 : i32
    return %c0_i32, %c0_i32_0 : i32, i32
  }
  func.func @transform_4(%arg0: i32, %arg1: i32) -> (i32, i32) {
    %c0_i32 = arith.constant 0 : i32
    %c0_i32_0 = arith.constant 0 : i32
    %c0_i32_1 = arith.constant 0 : i32
    return %c0_i32, %c0_i32_0 : i32, i32
  }
  func.func @transform_5(%arg0: i32, %arg1: i32) -> (i32, i32, i32, i32) {
    %c0_i32 = arith.constant 0 : i32
    %c0_i32_0 = arith.constant 0 : i32
    %c0_i32_1 = arith.constant 0 : i32
    return %arg0, %arg1, %c0_i32, %c0_i32_0 : i32, i32, i32, i32
  }
}

</mosaic_0001>

<bundles_post_ra>
// kernel: upsample_block_forward.2
= control target key start
LH: loop header
LB: loop body
LE: loop exit
PB: predicated region body
PF: predicated region fallthrough
CT: control target
= control target key end

     0   :  { %s5662_s18 = smov 0   ;;  %s5664_s19 = smov 0   ;;  %s7803_s0 = inlined_call_operand.vmem [shape: f32[2,16,16,8], index: 0, kind: input, shape index: {}, may-alias: {0,1,2}]   ;;  %s7804_s1 = inlined_call_operand.vmem [shape: f32[2,16,16,8], index: 1, kind: input, shape index: {}, may-alias: {0,1,2}]   ;;  %s7805_s2 = inlined_call_operand.vmem [shape: f32[2,16,16,8], index: 2, kind: input, shape index: {}, may-alias: {0,1,2}]   ;;  %s7806_s3 = inlined_call_operand.vmem [shape: f32[72,32], index: 3, kind: input, shape index: {}]   ;;  %s7807_s4 = inlined_call_operand.vmem [shape: f32[1,32], index: 4, kind: input, shape index: {}]   ;;  %s7808_s5 = inlined_call_operand.vmem [shape: f32[2,16,2,256], index: 5, kind: output, shape index: {}]  }
   0x1   :  { %s5666_s20 = smov 0   ;;  %s5668_s21 = smov 0  }
   0x2   :  { %s5670_s22 = smov 0  }
   0x3 LB: > { %s24_s23 = sadd.s32 1, %s5608_s20  ;;  %s27_s24 = sadd.s32 1, %s5612_s21  ;;  %s5616_s22 = sphi %s5670_s22, %s15_s22   ;;  %s5612_s21 = sphi %s5668_s21, %s7824_s21   ;;  %s5608_s20 = sphi %s5666_s20, %s7823_s20   ;;  %s5604_s19 = sphi %s5664_s19, %s7822_s19   ;;  %s5600_s18 = sphi %s5662_s18, %s7821_s18  }
   0x4   : > { %p25_p0 = scmp.ge.s32.totalorder %s24_s23, 2  ;;  %p5310_p1 = scmp.ge.s32.totalorder %s5616_s22, 1 }
   0x5   : > { %p273_p2 = scmp.lt.s32.totalorder %s5616_s22, 5 }
   0x6   : > { %s7826_s23 = smov (%p25_p0, %s24_s23), 0  ;;  %s7828_s24 = smov (!%p25_p0, %s27_s24), %s5612_s21 }
   0x7   : > { %p274_p3 = pnand %p5310_p1, %p273_p2  ;;  %p29_p4 = scmp.ge.s32.totalorder %s7828_s24, 2 }
   0x9   : > { %s7830_s24 = smov (%p29_p4, %s7828_s24), 0  ;;  %277 = sbr.rel (%p274_p3) target bundleno = 1026 (0x402), region = 40 }
  0x10   : > { %s5697_s25 = sshll.u32 %s5600_s18, 3  ;;  %p341_p5 = scmp.lt.s32.totalorder %s5604_s19, 1  ;;  %vm393_vm0 = vcmask 57344   ;;  %v5618_v0 = vmov 0.0   ;;  %vm430_vm1 = vcmask 64512   ;;  %vm581_vm2 = vcmask 130112  }
  0x11   : > { %p357_p6 = scmp.lt.s32.totalorder %s5697_s25, 15  ;;  %404 = vst.msk [vmem:[#allocation2 + $0x11] sm:$0x1] %vm393_vm0, %v5618_v0  ;;  %394 = vst.msk [vmem:[#allocation2] sm:$0x1] %vm393_vm0, %v5618_v0  ;;  %s5312_s28 = sadd.s32 4294967295, %s5697_s25 }
  0x12   : > { %395 = vst.msk [vmem:[#allocation2 + $0x18] sm:$0x1] %vm393_vm0, %v5618_v0  ;;  %396 = vst.msk [vmem:[#allocation2 + $0x30] sm:$0x1] %vm393_vm0, %v5618_v0  ;;  %s7832_s19 = smov (!%p341_p5, %s5604_s19), 1  ;;  %p339_p7 = scmp.gt.s32.totalorder %s5312_s28, 0 }
  0x13   : > { %397 = vst.msk [vmem:[#allocation2 + $0x48] sm:$0x1] %vm393_vm0, %v5618_v0  ;;  %398 = vst.msk [vmem:[#allocation2 + $0x60] sm:$0x1] %vm393_vm0, %v5618_v0  ;;  %s358_s26 = scalar_select %p357_p6, %s5697_s25, 15  ;;  %vm678_vm3 = vcmask 195712  }
  0x14   : > { %399 = vst.msk [vmem:[#allocation2 + $0x78] sm:$0x1] %vm393_vm0, %v5618_v0  ;;  %400 = vst.msk [vmem:[#allocation2 + $0x90] sm:$0x1] %vm393_vm0, %v5618_v0  ;;  %s5747_s27 = sshll.u32 %s7832_s19, 5  ;;  %p5313_p8 = scmp.lt.s32.totalorder %s5312_s28, 15 }
  0x15   : > { %401 = vst.msk [vmem:[#allocation2 + $0xa8] sm:$0x1] %vm393_vm0, %v5618_v0  ;;  %402 = vst.msk [vmem:[#allocation2 + $0xc0] sm:$0x1] %vm393_vm0, %v5618_v0  ;;  %s5322_s29 = sshll.u32 %s358_s26, 1  ;;  %p414_p9 = scmp.eq.s32.totalorder %s5600_s18, 0 }
  0x16   : > { %403 = vst.msk [vmem:[#allocation2 + $0xd8] sm:$0x1] %vm393_vm0, %v5618_v0  ;;  %405 = vst.msk [vmem:[#allocation2 + $0x29] sm:$0x1] %vm393_vm0, %v5618_v0  ;;  %s5751_s30 = sadd.s32 %s5322_s29, %s5747_s27  ;;  %s5619_s19 = smov 8   ;;  %vm775_vm4 = vcmask 261312  }
  0x17   : > { %406 = vst.msk [vmem:[#allocation2 + $0x41] sm:$0x1] %vm393_vm0, %v5618_v0  ;;  %407 = vst.msk [vmem:[#allocation2 + $0x59] sm:$0x1] %vm393_vm0, %v5618_v0  ;;  %s5324_s6 = sshll.u32 %s5751_s30, 3  ;;  %s5620_s26 = smov 16  }
  0x18   : > { %408 = vst.msk [vmem:[#allocation2 + $0x71] sm:$0x1] %vm393_vm0, %v5618_v0  ;;  %409 = vst.msk [vmem:[#allocation2 + $0x89] sm:$0x1] %vm393_vm0, %v5618_v0  ;;  %s5758_s9 = scalar_lea.vmem %s7804_s1, %s5324_s6  ;;  %s5622_s29 = smov 32   ;;  %vm872_vm5 = vcmask 326912  }
  0x19   : > { %410 = vst.msk [vmem:[#allocation2 + $0xa1] sm:$0x1] %vm393_vm0, %v5618_v0  ;;  %411 = vst.msk [vmem:[#allocation2 + $0xb9] sm:$0x1] %vm393_vm0, %v5618_v0  ;;  %v436_v1 = vld [vmem:[%s5758_s9] sm:$0xff]  ;;  %v438_v2 = vld [vmem:[%s5758_s9 + $0x10] sm:$0xff] }
  0x1a   : > { %412 = vst.msk [vmem:[#allocation2 + $0xd1] sm:$0x1] %vm393_vm0, %v5618_v0  ;;  %413 = vst.msk [vmem:[#allocation2 + $0xe9] sm:$0x1] %vm393_vm0, %v5618_v0  ;;  %v437_v3 = vld [vmem:[%s5758_s9 + $0x8] sm:$0xff]  ;;  %s340_s10 = scalar_select %p339_p7, %s5312_s28, 0 }
  0x1b   : > { %453 = vst.msk [vmem:[#allocation2 + $0x19] sm:$0xff] %vm430_vm1, %v436_v1  ;;  %455 = vst.msk [vmem:[#allocation2 + $0x31] sm:$0xff] %vm430_vm1, %v438_v2  ;;  %v440_v4 = vld [vmem:[%s5758_s9 + $0x20] sm:$0xff]  ;;  %v439_v5 = vld [vmem:[%s5758_s9 + $0x18] sm:$0xff]  ;;  %s5567_s17 = scalar_select %p414_p9, 0, 255 }
  0x1c   : > { %454 = vst.msk [vmem:[#allocation2 + $0x21] sm:$0xff] %vm430_vm1, %v437_v3  ;;  %v442_v6 = vld [vmem:[%s5758_s9 + $0x30] sm:$0xff]  ;;  %457 = vst.msk [vmem:[#allocation2 + $0x49] sm:$0xff] %vm430_vm1, %v440_v4  ;;  %v441_v7 = vld [vmem:[%s5758_s9 + $0x28] sm:$0xff]  ;;  %s7834_s10 = smov (!%p5313_p8, %s340_s10), 15  ;;  %s5621_s28 = smov 24  }
  0x1d   : > { %456 = vst.msk [vmem:[#allocation2 + $0x39] sm:$0xff] %vm430_vm1, %v439_v5  ;;  %459 = vst.msk [vmem:[#allocation2 + $0x61] sm:$0xff] %vm430_vm1, %v442_v6  ;;  %v444_v8 = vld [vmem:[%s5758_s9 + $0x40] sm:$0xff]  ;;  %v443_v9 = vld [vmem:[%s5758_s9 + $0x38] sm:$0xff]  ;;  %s5318_s11 = sshll.u32 %s7834_s10, 1  ;;  %s5623_s6 = smov 40  }
  0x1e   : > { %458 = vst.msk [vmem:[#allocation2 + $0x51] sm:$0xff] %vm430_vm1, %v441_v7  ;;  %461 = vst.msk [vmem:[#allocation2 + $0x79] sm:$0xff] %vm430_vm1, %v444_v8  ;;  %v445_v10 = vld [vmem:[%s5758_s9 + $0x48] sm:$0xff]  ;;  %v447_v11 = vld [vmem:[%s5758_s9 + $0x58] sm:$0xff]  ;;  %s347_s12 = sadd.s32 %s5747_s27, %s5318_s11  ;;  %s5624_s7 = smov 48   ;;  %vm969_vm6 = vcmask 392512  }
  0x1f   : > { %460 = vst.msk [vmem:[#allocation2 + $0x69] sm:$0xff] %vm430_vm1, %v443_v9  ;;  %v449_v12 = vld [vmem:[%s5758_s9 + $0x68] sm:$0xff]  ;;  %462 = vst.msk [vmem:[#allocation2 + $0x81] sm:$0xff] %vm430_vm1, %v445_v10  ;;  %v446_v13 = vld [vmem:[%s5758_s9 + $0x50] sm:$0xff]  ;;  %s5320_s13 = sshll.u32 %s347_s12, 3  ;;  %s5418_s8 = sadd.s32 8, %s5697_s25 }
  0x20   : > { %464 = vst.msk [vmem:[#allocation2 + $0x99] sm:$0xff] %vm430_vm1, %v447_v11  ;;  %466 = vst.msk [vmem:[#allocation2 + $0xb1] sm:$0xff] %vm430_vm1, %v449_v12  ;;  %v448_v14 = vld [vmem:[%s5758_s9 + $0x60] sm:$0xff]  ;;  %s349_s16 = scalar_lea.vmem %s7803_s0, %s5320_s13  ;;  %v450_v61 = vld [vmem:[%s5758_s9 + $0x70] sm:$0xff]  ;;  %p367_p10 = scmp.lt.s32.totalorder %s5418_s8, 15  ;;  %vm1067_vm7 = vcmask 458112  }
  0x21   : > { %463 = vst.msk [vmem:[#allocation2 + $0x91] sm:$0xff] %vm430_vm1, %v446_v13  ;;  %465 = vst.msk [vmem:[#allocation2 + $0xa9] sm:$0xff] %vm430_vm1, %v448_v14  ;;  %v5568_v19 = vld [vmem:[%s349_s16] sm:%s5567_s17]  ;;  %v5571_v20 = vld [vmem:[%s349_s16 + $0x8] sm:%s5567_s17]  ;;  %p422_p11 = scmp.eq.s32.totalorder %s5600_s18, 1  ;;  %s5625_s15 = smov 56  }
  0x22   : > { %v5793_v15 = vld [vmem:[#allocation2 + $0x19] sm:$0xff]  ;;  %v5795_v16 = vld [vmem:[#allocation2 + $0x31] sm:$0xff]  ;;  %431 = vst.msk [vmem:[#allocation2 + $0x1] sm:$0xff] %vm430_vm1, %v5568_v19  ;;  %432 = vst.msk [vmem:[#allocation2 + $0x9] sm:$0xff] %vm430_vm1, %v5571_v20  ;;  %s7836_s8 = smov (!%p367_p10, %s5418_s8), 15  ;;  %vm1164_vm8 = vcmask 523712  }
  0x23   : > { %537 = vrot.lane.b32.xlu1 %v5793_v15, %s5619_s19  ;;  %541 = vrot.lane.b32.xlu0 %v5795_v16, %s5619_s19  ;;  %v5803_v17 = vld [vmem:[#allocation2 + $0x21] sm:$0xff]  ;;  %v5805_v18 = vld [vmem:[#allocation2 + $0x49] sm:$0xff]  ;;  %v5829_v27 = vld [vmem:[#allocation2 + $0x18] sm:$0xff]  ;;  %467 = vst.msk [vmem:[#allocation2 + $0xc1] sm:$0xff] %vm430_vm1, %v450_v61  ;;  %s7838_s8 = smov (!%p367_p10, %s7836_s8), 15  ;;  %vm1261_vm9 = vcmask 589312  }
  0x24   : > { %v5813_v21 = vld [vmem:[#allocation2 + $0x39] sm:$0xff]  ;;  %v5815_v22 = vld [vmem:[#allocation2 + $0x61] sm:$0xff]  ;;  %v5839_v30 = vld [vmem:[#allocation2 + $0x30] sm:$0xff]  ;;  %487 = vst.msk [vmem:[#allocation3 + $0x10] sm:$0xff] %vm430_vm1, %v5829_v27  ;;  %s5573_s14 = scalar_select %p422_p11, 0, 255 }
  0x25   : > { %v5817_v23 = vld [vmem:[#allocation2 + $0x51] sm:$0xff]  ;;  %v5823_v24 = vld [vmem:[#allocation2 + $0x79] sm:$0xff]  ;;  %489 = vst.msk [vmem:[#allocation3 + $0x20] sm:$0xff] %vm430_vm1, %v5839_v30  ;;  %v5861_v35 = vld [vmem:[#allocation2 + $0x48] sm:$0xff]  ;;  %vm1310_vm10 = vcmask 588800   ;;  %vm4944_vm11 = vcmask 130048  }
  0x26   : > { %v5825_v25 = vld [vmem:[#allocation2 + $0x78] sm:$0xff]  ;;  %v5827_v26 = vld [vmem:[#allocation2 + $0x80] sm:$0xff]  ;;  %v5849_v32 = vld [vmem:[#allocation2 + $0x69] sm:$0xff]  ;;  %491 = vst.msk [vmem:[#allocation3 + $0x30] sm:$0xff] %vm430_vm1, %v5861_v35  ;;  %vm4953_vm12 = vcmask 261120   ;;  %vm4962_vm13 = vcmask 392192  }
  0x27   : > { %539 = vrot.lane.b32.xlu1 %v5803_v17, %s5619_s19  ;;  %545 = vrot.lane.b32.xlu0 %v5805_v18, %s5619_s19  ;;  %v5831_v28 = vld [vmem:[#allocation2 + $0x20] sm:$0xff]  ;;  %495 = vst.msk [vmem:[#allocation3 + $0x50] sm:$0xff] %vm430_vm1, %v5825_v25  ;;  %496 = vst.msk [vmem:[#allocation3 + $0x58] sm:$0xff] %vm430_vm1, %v5827_v26  ;;  %v5859_v34 = vld [vmem:[#allocation2 + $0x38] sm:$0xff]  ;;  %vm4971_vm14 = vcmask 523264   ;;  %vm4980_vm15 = vcmask 654336  }
  0x28   : > { %v5833_v29 = vld [vmem:[#allocation2 + $0x90] sm:$0xff]  ;;  %v5841_v31 = vld [vmem:[#allocation2 + $0x98] sm:$0xff]  ;;  %488 = vst.msk [vmem:[#allocation3 + $0x18] sm:$0xff] %vm430_vm1, %v5831_v28  ;;  %v5863_v36 = vld [vmem:[#allocation2 + $0x60] sm:$0xff]  ;;  %vm4989_vm0 = vcmask 785408  }
  0x29   : > { %497 = vst.msk [vmem:[#allocation3 + $0x60] sm:$0xff] %vm430_vm1, %v5833_v29  ;;  %v501_v33 = vld [vmem:[#allocation2 + $0x1] sm:$0xff]  ;;  %498 = vst.msk [vmem:[#allocation3 + $0x68] sm:$0xff] %vm430_vm1, %v5841_v31  ;;  %v5871_v37 = vld [vmem:[#allocation2 + $0x50] sm:$0xff] }
  0x2a   : > { %490 = vst.msk [vmem:[#allocation3 + $0x28] sm:$0xff] %vm430_vm1, %v5859_v34  ;;  %493 = vst.msk [vmem:[#allocation3 + $0x40] sm:$0xff] %vm430_vm1, %v5863_v36  ;;  %v5873_v38 = vld [vmem:[#allocation2 + $0x68] sm:$0xff]  ;;  %v469_v40 = vld [vmem:[#allocation2] sm:$0xff] }
  0x2b   : > { %543 = vrot.lane.b32.xlu1 %v5813_v21, %s5619_s19  ;;  %549 = vrot.lane.b32.xlu0 %v5815_v22, %s5619_s19  ;;  %v5875_v39 = vld [vmem:[#allocation2 + $0xa8] sm:$0xff]  ;;  %492 = vst.msk [vmem:[#allocation3 + $0x38] sm:$0xff] %vm430_vm1, %v5871_v37  ;;  %494 = vst.msk [vmem:[#allocation3 + $0x48] sm:$0xff] %vm430_vm1, %v5873_v38  ;;  %v5881_v42 = vld [vmem:[#allocation2 + $0xb0] sm:$0xff] }
  0x2c   : > { %v470_v41 = vld [vmem:[#allocation2 + $0x8] sm:$0xff]  ;;  %499 = vst.msk [vmem:[#allocation3 + $0x70] sm:$0xff] %vm430_vm1, %v5875_v39  ;;  %485 = vst.msk [vmem:[#allocation3] sm:$0xff] %vm430_vm1, %v469_v40  ;;  %v5894_v45 = vld [vmem:[#allocation2 + $0x99] sm:$0xff] }
  0x2d   : > { %486 = vst.msk [vmem:[#allocation3 + $0x8] sm:$0xff] %vm430_vm1, %v470_v41  ;;  %500 = vst.msk [vmem:[#allocation3 + $0x78] sm:$0xff] %vm430_vm1, %v5881_v42  ;;  %v512_v43 = vld [vmem:[#allocation2 + $0x81] sm:$0xff]  ;;  %v502_v44 = vld [vmem:[#allocation2 + $0x9] sm:$0xff] }
  0x2e   : > { %v5896_v46 = vld [vmem:[#allocation2 + $0x91] sm:$0xff]  ;;  %v5904_v48 = vld [vmem:[#allocation2 + $0xa9] sm:$0xff]  ;;  %v600_v52 = vld [vmem:[#allocation2 + $0x1a] sm:$0xff] }
  0x2f   : > { %547 = vrot.lane.b32.xlu1 %v5817_v23, %s5619_s19  ;;  %553 = vrot.lane.b32.xlu0 %v5823_v24, %s5619_s19  ;;  %v5902_v47 = vld [vmem:[#allocation2 + $0xb1] sm:$0xff]  ;;  %v598_v50 = vld [vmem:[#allocation2 + $0x2] sm:$0xff]  ;;  %v5914_v53 = vld [vmem:[#allocation2 + $0x3a] sm:$0xff] }
  0x30   : > { %v599_v49 = vld [vmem:[#allocation2 + $0xa] sm:$0xff]  ;;  %v601_v51 = vld [vmem:[#allocation2 + $0x22] sm:$0xff]  ;;  %v5916_v54 = vld [vmem:[#allocation2 + $0x32] sm:$0xff] }
  0x31   : > { %v5922_v55 = vld [vmem:[#allocation2 + $0x52] sm:$0xff]  ;;  %v5924_v56 = vld [vmem:[#allocation2 + $0x4a] sm:$0xff]  ;;  %v5932_v58 = vld [vmem:[#allocation2 + $0x62] sm:$0xff] }
  0x32   : > { %v5930_v57 = vld [vmem:[#allocation2 + $0x6a] sm:$0xff]  ;;  %v5938_v59 = vld [vmem:[#allocation2 + $0x82] sm:$0xff]  ;;  %v5940_v60 = vld [vmem:[#allocation2 + $0x7a] sm:$0xff] }
  0x33   : > { %551 = vrot.lane.b32.xlu1 %v5849_v32, %s5619_s19  ;;  %533 = vrot.lane.b32.xlu0 %v501_v33, %s5619_s19  ;;  %v5948_v62 = vld [vmem:[#allocation2 + $0x9a] sm:$0xff]  ;;  %v5950_v63 = vld [vmem:[#allocation2 + $0x92] sm:$0xff]  ;;  %v1295_v4 = vld [vmem:[%s7806_s3 + $0x8] sm:$0xff] }
  0x34   : > { %v451_v1 = vld [vmem:[%s5758_s9 + $0x78] sm:$0xff]  ;;  %s5329_s9 = sshll.u32 %s7838_s8, 1  ;;  %v1294_v3 = vld [vmem:[%s7806_s3] sm:$0xff]  ;;  %v1296_v7 = vld [vmem:[%s7806_s3 + $0x10] sm:$0xff] }
  0x35   : > { %468 = vst.msk [vmem:[#allocation2 + $0xc9] sm:$0xff] %vm430_vm1, %v451_v1  ;;  %s375_s10 = sadd.s32 %s5329_s9, %s5747_s27  ;;  %v5486_v5 = vpack.c.bf16 %v1295_v4, %v1294_v3  ;;  %v1297_v8 = vld [vmem:[%s7806_s3 + $0x18] sm:$0xff]  ;;  %v1298_v10 = vld [vmem:[%s7806_s3 + $0x20] sm:$0xff]  ;;  %v1299_v11 = vld [vmem:[%s7806_s3 + $0x28] sm:$0xff]  ;;  %s5626_s27 = smov 64  }
  0x36   : > { %s5331_s11 = sshll.u32 %s375_s10, 3  ;;  %v5490_v9 = vpack.c.bf16 %v1297_v8, %v1296_v7  ;;  %v5494_v12 = vpack.c.bf16 %v1299_v11, %v1298_v10  ;;  %v1300_v13 = vld [vmem:[%s7806_s3 + $0x30] sm:$0xff]  ;;  %v1301_v14 = vld [vmem:[%s7806_s3 + $0x38] sm:$0xff]  ;;  %v1302_v19 = vld [vmem:[%s7806_s3 + $0x40] sm:$0xff]  ;;  %s5630_s9 = smov 96  }
  0x37   : > { %555 = vrot.lane.b32.xlu1 %v512_v43, %s5619_s19  ;;  %535 = vrot.lane.b32.xlu0 %v502_v44, %s5619_s19  ;;  %s377_s13 = scalar_lea.vmem %s7805_s2, %s5331_s11  ;;  %v1192_v61 = vld [vmem:[#allocation2 + $0xb2] sm:$0xff]  ;;  %s5631_s10 = smov 80  }
  0x38   : > { %v5574_v2 = vld [vmem:[%s377_s13] sm:%s5573_s14]  ;;  %v5577_v6 = vld [vmem:[%s377_s13 + $0x8] sm:%s5573_s14]  ;;  %5502 = vmatprep.subr.bf16.mxu1 %v5486_v5  ;;  %5487 = vmatprep.subr.bf16.mxu0 %v5486_v5  ;;  %s5335_s11 = sshll.u32 %s5751_s30, 1 }
  0x39   : > { %434 = vst.msk [vmem:[#allocation2 + $0xd9] sm:$0xff] %vm430_vm1, %v5574_v2  ;;  %435 = vst.msk [vmem:[#allocation2 + $0xe1] sm:$0xff] %vm430_vm1, %v5577_v6  ;;  %5507 = vmatpush3.bf16.msra.mxu1 %v5486_v5  ;;  %5489 = vmatpush3.bf16.msra.mxu0 %v5486_v5  ;;  %v709_v2 = vld [vmem:[#allocation2 + $0xc0] sm:$0xff]  ;;  %vm4998_vm1 = vcmask 916480   ;;  %s7462_s12 = scalar_lea.vmem %s7808_s5, %s5335_s11 }
  0x3a   : > { %5503 = vmatprep.subr.bf16.mxu1 %v5490_v9  ;;  %5491 = vmatprep.subr.bf16.mxu0 %v5490_v9 }
  0x3b   : > { %559 = vrot.lane.b32.xlu1 %v5894_v45, %s5619_s19  ;;  %557 = vrot.lane.b32.xlu0 %v5896_v46, %s5619_s19 }
  0x3c   : > { %v1000_v6 = vld [vmem:[#allocation2 + $0xc8] sm:$0xff] }
  0x3d   : > { %5508 = vmatpush3.bf16.msra.mxu1 %v5490_v9  ;;  %5493 = vmatpush3.bf16.msra.mxu0 %v5490_v9  ;;  %v1096_v9 = vld [vmem:[#allocation2 + $0xc1] sm:$0xff] }
  0x3e   : > { %5504 = vmatprep.subr.bf16.mxu1 %v5494_v12  ;;  %5495 = vmatprep.subr.bf16.mxu0 %v5494_v12 }
  0x3f   : > { %563 = vrot.lane.b32.xlu1 %v5902_v47, %s5619_s19  ;;  %561 = vrot.lane.b32.xlu0 %v5904_v48, %s5619_s19 }
  0x41   : > { %5509 = vmatpush3.bf16.msra.mxu1 %v5494_v12  ;;  %5497 = vmatpush3.bf16.msra.mxu0 %v5494_v12 }
  0x43   : > { %632 = vrot.lane.b32.xlu1 %v599_v49, %s5620_s26  ;;  %630 = vrot.lane.b32.xlu0 %v598_v50, %s5620_s26 }
  0x47   : > { %636 = vrot.lane.b32.xlu1 %v601_v51, %s5620_s26  ;;  %634 = vrot.lane.b32.xlu0 %v600_v52, %s5620_s26 }
  0x4b   : > { %640 = vrot.lane.b32.xlu1 %v5914_v53, %s5620_s26  ;;  %638 = vrot.lane.b32.xlu0 %v5916_v54, %s5620_s26 }
  0x4f   : > { %644 = vrot.lane.b32.xlu1 %v5922_v55, %s5620_s26  ;;  %642 = vrot.lane.b32.xlu0 %v5924_v56, %s5620_s26 }
  0x53   : > { %648 = vrot.lane.b32.xlu1 %v5930_v57, %s5620_s26  ;;  %646 = vrot.lane.b32.xlu0 %v5932_v58, %s5620_s26 }
  0x57   : > { %652 = vrot.lane.b32.xlu1 %v5938_v59, %s5620_s26  ;;  %650 = vrot.lane.b32.xlu0 %v5940_v60, %s5620_s26 }
  0x5b   : > { %656 = vrot.lane.b32.xlu1 %v5948_v62, %s5620_s26  ;;  %654 = vrot.lane.b32.xlu0 %v5950_v63, %s5620_s26 }
  0x5f   : > { %743 = vrot.lane.b32.xlu1 %v5825_v25, %s5621_s28  ;;  %727 = vrot.lane.b32.xlu0 %v5829_v27, %s5621_s28 }
  0x63   : > { %745 = vrot.lane.b32.xlu1 %v5827_v26, %s5621_s28  ;;  %729 = vrot.lane.b32.xlu0 %v5831_v28, %s5621_s28 }
  0x67   : > { %840 = vrot.lane.b32.xlu1 %v5823_v24, %s5622_s29  ;;  %824 = vrot.lane.b32.xlu0 %v5793_v15, %s5622_s29  ;;  %v5498_v15 = vpack.c.bf16 %v1301_v14, %v1300_v13 }
  0x69   : > { %5505 = vmatprep.subr.bf16.mxu1 %v5498_v15  ;;  %5499 = vmatprep.subr.bf16.mxu0 %v5498_v15 }
  0x6a   : > { %5510 = vmatpush3.bf16.msra.mxu1 %v5498_v15  ;;  %5501 = vmatpush3.bf16.msra.mxu0 %v5498_v15  ;;  %v1097_v15 = vld [vmem:[#allocation2 + $0xc9] sm:$0xff] }
  0x6b   : > { %842 = vrot.lane.b32.xlu1 %v512_v43, %s5622_s29  ;;  %826 = vrot.lane.b32.xlu0 %v5803_v17, %s5622_s29 }
  0x6c   : > { %5506 = vmatprep.subr.mxu1 %v1302_v19  ;;  %5460 = vmatprep.subr.mxu0 %v1302_v19 }
  0x6e   : > { %5511 = vmatpush3.msra.mxu1 %v1302_v19  ;;  %5461 = vmatpush3.msra.mxu0 %v1302_v19 }
  0x6f   : > { %937 = vrot.lane.b32.xlu1 %v5940_v60, %s5623_s6  ;;  %921 = vrot.lane.b32.xlu0 %v600_v52, %s5623_s6 }
  0x73   : > { %939 = vrot.lane.b32.xlu1 %v5938_v59, %s5623_s6  ;;  %923 = vrot.lane.b32.xlu0 %v601_v51, %s5623_s6 }
  0x77   : > { %1035 = vrot.lane.b32.xlu1 %v5833_v29, %s5624_s7  ;;  %1019 = vrot.lane.b32.xlu0 %v5839_v30, %s5624_s7 }
  0x7b   : > { %747 = vrot.lane.b32.xlu1 %v5833_v29, %s5621_s28  ;;  %731 = vrot.lane.b32.xlu0 %v5839_v30, %s5621_s28 }
  0x7f   : > { %1037 = vrot.lane.b32.xlu1 %v5841_v31, %s5624_s7  ;;  %1021 = vrot.lane.b32.xlu0 %v5859_v34, %s5624_s7 }
  0x83   : > { %1132 = vrot.lane.b32.xlu1 %v5896_v46, %s5625_s15  ;;  %1116 = vrot.lane.b32.xlu0 %v5795_v16, %s5625_s15 }
  0x87   : > { %749 = vrot.lane.b32.xlu1 %v5841_v31, %s5621_s28  ;;  %733 = vrot.lane.b32.xlu0 %v5859_v34, %s5621_s28 }
  0x8b   : > { %844 = vrot.lane.b32.xlu1 %v5896_v46, %s5622_s29  ;;  %828 = vrot.lane.b32.xlu0 %v5795_v16, %s5622_s29 }
  0x8f   : > { %1134 = vrot.lane.b32.xlu1 %v5894_v45, %s5625_s15  ;;  %1118 = vrot.lane.b32.xlu0 %v5813_v21, %s5625_s15 }
  0x93   : > { %1229 = vrot.lane.b32.xlu1 %v5950_v63, %s5626_s27  ;;  %1213 = vrot.lane.b32.xlu0 %v5916_v54, %s5626_s27 }
  0x95   : > { %v538_v16 = vpop.permute.xlu1 %537  ;;  %v542_v17 = vpop.permute.xlu0 %541 }
  0x96   : > { %584 = vst.msk [vmem:[#allocation3 + $0x10] sm:$0xff] %vm581_vm2, %v538_v16  ;;  %586 = vst.msk [vmem:[#allocation3 + $0x20] sm:$0xff] %vm581_vm2, %v542_v17 }
  0x97   : > { %846 = vrot.lane.b32.xlu1 %v5894_v45, %s5622_s29  ;;  %830 = vrot.lane.b32.xlu0 %v5813_v21, %s5622_s29 }
  0x99   : > { %v540_v20 = vpop.permute.xlu1 %539  ;;  %v546_v27 = vpop.permute.xlu0 %545 }
  0x9a   : > { %585 = vst.msk [vmem:[#allocation3 + $0x18] sm:$0xff] %vm581_vm2, %v540_v20  ;;  %588 = vst.msk [vmem:[#allocation3 + $0x30] sm:$0xff] %vm581_vm2, %v546_v27 }
  0x9b   : > { %941 = vrot.lane.b32.xlu1 %v5950_v63, %s5623_s6  ;;  %925 = vrot.lane.b32.xlu0 %v5916_v54, %s5623_s6 }
  0x9d   : > { %v544_v21 = vpop.permute.xlu1 %543  ;;  %v550_v28 = vpop.permute.xlu0 %549 }
  0x9e   : > { %587 = vst.msk [vmem:[#allocation3 + $0x28] sm:$0xff] %vm581_vm2, %v544_v21  ;;  %590 = vst.msk [vmem:[#allocation3 + $0x40] sm:$0xff] %vm581_vm2, %v550_v28 }
  0x9f   : > { %1231 = vrot.lane.b32.xlu1 %v5948_v62, %s5626_s27  ;;  %1215 = vrot.lane.b32.xlu0 %v5914_v53, %s5626_s27 }
  0xa1   : > { %v548_v29 = vpop.permute.xlu1 %547  ;;  %v554_v30 = vpop.permute.xlu0 %553 }
  0xa2   : > { %589 = vst.msk [vmem:[#allocation3 + $0x38] sm:$0xff] %vm581_vm2, %v548_v29  ;;  %592 = vst.msk [vmem:[#allocation3 + $0x50] sm:$0xff] %vm581_vm2, %v554_v30  ;;  %v1194_v29 = vld [vmem:[#allocation2 + $0xca] sm:$0xff] }
  0xa3   : > { %943 = vrot.lane.b32.xlu1 %v5948_v62, %s5623_s6  ;;  %927 = vrot.lane.b32.xlu0 %v5914_v53, %s5623_s6 }
  0xa5   : > { %v552_v31 = vpop.permute.xlu1 %551  ;;  %v534_v33 = vpop.permute.xlu0 %533 }
  0xa6   : > { %591 = vst.msk [vmem:[#allocation3 + $0x48] sm:$0xff] %vm581_vm2, %v552_v31  ;;  %582 = vst.msk [vmem:[#allocation3] sm:$0xff] %vm581_vm2, %v534_v33 }
  0xa7   : > { %1039 = vrot.lane.b32.xlu1 %v5875_v39, %s5624_s7  ;;  %1023 = vrot.lane.b32.xlu0 %v5861_v35, %s5624_s7 }
  0xa9   : > { %v556_v34 = vpop.permute.xlu1 %555  ;;  %v536_v40 = vpop.permute.xlu0 %535 }
  0xaa   : > { %593 = vst.msk [vmem:[#allocation3 + $0x58] sm:$0xff] %vm581_vm2, %v556_v34  ;;  %583 = vst.msk [vmem:[#allocation3 + $0x8] sm:$0xff] %vm581_vm2, %v536_v40 }
  0xab   : > { %751 = vrot.lane.b32.xlu1 %v5875_v39, %s5621_s28  ;;  %735 = vrot.lane.b32.xlu0 %v5861_v35, %s5621_s28 }
  0xad   : > { %v560_v41 = vpop.permute.xlu1 %559  ;;  %v558_v43 = vpop.permute.xlu0 %557 }
  0xae   : > { %595 = vst.msk [vmem:[#allocation3 + $0x68] sm:$0xff] %vm581_vm2, %v560_v41  ;;  %594 = vst.msk [vmem:[#allocation3 + $0x60] sm:$0xff] %vm581_vm2, %v558_v43  ;;  %v1002_v41 = vld [vmem:[#allocation2 + $0xe0] sm:$0xff] }
  0xaf   : > { %1041 = vrot.lane.b32.xlu1 %v5881_v42, %s5624_s7  ;;  %1025 = vrot.lane.b32.xlu0 %v5871_v37, %s5624_s7 }
  0xb1   : > { %v564_v44 = vpop.permute.xlu1 %563  ;;  %v562_v45 = vpop.permute.xlu0 %561 }
  0xb2   : > { %597 = vst.msk [vmem:[#allocation3 + $0x78] sm:$0xff] %vm581_vm2, %v564_v44  ;;  %596 = vst.msk [vmem:[#allocation3 + $0x70] sm:$0xff] %vm581_vm2, %v562_v45 }
  0xb3   : > { %1136 = vrot.lane.b32.xlu1 %v5904_v48, %s5625_s15  ;;  %1120 = vrot.lane.b32.xlu0 %v5805_v18, %s5625_s15 }
  0xb5   : > { %v633_v35 = vpop.permute.xlu1 %632  ;;  %v631_v39 = vpop.permute.xlu0 %630 }
  0xb6   : > { %680 = vst.msk [vmem:[#allocation3 + $0x8] sm:$0xff] %vm678_vm3, %v633_v35  ;;  %679 = vst.msk [vmem:[#allocation3] sm:$0xff] %vm678_vm3, %v631_v39 }
  0xb7   : > { %753 = vrot.lane.b32.xlu1 %v5881_v42, %s5621_s28  ;;  %737 = vrot.lane.b32.xlu0 %v5871_v37, %s5621_s28  ;;  %v1191_v37 = vld [vmem:[#allocation2 + $0xaa] sm:$0xff] }
  0xb9   : > { %v637_v46 = vpop.permute.xlu1 %636  ;;  %v635_v49 = vpop.permute.xlu0 %634 }
  0xba   : > { %682 = vst.msk [vmem:[#allocation3 + $0x18] sm:$0xff] %vm678_vm3, %v637_v46  ;;  %681 = vst.msk [vmem:[#allocation3 + $0x10] sm:$0xff] %vm678_vm3, %v635_v49  ;;  %v1099_v46 = vld [vmem:[#allocation2 + $0xe1] sm:$0xff] }
  0xbb   : > { %848 = vrot.lane.b32.xlu1 %v5904_v48, %s5622_s29  ;;  %832 = vrot.lane.b32.xlu0 %v5805_v18, %s5622_s29  ;;  %v1091_v49 = vld [vmem:[#allocation2 + $0x81] sm:$0xff] }
  0xbd   : > { %v641_v50 = vpop.permute.xlu1 %640  ;;  %v639_v51 = vpop.permute.xlu0 %638 }
  0xbe   : > { %684 = vst.msk [vmem:[#allocation3 + $0x28] sm:$0xff] %vm678_vm3, %v641_v50  ;;  %683 = vst.msk [vmem:[#allocation3 + $0x20] sm:$0xff] %vm678_vm3, %v639_v51 }
  0xbf   : > { %1138 = vrot.lane.b32.xlu1 %v5902_v47, %s5625_s15  ;;  %1122 = vrot.lane.b32.xlu0 %v5817_v23, %s5625_s15 }
  0xc1   : > { %v645_v42 = vpop.permute.xlu1 %644  ;;  %v643_v52 = vpop.permute.xlu0 %642 }
  0xc2   : > { %686 = vst.msk [vmem:[#allocation3 + $0x38] sm:$0xff] %vm678_vm3, %v645_v42  ;;  %685 = vst.msk [vmem:[#allocation3 + $0x30] sm:$0xff] %vm678_vm3, %v643_v52 }
  0xc3   : > { %1233 = vrot.lane.b32.xlu1 %v1191_v37, %s5626_s27  ;;  %1217 = vrot.lane.b32.xlu0 %v5924_v56, %s5626_s27 }
  0xc5   : > { %v649_v18 = vpop.permute.xlu1 %648  ;;  %v647_v48 = vpop.permute.xlu0 %646 }
  0xc6   : > { %688 = vst.msk [vmem:[#allocation3 + $0x48] sm:$0xff] %vm678_vm3, %v649_v18  ;;  %687 = vst.msk [vmem:[#allocation3 + $0x40] sm:$0xff] %vm678_vm3, %v647_v48 }
  0xc7   : > { %850 = vrot.lane.b32.xlu1 %v5902_v47, %s5622_s29  ;;  %834 = vrot.lane.b32.xlu0 %v5817_v23, %s5622_s29 }
  0xc9   : > { %v653_v53 = vpop.permute.xlu1 %652  ;;  %v651_v54 = vpop.permute.xlu0 %650 }
  0xca   : > { %690 = vst.msk [vmem:[#allocation3 + $0x58] sm:$0xff] %vm678_vm3, %v653_v53  ;;  %689 = vst.msk [vmem:[#allocation3 + $0x50] sm:$0xff] %vm678_vm3, %v651_v54 }
  0xcb   : > { %945 = vrot.lane.b32.xlu1 %v1191_v37, %s5623_s6  ;;  %929 = vrot.lane.b32.xlu0 %v5924_v56, %s5623_s6 }
  0xcd   : > { %v657_v62 = vpop.permute.xlu1 %656  ;;  %v655_v63 = vpop.permute.xlu0 %654 }
  0xce   : > { %692 = vst.msk [vmem:[#allocation3 + $0x68] sm:$0xff] %vm678_vm3, %v657_v62  ;;  %691 = vst.msk [vmem:[#allocation3 + $0x60] sm:$0xff] %vm678_vm3, %v655_v63 }
  0xcf   : > { %1235 = vrot.lane.b32.xlu1 %v1192_v61, %s5626_s27  ;;  %1219 = vrot.lane.b32.xlu0 %v5922_v55, %s5626_s27 }
  0xd1   : > { %v744_v23 = vpop.permute.xlu1 %743  ;;  %v728_v47 = vpop.permute.xlu0 %727 }
  0xd2   : > { %784 = vst.msk [vmem:[#allocation3 + $0x40] sm:$0xff] %vm775_vm4, %v744_v23  ;;  %776 = vst.msk [vmem:[#allocation3] sm:$0xff] %vm775_vm4, %v728_v47 }
  0xd3   : > { %931 = vrot.lane.b32.xlu1 %v5922_v55, %s5623_s6  ;;  %658 = vrot.lane.b32.xlu0 %v1191_v37, %s5620_s26 }
  0xd5   : > { %v746_v56 = vpop.permute.xlu1 %745  ;;  %v730_v1 = vpop.permute.xlu0 %729 }
  0xd6   : > { %785 = vst.msk [vmem:[#allocation3 + $0x48] sm:$0xff] %vm775_vm4, %v746_v56  ;;  %777 = vst.msk [vmem:[#allocation3 + $0x8] sm:$0xff] %vm775_vm4, %v730_v1 }
  0xd7   : > { %1027 = vrot.lane.b32.xlu1 %v5863_v36, %s5624_s7  ;;  %947 = vrot.lane.b32.xlu0 %v1192_v61, %s5623_s6 }
  0xd9   : > { %v841_v3 = vpop.permute.xlu1 %840  ;;  %v825_v4 = vpop.permute.xlu0 %824 }
  0xda   : > { %881 = vst.msk [vmem:[#allocation3 + $0x40] sm:$0xff] %vm872_vm5, %v841_v3  ;;  %873 = vst.msk [vmem:[#allocation3] sm:$0xff] %vm872_vm5, %v825_v4 }
  0xdb   : > { %660 = vrot.lane.b32.xlu1 %v1192_v61, %s5620_s26  ;;  %1043 = vrot.lane.b32.xlu0 %v709_v2, %s5624_s7 }
  0xdd   : > { %v843_v55 = vpop.permute.xlu1 %842  ;;  %v827_v5 = vpop.permute.xlu0 %826 }
  0xde   : > { %882 = vst.msk [vmem:[#allocation3 + $0x48] sm:$0xff] %vm872_vm5, %v843_v55  ;;  %874 = vst.msk [vmem:[#allocation3 + $0x8] sm:$0xff] %vm872_vm5, %v827_v5 }
  0xdf   : > { %755 = vrot.lane.b32.xlu1 %v709_v2, %s5621_s28  ;;  %739 = vrot.lane.b32.xlu0 %v5863_v36, %s5621_s28 }
  0xe1   : > { %v938_v7 = vpop.permute.xlu1 %937  ;;  %v922_v8 = vpop.permute.xlu0 %921 }
  0xe2   : > { %978 = vst.msk [vmem:[#allocation3 + $0x40] sm:$0xff] %vm969_vm6, %v938_v7  ;;  %970 = vst.msk [vmem:[#allocation3] sm:$0xff] %vm969_vm6, %v922_v8 }
  0xe3   : > { %1045 = vrot.lane.b32.xlu1 %v1000_v6, %s5624_s7  ;;  %1029 = vrot.lane.b32.xlu0 %v5873_v38, %s5624_s7 }
  0xe5   : > { %v940_v10 = vpop.permute.xlu1 %939  ;;  %v924_v11 = vpop.permute.xlu0 %923 }
  0xe6   : > { %979 = vst.msk [vmem:[#allocation3 + $0x48] sm:$0xff] %vm969_vm6, %v940_v10  ;;  %971 = vst.msk [vmem:[#allocation3 + $0x8] sm:$0xff] %vm969_vm6, %v924_v11 }
  0xe7   : > { %1140 = vrot.lane.b32.xlu1 %v1096_v9, %s5625_s15  ;;  %1124 = vrot.lane.b32.xlu0 %v5815_v22, %s5625_s15 }
  0xe9   : > { %v1036_v36 = vpop.permute.xlu1 %1035  ;;  %v1020_v12 = vpop.permute.xlu0 %1019 }
  0xea   : > { %1076 = vst.msk [vmem:[#allocation3 + $0x40] sm:$0xff] %vm1067_vm7, %v1036_v36  ;;  %1068 = vst.msk [vmem:[#allocation3] sm:$0xff] %vm1067_vm7, %v1020_v12 }
  0xeb   : > { %757 = vrot.lane.b32.xlu1 %v1000_v6, %s5621_s28  ;;  %741 = vrot.lane.b32.xlu0 %v5873_v38, %s5621_s28  ;;  %v1193_v38 = vld [vmem:[#allocation2 + $0xc2] sm:$0xff] }
  0xed   : > { %v748_v13 = vpop.permute.xlu1 %747  ;;  %v732_v14 = vpop.permute.xlu0 %731 }
  0xee   : > { %786 = vst.msk [vmem:[#allocation3 + $0x50] sm:$0xff] %vm775_vm4, %v748_v13  ;;  %778 = vst.msk [vmem:[#allocation3 + $0x10] sm:$0xff] %vm775_vm4, %v732_v14 }
  0xef   : > { %852 = vrot.lane.b32.xlu1 %v1096_v9, %s5622_s29  ;;  %836 = vrot.lane.b32.xlu0 %v5815_v22, %s5622_s29 }
  0xf1   : > { %v1038_v16 = vpop.permute.xlu1 %1037  ;;  %v1022_v17 = vpop.permute.xlu0 %1021 }
  0xf2   : > { %1077 = vst.msk [vmem:[#allocation3 + $0x48] sm:$0xff] %vm1067_vm7, %v1038_v16  ;;  %1069 = vst.msk [vmem:[#allocation3 + $0x8] sm:$0xff] %vm1067_vm7, %v1022_v17 }
  0xf3   : > { %1142 = vrot.lane.b32.xlu1 %v1097_v15, %s5625_s15  ;;  %1126 = vrot.lane.b32.xlu0 %v5849_v32, %s5625_s15 }
  0xf5   : > { %v1133_v19 = vpop.permute.xlu1 %1132  ;;  %v1117_v20 = vpop.permute.xlu0 %1116 }
  0xf6   : > { %1173 = vst.msk [vmem:[#allocation3 + $0x40] sm:$0xff] %vm1164_vm8, %v1133_v19  ;;  %1165 = vst.msk [vmem:[#allocation3] sm:$0xff] %vm1164_vm8, %v1117_v20 }
  0xf7   : > { %1237 = vrot.lane.b32.xlu1 %v1193_v38, %s5626_s27  ;;  %1221 = vrot.lane.b32.xlu0 %v5932_v58, %s5626_s27 }
  0xf9   : > { %v750_v22 = vpop.permute.xlu1 %749  ;;  %v734_v27 = vpop.permute.xlu0 %733 }
  0xfa   : > { %787 = vst.msk [vmem:[#allocation3 + $0x58] sm:$0xff] %vm775_vm4, %v750_v22  ;;  %779 = vst.msk [vmem:[#allocation3 + $0x18] sm:$0xff] %vm775_vm4, %v734_v27 }
  0xfb   : > { %854 = vrot.lane.b32.xlu1 %v1097_v15, %s5622_s29  ;;  %838 = vrot.lane.b32.xlu0 %v5849_v32, %s5622_s29 }
  0xfd   : > { %v845_v21 = vpop.permute.xlu1 %844  ;;  %v829_v28 = vpop.permute.xlu0 %828 }
  0xfe   : > { %883 = vst.msk [vmem:[#allocation3 + $0x50] sm:$0xff] %vm872_vm5, %v845_v21  ;;  %875 = vst.msk [vmem:[#allocation3 + $0x10] sm:$0xff] %vm872_vm5, %v829_v28 }
  0xff   : > { %949 = vrot.lane.b32.xlu1 %v1193_v38, %s5623_s6  ;;  %933 = vrot.lane.b32.xlu0 %v5932_v58, %s5623_s6  ;;  %v1001_v58 = vld [vmem:[#allocation2 + $0xd8] sm:$0xff] }
 0x101   : > { %v1135_v30 = vpop.permute.xlu1 %1134  ;;  %v1119_v31 = vpop.permute.xlu0 %1118 }
 0x102   : > { %1174 = vst.msk [vmem:[#allocation3 + $0x48] sm:$0xff] %vm1164_vm8, %v1135_v30  ;;  %1166 = vst.msk [vmem:[#allocation3 + $0x8] sm:$0xff] %vm1164_vm8, %v1119_v31 }
 0x103   : > { %1239 = vrot.lane.b32.xlu1 %v1194_v29, %s5626_s27  ;;  %1223 = vrot.lane.b32.xlu0 %v5930_v57, %s5626_s27 }
 0x105   : > { %v1230_v32 = vpop.permute.xlu1 %1229  ;;  %v1214_v33 = vpop.permute.xlu0 %1213 }
 0x106   : > { %1270 = vst.msk [vmem:[#allocation3 + $0x40] sm:$0xff] %vm1261_vm9, %v1230_v32  ;;  %1262 = vst.msk [vmem:[#allocation3] sm:$0xff] %vm1261_vm9, %v1214_v33 }
 0x107   : > { %951 = vrot.lane.b32.xlu1 %v1194_v29, %s5623_s6  ;;  %935 = vrot.lane.b32.xlu0 %v5930_v57, %s5623_s6  ;;  %v1098_v57 = vld [vmem:[#allocation2 + $0xd9] sm:$0xff] }
 0x109   : > { %v847_v34 = vpop.permute.xlu1 %846  ;;  %v831_v40 = vpop.permute.xlu0 %830 }
 0x10a   : > { %884 = vst.msk [vmem:[#allocation3 + $0x58] sm:$0xff] %vm872_vm5, %v847_v34  ;;  %876 = vst.msk [vmem:[#allocation3 + $0x18] sm:$0xff] %vm872_vm5, %v831_v40 }
 0x10b   : > { %1047 = vrot.lane.b32.xlu1 %v1001_v58, %s5624_s7  ;;  %1031 = vrot.lane.b32.xlu0 %v5825_v25, %s5624_s7 }
 0x10d   : > { %v942_v43 = vpop.permute.xlu1 %941  ;;  %v1286_v44 = vld [vmem:[#allocation3 + $0x40] sm:$0xff]  ;;  %v926_v45 = vpop.permute.xlu0 %925 }
 0x10e   : > { %v1278_v35 = vld [vmem:[#allocation3] sm:$0xff]  ;;  %980 = vst.msk [vmem:[#allocation3 + $0x50] sm:$0xff] %vm969_vm6, %v942_v43  ;;  %5474 = vmatprep.mubr.msk.f32.mxu1 %vm1310_vm10, %v1286_v44  ;;  %972 = vst.msk [vmem:[#allocation3 + $0x10] sm:$0xff] %vm969_vm6, %v926_v45 }
 0x10f   : > { %5462 = vmatprep.mubr.msk.f32.mxu0 %vm1310_vm10, %v1278_v35  ;;  %1049 = vrot.lane.b32.xlu1 %v1002_v41, %s5624_s7 }
 0x110   : > { %1033 = vrot.lane.b32.xlu0 %v5827_v26, %s5624_s7  ;;  %v1195_v26 = vld [vmem:[#allocation2 + $0xda] sm:$0xff] }
 0x111   : > { %v1232_v25 = vpop.permute.xlu1 %1231  ;;  %v1216_v39 = vpop.permute.xlu0 %1215 }
 0x112   : > { %1271 = vst.msk [vmem:[#allocation3 + $0x48] sm:$0xff] %vm1261_vm9, %v1232_v25  ;;  %1263 = vst.msk [vmem:[#allocation3 + $0x8] sm:$0xff] %vm1261_vm9, %v1216_v39 }
 0x113   : > { %1144 = vrot.lane.b32.xlu1 %v1098_v57, %s5625_s15 }
 0x114   : > { %1128 = vrot.lane.b32.xlu0 %v5823_v24, %s5625_s15  ;;  %v1196_v24 = vld [vmem:[#allocation2 + $0xe2] sm:$0xff] }
 0x115   : > { %v944_v50 = vpop.permute.xlu1 %943  ;;  %v928_v51 = vpop.permute.xlu0 %927 }
 0x116   : > { %981 = vst.msk [vmem:[#allocation3 + $0x58] sm:$0xff] %vm969_vm6, %v944_v50  ;;  %973 = vst.msk [vmem:[#allocation3 + $0x18] sm:$0xff] %vm969_vm6, %v928_v51 }
 0x117   : > { %1146 = vrot.lane.b32.xlu1 %v1099_v46, %s5625_s15 }
 0x118   : > { %1130 = vrot.lane.b32.xlu0 %v1091_v49, %s5625_s15  ;;  %s5627_s15 = smov 112  }
 0x119   : > { %v1040_v37 = vpop.permute.xlu1 %1039  ;;  %v1287_v42 = vld [vmem:[#allocation3 + $0x48] sm:$0xff]  ;;  %v1024_v52 = vpop.permute.xlu0 %1023 }
 0x11a   : > { %v1279_v18 = vld [vmem:[#allocation3 + $0x8] sm:$0xff]  ;;  %1078 = vst.msk [vmem:[#allocation3 + $0x50] sm:$0xff] %vm1067_vm7, %v1040_v37  ;;  %5475 = vmatmul.mubr.msk.f32.vlgmr.msra.gmra.mrb[0].mxu1 %vm1310_vm10, %v1287_v42  ;;  %1070 = vst.msk [vmem:[#allocation3 + $0x10] sm:$0xff] %vm1067_vm7, %v1024_v52 }
 0x11b   : > { %5463 = vmatmul.mubr.msk.f32.vlgmr.msra.gmra.mrb[0].mxu0 %vm1310_vm10, %v1279_v18  ;;  %1241 = vrot.lane.b32.xlu1 %v1195_v26, %s5626_s27 }
 0x11c   : > { %1225 = vrot.lane.b32.xlu0 %v5940_v60, %s5626_s27 }
 0x11d   : > { %v752_v48 = vpop.permute.xlu1 %751  ;;  %v736_v53 = vpop.permute.xlu0 %735 }
 0x11e   : > { %788 = vst.msk [vmem:[#allocation3 + $0x60] sm:$0xff] %vm775_vm4, %v752_v48  ;;  %780 = vst.msk [vmem:[#allocation3 + $0x20] sm:$0xff] %vm775_vm4, %v736_v53 }
 0x11f   : > { %1243 = vrot.lane.b32.xlu1 %v1196_v24, %s5626_s27 }
 0x120   : > { %1227 = vrot.lane.b32.xlu0 %v5938_v59, %s5626_s27 }
 0x121   : > { %v1042_v54 = vpop.permute.xlu1 %1041  ;;  %v1026_v61 = vpop.permute.xlu0 %1025 }
 0x122   : > { %1079 = vst.msk [vmem:[#allocation3 + $0x58] sm:$0xff] %vm1067_vm7, %v1042_v54  ;;  %1071 = vst.msk [vmem:[#allocation3 + $0x18] sm:$0xff] %vm1067_vm7, %v1026_v61 }
 0x125   : > { %v1137_v62 = vpop.permute.xlu1 %1136  ;;  %v1121_v60 = vpop.permute.xlu0 %1120 }
 0x126   : > { %1175 = vst.msk [vmem:[#allocation3 + $0x50] sm:$0xff] %vm1164_vm8, %v1137_v62  ;;  %1167 = vst.msk [vmem:[#allocation3 + $0x10] sm:$0xff] %vm1164_vm8, %v1121_v60 }
 0x129   : > { %v754_v63 = vpop.permute.xlu1 %753  ;;  %v738_v23 = vpop.permute.xlu0 %737 }
 0x12a   : > { %789 = vst.msk [vmem:[#allocation3 + $0x68] sm:$0xff] %vm775_vm4, %v754_v63  ;;  %781 = vst.msk [vmem:[#allocation3 + $0x28] sm:$0xff] %vm775_vm4, %v738_v23 }
 0x12d   : > { %v849_v47 = vpop.permute.xlu1 %848  ;;  %v833_v59 = vpop.permute.xlu0 %832 }
 0x12e   : > { %885 = vst.msk [vmem:[#allocation3 + $0x60] sm:$0xff] %vm872_vm5, %v849_v47  ;;  %877 = vst.msk [vmem:[#allocation3 + $0x20] sm:$0xff] %vm872_vm5, %v833_v59  ;;  %v6308_v59 = vld [vmem:[%s7807_s4] ss:$0 sm:$0xff] }
 0x131   : > { %v1139_v56 = vpop.permute.xlu1 %1138  ;;  %v1123_v1 = vpop.permute.xlu0 %1122 }
 0x132   : > { %1176 = vst.msk [vmem:[#allocation3 + $0x58] sm:$0xff] %vm1164_vm8, %v1139_v56  ;;  %1168 = vst.msk [vmem:[#allocation3 + $0x18] sm:$0xff] %vm1164_vm8, %v1123_v1 }
 0x135   : > { %v1234_v2 = vpop.permute.xlu1 %1233  ;;  %v1218_v3 = vpop.permute.xlu0 %1217 }
 0x136   : > { %1272 = vst.msk [vmem:[#allocation3 + $0x50] sm:$0xff] %vm1261_vm9, %v1234_v2  ;;  %1264 = vst.msk [vmem:[#allocation3 + $0x10] sm:$0xff] %vm1261_vm9, %v1218_v3 }
 0x139   : > { %v851_v4 = vpop.permute.xlu1 %850  ;;  %v835_v55 = vpop.permute.xlu0 %834 }
 0x13a   : > { %886 = vst.msk [vmem:[#allocation3 + $0x68] sm:$0xff] %vm872_vm5, %v851_v4  ;;  %878 = vst.msk [vmem:[#allocation3 + $0x28] sm:$0xff] %vm872_vm5, %v835_v55 }
 0x13d   : > { %v946_v5 = vpop.permute.xlu1 %945  ;;  %v1288_v6 = vld [vmem:[#allocation3 + $0x50] sm:$0xff]  ;;  %v930_v7 = vpop.permute.xlu0 %929 }
 0x13e   : > { %v1280_v8 = vld [vmem:[#allocation3 + $0x10] sm:$0xff]  ;;  %982 = vst.msk [vmem:[#allocation3 + $0x60] sm:$0xff] %vm969_vm6, %v946_v5  ;;  %5477 = vmatprep.mubr.msk.f32.mxu1 %vm1310_vm10, %v1288_v6  ;;  %974 = vst.msk [vmem:[#allocation3 + $0x20] sm:$0xff] %vm969_vm6, %v930_v7 }
 0x13f   : > { %5465 = vmatprep.mubr.msk.f32.mxu0 %vm1310_vm10, %v1280_v8 }
 0x141   : > { %v1236_v9 = vpop.permute.xlu1 %1235  ;;  %v1220_v10 = vpop.permute.xlu0 %1219 }
 0x142   : > { %1273 = vst.msk [vmem:[#allocation3 + $0x58] sm:$0xff] %vm1261_vm9, %v1236_v9  ;;  %1265 = vst.msk [vmem:[#allocation3 + $0x18] sm:$0xff] %vm1261_vm9, %v1220_v10 }
 0x145   : > { %v932_v11 = vpop.permute.xlu1 %931  ;;  %v659_v36 = vpop.permute.xlu0 %658 }
 0x146   : > { %975 = vst.msk [vmem:[#allocation3 + $0x28] sm:$0xff] %vm969_vm6, %v932_v11 }
 0x147   : > { %693 = vst.msk [vmem:[#allocation3 + $0x70] sm:$0xff] %vm678_vm3, %v659_v36 }
 0x149   : > { %v1028_v12 = vpop.permute.xlu1 %1027  ;;  %v1289_v13 = vld [vmem:[#allocation3 + $0x58] sm:$0xff]  ;;  %v948_v14 = vpop.permute.xlu0 %947 }
 0x14a   : > { %v1281_v15 = vld [vmem:[#allocation3 + $0x18] sm:$0xff]  ;;  %1072 = vst.msk [vmem:[#allocation3 + $0x20] sm:$0xff] %vm1067_vm7, %v1028_v12  ;;  %5478 = vmatmul.mubr.msk.f32.gmra.mrb[2].mxu1 %vm1310_vm10, %v1289_v13 }
 0x14b   : > { %983 = vst.msk [vmem:[#allocation3 + $0x68] sm:$0xff] %vm969_vm6, %v948_v14  ;;  %5466 = vmatmul.mubr.msk.f32.gmra.mrb[2].mxu0 %vm1310_vm10, %v1281_v15 }
 0x14d   : > { %v661_v16 = vpop.permute.xlu1 %660  ;;  %v1044_v17 = vpop.permute.xlu0 %1043 }
 0x14e   : > { %694 = vst.msk [vmem:[#allocation3 + $0x78] sm:$0xff] %vm678_vm3, %v661_v16 }
 0x14f   : > { %1080 = vst.msk [vmem:[#allocation3 + $0x60] sm:$0xff] %vm1067_vm7, %v1044_v17 }
 0x151   : > { %v756_v38 = vpop.permute.xlu1 %755  ;;  %v740_v19 = vpop.permute.xlu0 %739 }
 0x152   : > { %790 = vst.msk [vmem:[#allocation3 + $0x70] sm:$0xff] %vm775_vm4, %v756_v38  ;;  %782 = vst.msk [vmem:[#allocation3 + $0x30] sm:$0xff] %vm775_vm4, %v740_v19 }
 0x155   : > { %v1046_v20 = vpop.permute.xlu1 %1045  ;;  %v1030_v22 = vpop.permute.xlu0 %1029 }
 0x156   : > { %1081 = vst.msk [vmem:[#allocation3 + $0x68] sm:$0xff] %vm1067_vm7, %v1046_v20  ;;  %1073 = vst.msk [vmem:[#allocation3 + $0x28] sm:$0xff] %vm1067_vm7, %v1030_v22 }
 0x159   : > { %v1141_v27 = vpop.permute.xlu1 %1140  ;;  %v1125_v21 = vpop.permute.xlu0 %1124 }
 0x15a   : > { %1177 = vst.msk [vmem:[#allocation3 + $0x60] sm:$0xff] %vm1164_vm8, %v1141_v27  ;;  %1169 = vst.msk [vmem:[#allocation3 + $0x20] sm:$0xff] %vm1164_vm8, %v1125_v21 }
 0x15d   : > { %v758_v28 = vpop.permute.xlu1 %757  ;;  %v742_v29 = vpop.permute.xlu0 %741 }
 0x15e   : > { %791 = vst.msk [vmem:[#allocation3 + $0x78] sm:$0xff] %vm775_vm4, %v758_v28  ;;  %783 = vst.msk [vmem:[#allocation3 + $0x38] sm:$0xff] %vm775_vm4, %v742_v29 }
 0x161   : > { %v853_v30 = vpop.permute.xlu1 %852  ;;  %v837_v31 = vpop.permute.xlu0 %836 }
 0x162   : > { %887 = vst.msk [vmem:[#allocation3 + $0x70] sm:$0xff] %vm872_vm5, %v853_v30  ;;  %879 = vst.msk [vmem:[#allocation3 + $0x30] sm:$0xff] %vm872_vm5, %v837_v31 }
 0x165   : > { %v1143_v32 = vpop.permute.xlu1 %1142  ;;  %v1127_v33 = vpop.permute.xlu0 %1126 }
 0x166   : > { %1178 = vst.msk [vmem:[#allocation3 + $0x68] sm:$0xff] %vm1164_vm8, %v1143_v32  ;;  %1170 = vst.msk [vmem:[#allocation3 + $0x28] sm:$0xff] %vm1164_vm8, %v1127_v33 }
 0x169   : > { %v1238_v58 = vpop.permute.xlu1 %1237  ;;  %v1222_v34 = vpop.permute.xlu0 %1221 }
 0x16a   : > { %1274 = vst.msk [vmem:[#allocation3 + $0x60] sm:$0xff] %vm1261_vm9, %v1238_v58  ;;  %1266 = vst.msk [vmem:[#allocation3 + $0x20] sm:$0xff] %vm1261_vm9, %v1222_v34 }
 0x16d   : > { %v855_v40 = vpop.permute.xlu1 %854  ;;  %v839_v41 = vpop.permute.xlu0 %838 }
 0x16e   : > { %888 = vst.msk [vmem:[#allocation3 + $0x78] sm:$0xff] %vm872_vm5, %v855_v40  ;;  %880 = vst.msk [vmem:[#allocation3 + $0x38] sm:$0xff] %vm872_vm5, %v839_v41 }
 0x171   : > { %v950_v43 = vpop.permute.xlu1 %949  ;;  %v934_v44 = vpop.permute.xlu0 %933  ;;  %v1290_v45 = vld [vmem:[#allocation3 + $0x60] sm:$0xff] }
 0x172   : > { %v1282_v35 = vld [vmem:[#allocation3 + $0x20] sm:$0xff]  ;;  %984 = vst.msk [vmem:[#allocation3 + $0x70] sm:$0xff] %vm969_vm6, %v950_v43  ;;  %976 = vst.msk [vmem:[#allocation3 + $0x30] sm:$0xff] %vm969_vm6, %v934_v44  ;;  %5480 = vmatprep.mubr.msk.f32.mxu1 %vm1310_vm10, %v1290_v45  ;;  %v5628_v43 = vmov 1983009808   ;;  %v1588_v45 = vlaneseq }
 0x173   : > { %5468 = vmatprep.mubr.msk.f32.mxu0 %vm1310_vm10, %v1282_v35  ;;  %v1586_v44 = vunpack.c.l.s4 %v5628_v43 }
 0x175   : > { %v1240_v57 = vpop.permute.xlu1 %1239  ;;  %v1224_v25 = vpop.permute.xlu0 %1223  ;;  %v1587_v35 = vunpack.c.0.s8 %v1586_v44 }
 0x176   : > { %1275 = vst.msk [vmem:[#allocation3 + $0x68] sm:$0xff] %vm1261_vm9, %v1240_v57  ;;  %1267 = vst.msk [vmem:[#allocation3 + $0x28] sm:$0xff] %vm1261_vm9, %v1224_v25  ;;  %v1589_v57 = vshrl.u32 %v1588_v45, 7  ;;  %v5629_v25 = vmov 1934713408  }
 0x179   : > { %v952_v39 = vpop.permute.xlu1 %951  ;;  %v936_v46 = vpop.permute.xlu0 %935 }
 0x17a   : > { %985 = vst.msk [vmem:[#allocation3 + $0x78] sm:$0xff] %vm969_vm6, %v952_v39  ;;  %977 = vst.msk [vmem:[#allocation3 + $0x38] sm:$0xff] %vm969_vm6, %v936_v46  ;;  %v1617_v39 = vunpack.c.l.s4 %v5629_v25 }
 0x17d   : > { %v1048_v49 = vpop.permute.xlu1 %1047  ;;  %v1291_v50 = vld [vmem:[#allocation3 + $0x68] sm:$0xff]  ;;  %v1032_v51 = vpop.permute.xlu0 %1031 }
 0x17e   : > { %v1283_v26 = vld [vmem:[#allocation3 + $0x28] sm:$0xff]  ;;  %1082 = vst.msk [vmem:[#allocation3 + $0x70] sm:$0xff] %vm1067_vm7, %v1048_v49  ;;  %5481 = vmatmul.mubr.msk.f32.gmra.mrb[4].mxu1 %vm1310_vm10, %v1291_v50  ;;  %1074 = vst.msk [vmem:[#allocation3 + $0x30] sm:$0xff] %vm1067_vm7, %v1032_v51  ;;  %v6365_v49 = vsub.s32 %v1587_v35, %v1589_v57 }
 0x17f   : > { %5469 = vmatmul.mubr.msk.f32.gmra.mrb[4].mxu0 %vm1310_vm10, %v1283_v26  ;;  %v1618_v26 = vunpack.c.0.s8 %v1617_v39 }
 0x181   : > { %v1050_v37 = vpop.permute.xlu1 %1049 }
 0x182   : > { %v1034_v42 = vpop.permute.xlu0 %1033  ;;  %1083 = vst.msk [vmem:[#allocation3 + $0x78] sm:$0xff] %vm1067_vm7, %v1050_v37 }
 0x183   : > { %1075 = vst.msk [vmem:[#allocation3 + $0x38] sm:$0xff] %vm1067_vm7, %v1034_v42 }
 0x185   : > { %v1145_v52 = vpop.permute.xlu1 %1144 }
 0x186   : > { %v1129_v18 = vpop.permute.xlu0 %1128  ;;  %1179 = vst.msk [vmem:[#allocation3 + $0x70] sm:$0xff] %vm1164_vm8, %v1145_v52 }
 0x187   : > { %1171 = vst.msk [vmem:[#allocation3 + $0x30] sm:$0xff] %vm1164_vm8, %v1129_v18 }
 0x189   : > { %v1147_v24 = vpop.permute.xlu1 %1146 }
 0x18a   : > { %v1131_v48 = vpop.permute.xlu0 %1130  ;;  %1180 = vst.msk [vmem:[#allocation3 + $0x78] sm:$0xff] %vm1164_vm8, %v1147_v24 }
 0x18b   : > { %1172 = vst.msk [vmem:[#allocation3 + $0x38] sm:$0xff] %vm1164_vm8, %v1131_v48 }
 0x18d   : > { %v1242_v53 = vpop.permute.xlu1 %1241 }
 0x18e   : > { %v1226_v54 = vpop.permute.xlu0 %1225  ;;  %1276 = vst.msk [vmem:[#allocation3 + $0x70] sm:$0xff] %vm1261_vm9, %v1242_v53 }
 0x18f   : > { %1268 = vst.msk [vmem:[#allocation3 + $0x30] sm:$0xff] %vm1261_vm9, %v1226_v54 }
 0x191   : > { %v1244_v61 = vpop.permute.xlu1 %1243 }
 0x192   : > { %v1228_v62 = vpop.permute.xlu0 %1227  ;;  %1277 = vst.msk [vmem:[#allocation3 + $0x78] sm:$0xff] %vm1261_vm9, %v1244_v61 }
 0x193   : > { %1269 = vst.msk [vmem:[#allocation3 + $0x38] sm:$0xff] %vm1261_vm9, %v1228_v62 }
 0x195   : > { %v1292_v60 = vld [vmem:[#allocation3 + $0x70] sm:$0xff] }
 0x196   : > { %v1284_v63 = vld [vmem:[#allocation3 + $0x30] sm:$0xff]  ;;  %5483 = vmatprep.mubr.msk.f32.mxu1 %vm1310_vm10, %v1292_v60 }
 0x197   : > { %5471 = vmatprep.mubr.msk.f32.mxu0 %vm1310_vm10, %v1284_v63  ;;  %v6378_v63 = vsub.s32 %v1618_v26, %v1589_v57 }
 0x199   : > { %v1293_v23 = vld [vmem:[#allocation3 + $0x78] sm:$0xff] }
 0x19a   : > { %v1285_v47 = vld [vmem:[#allocation3 + $0x38] sm:$0xff]  ;;  %5484 = vmatmul.mubr.msk.f32.gmra.mrb[6].mxu1 %vm1310_vm10, %v1293_v23 }
 0x19b   : > { %5472 = vmatmul.mubr.msk.f32.gmra.mrb[6].mxu0 %vm1310_vm10, %v1285_v47 }
 0x1ed   : > { %v5476_v56 = vpop.f32.mrb[0].mxu1 }
 0x1ee   : > { %v5464_v1 = vpop.f32.mrb[0].mxu0  ;;  %v1471_v2 = vadd.f32 %v5476_v56, %v6308_v59  ;;  %v1465_v3 = vpop.f32.mrb[1].mxu1 }
 0x1ef   : > { %v1431_v4 = vadd.f32 %v5464_v1, %v6308_v59  ;;  %v1425_v55 = vpop.f32.mrb[1].mxu0  ;;  %v1466_v5 = vadd.f32 %v6308_v59, %v1465_v3 }
 0x1f0   : > { %v1426_v6 = vadd.f32 %v6308_v59, %v1425_v55  ;;  %v1513_v7 = vmax.f32 %v1471_v2, 0.0 }
 0x1f1   : > { %v1512_v8 = vmax.f32 %v1466_v5, 0.0  ;;  %v6314_v9 = vmax.f32 %v1431_v4, 0.0 }
 0x1f2   : > { %1554 = vrot.lane.b32.xlu1 %v1513_v7, %s5627_s15  ;;  %v6317_v10 = vmax.f32 %v1426_v6, 0.0  ;;  %v2178_v46 = vcombine.high %v1513_v7, %v5618_v0  ;;  %v2185_v54 = vrot.slane %v1513_v7, %v6365_v49 }
 0x1f3   : > { %1552 = vrot.lane.b32.xlu0 %v1512_v8, %s5627_s15  ;;  %v2112_v50 = vcombine.high %v1512_v8, %v5618_v0  ;;  %v2119_v60 = vrot.slane %v1512_v8, %v6365_v49 }
 0x1f4   : > { %v2192_v24 = vrot.slane %v2178_v46, %v6365_v49 }
 0x1f5   : > { %v2126_v61 = vrot.slane %v2112_v50, %v6365_v49 }
 0x1f6   : > { %1538 = vrot.lane.b32.xlu1 %v6314_v9, %s5627_s15 }
 0x1f7   : > { %1536 = vrot.lane.b32.xlu0 %v6317_v10, %s5627_s15 }
 0x21d   : > { %v5479_v11 = vpop.f32.mrb[2].mxu1 }
 0x21e   : > { %v5467_v36 = vpop.f32.mrb[2].mxu0  ;;  %v1481_v12 = vadd.f32 %v5479_v11, %v6308_v59  ;;  %v1475_v13 = vpop.f32.mrb[3].mxu1 }
 0x21f   : > { %v1441_v14 = vadd.f32 %v5467_v36, %v6308_v59  ;;  %v1435_v15 = vpop.f32.mrb[3].mxu0  ;;  %v1476_v16 = vadd.f32 %v6308_v59, %v1475_v13 }
 0x220   : > { %v1436_v17 = vadd.f32 %v6308_v59, %v1435_v15  ;;  %v6328_v38 = vmax.f32 %v1481_v12, 0.0 }
 0x221   : > { %v6330_v19 = vmax.f32 %v1476_v16, 0.0  ;;  %v6332_v20 = vmax.f32 %v1441_v14, 0.0 }
 0x222   : > { %1558 = vrot.lane.b32.xlu1 %v6328_v38, %s5627_s15  ;;  %v6336_v22 = vmax.f32 %v1436_v17, 0.0 }
 0x223   : > { %1556 = vrot.lane.b32.xlu0 %v6330_v19, %s5627_s15 }
 0x226   : > { %1542 = vrot.lane.b32.xlu1 %v6332_v20, %s5627_s15 }
 0x227   : > { %1540 = vrot.lane.b32.xlu0 %v6336_v22, %s5627_s15 }
 0x251   : > { %v5482_v27 = vpop.f32.mrb[4].mxu1 }
 0x252   : > { %v5470_v21 = vpop.f32.mrb[4].mxu0  ;;  %v1491_v28 = vadd.f32 %v5482_v27, %v6308_v59  ;;  %v1485_v29 = vpop.f32.mrb[5].mxu1 }
 0x253   : > { %v1451_v30 = vadd.f32 %v5470_v21, %v6308_v59  ;;  %v1445_v31 = vpop.f32.mrb[5].mxu0  ;;  %v1486_v32 = vadd.f32 %v6308_v59, %v1485_v29 }
 0x254   : > { %v1446_v33 = vadd.f32 %v6308_v59, %v1445_v31  ;;  %v6348_v58 = vmax.f32 %v1491_v28, 0.0 }
 0x255   : > { %v6350_v34 = vmax.f32 %v1486_v32, 0.0  ;;  %v6352_v40 = vmax.f32 %v1451_v30, 0.0 }
 0x256   : > { %1562 = vrot.lane.b32.xlu1 %v6348_v58, %s5627_s15  ;;  %v6356_v41 = vmax.f32 %v1446_v33, 0.0 }
 0x257   : > { %1560 = vrot.lane.b32.xlu0 %v6350_v34, %s5627_s15 }
 0x25a   : > { %1546 = vrot.lane.b32.xlu1 %v6352_v40, %s5627_s15 }
 0x25b   : > { %1544 = vrot.lane.b32.xlu0 %v6356_v41, %s5627_s15 }
 0x264   : > { %v1555_v51 = vpop.permute.xlu1 %1554 }
 0x265   : > { %v2193_v37 = vcombine.high %v1555_v51, %v5618_v0  ;;  %v1553_v42 = vpop.permute.xlu0 %1552  ;;  %v2200_v52 = vrot.slane %v1555_v51, %v6365_v49 }
 0x266   : > { %v2127_v18 = vcombine.high %v1553_v42, %v5618_v0  ;;  %v2134_v53 = vrot.slane %v1553_v42, %v6365_v49 }
 0x267   : > { %v2207_v48 = vrot.slane %v2193_v37, %v6365_v49  ;;  %v2208_v56 = vcombine.low %v2185_v54, %v2200_v52  ;;  %v2209_v1 = vcombine.high %v2185_v54, %v2200_v52 }
 0x268   : > { %v2141_v62 = vrot.slane %v2127_v18, %v6365_v49  ;;  %v2142_v4 = vcombine.low %v2119_v60, %v2134_v53  ;;  %v2143_v55 = vcombine.high %v2119_v60, %v2134_v53  ;;  %v1539_v52 = vpop.permute.xlu1 %1538 }
 0x269   : > { %v2224_v23 = vcombine.low %v2192_v24, %v2207_v48  ;;  %v2225_v47 = vcombine.high %v2192_v24, %v2207_v48  ;;  %v2216_v36 = vrot.slane %v2208_v56, %v6378_v63  ;;  %v2223_v8 = vrot.slane %v2209_v1, %v6378_v63 }
 0x26a   : > { %v2158_v2 = vcombine.low %v2126_v61, %v2141_v62  ;;  %v2159_v3 = vcombine.high %v2126_v61, %v2141_v62  ;;  %v2150_v16 = vrot.slane %v2142_v4, %v6378_v63  ;;  %v2157_v17 = vrot.slane %v2143_v55, %v6378_v63 }
 0x26b   : > { %v2232_v5 = vrot.slane %v2224_v23, %v6378_v63  ;;  %v2239_v6 = vrot.slane %v2225_v47, %v6378_v63  ;;  %v3090_v28 = vcombine.low %v2216_v36, %v2223_v8  ;;  %v5371_v29 = vcombine.high %v2216_v36, %v2223_v8 }
 0x26c   : > { %v2166_v12 = vrot.slane %v2158_v2, %v6378_v63  ;;  %v2173_v13 = vrot.slane %v2159_v3, %v6378_v63  ;;  %v3040_v32 = vcombine.low %v2150_v16, %v2157_v17  ;;  %v5369_v44 = vcombine.high %v2150_v16, %v2157_v17 }
 0x26d   : > { %v5485_v7 = vpop.f32.mrb[6].mxu1  ;;  %v3106_v27 = vcombine.low %v2232_v5, %v2239_v6  ;;  %v5372_v21 = vcombine.high %v2232_v5, %v2239_v6  ;;  %v3097_v35 = vrot.slane %v3090_v28, %v6365_v49  ;;  %v3105_v57 = vrot.slane %v5371_v29, %v6365_v49  ;;  %v1537_v5 = vpop.permute.xlu0 %1536 }
 0x26e   : > { %v5473_v11 = vpop.f32.mrb[6].mxu0  ;;  %v1495_v14 = vpop.f32.mrb[7].mxu1  ;;  %v3056_v30 = vcombine.low %v2166_v12, %v2173_v13  ;;  %v5370_v31 = vcombine.high %v2166_v12, %v2173_v13  ;;  %v1501_v45 = vadd.f32 %v5485_v7, %v6308_v59  ;;  %v3047_v50 = vrot.slane %v3040_v32, %v6365_v49 }
 0x26f   : > { %v1455_v15 = vpop.f32.mrb[7].mxu0  ;;  %v3113_v33 = vrot.slane %v3106_v27, %v6365_v49  ;;  %v3121_v43 = vrot.slane %v5372_v21, %v6365_v49  ;;  %v3055_v51 = vrot.slane %v5369_v44, %v6365_v49  ;;  %v3122_v37 = vcombine.low %v3097_v35, %v3105_v57 }
 0x270   : > { %v3063_v25 = vrot.slane %v3056_v30, %v6365_v49  ;;  %v3071_v39 = vrot.slane %v5370_v31, %v6365_v49  ;;  %v6397_v26 = vmax.f32 %v1501_v45, 0.0  ;;  %v1496_v48 = vadd.f32 %v6308_v59, %v1495_v14 }
 0x271   : > { %v3130_v46 = vcombine.low %v3113_v33, %v3121_v43  ;;  %v3072_v24 = vcombine.low %v3047_v50, %v3055_v51  ;;  %v1665_v53 = vcombine.high %v1539_v52, %v5618_v0  ;;  %v1461_v54 = vadd.f32 %v5473_v11, %v6308_v59 }
 0x272   : > { %v3080_v42 = vcombine.low %v3063_v25, %v3071_v39  ;;  %1566 = vrot.lane.b32.xlu1 %v6397_v26, %s5627_s15  ;;  %v1456_v61 = vadd.f32 %v6308_v59, %v1455_v15  ;;  %v6409_v60 = vmax.f32 %v1496_v48, 0.0  ;;  %v3129_v23 = vrot.slane %v3122_v37, %v6378_v63 }
 0x273   : > { %v3137_v18 = vrot.slane %v3130_v46, %v6378_v63  ;;  %v1650_v47 = vcombine.high %v6314_v9, %v5618_v0  ;;  %v1672_v56 = vrot.slane %v1539_v52, %v6365_v49  ;;  %v6415_v1 = vmax.f32 %v1461_v54, 0.0 }
 0x274   : > { %v6407_v62 = vrot.slane %v3080_v42, %v6378_v63  ;;  %v6417_v2 = vmax.f32 %v1456_v61, 0.0  ;;  %1564 = vrot.lane.b32.xlu0 %v6409_v60, %s5627_s15  ;;  %v3079_v3 = vrot.slane %v3072_v24, %v6378_v63  ;;  %v1657_v4 = vrot.slane %v6314_v9, %v6365_v49 }
 0x275   : > { %v3138_v59 = vcombine.low %v3129_v23, %v3137_v18  ;;  %v1679_v55 = vrot.slane %v1665_v53, %v6365_v49  ;;  %v3139_v6 = vcombine.high %v3129_v23, %v3137_v18  ;;  %v1664_v36 = vrot.slane %v1650_v47, %v6365_v49 }
 0x276   : > { %1550 = vrot.lane.b32.xlu1 %v6415_v1, %s5627_s15  ;;  %v6429_v11 = vcombine.low %v3079_v3, %v6407_v62  ;;  %v1680_v8 = vcombine.low %v1657_v4, %v1672_v56  ;;  %v1681_v12 = vcombine.high %v1657_v4, %v1672_v56  ;;  %v3089_v13 = vcombine.high %v3079_v3, %v6407_v62 }
 0x277   : > { %v4041_v7 = vrot.slane %v3138_v59, %v6365_v49  ;;  %v4056_v9 = vrot.slane %v3139_v6, %v6365_v49  ;;  %v1696_v15 = vcombine.low %v1664_v36, %v1679_v55  ;;  %v1697_v16 = vcombine.high %v1664_v36, %v1679_v55 }
 0x278   : > { %1548 = vrot.lane.b32.xlu0 %v6417_v2, %s5627_s15  ;;  %v6438_v14 = vrot.slane %v6429_v11, %v6365_v49  ;;  %v1599_v17 = vcombine.high %v1537_v5, %v5618_v0  ;;  %v6442_v27 = vrot.slane %v3089_v13, %v6365_v49  ;;  %v1584_v28 = vcombine.high %v6317_v10, %v5618_v0 }
 0x279   : > { %v4065_v21 = vcombine.high %v4041_v7, %v4056_v9  ;;  %v1688_v29 = vrot.slane %v1680_v8, %v6378_v63  ;;  %v1695_v30 = vrot.slane %v1681_v12, %v6378_v63  ;;  %v4064_v33 = vcombine.low %v4041_v7, %v4056_v9 }
 0x27a   : > { %v3999_v32 = vcombine.high %v6438_v14, %v6442_v27  ;;  %v1704_v43 = vrot.slane %v1696_v15, %v6378_v63  ;;  %v1711_v44 = vrot.slane %v1697_v16, %v6378_v63  ;;  %v1613_v45 = vrot.slane %v1599_v17, %v6365_v49 }
 0x27b   : > { %v4079_v31 = vrot.slane %v4065_v21, %v6378_v63  ;;  %v1591_v35 = vrot.slane %v6317_v10, %v6365_v49  ;;  %v1598_v57 = vrot.slane %v1584_v28, %v6365_v49  ;;  %v2690_v25 = vcombine.low %v1688_v29, %v1695_v30 }
 0x27c   : > { %v1606_v39 = vrot.slane %v1537_v5, %v6365_v49  ;;  %v5355_v46 = vcombine.high %v1688_v29, %v1695_v30  ;;  %v6460_v50 = vrot.slane %v3999_v32, %v6378_v63  ;;  %v6463_v51 = vrot.slane %v4064_v33, %v6378_v63 }
 0x27d   : > { %4768 = vrot.lane.b32.xlu0 %v4079_v31, %s5622_s29  ;;  %v4034_v37 = vcombine.high %v3138_v59, %v5618_v0  ;;  %v2706_v42 = vcombine.low %v1704_v43, %v1711_v44  ;;  %v5356_v52 = vcombine.high %v1704_v43, %v1711_v44  ;;  %v1630_v24 = vcombine.low %v1598_v57, %v1613_v45 }
 0x27e   : > { %v1631_v48 = vcombine.high %v1598_v57, %v1613_v45  ;;  %v5394_v10 = vcombine.high %v3137_v18, %v5618_v0  ;;  %v2310_v53 = vcombine.high %v6328_v38, %v5618_v0  ;;  %v2244_v54 = vcombine.high %v6330_v19, %v5618_v0 }
 0x27f   : > { %v1614_v61 = vcombine.low %v1591_v35, %v1606_v39  ;;  %v1615_v23 = vcombine.high %v1591_v35, %v1606_v39  ;;  %v6474_v47 = vrot.slane %v2690_v25, %v6365_v49  ;;  %v6477_v56 = vrot.slane %v5355_v46, %v6365_v49 }
 0x280   : > { %v4096_v59 = vcombine.high %v6463_v51, %v5618_v0  ;;  %v4048_v3 = vrot.slane %v4034_v37, %v6365_v49  ;;  %v2713_v18 = vrot.slane %v2706_v42, %v6365_v49  ;;  %v2721_v4 = vrot.slane %v5356_v52, %v6365_v49 }
 0x281   : > { %4544 = vrot.lane.b32.xlu0 %v6460_v50, %s5622_s29  ;;  %v6485_v55 = vrot.slane %v1630_v24, %v6378_v63  ;;  %v6488_v5 = vrot.slane %v1631_v48, %v6378_v63  ;;  %v2317_v6 = vrot.slane %v6328_v38, %v6365_v49  ;;  %v4063_v7 = vrot.slane %v5394_v10, %v6365_v49 }
 0x282   : > { %v2324_v36 = vrot.slane %v2310_v53, %v6365_v49  ;;  %v2251_v8 = vrot.slane %v6330_v19, %v6365_v49  ;;  %v2258_v12 = vrot.slane %v2244_v54, %v6365_v49  ;;  %v6499_v13 = vrot.slane %v1614_v61, %v6378_v63 }
 0x283   : > { %v2722_v9 = vcombine.low %v6474_v47, %v6477_v56  ;;  %v6504_v15 = vrot.slane %v1615_v23, %v6378_v63  ;;  %v4097_v38 = vcombine.high %v4079_v31, %v5618_v0  ;;  %v4080_v16 = vcombine.low %v4048_v3, %v4063_v7 }
 0x284   : > { %v2730_v21 = vcombine.low %v2713_v18, %v2721_v4  ;;  %v2656_v28 = vcombine.low %v6485_v55, %v6488_v5  ;;  %v4081_v32 = vcombine.high %v4048_v3, %v4063_v7  ;;  %v3998_v33 = vcombine.low %v6438_v14, %v6442_v27 }
 0x285   : > { %4736 = vrot.lane.b32.xlu0 %v4096_v59, %s5620_s26  ;;  %v3968_v57 = vcombine.high %v6429_v11, %v5618_v0  ;;  %v6520_v25 = vrot.slane %v4080_v16, %v6378_v63  ;;  %v5354_v18 = vcombine.high %v6485_v55, %v6488_v5  ;;  %v5393_v7 = vcombine.high %v6407_v62, %v5618_v0 }
 0x286   : > { %v6528_v24 = vrot.slane %v4081_v32, %v6378_v63  ;;  %v6531_v11 = vrot.slane %v3998_v33, %v6378_v63  ;;  %v6548_v16 = vrot.slane %v2730_v21, %v6378_v63  ;;  %v2640_v62 = vcombine.low %v6499_v13, %v6504_v15 }
 0x287   : > { %v5353_v32 = vcombine.high %v6499_v13, %v6504_v15  ;;  %v3997_v21 = vrot.slane %v5393_v7, %v6365_v49 }
 0x289   : > { %4800 = vrot.lane.b32.xlu0 %v4097_v38, %s5624_s7 }
 0x28d   : > { %4832 = vrot.lane.b32.xlu0 %v6520_v25, %s5626_s27 }
 0x291   : > { %4896 = vrot.lane.b32.xlu0 %v6528_v24, %s5630_s9 }
 0x294   : > { %v1559_v17 = vpop.permute.xlu1 %1558 }
 0x295   : > { %v2325_v19 = vcombine.high %v1559_v17, %v5618_v0  ;;  %v2332_v29 = vrot.slane %v1559_v17, %v6365_v49  ;;  %v1557_v30 = vpop.permute.xlu0 %1556  ;;  %v3982_v17 = vrot.slane %v3968_v57, %v6365_v49  ;;  %v2671_v57 = vrot.slane %v5354_v18, %v6365_v49 }
 0x296   : > { %v2259_v43 = vcombine.high %v1557_v30, %v5618_v0  ;;  %v2266_v31 = vrot.slane %v1557_v30, %v6365_v49 }
 0x297   : > { %v2339_v44 = vrot.slane %v2325_v19, %v6365_v49  ;;  %v2340_v45 = vcombine.low %v2317_v6, %v2332_v29  ;;  %v2341_v35 = vcombine.high %v2317_v6, %v2332_v29  ;;  %v4030_v19 = vcombine.high %v6531_v11, %v5618_v0 }
 0x298   : > { %v2273_v39 = vrot.slane %v2259_v43, %v6365_v49  ;;  %v2274_v46 = vcombine.low %v2251_v8, %v2266_v31  ;;  %v2275_v37 = vcombine.high %v2251_v8, %v2266_v31  ;;  %v2729_v43 = vrot.slane %v2722_v9, %v6378_v63 }
 0x299   : > { %v2348_v14 = vrot.slane %v2340_v45, %v6378_v63  ;;  %v2355_v27 = vrot.slane %v2341_v35, %v6378_v63  ;;  %v2356_v42 = vcombine.low %v2324_v36, %v2339_v44  ;;  %v2357_v52 = vcombine.high %v2324_v36, %v2339_v44  ;;  %4512 = vrot.lane.b32.xlu0 %v4030_v19, %s5620_s26 }
 0x29a   : > { %v2290_v48 = vcombine.low %v2258_v12, %v2273_v39  ;;  %v2291_v10 = vcombine.high %v2258_v12, %v2273_v39  ;;  %v2282_v47 = vrot.slane %v2274_v46, %v6378_v63  ;;  %v2289_v56 = vrot.slane %v2275_v37, %v6378_v63 }
 0x29b   : > { %v2364_v53 = vrot.slane %v2356_v42, %v6378_v63  ;;  %v2371_v54 = vrot.slane %v2357_v52, %v6378_v63  ;;  %v3190_v61 = vcombine.low %v2348_v14, %v2355_v27  ;;  %v5375_v23 = vcombine.high %v2348_v14, %v2355_v27 }
 0x29c   : > { %v2298_v59 = vrot.slane %v2290_v48, %v6378_v63  ;;  %v2305_v3 = vrot.slane %v2291_v10, %v6378_v63  ;;  %v3140_v29 = vcombine.low %v2282_v47, %v2289_v56  ;;  %v5373_v30 = vcombine.high %v2282_v47, %v2289_v56 }
 0x29d   : > { %v3206_v4 = vcombine.low %v2364_v53, %v2371_v54  ;;  %v5376_v6 = vcombine.high %v2364_v53, %v2371_v54  ;;  %v3197_v36 = vrot.slane %v3190_v61, %v6365_v49  ;;  %v3205_v8 = vrot.slane %v5375_v23, %v6365_v49  ;;  %v1543_v61 = vpop.permute.xlu1 %1542 }
 0x29e   : > { %v3156_v12 = vcombine.low %v2298_v59, %v2305_v3  ;;  %v5374_v38 = vcombine.high %v2298_v59, %v2305_v3  ;;  %v2663_v31 = vrot.slane %v2656_v28, %v6365_v49  ;;  %v4014_v39 = vcombine.low %v3982_v17, %v3997_v21 }
 0x29f   : > { %v3213_v55 = vrot.slane %v3206_v4, %v6365_v49  ;;  %v3221_v5 = vrot.slane %v5376_v6, %v6365_v49  ;;  %v3222_v44 = vcombine.low %v3197_v36, %v3205_v8  ;;  %v6567_v46 = vcombine.low %v2729_v43, %v6548_v16 }
 0x2a0   : > { %v3163_v45 = vrot.slane %v3156_v12, %v6365_v49  ;;  %v3171_v35 = vrot.slane %v5374_v38, %v6365_v49  ;;  %v2739_v13 = vcombine.high %v2729_v43, %v6548_v16  ;;  %v3147_v9 = vrot.slane %v3140_v29, %v6365_v49 }
 0x2a1   : > { %v3230_v33 = vcombine.low %v3213_v55, %v3221_v5  ;;  %v3155_v28 = vrot.slane %v5373_v30, %v6365_v49  ;;  %v4031_v37 = vcombine.high %v6460_v50, %v5618_v0  ;;  %v2647_v14 = vrot.slane %v2640_v62, %v6365_v49 }
 0x2a2   : > { %v2655_v27 = vrot.slane %v5353_v32, %v6365_v49  ;;  %v3180_v42 = vcombine.low %v3163_v45, %v3171_v35  ;;  %v3229_v52 = vrot.slane %v3222_v44, %v6378_v63  ;;  %v2680_v48 = vcombine.low %v2663_v31, %v2671_v57 }
 0x2a3   : > { %v6571_v15 = vrot.slane %v3230_v33, %v6378_v63  ;;  %4576 = vrot.lane.b32.xlu0 %v4031_v37, %s5624_s7  ;;  %v6583_v10 = vrot.slane %v6567_v46, %v6365_v49  ;;  %v6586_v53 = vrot.slane %v2739_v13, %v6365_v49  ;;  %v3172_v54 = vcombine.low %v3147_v9, %v3155_v28 }
 0x2a4   : > { %v6589_v50 = vrot.slane %v4014_v39, %v6378_v63  ;;  %v4015_v23 = vcombine.high %v3982_v17, %v3997_v21  ;;  %v2672_v56 = vcombine.low %v2647_v14, %v2655_v27  ;;  %v6593_v59 = vrot.slane %v3180_v42, %v6378_v63  ;;  %v1541_v39 = vpop.permute.xlu0 %1540 }
 0x2a5   : > { %v3238_v47 = vcombine.low %v3229_v52, %v6571_v15  ;;  %v3239_v3 = vcombine.high %v3229_v52, %v6571_v15  ;;  %v6599_v18 = vrot.slane %v2680_v48, %v6378_v63  ;;  %v1797_v4 = vcombine.high %v1543_v61, %v5618_v0 }
 0x2a6   : > { %v3537_v6 = vcombine.high %v6583_v10, %v6586_v53  ;;  %v6606_v36 = vrot.slane %v4015_v23, %v6378_v63  ;;  %v3179_v12 = vrot.slane %v3172_v54, %v6378_v63  ;;  %v1782_v38 = vcombine.high %v6332_v20, %v5618_v0 }
 0x2a7   : > { %4608 = vrot.lane.b32.xlu0 %v6589_v50, %s5626_s27  ;;  %v4173_v7 = vrot.slane %v3238_v47, %v6365_v49  ;;  %v4188_v8 = vrot.slane %v3239_v3, %v6365_v49  ;;  %v2679_v55 = vrot.slane %v2672_v56, %v6378_v63  ;;  %v1811_v19 = vrot.slane %v1797_v4, %v6365_v49 }
 0x2a8   : > { %v6616_v17 = vcombine.low %v3179_v12, %v6593_v59  ;;  %v3189_v62 = vcombine.high %v3179_v12, %v6593_v59  ;;  %v6621_v29 = vrot.slane %v3537_v6, %v6378_v63  ;;  %v1789_v44 = vrot.slane %v6332_v20, %v6365_v49 }
 0x2a9   : > { %v4197_v5 = vcombine.high %v4173_v7, %v4188_v8  ;;  %v6624_v30 = vcombine.low %v2679_v55, %v6599_v18  ;;  %v2689_v32 = vcombine.high %v2679_v55, %v6599_v18  ;;  %v4196_v31 = vcombine.low %v4173_v7, %v4188_v8 }
 0x2aa   : > { %v6630_v21 = vrot.slane %v6616_v17, %v6365_v49  ;;  %v6633_v43 = vrot.slane %v3189_v62, %v6365_v49  ;;  %v1796_v45 = vrot.slane %v1782_v38, %v6365_v49  ;;  %v1716_v35 = vcombine.high %v6336_v22, %v5618_v0 }
 0x2ab   : > { %4672 = vrot.lane.b32.xlu0 %v6606_v36, %s5630_s9  ;;  %v4211_v33 = vrot.slane %v4197_v5, %v6378_v63  ;;  %v1804_v57 = vrot.slane %v1543_v61, %v6365_v49  ;;  %v4098_v20 = vcombine.high %v6520_v25, %v5618_v0  ;;  %v6650_v37 = vrot.slane %v6624_v30, %v6365_v49 }
 0x2ac   : > { %v4131_v13 = vcombine.high %v6630_v21, %v6633_v43  ;;  %v1828_v9 = vcombine.low %v1796_v45, %v1811_v19  ;;  %v1829_v28 = vcombine.high %v1796_v45, %v1811_v19  ;;  %v6656_v27 = vrot.slane %v2689_v32, %v6365_v49 }
 0x2ad   : > { %4770 = vrot.lane.b32.xlu1 %v4211_v33, %s5622_s29  ;;  %v6659_v42 = vrot.slane %v4196_v31, %v6378_v63  ;;  %v4166_v52 = vcombine.high %v3238_v47, %v5618_v0  ;;  %v1723_v48 = vrot.slane %v6336_v22, %v6365_v49  ;;  %v1731_v25 = vcombine.high %v1541_v39, %v5618_v0 }
 0x2ae   : > { %v6653_v14 = vrot.slane %v4131_v13, %v6378_v63  ;;  %v1812_v54 = vcombine.low %v1789_v44, %v1804_v57  ;;  %v1813_v61 = vcombine.high %v1789_v44, %v1804_v57  ;;  %v5396_v23 = vcombine.high %v6571_v15, %v5618_v0 }
 0x2af   : > { %4760 = vrot.lane.b32.xlu0 %v6621_v29, %s5622_s29  ;;  %v1730_v56 = vrot.slane %v1716_v35, %v6365_v49  ;;  %v1836_v47 = vrot.slane %v1828_v9, %v6378_v63  ;;  %v1843_v3 = vrot.slane %v1829_v28, %v6378_v63  ;;  %v1738_v22 = vrot.slane %v1541_v39, %v6365_v49 }
 0x2b0   : > { %v4099_v4 = vcombine.high %v6528_v24, %v5618_v0  ;;  %v3471_v6 = vcombine.high %v6650_v37, %v6656_v27  ;;  %v4228_v7 = vcombine.high %v6659_v42, %v5618_v0  ;;  %v4180_v8 = vrot.slane %v4166_v52, %v6365_v49 }
 0x2b1   : > { %4546 = vrot.lane.b32.xlu1 %v6653_v14, %s5622_s29  ;;  %v2442_v15 = vcombine.high %v6348_v58, %v5618_v0  ;;  %v6685_v12 = vrot.slane %v6348_v58, %v6365_v49  ;;  %v2376_v38 = vcombine.high %v6350_v34, %v5618_v0  ;;  %v1745_v24 = vrot.slane %v1731_v25, %v6365_v49 }
 0x2b2   : > { %v1820_v55 = vrot.slane %v1812_v54, %v6378_v63  ;;  %v1827_v5 = vrot.slane %v1813_v61, %v6378_v63  ;;  %v4195_v62 = vrot.slane %v5396_v23, %v6365_v49  ;;  %v2806_v19 = vcombine.low %v1836_v47, %v1843_v3 }
 0x2b3   : > { %4864 = vrot.lane.b32.xlu0 %v4098_v20, %s5631_s10  ;;  %v1746_v32 = vcombine.low %v1723_v48, %v1738_v22  ;;  %v1747_v31 = vcombine.high %v1723_v48, %v1738_v22  ;;  %v3506_v58 = vcombine.high %v6567_v46, %v5618_v0  ;;  %v5360_v44 = vcombine.high %v1836_v47, %v1843_v3 }
 0x2b4   : > { %v6698_v45 = vrot.slane %v3471_v6, %v6378_v63  ;;  %v4229_v35 = vcombine.high %v4211_v33, %v5618_v0  ;;  %v4212_v57 = vcombine.low %v4180_v8, %v4195_v62  ;;  %v1762_v39 = vcombine.low %v1730_v56, %v1745_v24 }
 0x2b5   : > { %4738 = vrot.lane.b32.xlu1 %v4228_v7, %s5620_s26  ;;  %v1763_v13 = vcombine.high %v1730_v56, %v1745_v24  ;;  %v4032_v9 = vcombine.high %v6589_v50, %v5618_v0  ;;  %v5386_v28 = vcombine.high %v6548_v16, %v5618_v0  ;;  %v2790_v20 = vcombine.low %v1820_v55, %v1827_v5 }
 0x2b6   : > { %v5359_v52 = vcombine.high %v1820_v55, %v1827_v5  ;;  %v3536_v46 = vcombine.low %v6583_v10, %v6586_v53  ;;  %v2813_v33 = vrot.slane %v2806_v19, %v6365_v49  ;;  %v6712_v48 = vrot.slane %v1746_v32, %v6378_v63 }
 0x2b7   : > { %4928 = vrot.lane.b32.xlu0 %v4099_v4, %s5627_s15  ;;  %v6715_v50 = vrot.slane %v1747_v31, %v6378_v63  ;;  %v6718_v16 = vrot.slane %v3506_v58, %v6365_v49  ;;  %v2821_v25 = vrot.slane %v5360_v44, %v6365_v49  ;;  %v6722_v54 = vrot.slane %v4212_v57, %v6378_v63 }
 0x2b8   : > { %v4213_v61 = vcombine.high %v4180_v8, %v4195_v62  ;;  %v4130_v10 = vcombine.low %v6630_v21, %v6633_v43  ;;  %v6728_v53 = vrot.slane %v6350_v34, %v6365_v49  ;;  %v1770_v23 = vrot.slane %v1762_v39, %v6378_v63 }
 0x2b9   : > { %4802 = vrot.lane.b32.xlu1 %v4229_v35, %s5624_s7  ;;  %v1777_v56 = vrot.slane %v1763_v13, %v6378_v63  ;;  %v6733_v47 = vrot.slane %v5386_v28, %v6365_v49  ;;  %v2456_v3 = vrot.slane %v2442_v15, %v6365_v49  ;;  %v2797_v22 = vrot.slane %v2790_v20, %v6365_v49 }
 0x2ba   : > { %v2805_v4 = vrot.slane %v5359_v52, %v6365_v49  ;;  %v4033_v34 = vcombine.high %v6606_v36, %v5618_v0  ;;  %v6744_v21 = vrot.slane %v3536_v46, %v6378_v63  ;;  %v4100_v6 = vcombine.high %v6616_v17, %v5618_v0 }
 0x2bb   : > { %4536 = vrot.lane.b32.xlu0 %v6698_v45, %s5622_s29  ;;  %v3552_v43 = vcombine.low %v6718_v16, %v6733_v47  ;;  %v2830_v7 = vcombine.low %v2813_v33, %v2821_v25  ;;  %v2740_v8 = vcombine.low %v6712_v48, %v6715_v50  ;;  %v6753_v15 = vrot.slane %v4213_v61, %v6378_v63 }
 0x2bc   : > { %v6756_v24 = vrot.slane %v4130_v10, %v6378_v63  ;;  %v6759_v36 = vrot.slane %v2376_v38, %v6365_v49  ;;  %v2756_v55 = vcombine.low %v1770_v23, %v1777_v56  ;;  %v5395_v5 = vcombine.high %v6593_v59, %v5618_v0 }
 0x2bd   : > { %4834 = vrot.lane.b32.xlu1 %v6722_v54, %s5626_s27  ;;  %v3470_v17 = vcombine.low %v6650_v37, %v6656_v27  ;;  %v2822_v62 = vcombine.low %v2797_v22, %v2805_v4  ;;  %v5358_v19 = vcombine.high %v1770_v23, %v1777_v56  ;;  %v3553_v32 = vcombine.high %v6718_v16, %v6733_v47 }
 0x2be   : > { %v3568_v38 = vcombine.high %v6744_v21, %v5618_v0  ;;  %v3569_v31 = vcombine.high %v6621_v29, %v5618_v0  ;;  %v6775_v59 = vrot.slane %v3552_v43, %v6378_v63  ;;  %v4114_v37 = vrot.slane %v4100_v6, %v6365_v49 }
 0x2bf   : > { %4640 = vrot.lane.b32.xlu0 %v4032_v9, %s5631_s10  ;;  %v6779_v27 = vrot.slane %v2830_v7, %v6378_v63  ;;  %v6782_v58 = vrot.slane %v2740_v8, %v6365_v49  ;;  %v5357_v44 = vcombine.high %v6712_v48, %v6715_v50  ;;  %v4162_v35 = vcombine.high %v6756_v24, %v5618_v0 }
 0x2c0   : > { %v2763_v29 = vrot.slane %v2756_v55, %v6365_v49  ;;  %v4129_v28 = vrot.slane %v5395_v5, %v6365_v49  ;;  %v2771_v20 = vrot.slane %v5358_v19, %v6365_v49  ;;  %v2829_v46 = vrot.slane %v2822_v62, %v6378_v63 }
 0x2c1   : > { %4898 = vrot.lane.b32.xlu1 %v6753_v15, %s5630_s9  ;;  %v4163_v25 = vcombine.high %v6653_v14, %v5618_v0 }
 0x2c2   : > { %v4146_v16 = vcombine.low %v4114_v37, %v4129_v28  ;;  %v6804_v10 = vcombine.low %v2829_v46, %v6779_v27  ;;  %v2839_v23 = vcombine.high %v2829_v46, %v6779_v27  ;;  %v4147_v8 = vcombine.high %v4114_v37, %v4129_v28 }
 0x2c3   : > { %4704 = vrot.lane.b32.xlu0 %v4033_v34, %s5627_s15  ;;  %v2755_v34 = vrot.slane %v5357_v44, %v6365_v49 }
 0x2c4   : > { %v6816_v7 = vrot.slane %v4146_v16, %v6378_v63  ;;  %v6822_v5 = vrot.slane %v6804_v10, %v6365_v49  ;;  %v6825_v62 = vrot.slane %v2839_v23, %v6365_v49 }
 0x2c5   : > { %4514 = vrot.lane.b32.xlu1 %v4162_v35, %s5620_s26 }
 0x2c7   : > { %4728 = vrot.lane.b32.xlu0 %v3568_v38, %s5620_s26 }
 0x2c8   : > { %v1563_v57 = vpop.permute.xlu1 %1562 }
 0x2c9   : > { %v2457_v39 = vcombine.high %v1563_v57, %v5618_v0  ;;  %v2464_v13 = vrot.slane %v1563_v57, %v6365_v49  ;;  %v1561_v9 = vpop.permute.xlu0 %1560  ;;  %4578 = vrot.lane.b32.xlu1 %v4163_v25, %s5624_s7  ;;  %v2772_v57 = vcombine.low %v6782_v58, %v2755_v34 }
 0x2ca   : > { %v2391_v52 = vcombine.high %v1561_v9, %v5618_v0  ;;  %v2398_v14 = vrot.slane %v1561_v9, %v6365_v49 }
 0x2cb   : > { %v2471_v33 = vrot.slane %v2457_v39, %v6365_v49  ;;  %v2472_v48 = vcombine.low %v6685_v12, %v2464_v13  ;;  %v2473_v50 = vcombine.high %v6685_v12, %v2464_v13  ;;  %v2780_v12 = vcombine.low %v2763_v29, %v2771_v20  ;;  %4792 = vrot.lane.b32.xlu0 %v3569_v31, %s5624_s7 }
 0x2cc   : > { %v2405_v61 = vrot.slane %v2391_v52, %v6365_v49  ;;  %v2406_v37 = vcombine.low %v6728_v53, %v2398_v14  ;;  %v2407_v35 = vcombine.high %v6728_v53, %v2398_v14  ;;  %v6839_v13 = vrot.slane %v3470_v17, %v6378_v63 }
 0x2cd   : > { %v2480_v56 = vrot.slane %v2472_v48, %v6378_v63  ;;  %v2487_v47 = vrot.slane %v2473_v50, %v6378_v63  ;;  %v2488_v22 = vcombine.low %v2456_v3, %v2471_v33  ;;  %v2489_v4 = vcombine.high %v2456_v3, %v2471_v33  ;;  %4610 = vrot.lane.b32.xlu1 %v6816_v7, %s5626_s27 }
 0x2ce   : > { %v2422_v55 = vcombine.low %v6759_v36, %v2405_v61  ;;  %v2423_v3 = vcombine.high %v6759_v36, %v2405_v61  ;;  %v3440_v36 = vcombine.high %v6624_v30, %v5618_v0  ;;  %v6842_v9 = vrot.slane %v2780_v12, %v6378_v63 }
 0x2cf   : > { %v2496_v43 = vrot.slane %v2488_v22, %v6378_v63  ;;  %v2503_v6 = vrot.slane %v2489_v4, %v6378_v63  ;;  %v3290_v19 = vcombine.low %v2480_v56, %v2487_v47  ;;  %v5379_v38 = vcombine.high %v2480_v56, %v2487_v47  ;;  %4824 = vrot.lane.b32.xlu0 %v6775_v59, %s5626_s27 }
 0x2d0   : > { %v2430_v53 = vrot.slane %v2422_v55, %v6378_v63  ;;  %v2437_v28 = vrot.slane %v2423_v3, %v6378_v63  ;;  %v6847_v30 = vrot.slane %v3553_v32, %v6378_v63  ;;  %v6852_v52 = vrot.slane %v4147_v8, %v6378_v63 }
 0x2d1   : > { %v3306_v31 = vcombine.low %v2496_v43, %v2503_v6  ;;  %v5380_v44 = vcombine.high %v2496_v43, %v2503_v6  ;;  %v3297_v58 = vrot.slane %v3290_v19, %v6365_v49  ;;  %v3305_v20 = vrot.slane %v5379_v38, %v6365_v49 }
 0x2d2   : > { %v3669_v17 = vcombine.high %v6822_v5, %v6825_v62  ;;  %v2414_v46 = vrot.slane %v2406_v37, %v6378_v63  ;;  %v2421_v33 = vrot.slane %v2407_v35, %v6378_v63  ;;  %v5385_v32 = vcombine.high %v6599_v18, %v5618_v0  ;;  %4674 = vrot.lane.b32.xlu1 %v6852_v52, %s5630_s9 }
 0x2d3   : > { %v3313_v29 = vrot.slane %v3306_v31, %v6365_v49  ;;  %v3321_v39 = vrot.slane %v5380_v44, %v6365_v49  ;;  %4888 = vrot.lane.b32.xlu0 %v6847_v30, %s5630_s9  ;;  %v2779_v50 = vrot.slane %v2772_v57, %v6378_v63  ;;  %v3256_v16 = vcombine.low %v2430_v53, %v2437_v28 }
 0x2d4   : > { %v5378_v25 = vcombine.high %v2430_v53, %v2437_v28  ;;  %v3502_v61 = vcombine.high %v6839_v13, %v5618_v0  ;;  %v3454_v23 = vrot.slane %v3440_v36, %v6365_v49  ;;  %v3322_v56 = vcombine.low %v3297_v58, %v3305_v20 }
 0x2d5   : > { %v3330_v48 = vcombine.low %v3313_v29, %v3321_v39  ;;  %v6869_v47 = vrot.slane %v3669_v17, %v6378_v63  ;;  %v6872_v22 = vcombine.low %v2779_v50, %v6842_v9  ;;  %v2789_v18 = vcombine.high %v2779_v50, %v6842_v9 }
 0x2d6   : > { %v3240_v4 = vcombine.low %v2414_v46, %v2421_v33  ;;  %v5377_v34 = vcombine.high %v2414_v46, %v2421_v33  ;;  %v3469_v12 = vrot.slane %v5385_v32, %v6365_v49  ;;  %v3263_v43 = vrot.slane %v3256_v16, %v6365_v49 }
 0x2d7   : > { %4504 = vrot.lane.b32.xlu0 %v3502_v61, %s5620_s26  ;;  %v6878_v14 = vrot.slane %v3330_v48, %v6378_v63  ;;  %4762 = vrot.lane.b32.xlu1 %v6869_v47, %s5622_s29  ;;  %v3271_v6 = vrot.slane %v5378_v25, %v6365_v49  ;;  %v3503_v8 = vcombine.high %v6698_v45, %v5618_v0  ;;  %v6937_v48 = vpop.permute.xlu1 %1546 }
 0x2d8   : > { %v3486_v55 = vcombine.low %v3454_v23, %v3469_v12  ;;  %v4230_v3 = vcombine.high %v6722_v54, %v5618_v0  ;;  %v6890_v19 = vrot.slane %v6872_v22, %v6365_v49  ;;  %v6893_v38 = vrot.slane %v2789_v18, %v6365_v49 }
 0x2d9   : > { %v3329_v31 = vrot.slane %v3322_v56, %v6378_v63  ;;  %v3247_v44 = vrot.slane %v3240_v4, %v6365_v49  ;;  %v3255_v37 = vrot.slane %v5377_v34, %v6365_v49  ;;  %v3280_v35 = vcombine.low %v3263_v43, %v3271_v6 }
 0x2da   : > { %v3494_v36 = vrot.slane %v3486_v55, %v6378_v63  ;;  %v3487_v57 = vcombine.high %v3454_v23, %v3469_v12  ;;  %v4231_v29 = vcombine.high %v6753_v15, %v5618_v0  ;;  %v3603_v39 = vcombine.high %v6890_v19, %v6893_v38 }
 0x2db   : > { %4568 = vrot.lane.b32.xlu0 %v3503_v8, %s5624_s7  ;;  %4866 = vrot.lane.b32.xlu1 %v4230_v3, %s5631_s10  ;;  %v6901_v45 = vcombine.low %v3329_v31, %v6878_v14  ;;  %v3339_v54 = vcombine.high %v3329_v31, %v6878_v14  ;;  %v3272_v58 = vcombine.low %v3247_v44, %v3255_v37  ;;  %v6999_v44 = vpop.permute.xlu0 %1544 }
 0x2dc   : > { %v6921_v15 = vrot.slane %v3280_v35, %v6378_v63  ;;  %v6924_v17 = vrot.slane %v3487_v57, %v6378_v63  ;;  %v6927_v46 = vrot.slane %v3603_v39, %v6378_v63  ;;  %v4164_v25 = vcombine.high %v6816_v7, %v5618_v0 }
 0x2dd   : > { %v6911_v53 = vrot.slane %v6901_v45, %v6365_v49  ;;  %v6914_v28 = vrot.slane %v3339_v54, %v6365_v49  ;;  %v3279_v32 = vrot.slane %v3272_v58, %v6378_v63  ;;  %v3668_v61 = vcombine.low %v6822_v5, %v6825_v62 }
 0x2de   : > { %v1914_v23 = vcombine.high %v6352_v40, %v5618_v0  ;;  %v6951_v56 = vrot.slane %v6352_v40, %v6365_v49  ;;  %v1848_v18 = vcombine.high %v6356_v41, %v5618_v0  ;;  %v2574_v4 = vcombine.high %v6397_v26, %v5618_v0 }
 0x2df   : > { %4600 = vrot.lane.b32.xlu0 %v3494_v36, %s5626_s27  ;;  %4930 = vrot.lane.b32.xlu1 %v4231_v29, %s5627_s15  ;;  %v4329_v20 = vcombine.high %v6911_v53, %v6914_v28  ;;  %v6940_v50 = vcombine.low %v3279_v32, %v6921_v15  ;;  %v3289_v16 = vcombine.high %v3279_v32, %v6921_v15 }
 0x2e0   : > { %v6961_v7 = vrot.slane %v6356_v41, %v6365_v49  ;;  %v2581_v5 = vrot.slane %v6397_v26, %v6365_v49  ;;  %v2508_v40 = vcombine.high %v6409_v60, %v5618_v0  ;;  %v3570_v62 = vcombine.high %v6775_v59, %v5618_v0 }
 0x2e1   : > { %v6932_v33 = vrot.slane %v4329_v20, %v6378_v63  ;;  %v6972_v12 = vrot.slane %v6940_v50, %v6365_v49  ;;  %v6975_v43 = vrot.slane %v3289_v16, %v6365_v49  ;;  %v3638_v41 = vcombine.high %v6804_v10, %v5618_v0 }
 0x2e2   : > { %v5388_v26 = vcombine.high %v6779_v27, %v5618_v0  ;;  %v4165_v59 = vcombine.high %v6852_v52, %v5618_v0  ;;  %v6986_v55 = vrot.slane %v3668_v61, %v6378_v63  ;;  %v6989_v3 = vrot.slane %v1914_v23, %v6365_v49 }
 0x2e3   : > { %4664 = vrot.lane.b32.xlu0 %v6924_v17, %s5630_s9  ;;  %4538 = vrot.lane.b32.xlu1 %v6927_v46, %s5622_s29  ;;  %v6992_v31 = vrot.slane %v1848_v18, %v6365_v49  ;;  %v2588_v10 = vrot.slane %v2574_v4, %v6365_v49  ;;  %v6997_v27 = vrot.slane %v6409_v60, %v6365_v49 }
 0x2e4   : > { %v1567_v34 = vpop.permute.xlu1 %1566  ;;  %7813 = vst [vmem:[#allocation4_spill] sm:$0xff] %v6986_v55  ;;  %v7003_v52 = vrot.slane %v2508_v40, %v6365_v49  ;;  %v3571_v57 = vcombine.high %v6847_v30, %v5618_v0  ;;  %v4263_v60 = vcombine.high %v6972_v12, %v6975_v43  ;;  %v3504_v29 = vcombine.high %v3494_v36, %v5618_v0 }
 0x2e5   : > { %v2589_v6 = vcombine.high %v1567_v34, %v5618_v0  ;;  %v2596_v8 = vrot.slane %v1567_v34, %v6365_v49  ;;  %v3652_v39 = vrot.slane %v3638_v41, %v6365_v49  ;;  %v3700_v32 = vcombine.high %v6986_v55, %v5618_v0 }
 0x2e6   : > { %v3667_v16 = vrot.slane %v5388_v26, %v6365_v49  ;;  %v1565_v61 = vpop.permute.xlu0 %1564  ;;  %v3602_v30 = vcombine.low %v6890_v19, %v6893_v38  ;;  %v3572_v36 = vcombine.high %v6872_v22, %v5618_v0  ;;  %v5387_v23 = vcombine.high %v6842_v9, %v5618_v0 }
 0x2e7   : > { %4772 = vrot.lane.b32.xlu0 %v6932_v33, %s5622_s29  ;;  %4642 = vrot.lane.b32.xlu1 %v4164_v25, %s5631_s10  ;;  %v2603_v37 = vrot.slane %v2589_v6, %v6365_v49  ;;  %v2604_v54 = vcombine.low %v2581_v5, %v2596_v8  ;;  %v2605_v35 = vcombine.high %v2581_v5, %v2596_v8 }
 0x2e8   : > { %v1929_v25 = vcombine.high %v6937_v48, %v5618_v0  ;;  %v7032_v19 = vrot.slane %v4263_v60, %v6378_v63  ;;  %v3684_v38 = vcombine.low %v3652_v39, %v3667_v16  ;;  %v3685_v22 = vcombine.high %v3652_v39, %v3667_v16 }
 0x2e9   : > { %v2620_v58 = vcombine.low %v2588_v10, %v2603_v37  ;;  %v2621_v20 = vcombine.high %v2588_v10, %v2603_v37  ;;  %v2612_v18 = vrot.slane %v2604_v54, %v6378_v63  ;;  %v2619_v4 = vrot.slane %v2605_v35, %v6378_v63 }
 0x2ea   : > { %v3701_v9 = vcombine.high %v6869_v47, %v5618_v0  ;;  %v3505_v26 = vcombine.high %v6924_v17, %v5618_v0  ;;  %v1943_v6 = vrot.slane %v1929_v25, %v6365_v49  ;;  %v7046_v10 = vrot.slane %v3572_v36, %v6365_v49 }
 0x2eb   : > { %4856 = vrot.lane.b32.xlu0 %v3570_v62, %s5631_s10  ;;  %4706 = vrot.lane.b32.xlu1 %v4165_v59, %s5627_s15  ;;  %v2628_v5 = vrot.slane %v2620_v58, %v6378_v63  ;;  %v2635_v40 = vrot.slane %v2621_v20, %v6378_v63  ;;  %v2523_v62 = vcombine.high %v1565_v61, %v5618_v0 }
 0x2ec   : > { %v7043_v59 = vrot.slane %v3602_v30, %v6378_v63  ;;  %v3390_v37 = vcombine.low %v2612_v18, %v2619_v4  ;;  %v5383_v54 = vcombine.high %v2612_v18, %v2619_v4  ;;  %v2530_v47 = vrot.slane %v1565_v61, %v6365_v49 }
 0x2ed   : > { %v3406_v34 = vcombine.low %v2628_v5, %v2635_v40  ;;  %v5384_v41 = vcombine.high %v2628_v5, %v2635_v40  ;;  %v2537_v8 = vrot.slane %v2523_v62, %v6365_v49  ;;  %v7051_v17 = vrot.slane %v5387_v23, %v6365_v49 }
 0x2ee   : > { %7814 = vst [vmem:[#allocation5_spill] sm:$0xff] %v7043_v59  ;;  %v1936_v35 = vrot.slane %v6937_v48, %v6365_v49  ;;  %v7058_v60 = vrot.slane %v3684_v38, %v6378_v63  ;;  %v7061_v39 = vrot.slane %v3685_v22, %v6378_v63  ;;  %v4328_v58 = vcombine.low %v6911_v53, %v6914_v28 }
 0x2ef   : > { %4920 = vrot.lane.b32.xlu0 %v3571_v57, %s5627_s15  ;;  %4730 = vrot.lane.b32.xlu1 %v3700_v32, %s5620_s26  ;;  %v7055_v57 = vpop.permute.xlu0 %1548  ;;  %v3413_v20 = vrot.slane %v3406_v34, %v6365_v49  ;;  %v3421_v32 = vrot.slane %v5384_v41, %v6365_v49  ;;  %v2554_v16 = vcombine.low %v7003_v52, %v2537_v8 }
 0x2f0   : > { %v2555_v25 = vcombine.high %v7003_v52, %v2537_v8  ;;  %v1960_v48 = vcombine.low %v6989_v3, %v1943_v6  ;;  %v1961_v61 = vcombine.high %v6989_v3, %v1943_v6  ;;  %v1863_v30 = vcombine.high %v6999_v44, %v5618_v0 }
 0x2f1   : > { %v3635_v53 = vcombine.high %v6927_v46, %v5618_v0  ;;  %v3397_v28 = vrot.slane %v3390_v37, %v6365_v49  ;;  %v3405_v36 = vrot.slane %v5383_v54, %v6365_v49  ;;  %v2538_v23 = vcombine.low %v6997_v27, %v2530_v47 }
 0x2f2   : > { %v2539_v52 = vcombine.high %v6997_v27, %v2530_v47  ;;  %v1944_v3 = vcombine.low %v6951_v56, %v1936_v35  ;;  %v1945_v18 = vcombine.high %v6951_v56, %v1936_v35  ;;  %v4298_v46 = vcombine.high %v6901_v45, %v5618_v0 }
 0x2f3   : > { %4548 = vrot.lane.b32.xlu0 %v7032_v19, %s5622_s29  ;;  %4794 = vrot.lane.b32.xlu1 %v3701_v9, %s5624_s7  ;;  %v7084_v4 = vpop.permute.xlu0 %4768  ;;  %v3430_v5 = vcombine.low %v3413_v20, %v3421_v32  ;;  %v2562_v40 = vrot.slane %v2554_v16, %v6378_v63  ;;  %v2569_v27 = vrot.slane %v2555_v25, %v6378_v63 }
 0x2f4   : > { %v3634_v62 = vcombine.high %v7043_v59, %v5618_v0  ;;  %v1968_v38 = vrot.slane %v1960_v48, %v6378_v63  ;;  %v1975_v56 = vrot.slane %v1961_v61, %v6378_v63  ;;  %v1877_v22 = vrot.slane %v1863_v30, %v6365_v49 }
 0x2f5   : > { %v5398_v34 = vcombine.high %v6878_v14, %v5618_v0  ;;  %v3422_v45 = vcombine.low %v3397_v28, %v3405_v36  ;;  %v2546_v41 = vrot.slane %v2538_v23, %v6378_v63  ;;  %v2553_v9 = vrot.slane %v2539_v52, %v6378_v63 }
 0x2f6   : > { %v3618_v6 = vcombine.low %v7046_v10, %v7051_v17  ;;  %v1952_v8 = vrot.slane %v1944_v3, %v6378_v63  ;;  %v1959_v37 = vrot.slane %v1945_v18, %v6378_v63  ;;  %v7115_v47 = vrot.slane %v3430_v5, %v6378_v63 }
 0x2f7   : > { %4632 = vrot.lane.b32.xlu0 %v3504_v29, %s5631_s10  ;;  %4826 = vrot.lane.b32.xlu1 %v7058_v60, %s5626_s27  ;;  %v7087_v29 = vrot.slane %v4328_v58, %v6378_v63  ;;  %v7109_v54 = vpop.permute.xlu0 %4544  ;;  %v3356_v35 = vcombine.low %v2562_v40, %v2569_v27  ;;  %v5382_v58 = vcombine.high %v2562_v40, %v2569_v27 }
 0x2f8   : > { %v3619_v20 = vcombine.high %v7046_v10, %v7051_v17  ;;  %v2906_v32 = vcombine.low %v1968_v38, %v1975_v56  ;;  %v1870_v16 = vrot.slane %v6999_v44, %v6365_v49  ;;  %v1894_v25 = vcombine.low %v6992_v31, %v1877_v22 }
 0x2f9   : > { %v4360_v14 = vcombine.high %v7087_v29, %v5618_v0  ;;  %v4327_v48 = vrot.slane %v5398_v34, %v6365_v49  ;;  %v1895_v61 = vcombine.high %v6992_v31, %v1877_v22  ;;  %v3340_v30 = vcombine.low %v2546_v41, %v2553_v9 }
 0x2fa   : > { %v5381_v28 = vcombine.high %v2546_v41, %v2553_v9  ;;  %v3429_v36 = vrot.slane %v3422_v45, %v6378_v63  ;;  %v2890_v23 = vcombine.low %v1952_v8, %v1959_v37  ;;  %v5364_v10 = vcombine.high %v1968_v38, %v1975_v56 }
 0x2fb   : > { %4696 = vrot.lane.b32.xlu0 %v3505_v26, %s5627_s15  ;;  %4890 = vrot.lane.b32.xlu1 %v7061_v39, %s5630_s9  ;;  %v4312_v26 = vrot.slane %v4298_v46, %v6365_v49  ;;  %v7127_v17 = vpop.permute.xlu0 %4736  ;;  %v4361_v44 = vcombine.high %v6932_v33, %v5618_v0  ;;  %v3363_v3 = vrot.slane %v3356_v35, %v6365_v49 }
 0x2fc   : > { %v3371_v18 = vrot.slane %v5382_v58, %v6365_v49  ;;  %v7134_v31 = vcombine.low %v3429_v36, %v7115_v47  ;;  %v3439_v46 = vcombine.high %v3429_v36, %v7115_v47  ;;  %v5363_v5 = vcombine.high %v1952_v8, %v1959_v37 }
 0x2fd   : > { %v4344_v52 = vcombine.low %v4312_v26, %v4327_v48  ;;  %v2913_v40 = vrot.slane %v2906_v32, %v6365_v49  ;;  %v1878_v27 = vcombine.low %v6961_v7, %v1870_v16  ;;  %v1902_v33 = vrot.slane %v1894_v25, %v6378_v63 }
 0x2fe   : > { %v1909_v38 = vrot.slane %v1895_v61, %v6378_v63  ;;  %v3347_v56 = vrot.slane %v3340_v30, %v6365_v49  ;;  %v3355_v22 = vrot.slane %v5381_v28, %v6365_v49  ;;  %v2921_v34 = vrot.slane %v5364_v10, %v6365_v49 }
 0x2ff   : > { %4740 = vrot.lane.b32.xlu0 %v4360_v14, %s5620_s26  ;;  %4506 = vrot.lane.b32.xlu1 %v3634_v62, %s5620_s26  ;;  %v1879_v62 = vcombine.high %v6961_v7, %v1870_v16  ;;  %v7147_v45 = vpop.permute.xlu0 %4800  ;;  %v7150_v41 = vrot.slane %v4344_v52, %v6378_v63  ;;  %v4345_v7 = vcombine.high %v4312_v26, %v4327_v48 }
 0x300   : > { %v4262_v9 = vcombine.low %v6972_v12, %v6975_v43  ;;  %v3380_v8 = vcombine.low %v3363_v3, %v3371_v18  ;;  %v7155_v37 = vrot.slane %v3618_v6, %v6378_v63  ;;  %v7159_v14 = vrot.slane %v7134_v31, %v6365_v49 }
 0x301   : > { %v2897_v35 = vrot.slane %v2890_v23, %v6365_v49  ;;  %v2905_v58 = vrot.slane %v5363_v5, %v6365_v49  ;;  %v1886_v26 = vrot.slane %v1878_v27, %v6378_v63  ;;  %v1893_v32 = vrot.slane %v1879_v62, %v6378_v63 }
 0x302   : > { %v2856_v12 = vcombine.low %v1902_v33, %v1909_v38  ;;  %v5362_v43 = vcombine.high %v1902_v33, %v1909_v38  ;;  %v3372_v6 = vcombine.low %v3347_v56, %v3355_v22  ;;  %v2930_v16 = vcombine.low %v2913_v40, %v2921_v34 }
 0x303   : > { %4804 = vrot.lane.b32.xlu0 %v4361_v44, %s5624_s7  ;;  %4570 = vrot.lane.b32.xlu1 %v3635_v53, %s5624_s7  ;;  %v7162_v53 = vrot.slane %v3439_v46, %v6365_v49  ;;  %v7172_v25 = vpop.permute.xlu0 %4832  ;;  %v7175_v48 = vrot.slane %v4345_v7, %v6378_v63  ;;  %v7178_v61 = vrot.slane %v4262_v9, %v6378_v63 }
 0x304   : > { %v4232_v30 = vcombine.high %v6940_v50, %v5618_v0  ;;  %v7183_v28 = vrot.slane %v3380_v8, %v6378_v63  ;;  %v7186_v36 = vrot.slane %v3619_v20, %v6378_v63  ;;  %v2922_v10 = vcombine.low %v2897_v35, %v2905_v58 }
 0x305   : > { %7815 = vst [vmem:[#allocation6_spill] sm:$0xff] %v7178_v61  ;;  %v4461_v23 = vcombine.high %v7159_v14, %v7162_v53  ;;  %v2840_v44 = vcombine.low %v1886_v26, %v1893_v32  ;;  %v5361_v52 = vcombine.high %v1886_v26, %v1893_v32  ;;  %v5397_v3 = vcombine.high %v6921_v15, %v5618_v0 }
 0x306   : > { %v2863_v50 = vrot.slane %v2856_v12, %v6365_v49  ;;  %v2871_v18 = vrot.slane %v5362_v43, %v6365_v49  ;;  %v3379_v20 = vrot.slane %v3372_v6, %v6378_v63  ;;  %v7200_v46 = vrot.slane %v2930_v16, %v6378_v63  ;;  %v1551_v16 = vpop.permute.xlu1 %1550 }
 0x307   : > { %4836 = vrot.lane.b32.xlu0 %v7150_v41, %s5626_s27  ;;  %4602 = vrot.lane.b32.xlu1 %v7155_v37, %s5626_s27  ;;  %v7202_v5 = vpop.permute.xlu0 %4896  ;;  %v4294_v40 = vcombine.high %v7178_v61, %v5618_v0  ;;  %v4246_v27 = vrot.slane %v4232_v30, %v6365_v49  ;;  %v7208_v15 = vrot.slane %v4461_v23, %v6378_v63 }
 0x308   : > { %v7211_v62 = vcombine.low %v3379_v20, %v7183_v28  ;;  %v3389_v33 = vcombine.high %v3379_v20, %v7183_v28  ;;  %v2847_v38 = vrot.slane %v2840_v44, %v6365_v49  ;;  %v2855_v56 = vrot.slane %v5361_v52, %v6365_v49 }
 0x309   : > { %v4261_v22 = vrot.slane %v5397_v3, %v6365_v49  ;;  %v2929_v34 = vrot.slane %v2922_v10, %v6378_v63  ;;  %v2880_v7 = vcombine.low %v2863_v50, %v2871_v18  ;;  %v4295_v8 = vcombine.high %v7032_v19, %v5618_v0 }
 0x30a   : > { %v3702_v32 = vcombine.high %v7058_v60, %v5618_v0  ;;  %v7233_v12 = vrot.slane %v7211_v62, %v6365_v49  ;;  %v7236_v43 = vrot.slane %v3389_v33, %v6365_v49  ;;  %v2872_v6 = vcombine.low %v2847_v38, %v2855_v56 }
 0x30b   : > { %4900 = vrot.lane.b32.xlu0 %v7175_v48, %s5630_s9  ;;  %4666 = vrot.lane.b32.xlu1 %v7186_v36, %s5630_s9  ;;  %v7221_v9 = vpop.permute.xlu0 %4512  ;;  %v4278_v35 = vcombine.low %v4246_v27, %v4261_v22  ;;  %v7226_v58 = vcombine.low %v2929_v34, %v7200_v46  ;;  %v2939_v26 = vcombine.high %v2929_v34, %v7200_v46 }
 0x30c   : > { %v7240_v19 = vrot.slane %v2880_v7, %v6378_v63  ;;  %v4279_v23 = vcombine.high %v4246_v27, %v4261_v22  ;;  %v3703_v52 = vcombine.high %v7061_v39, %v5618_v0  ;;  %v4395_v3 = vcombine.high %v7233_v12, %v7236_v43 }
 0x30d   : > { %v7246_v60 = vrot.slane %v4278_v35, %v6378_v63  ;;  %v7250_v10 = vrot.slane %v7226_v58, %v6365_v49  ;;  %v7253_v44 = vrot.slane %v2939_v26, %v6365_v49  ;;  %v2061_v50 = vcombine.high %v1551_v16, %v5618_v0 }
 0x30e   : > { %v2879_v18 = vrot.slane %v2872_v6, %v6378_v63  ;;  %v2046_v20 = vcombine.high %v6415_v1, %v5618_v0  ;;  %v7269_v27 = vrot.slane %v4279_v23, %v6378_v63  ;;  %v7278_v56 = vrot.slane %v4395_v3, %v6378_v63 }
 0x30f   : > { %4516 = vrot.lane.b32.xlu0 %v4294_v40, %s5620_s26  ;;  %4774 = vrot.lane.b32.xlu1 %v7208_v15, %s5622_s29  ;;  %v3801_v39 = vcombine.high %v7250_v10, %v7253_v44  ;;  %v2075_v22 = vrot.slane %v2061_v50, %v6365_v49  ;;  %v3636_v6 = vcombine.high %v7155_v37, %v5618_v0 }
 0x310   : > { %v7274_v33 = vcombine.low %v2879_v18, %v7240_v19  ;;  %v2889_v38 = vcombine.high %v2879_v18, %v7240_v19  ;;  %v2060_v34 = vrot.slane %v2046_v20, %v6365_v49  ;;  %v4460_v23 = vcombine.low %v7159_v14, %v7162_v53 }
 0x311   : > { %v2053_v50 = vrot.slane %v6415_v1, %v6365_v49  ;;  %v1980_v18 = vcombine.high %v6417_v2, %v5618_v0  ;;  %v4362_v14 = vcombine.high %v7150_v41, %v5618_v0  ;;  %v3637_v20 = vcombine.high %v7186_v36, %v5618_v0 }
 0x312   : > { %v7293_v35 = vrot.slane %v7274_v33, %v6365_v49  ;;  %v7296_v26 = vrot.slane %v2889_v38, %v6365_v49  ;;  %v2093_v3 = vcombine.high %v2060_v34, %v2075_v22 }
 0x313   : > { %4580 = vrot.lane.b32.xlu0 %v4295_v8, %s5624_s7  ;;  %4858 = vrot.lane.b32.xlu1 %v3702_v32, %s5631_s10  ;;  %v7289_v8 = vrot.slane %v3801_v39, %v6378_v63  ;;  %v2068_v32 = vrot.slane %v1551_v16, %v6365_v49  ;;  %v1995_v16 = vcombine.high %v7055_v57, %v5618_v0 }
 0x314   : > { %v3735_v1 = vcombine.high %v7293_v35, %v7296_v26  ;;  %v2107_v59 = vrot.slane %v2093_v3, %v6378_v63  ;;  %v1994_v36 = vrot.slane %v1980_v18, %v6365_v49  ;;  %v3800_v3 = vcombine.low %v7250_v10, %v7253_v44 }
 0x315   : > { %v7243_v30 = vpop.permute.xlu0 %4576  ;;  %v2076_v39 = vcombine.low %v2053_v50, %v2068_v32  ;;  %v2077_v38 = vcombine.high %v2053_v50, %v2068_v32  ;;  %v2009_v32 = vrot.slane %v1995_v16, %v6365_v49 }
 0x317   : > { %4612 = vrot.lane.b32.xlu0 %v7246_v60, %s5626_s27  ;;  %4922 = vrot.lane.b32.xlu1 %v3703_v52, %s5627_s15  ;;  %v2092_v52 = vcombine.low %v2060_v34, %v2075_v22  ;;  %v7323_v22 = vrot.slane %v4460_v23, %v6378_v63  ;;  %v4430_v34 = vcombine.high %v7134_v31, %v5618_v0 }
 0x318   : > { %v5400_v31 = vcombine.high %v7115_v47, %v5618_v0  ;;  %v7342_v23 = vrot.slane %v3735_v1, %v6378_v63  ;;  %v2084_v50 = vrot.slane %v2076_v39, %v6378_v63  ;;  %v2091_v18 = vrot.slane %v2077_v38, %v6378_v63 }
 0x319   : > { %v7266_v40 = vpop.permute.xlu0 %4608  ;;  %7816 = vst [vmem:[#allocation7_spill] sm:$0xff] %v7323_v22  ;;  %v2100_v41 = vrot.slane %v2092_v52, %v6378_v63  ;;  %v4492_v16 = vcombine.high %v7323_v22, %v5618_v0  ;;  %v4444_v47 = vrot.slane %v4430_v34, %v6365_v49  ;;  %v2002_v1 = vrot.slane %v7055_v57, %v6365_v49 }
 0x31a   : > { %v2026_v55 = vcombine.low %v1994_v36, %v2009_v32  ;;  %v2027_v10 = vcombine.high %v1994_v36, %v2009_v32  ;;  %v4459_v44 = vrot.slane %v5400_v31, %v6365_v49  ;;  %v4296_v38 = vcombine.high %v7246_v60, %v5618_v0 }
 0x31b   : > { %4676 = vrot.lane.b32.xlu0 %v7269_v27, %s5630_s9  ;;  %4550 = vrot.lane.b32.xlu1 %v7278_v56, %s5622_s29  ;;  %v7366_v57 = vrot.slane %v3800_v3, %v6378_v63  ;;  %v3770_v34 = vcombine.high %v7226_v58, %v5618_v0  ;;  %v2990_v36 = vcombine.low %v2084_v50, %v2091_v18 }
 0x31c   : > { %v5367_v32 = vcombine.high %v2084_v50, %v2091_v18  ;;  %v4493_v31 = vcombine.high %v7208_v15, %v5618_v0  ;;  %v2041_v58 = vrot.slane %v2027_v10, %v6378_v63  ;;  %v5011_v15 = vsel %vm4944_vm11, %v6463_v51, %v7127_v17 }
 0x31d   : > { %v7286_v7 = vpop.permute.xlu0 %4672  ;;  %v4949_v50 = vsel %vm4944_vm11, %v6531_v11, %v7221_v9  ;;  %v7399_v51 = vrot.slane %v3770_v34, %v6365_v49  ;;  %v2997_v11 = vrot.slane %v2990_v36, %v6365_v49 }
 0x31e   : > { %v3005_v17 = vrot.slane %v5367_v32, %v6365_v49 }
 0x31f   : > { %4764 = vrot.lane.b32.xlu0 %v7289_v8, %s5622_s29  ;;  %4634 = vrot.lane.b32.xlu1 %v3636_v6, %s5631_s10  ;;  %v7316_v53 = vpop.permute.xlu1 %4770  ;;  %v7329_v6 = vrot.slane %v6417_v2, %v6365_v49 }
 0x321   : > { %v7312_v37 = vpop.permute.xlu0 %4760  ;;  %v2010_v3 = vcombine.low %v7329_v6, %v2002_v1  ;;  %v2011_v61 = vcombine.high %v7329_v6, %v2002_v1  ;;  %v4297_v6 = vcombine.high %v7269_v27, %v5618_v0  ;;  %v4477_v1 = vcombine.high %v4444_v47, %v4459_v44 }
 0x323   : > { %4868 = vrot.lane.b32.xlu0 %v4362_v14, %s5631_s10  ;;  %4698 = vrot.lane.b32.xlu1 %v3637_v20, %s5627_s15  ;;  %v7344_v52 = vpop.permute.xlu1 %4546  ;;  %v3006_v14 = vcombine.low %v2100_v41, %v2107_v59  ;;  %v5368_v20 = vcombine.high %v2100_v41, %v2107_v59  ;;  %v5390_v41 = vcombine.high %v7200_v46, %v5618_v0 }
 0x324   : > { %v2034_v46 = vrot.slane %v2026_v55, %v6378_v63  ;;  %v3832_v55 = vcombine.high %v7366_v57, %v5618_v0  ;;  %v2018_v27 = vrot.slane %v2010_v3, %v6378_v63  ;;  %v2025_v10 = vrot.slane %v2011_v61, %v6378_v63 }
 0x325   : > { %v7339_v2 = vpop.permute.xlu0 %4864  ;;  %v3013_v60 = vrot.slane %v3006_v14, %v6365_v49  ;;  %v3021_v22 = vrot.slane %v5368_v20, %v6365_v49  ;;  %v4394_v20 = vcombine.low %v7233_v12, %v7236_v43  ;;  %v4958_v12 = vsel %vm4953_vm12, %v4949_v50, %v7109_v54 }
 0x326   : > { %v2956_v34 = vcombine.low %v2034_v46, %v2041_v58  ;;  %v5366_v61 = vcombine.high %v2034_v46, %v2041_v58  ;;  %v3799_v3 = vrot.slane %v5390_v41, %v6365_v49  ;;  %v5365_v46 = vcombine.high %v2018_v27, %v2025_v10 }
 0x327   : > { %4540 = vrot.lane.b32.xlu0 %v7342_v23, %s5622_s29  ;;  %4742 = vrot.lane.b32.xlu1 %v4492_v16, %s5620_s26  ;;  %v7363_v59 = vpop.permute.xlu1 %4738  ;;  %v4476_v16 = vcombine.low %v4444_v47, %v4459_v44  ;;  %v3030_v43 = vcombine.low %v3013_v60, %v3021_v22  ;;  %v4967_v47 = vsel %vm4962_vm13, %v4958_v12, %v7243_v30 }
 0x328   : > { %v4976_v54 = vsel %vm4971_vm14, %v4967_v47, %v7266_v40  ;;  %v7426_v32 = vrot.slane %v4394_v20, %v6378_v63  ;;  %v2940_v60 = vcombine.low %v2018_v27, %v2025_v10  ;;  %v3833_v40 = vcombine.high %v7289_v8, %v5618_v0 }
 0x329   : > { %v7359_v39 = vpop.permute.xlu0 %4928  ;;  %v7404_v9 = vrot.slane %v4476_v16, %v6378_v63  ;;  %v3022_v16 = vcombine.low %v2997_v11, %v3005_v17  ;;  %v2963_v58 = vrot.slane %v2956_v34, %v6365_v49  ;;  %v3817_v34 = vcombine.high %v7399_v51, %v3799_v3 }
 0x32a   : > { %v2947_v17 = vrot.slane %v2940_v60, %v6365_v49  ;;  %v4427_v47 = vcombine.high %v7278_v56, %v5618_v0 }
 0x32b   : > { %4644 = vrot.lane.b32.xlu0 %v4296_v38, %s5631_s10  ;;  %4806 = vrot.lane.b32.xlu1 %v4493_v31, %s5624_s7  ;;  %v7392_v14 = vpop.permute.xlu1 %4802  ;;  %v5019_v38 = vsel %vm4953_vm12, %v5011_v15, %v7084_v4  ;;  %v7432_v31 = vrot.slane %v4477_v1, %v6378_v63  ;;  %v2971_v15 = vrot.slane %v5366_v61, %v6365_v49 }
 0x32c   : > { %v5027_v36 = vsel %vm4962_vm13, %v5019_v38, %v7147_v45  ;;  %v3029_v27 = vrot.slane %v3022_v16, %v6378_v63 }
 0x32d   : > { %v7388_v18 = vpop.permute.xlu0 %4536  ;;  %v5035_v4 = vsel %vm4971_vm14, %v5027_v36, %v7172_v25  ;;  %v4364_v25 = vcombine.high %v7211_v62, %v5618_v0  ;;  %v5399_v62 = vcombine.high %v7183_v28, %v5618_v0  ;;  %v2980_v10 = vcombine.low %v2963_v58, %v2971_v15 }
 0x32e   : > { %v5043_v45 = vsel %vm4980_vm15, %v5035_v4, %v7339_v2  ;;  %v7442_v2 = vrot.slane %v3030_v43, %v6378_v63  ;;  %v3734_v36 = vcombine.low %v7293_v35, %v7296_v26  ;;  %v3831_v35 = vrot.slane %v3817_v34, %v6378_v63 }
 0x32f   : > { %4708 = vrot.lane.b32.xlu0 %v4297_v6, %s5627_s15  ;;  %4838 = vrot.lane.b32.xlu1 %v7404_v9, %s5626_s27  ;;  %v7423_v22 = vpop.permute.xlu1 %4834  ;;  %v5051_v50 = vsel %vm4989_vm0, %v5043_v45, %v7202_v5  ;;  %v4426_v5 = vcombine.high %v7426_v32, %v5618_v0  ;;  %v4393_v1 = vrot.slane %v5399_v62, %v6365_v49 }
 0x330   : > { %v5059_v20 = vsel %vm4998_vm1, %v5051_v50, %v7359_v39  ;;  %v2955_v39 = vrot.slane %v5365_v46, %v6365_v49  ;;  %v7486_v4 = vcombine.low %v3029_v27, %v7442_v2  ;;  %v7492_v45 = vrot.slane %v2980_v10, %v6378_v63 }
 0x331   : > { %v4641_v44 = vpop.permute.xlu0 %4640  ;;  %v7500_v56 = vrot.slane %v3734_v36, %v6378_v63  ;;  %v4494_v34 = vcombine.high %v7404_v9, %v5618_v0 }
 0x332   : > { %v4985_v30 = vsel %vm4980_vm15, %v4976_v54, %v4641_v44  ;;  %v3039_v54 = vcombine.high %v3029_v27, %v7442_v2  ;;  %v2972_v44 = vcombine.low %v2947_v17, %v2955_v39  ;;  %v3909_v60 = vrot.slane %v7486_v4, %v6365_v49 }
 0x333   : > { %4732 = vrot.lane.b32.xlu0 %v3832_v55, %s5620_s26  ;;  %4902 = vrot.lane.b32.xlu1 %v7432_v31, %s5630_s9  ;;  %v4994_v8 = vsel %vm4989_vm0, %v4985_v30, %v7286_v7  ;;  %v7454_v6 = vpop.permute.xlu1 %4898  ;;  %v3816_v55 = vcombine.low %v7399_v51, %v3799_v3  ;;  %v4378_v7 = vrot.slane %v4364_v25, %v6365_v49 }
 0x334   : > { %v3704_v30 = vcombine.high %v7274_v33, %v5618_v0  ;;  %v5389_v3 = vcombine.high %v7240_v19, %v5618_v0  ;;  %v2979_v46 = vrot.slane %v2972_v44, %v6378_v63  ;;  %v3766_v33 = vcombine.high %v7500_v56, %v5618_v0 }
 0x335   : > { %v4705_v41 = vpop.permute.xlu0 %4704  ;;  %v3824_v12 = vrot.slane %v3816_v55, %v6378_v63  ;;  %v4410_v61 = vcombine.low %v4378_v7, %v4393_v1  ;;  %v4411_v16 = vcombine.high %v4378_v7, %v4393_v1 }
 0x336   : > { %v5003_v28 = vsel %vm4998_vm1, %v4994_v8, %v4705_v41  ;;  %v3718_v62 = vrot.slane %v3704_v30, %v6365_v49  ;;  %v7520_v41 = vcombine.low %v2979_v46, %v7492_v45  ;;  %v2989_v19 = vcombine.high %v2979_v46, %v7492_v45 }
 0x337   : > { %v5111_v11 = vcombine.low %v5003_v28, %v5059_v20  ;;  %4796 = vrot.lane.b32.xlu0 %v3833_v40, %s5624_s7  ;;  %4518 = vrot.lane.b32.xlu1 %v4426_v5, %s5620_s26  ;;  %v7478_v43 = vpop.permute.xlu1 %4514  ;;  %v4418_v25 = vrot.slane %v4410_v61, %v6378_v63  ;;  %v3924_v40 = vrot.slane %v3039_v54, %v6365_v49 }
 0x338   : > { %v4425_v50 = vrot.slane %v4411_v16, %v6378_v63  ;;  %v3733_v55 = vrot.slane %v5389_v3, %v6365_v49  ;;  %v3767_v28 = vcombine.high %v7342_v23, %v5618_v0  ;;  %v7533_v17 = vrot.slane %v7520_v41, %v6365_v49 }
 0x339   : > { %5405 = vst.sshfl [vmem:[%s7462_s12 + $0x10] sm:$0x33 pattern:$0x76325410] %v5111_v11  ;;  %v7475_v38 = vpop.permute.xlu0 %4728  ;;  %v3933_v8 = vcombine.high %v3909_v60, %v3924_v40  ;;  %v7536_v39 = vrot.slane %v2989_v19, %v6365_v49  ;;  %v3834_v30 = vcombine.high %v3824_v12, %v5618_v0  ;;  %v4428_v3 = vcombine.high %v4418_v25, %v5618_v0 }
 0x33a   : > { %v3750_v5 = vcombine.low %v3718_v62, %v3733_v55  ;;  %v3751_v23 = vcombine.high %v3718_v62, %v3733_v55  ;;  %v3932_v46 = vcombine.low %v3909_v60, %v3924_v40  ;;  %v4950_v62 = vsel %vm4944_vm11, %v6756_v24, %v7478_v43 }
 0x33b   : > { %4828 = vrot.lane.b32.xlu0 %v3824_v12, %s5626_s27  ;;  %4582 = vrot.lane.b32.xlu1 %v4427_v47, %s5624_s7  ;;  %v7497_v26 = vpop.permute.xlu1 %4578  ;;  %v3947_v11 = vrot.slane %v3933_v8, %v6378_v63  ;;  %v3867_v36 = vcombine.high %v7533_v17, %v7536_v39  ;;  %v3835_v12 = vcombine.high %v3831_v35, %v5618_v0 }
 0x33c   : > { %v3758_v27 = vrot.slane %v3750_v5, %v6378_v63  ;;  %v3765_v61 = vrot.slane %v3751_v23, %v6378_v63  ;;  %v7579_v60 = vrot.slane %v3932_v46, %v6378_v63  ;;  %v3902_v40 = vcombine.high %v7486_v4, %v5618_v0 }
 0x33d   : > { %v7494_v51 = vpop.permute.xlu0 %4792  ;;  %v7555_v44 = vrot.slane %v3867_v36, %v6378_v63  ;;  %v4959_v24 = vsel %vm4953_vm12, %v4950_v62, %v7344_v52  ;;  %v3965_v36 = vcombine.high %v3947_v11, %v5618_v0  ;;  %v5007_v62 = vsel %vm4944_vm11, %v6744_v21, %v7475_v38 }
 0x33e   : > { %v5015_v21 = vsel %vm4953_vm12, %v5007_v62, %v7312_v37 }
 0x33f   : > { %4892 = vrot.lane.b32.xlu0 %v3831_v35, %s5630_s9  ;;  %4614 = vrot.lane.b32.xlu1 %v4418_v25, %s5626_s27  ;;  %v4611_v15 = vpop.permute.xlu1 %4610  ;;  %v4429_v25 = vcombine.high %v4425_v50, %v5618_v0  ;;  %v4968_v35 = vsel %vm4962_vm13, %v4959_v24, %v7497_v26 }
 0x340   : > { %v4977_v52 = vsel %vm4971_vm14, %v4968_v35, %v4611_v15  ;;  %v3769_v15 = vcombine.high %v3765_v61, %v5618_v0 }
 0x341   : > { %v7513_v58 = vpop.permute.xlu0 %4824 }
 0x343   : > { %4508 = vrot.lane.b32.xlu0 %v3766_v33, %s5620_s26  ;;  %4678 = vrot.lane.b32.xlu1 %v4425_v50, %s5630_s9  ;;  %v5012_v33 = vsel %vm4944_vm11, %v6659_v42, %v7363_v59  ;;  %v5392_v59 = vcombine.high %v7442_v2, %v5618_v0  ;;  %v3768_v50 = vcombine.high %v3758_v27, %v5618_v0 }
 0x344   : > { %v4675_v7 = vpop.permute.xlu1 %4674  ;;  %v5020_v42 = vsel %vm4953_vm12, %v5012_v33, %v7316_v53  ;;  %v3916_v2 = vrot.slane %v3902_v40, %v6365_v49 }
 0x345   : > { %v7526_v20 = vpop.permute.xlu0 %4888  ;;  %v5028_v43 = vsel %vm4962_vm13, %v5020_v42, %v7392_v14  ;;  %v3931_v5 = vrot.slane %v5392_v59, %v6365_v49 }
 0x346   : > { %v5036_v53 = vsel %vm4971_vm14, %v5028_v43, %v7423_v22 }
 0x347   : > { %4572 = vrot.lane.b32.xlu0 %v3767_v28, %s5624_s7  ;;  %4766 = vrot.lane.b32.xlu1 %v3947_v11, %s5622_s29  ;;  %v3964_v28 = vcombine.high %v7579_v60, %v5618_v0  ;;  %v3949_v11 = vcombine.high %v3916_v2, %v3931_v5 }
 0x349   : > { %v7540_v1 = vpop.permute.xlu0 %4504  ;;  %v7543_v10 = vpop.permute.xlu1 %4762  ;;  %v3963_v40 = vrot.slane %v3949_v11, %v6378_v63 }
 0x34b   : > { %4604 = vrot.lane.b32.xlu0 %v3758_v27, %s5626_s27  ;;  %4870 = vrot.lane.b32.xlu1 %v4494_v34, %s5631_s10 }
 0x34d   : > { %v7551_v47 = vpop.permute.xlu0 %4568  ;;  %v4867_v54 = vpop.permute.xlu1 %4866 }
 0x34e   : > { %v5044_v14 = vsel %vm4980_vm15, %v5036_v53, %v4867_v54  ;;  %v3948_v54 = vcombine.low %v3916_v2, %v3931_v5 }
 0x34f   : > { %4668 = vrot.lane.b32.xlu0 %v3765_v61, %s5630_s9  ;;  %4542 = vrot.lane.b32.xlu1 %v7555_v44, %s5622_s29  ;;  %v5052_v27 = vsel %vm4989_vm0, %v5044_v14, %v7454_v6  ;;  %v4363_v61 = vcombine.high %v7175_v48, %v5618_v0 }
 0x351   : > { %v7560_v9 = vpop.permute.xlu0 %4600  ;;  %v4931_v16 = vpop.permute.xlu1 %4930 }
 0x353   : > { %4860 = vrot.lane.b32.xlu0 %v3834_v30, %s5631_s10  ;;  %4646 = vrot.lane.b32.xlu1 %v4428_v3, %s5631_s10  ;;  %v5060_v30 = vsel %vm4998_vm1, %v5052_v27, %v4931_v16  ;;  %v3866_v16 = vcombine.low %v7533_v17, %v7536_v39  ;;  %v3836_v17 = vcombine.high %v7520_v41, %v5618_v0 }
 0x355   : > { %v7572_v8 = vpop.permute.xlu0 %4664  ;;  %v7575_v19 = vpop.permute.xlu1 %4538  ;;  %v7638_v42 = vrot.slane %v3866_v16, %v6378_v63  ;;  %v3850_v43 = vrot.slane %v3836_v17, %v6365_v49 }
 0x357   : > { %4924 = vrot.lane.b32.xlu0 %v3835_v12, %s5627_s15  ;;  %4710 = vrot.lane.b32.xlu1 %v4429_v25, %s5627_s15  ;;  %v4945_v12 = vsel %vm4944_vm11, %v6839_v13, %v7540_v1  ;;  %v5023_v13 = vsel %vm4962_vm13, %v5015_v21, %v7494_v51  ;;  %v5391_v1 = vcombine.high %v7492_v45, %v5618_v0 }
 0x358   : > { %v4954_v38 = vsel %vm4953_vm12, %v4945_v12, %v7388_v18  ;;  %v5031_v41 = vsel %vm4971_vm14, %v5023_v13, %v7513_v58 }
 0x359   : > { %v7595_v4 = vpop.permute.xlu0 %4772  ;;  %v4643_v55 = vpop.permute.xlu1 %4642  ;;  %v4963_v39 = vsel %vm4962_vm13, %v4954_v38, %v7551_v47  ;;  %v3898_v47 = vcombine.high %v7638_v42, %v5618_v0  ;;  %v3865_v45 = vrot.slane %v5391_v1, %v6365_v49  ;;  %v4495_v38 = vcombine.high %v7432_v31, %v5618_v0 }
 0x35a   : > { %v4986_v26 = vsel %vm4980_vm15, %v4977_v52, %v4643_v55  ;;  %v4972_v37 = vsel %vm4971_vm14, %v4963_v39, %v7560_v9  ;;  %v3899_v55 = vcombine.high %v7555_v44, %v5618_v0  ;;  %v7819_v39 = vld [vmem:[#allocation5_spill] sm:$0xff] }
 0x35b   : > { %4636 = vrot.lane.b32.xlu0 %v3768_v50, %s5631_s10  ;;  %4734 = vrot.lane.b32.xlu1 %v3964_v28, %s5620_s26  ;;  %v4995_v23 = vsel %vm4989_vm0, %v4986_v26, %v4675_v7  ;;  %v3956_v7 = vrot.slane %v3948_v54, %v6378_v63  ;;  %v3882_v28 = vcombine.low %v3850_v43, %v3865_v45 }
 0x35c   : > { %v3883_v26 = vcombine.high %v3850_v43, %v3865_v45 }
 0x35d   : > { %v4857_v22 = vpop.permute.xlu0 %4856  ;;  %v4707_v34 = vpop.permute.xlu1 %4706 }
 0x35e   : > { %v5004_v3 = vsel %vm4998_vm1, %v4995_v23, %v4707_v34  ;;  %v5039_v18 = vsel %vm4980_vm15, %v5031_v41, %v4857_v22  ;;  %v3897_v27 = vrot.slane %v3883_v26, %v6378_v63 }
 0x35f   : > { %4700 = vrot.lane.b32.xlu0 %v3769_v15, %s5627_s15  ;;  %v5119_v46 = vcombine.low %v5004_v3, %v5060_v30  ;;  %4798 = vrot.lane.b32.xlu1 %v3965_v36, %s5624_s7  ;;  %v5047_v58 = vsel %vm4989_vm0, %v5039_v18, %v7526_v20  ;;  %v3966_v36 = vcombine.high %v3956_v7, %v5618_v0 }
 0x360   : > { %v3967_v30 = vcombine.high %v3963_v40, %v5618_v0  ;;  %v3901_v12 = vcombine.high %v3897_v27, %v5618_v0 }
 0x361   : > { %v4921_v33 = vpop.permute.xlu0 %4920  ;;  %5406 = vst.sshfl [vmem:[%s7462_s12 + $0x14] sm:$0x33 pattern:$0x76325410] %v5119_v46  ;;  %v7621_v6 = vpop.permute.xlu1 %4730  ;;  %v7817_v46 = vld [vmem:[#allocation6_spill] sm:$0xff] }
 0x362   : > { %v5055_v50 = vsel %vm4998_vm1, %v5047_v58, %v4921_v33 }
 0x363   : > { %4932 = vrot.lane.b32.xlu0 %v4363_v61, %s5627_s15  ;;  %4830 = vrot.lane.b32.xlu1 %v3956_v7, %s5626_s27 }
 0x365   : > { %v4549_v48 = vpop.permute.xlu0 %4548  ;;  %v7634_v25 = vpop.permute.xlu1 %4794 }
 0x367   : > { %4894 = vrot.lane.b32.xlu1 %v3963_v40, %s5630_s9 }
 0x369   : > { %v4633_v24 = vpop.permute.xlu0 %4632  ;;  %v7659_v51 = vpop.permute.xlu1 %4826 }
 0x36a   : > { %v4981_v59 = vsel %vm4980_vm15, %v4972_v37, %v4633_v24 }
 0x36b   : > { %4510 = vrot.lane.b32.xlu1 %v3898_v47, %s5620_s26  ;;  %v4990_v9 = vsel %vm4989_vm0, %v4981_v59, %v7572_v8  ;;  %v3890_v8 = vrot.slane %v3882_v28, %v6378_v63 }
 0x36d   : > { %v4697_v35 = vpop.permute.xlu0 %4696  ;;  %v4891_v52 = vpop.permute.xlu1 %4890  ;;  %v3900_v61 = vcombine.high %v3890_v8, %v5618_v0 }
 0x36e   : > { %v4999_v53 = vsel %vm4998_vm1, %v4990_v9, %v4697_v35 }
 0x36f   : > { %v5079_v2 = vcombine.low %v4999_v53, %v5055_v50  ;;  %4574 = vrot.lane.b32.xlu1 %v3899_v55, %s5624_s7 }
 0x371   : > { %5401 = vst.sshfl [vmem:[%s7462_s12] sm:$0x33 pattern:$0x76325410] %v5079_v2  ;;  %v4741_v49 = vpop.permute.xlu0 %4740  ;;  %v4507_v14 = vpop.permute.xlu1 %4506 }
 0x372   : > { %v5013_v20 = vsel %vm4944_vm11, %v7087_v29, %v4741_v49  ;;  %v4946_v1 = vsel %vm4944_vm11, %v7819_v39, %v4507_v14  ;;  %v7820_v49 = vld [vmem:[#allocation7_spill] sm:$0xff] }
 0x373   : > { %v5021_v5 = vsel %vm4953_vm12, %v5013_v20, %v7595_v4  ;;  %4606 = vrot.lane.b32.xlu1 %v3890_v8, %s5626_s27  ;;  %v4955_v18 = vsel %vm4953_vm12, %v4946_v1, %v7575_v19 }
 0x375   : > { %v4805_v22 = vpop.permute.xlu0 %4804  ;;  %v4571_v15 = vpop.permute.xlu1 %4570 }
 0x376   : > { %v5029_v44 = vsel %vm4962_vm13, %v5021_v5, %v4805_v22  ;;  %v4964_v31 = vsel %vm4962_vm13, %v4955_v18, %v4571_v15 }
 0x377   : > { %4670 = vrot.lane.b32.xlu1 %v3897_v27, %s5630_s9 }
 0x379   : > { %v4837_v23 = vpop.permute.xlu0 %4836  ;;  %v4603_v34 = vpop.permute.xlu1 %4602 }
 0x37a   : > { %v5037_v29 = vsel %vm4971_vm14, %v5029_v44, %v4837_v23  ;;  %v4973_v47 = vsel %vm4971_vm14, %v4964_v31, %v4603_v34 }
 0x37b   : > { %4862 = vrot.lane.b32.xlu1 %v3966_v36, %s5631_s10 }
 0x37d   : > { %v4901_v54 = vpop.permute.xlu0 %4900  ;;  %v4667_v4 = vpop.permute.xlu1 %4666 }
 0x37f   : > { %4926 = vrot.lane.b32.xlu1 %v3967_v30, %s5627_s15 }
 0x381   : > { %v4517_v3 = vpop.permute.xlu0 %4516  ;;  %v4775_v33 = vpop.permute.xlu1 %4774 }
 0x382   : > { %v4951_v63 = vsel %vm4944_vm11, %v7817_v46, %v4517_v3 }
 0x383   : > { %v4960_v11 = vsel %vm4953_vm12, %v4951_v63, %v4549_v48  ;;  %4638 = vrot.lane.b32.xlu1 %v3900_v61, %s5631_s10  ;;  %v7818_v48 = vld [vmem:[#allocation4_spill] sm:$0xff] }
 0x384   : > { %v5008_v13 = vsel %vm4944_vm11, %v7818_v48, %v7621_v6 }
 0x385   : > { %v4581_v7 = vpop.permute.xlu0 %4580  ;;  %v4859_v62 = vpop.permute.xlu1 %4858  ;;  %v5016_v24 = vsel %vm4953_vm12, %v5008_v13, %v7543_v10 }
 0x386   : > { %v4969_v16 = vsel %vm4962_vm13, %v4960_v11, %v4581_v7  ;;  %v5024_v0 = vsel %vm4962_vm13, %v5016_v24, %v7634_v25 }
 0x387   : > { %4702 = vrot.lane.b32.xlu1 %v3901_v12, %s5627_s15  ;;  %v5032_v6 = vsel %vm4971_vm14, %v5024_v0, %v7659_v51 }
 0x388   : > { %v5040_v45 = vsel %vm4980_vm15, %v5032_v6, %v4859_v62 }
 0x389   : > { %v4613_v40 = vpop.permute.xlu0 %4612  ;;  %v4923_v21 = vpop.permute.xlu1 %4922  ;;  %v5048_v19 = vsel %vm4989_vm0, %v5040_v45, %v4891_v52 }
 0x38a   : > { %v4978_v17 = vsel %vm4971_vm14, %v4969_v16, %v4613_v40  ;;  %v5056_v50 = vsel %vm4998_vm1, %v5048_v19, %v4923_v21 }
 0x38b   : > { %4934 = vrot.lane.b32.xlu1 %v4495_v38, %s5627_s15 }
 0x38d   : > { %v4677_v41 = vpop.permute.xlu0 %4676  ;;  %v4551_v37 = vpop.permute.xlu1 %4550 }
 0x391   : > { %v4765_v59 = vpop.permute.xlu0 %4764  ;;  %v4635_v43 = vpop.permute.xlu1 %4634 }
 0x392   : > { %v4982_v10 = vsel %vm4980_vm15, %v4973_v47, %v4635_v43 }
 0x393   : > { %v4991_v25 = vsel %vm4989_vm0, %v4982_v10, %v4667_v4 }
 0x395   : > { %v4869_v58 = vpop.permute.xlu0 %4868  ;;  %v4699_v35 = vpop.permute.xlu1 %4698 }
 0x396   : > { %v5045_v9 = vsel %vm4980_vm15, %v5037_v29, %v4869_v58  ;;  %v5000_v53 = vsel %vm4998_vm1, %v4991_v25, %v4699_v35 }
 0x397   : > { %v7725_v51 = vsel %vm4989_vm0, %v5045_v9, %v4901_v54  ;;  %v5087_v55 = vcombine.low %v5000_v53, %v5056_v50 }
 0x399   : > { %v4541_v28 = vpop.permute.xlu0 %4540  ;;  %5402 = vst.sshfl [vmem:[%s7462_s12 + $0x4] sm:$0x33 pattern:$0x76325410] %v5087_v55  ;;  %v4743_v2 = vpop.permute.xlu1 %4742 }
 0x39a   : > { %v5014_v20 = vsel %vm4944_vm11, %v7820_v49, %v4743_v2 }
 0x39b   : > { %v5022_v52 = vsel %vm4953_vm12, %v5014_v20, %v4775_v33 }
 0x39d   : > { %v4645_v14 = vpop.permute.xlu0 %4644  ;;  %v4807_v26 = vpop.permute.xlu1 %4806 }
 0x39e   : > { %v4987_v8 = vsel %vm4980_vm15, %v4978_v17, %v4645_v14  ;;  %v5030_v5 = vsel %vm4962_vm13, %v5022_v52, %v4807_v26 }
 0x39f   : > { %v4996_v22 = vsel %vm4989_vm0, %v4987_v8, %v4677_v41 }
 0x3a1   : > { %v4709_v44 = vpop.permute.xlu0 %4708  ;;  %v4839_v15 = vpop.permute.xlu1 %4838 }
 0x3a2   : > { %v5038_v27 = vsel %vm4971_vm14, %v5030_v5, %v4839_v15 }
 0x3a5   : > { %v4733_v23 = vpop.permute.xlu0 %4732  ;;  %v4903_v29 = vpop.permute.xlu1 %4902 }
 0x3a6   : > { %v5009_v1 = vsel %vm4944_vm11, %v7366_v57, %v4733_v23 }
 0x3a7   : > { %v5017_v0 = vsel %vm4953_vm12, %v5009_v1, %v4765_v59 }
 0x3a9   : > { %v4797_v34 = vpop.permute.xlu0 %4796  ;;  %v4519_v36 = vpop.permute.xlu1 %4518 }
 0x3aa   : > { %v4952_v54 = vsel %vm4944_vm11, %v7426_v32, %v4519_v36  ;;  %v5025_v6 = vsel %vm4962_vm13, %v5017_v0, %v4797_v34 }
 0x3ab   : > { %v4961_v4 = vsel %vm4953_vm12, %v4952_v54, %v4551_v37 }
 0x3ad   : > { %v4829_v30 = vpop.permute.xlu0 %4828  ;;  %v4583_v3 = vpop.permute.xlu1 %4582 }
 0x3ae   : > { %v4970_v46 = vsel %vm4962_vm13, %v4961_v4, %v4583_v3  ;;  %v5033_v43 = vsel %vm4971_vm14, %v5025_v6, %v4829_v30 }
 0x3b1   : > { %v4893_v63 = vpop.permute.xlu0 %4892  ;;  %v4615_v33 = vpop.permute.xlu1 %4614 }
 0x3b2   : > { %v4979_v61 = vsel %vm4971_vm14, %v4970_v46, %v4615_v33 }
 0x3b5   : > { %v4509_v11 = vpop.permute.xlu0 %4508  ;;  %v4679_v7 = vpop.permute.xlu1 %4678 }
 0x3b6   : > { %v4947_v41 = vsel %vm4944_vm11, %v7500_v56, %v4509_v11 }
 0x3b7   : > { %v4956_v31 = vsel %vm4953_vm12, %v4947_v41, %v4541_v28  ;;  %v5005_v28 = vsel %vm4998_vm1, %v4996_v22, %v4709_v44 }
 0x3b9   : > { %v4573_v16 = vpop.permute.xlu0 %4572  ;;  %v4767_v62 = vpop.permute.xlu1 %4766 }
 0x3ba   : > { %v4965_v47 = vsel %vm4962_vm13, %v4956_v31, %v4573_v16 }
 0x3bd   : > { %v4605_v12 = vpop.permute.xlu0 %4604  ;;  %v4871_v40 = vpop.permute.xlu1 %4870 }
 0x3be   : > { %v5046_v17 = vsel %vm4980_vm15, %v5038_v27, %v4871_v40  ;;  %v4974_v57 = vsel %vm4971_vm14, %v4965_v47, %v4605_v12 }
 0x3bf   : > { %v7742_v32 = vsel %vm4989_vm0, %v5046_v17, %v4903_v29 }
 0x3c1   : > { %v4669_v21 = vpop.permute.xlu0 %4668  ;;  %v4543_v38 = vpop.permute.xlu1 %4542 }
 0x3c5   : > { %v4861_v48 = vpop.permute.xlu0 %4860  ;;  %v4647_v13 = vpop.permute.xlu1 %4646 }
 0x3c6   : > { %v4988_v39 = vsel %vm4980_vm15, %v4979_v61, %v4647_v13  ;;  %v5041_v56 = vsel %vm4980_vm15, %v5033_v43, %v4861_v48 }
 0x3c7   : > { %v4997_v37 = vsel %vm4989_vm0, %v4988_v39, %v4679_v7  ;;  %v5049_v59 = vsel %vm4989_vm0, %v5041_v56, %v4893_v63 }
 0x3c9   : > { %v4925_v24 = vpop.permute.xlu0 %4924  ;;  %v4711_v18 = vpop.permute.xlu1 %4710 }
 0x3ca   : > { %v5057_v25 = vsel %vm4998_vm1, %v5049_v59, %v4925_v24  ;;  %v5006_v7 = vsel %vm4998_vm1, %v4997_v37, %v4711_v18 }
 0x3cd   : > { %v4637_v45 = vpop.permute.xlu0 %4636  ;;  %v4735_v58 = vpop.permute.xlu1 %4734 }
 0x3ce   : > { %v4983_v10 = vsel %vm4980_vm15, %v4974_v57, %v4637_v45  ;;  %v5010_v27 = vsel %vm4944_vm11, %v7579_v60, %v4735_v58 }
 0x3cf   : > { %v4992_v19 = vsel %vm4989_vm0, %v4983_v10, %v4669_v21  ;;  %v5018_v22 = vsel %vm4953_vm12, %v5010_v27, %v4767_v62 }
 0x3d1   : > { %v4701_v9 = vpop.permute.xlu0 %4700  ;;  %v4799_v50 = vpop.permute.xlu1 %4798 }
 0x3d2   : > { %v5001_v35 = vsel %vm4998_vm1, %v4992_v19, %v4701_v9  ;;  %v5026_v44 = vsel %vm4962_vm13, %v5018_v22, %v4799_v50 }
 0x3d3   : > { %v5095_v53 = vcombine.low %v5001_v35, %v5057_v25 }
 0x3d5   : > { %5403 = vst.sshfl [vmem:[%s7462_s12 + $0x8] sm:$0x33 pattern:$0x76325410] %v5095_v53  ;;  %v4933_v55 = vpop.permute.xlu0 %4932  ;;  %v4831_v49 = vpop.permute.xlu1 %4830 }
 0x3d6   : > { %v5061_v2 = vsel %vm4998_vm1, %v7725_v51, %v4933_v55  ;;  %v5034_v36 = vsel %vm4971_vm14, %v5026_v44, %v4831_v49 }
 0x3d7   : > { %v5127_v20 = vcombine.low %v5005_v28, %v5061_v2 }
 0x3d9   : > { %5407 = vst.sshfl [vmem:[%s7462_s12 + $0x18] sm:$0x33 pattern:$0x76325410] %v5127_v20  ;;  %v4895_v52 = vpop.permute.xlu1 %4894 }
 0x3dd   : > { %v4511_v14 = vpop.permute.xlu1 %4510 }
 0x3de   : > { %v4948_v23 = vsel %vm4944_vm11, %v7638_v42, %v4511_v14 }
 0x3df   : > { %v4957_v51 = vsel %vm4953_vm12, %v4948_v23, %v4543_v38 }
 0x3e1   : > { %v4575_v8 = vpop.permute.xlu1 %4574 }
 0x3e2   : > { %v4966_v34 = vsel %vm4962_vm13, %v4957_v51, %v4575_v8 }
 0x3e5   : > { %v4607_v26 = vpop.permute.xlu1 %4606 }
 0x3e6   : > { %v4975_v54 = vsel %vm4971_vm14, %v4966_v34, %v4607_v26 }
 0x3e9   : > { %v4671_v5 = vpop.permute.xlu1 %4670 }
 0x3ed   : > { %v4863_v15 = vpop.permute.xlu1 %4862 }
 0x3ee   : > { %v5042_v60 = vsel %vm4980_vm15, %v5034_v36, %v4863_v15 }
 0x3ef   : > { %v5050_v30 = vsel %vm4989_vm0, %v5042_v60, %v4895_v52 }
 0x3f1   : > { %v4927_v29 = vpop.permute.xlu1 %4926 }
 0x3f2   : > { %v5058_v63 = vsel %vm4998_vm1, %v5050_v30, %v4927_v29 }
 0x3f5   : > { %v4639_v4 = vpop.permute.xlu1 %4638 }
 0x3f6   : > { %v4984_v42 = vsel %vm4980_vm15, %v4975_v54, %v4639_v4 }
 0x3f7   : > { %v4993_v3 = vsel %vm4989_vm0, %v4984_v42, %v4671_v5 }
 0x3f9   : > { %v4703_v46 = vpop.permute.xlu1 %4702 }
 0x3fa   : > { %v5002_v33 = vsel %vm4998_vm1, %v4993_v3, %v4703_v46 }
 0x3fb   : > { %v5103_v61 = vcombine.low %v5002_v33, %v5058_v63 }
 0x3fd   : > { %5404 = vst.sshfl [vmem:[%s7462_s12 + $0xc] sm:$0x33 pattern:$0x76325410] %v5103_v61  ;;  %v4935_v11 = vpop.permute.xlu1 %4934 }
 0x3fe   : > { %v5062_v16 = vsel %vm4998_vm1, %v7742_v32, %v4935_v11 }
 0x3ff   : > { %v5135_v62 = vcombine.low %v5006_v7, %v5062_v16 }
 0x401   : > { %5408 = vst.sshfl [vmem:[%s7462_s12 + $0x1c] sm:$0x33 pattern:$0x76325410] %v5135_v62 }
 0x402 PF: > { %s15_s22 = sadd.s32 1, %s5616_s22   ;;  %s7821_s18 = smov %s5608_s20 }
 0x403   : > { %p12_p12 = scmp.ge.s32.totalorder %s15_s22, 6   ;;  %s7822_s19 = smov %s5612_s21 }
 0x404   : > { %s7823_s20 = smov %s7826_s23  ;;  %s7824_s21 = smov %s7830_s24 }
 0x405   :  { %14 = sbr.rel (!%p12_p12) target bundleno = 3 (0x3), region = 79 }

// kernel: upsample_block_forward.3
= control target key start
LH: loop header
LB: loop body
LE: loop exit
PB: predicated region body
PF: predicated region fallthrough
CT: control target
= control target key end

     0   :  { %s10398_s18 = smov 0   ;;  %s10400_s19 = smov 0   ;;  %s15447_s0 = inlined_call_operand.vmem [shape: f32[2,32,32,8], index: 0, kind: input, shape index: {}, may-alias: {0,1,2}]   ;;  %s15448_s1 = inlined_call_operand.vmem [shape: f32[2,32,32,8], index: 1, kind: input, shape index: {}, may-alias: {0,1,2}]   ;;  %s15449_s2 = inlined_call_operand.vmem [shape: f32[2,32,32,8], index: 2, kind: input, shape index: {}, may-alias: {0,1,2}]   ;;  %s15450_s3 = inlined_call_operand.vmem [shape: f32[72,32], index: 3, kind: input, shape index: {}]   ;;  %s15451_s4 = inlined_call_operand.vmem [shape: f32[1,32], index: 4, kind: input, shape index: {}]   ;;  %s15452_s5 = inlined_call_operand.vmem [shape: f32[2,32,2,512], index: 5, kind: output, shape index: {}]  }
   0x1   :  { %s10402_s20 = smov 0   ;;  %s10404_s21 = smov 0  }
   0x2   :  { %s10406_s22 = smov 0  }
   0x3 LB: > { %s24_s23 = sadd.s32 1, %s10344_s20  ;;  %s27_s24 = sadd.s32 1, %s10348_s21  ;;  %s10352_s22 = sphi %s10406_s22, %s15_s22   ;;  %s10348_s21 = sphi %s10404_s21, %s15968_s21   ;;  %s10344_s20 = sphi %s10402_s20, %s15967_s20   ;;  %s10340_s19 = sphi %s10400_s19, %s15966_s19   ;;  %s10336_s18 = sphi %s10398_s18, %s15965_s18  }
   0x4   : > { %p25_p0 = scmp.ge.s32.totalorder %s24_s23, 4  ;;  %p9938_p1 = scmp.ge.s32.totalorder %s10352_s22, 1 }
   0x5   : > { %p273_p2 = scmp.lt.s32.totalorder %s10352_s22, 9 }
   0x6   : > { %s15970_s23 = smov (%p25_p0, %s24_s23), 0  ;;  %s15972_s24 = smov (!%p25_p0, %s27_s24), %s10348_s21 }
   0x7   : > { %p274_p3 = pnand %p9938_p1, %p273_p2  ;;  %p29_p4 = scmp.ge.s32.totalorder %s15972_s24, 2 }
   0x9   : > { %s15974_s24 = smov (%p29_p4, %s15972_s24), 0  ;;  %277 = sbr.rel (%p274_p3) target bundleno = 1584 (0x630), region = 40 }
  0x10   : > { %s10433_s25 = sshll.u32 %s10336_s18, 3  ;;  %p341_p5 = scmp.lt.s32.totalorder %s10340_s19, 1  ;;  %vm393_vm0 = vcmask 57344   ;;  %v15453_v0 = vmov 0.0   ;;  %vm438_vm1 = vcmask 64512   ;;  %vm737_vm2 = vcmask 130112  }
  0x11   : > { %p357_p6 = scmp.lt.s32.totalorder %s10433_s25, 31  ;;  %404 = vst.msk [vmem:[#allocation2 + $0x21] sm:$0x1] %vm393_vm0, %v15453_v0  ;;  %394 = vst.msk [vmem:[#allocation2] sm:$0x1] %vm393_vm0, %v15453_v0  ;;  %s9940_s28 = sadd.s32 4294967295, %s10433_s25 }
  0x12   : > { %395 = vst.msk [vmem:[#allocation2 + $0x28] sm:$0x1] %vm393_vm0, %v15453_v0  ;;  %396 = vst.msk [vmem:[#allocation2 + $0x50] sm:$0x1] %vm393_vm0, %v15453_v0  ;;  %s15976_s19 = smov (!%p341_p5, %s10340_s19), 1  ;;  %p339_p7 = scmp.gt.s32.totalorder %s9940_s28, 0 }
  0x13   : > { %397 = vst.msk [vmem:[#allocation2 + $0x78] sm:$0x1] %vm393_vm0, %v15453_v0  ;;  %398 = vst.msk [vmem:[#allocation2 + $0xa0] sm:$0x1] %vm393_vm0, %v15453_v0  ;;  %s358_s26 = scalar_select %p357_p6, %s10433_s25, 31  ;;  %vm930_vm3 = vcmask 195712  }
  0x14   : > { %399 = vst.msk [vmem:[#allocation2 + $0xc8] sm:$0x1] %vm393_vm0, %v15453_v0  ;;  %400 = vst.msk [vmem:[#allocation2 + $0xf0] sm:$0x1] %vm393_vm0, %v15453_v0  ;;  %s10483_s27 = sshll.u32 %s15976_s19, 7  ;;  %p9941_p8 = scmp.lt.s32.totalorder %s9940_s28, 31 }
  0x15   : > { %401 = vst.msk [vmem:[#allocation2 + $0x118] sm:$0x1] %vm393_vm0, %v15453_v0  ;;  %402 = vst.msk [vmem:[#allocation2 + $0x140] sm:$0x1] %vm393_vm0, %v15453_v0  ;;  %s9950_s29 = sshll.u32 %s358_s26, 2  ;;  %p414_p9 = scmp.eq.s32.totalorder %s10336_s18, 0 }
  0x16   : > { %403 = vst.msk [vmem:[#allocation2 + $0x168] sm:$0x1] %vm393_vm0, %v15453_v0  ;;  %405 = vst.msk [vmem:[#allocation2 + $0x49] sm:$0x1] %vm393_vm0, %v15453_v0  ;;  %s10487_s30 = sadd.s32 %s9950_s29, %s10483_s27  ;;  %s10355_s19 = smov 8   ;;  %vm1123_vm4 = vcmask 261312  }
  0x17   : > { %406 = vst.msk [vmem:[#allocation2 + $0x71] sm:$0x1] %vm393_vm0, %v15453_v0  ;;  %407 = vst.msk [vmem:[#allocation2 + $0x99] sm:$0x1] %vm393_vm0, %v15453_v0  ;;  %s9952_s6 = sshll.u32 %s10487_s30, 3  ;;  %s10356_s26 = smov 16  }
  0x18   : > { %408 = vst.msk [vmem:[#allocation2 + $0xc1] sm:$0x1] %vm393_vm0, %v15453_v0  ;;  %409 = vst.msk [vmem:[#allocation2 + $0xe9] sm:$0x1] %vm393_vm0, %v15453_v0  ;;  %s10494_s9 = scalar_lea.vmem %s15448_s1, %s9952_s6  ;;  %s10358_s29 = smov 32   ;;  %vm1316_vm5 = vcmask 326912  }
  0x19   : > { %410 = vst.msk [vmem:[#allocation2 + $0x111] sm:$0x1] %vm393_vm0, %v15453_v0  ;;  %411 = vst.msk [vmem:[#allocation2 + $0x139] sm:$0x1] %vm393_vm0, %v15453_v0  ;;  %v448_v1 = vld [vmem:[%s10494_s9] sm:$0xff]  ;;  %v449_v2 = vld [vmem:[%s10494_s9 + $0x8] sm:$0xff] }
  0x1a   : > { %412 = vst.msk [vmem:[#allocation2 + $0x161] sm:$0x1] %vm393_vm0, %v15453_v0  ;;  %413 = vst.msk [vmem:[#allocation2 + $0x189] sm:$0x1] %vm393_vm0, %v15453_v0  ;;  %v450_v3 = vld [vmem:[%s10494_s9 + $0x10] sm:$0xff]  ;;  %s340_s10 = scalar_select %p339_p7, %s9940_s28, 0 }
  0x1b   : > { %481 = vst.msk [vmem:[#allocation2 + $0x29] sm:$0xff] %vm438_vm1, %v448_v1  ;;  %482 = vst.msk [vmem:[#allocation2 + $0x31] sm:$0xff] %vm438_vm1, %v449_v2  ;;  %v451_v4 = vld [vmem:[%s10494_s9 + $0x18] sm:$0xff]  ;;  %v452_v5 = vld [vmem:[%s10494_s9 + $0x20] sm:$0xff]  ;;  %s10291_s17 = scalar_select %p414_p9, 0, 255 }
  0x1c   : > { %483 = vst.msk [vmem:[#allocation2 + $0x39] sm:$0xff] %vm438_vm1, %v450_v3  ;;  %v453_v6 = vld [vmem:[%s10494_s9 + $0x28] sm:$0xff]  ;;  %484 = vst.msk [vmem:[#allocation2 + $0x41] sm:$0xff] %vm438_vm1, %v451_v4  ;;  %v454_v7 = vld [vmem:[%s10494_s9 + $0x30] sm:$0xff]  ;;  %s15978_s10 = smov (!%p9941_p8, %s340_s10), 31  ;;  %s10357_s28 = smov 24  }
  0x1d   : > { %485 = vst.msk [vmem:[#allocation2 + $0x51] sm:$0xff] %vm438_vm1, %v452_v5  ;;  %486 = vst.msk [vmem:[#allocation2 + $0x59] sm:$0xff] %vm438_vm1, %v453_v6  ;;  %v455_v8 = vld [vmem:[%s10494_s9 + $0x38] sm:$0xff]  ;;  %v456_v9 = vld [vmem:[%s10494_s9 + $0x40] sm:$0xff]  ;;  %s9946_s11 = sshll.u32 %s15978_s10, 2  ;;  %s10102_s6 = sadd.s32 8, %s10433_s25 }
  0x1e   : > { %487 = vst.msk [vmem:[#allocation2 + $0x61] sm:$0xff] %vm438_vm1, %v454_v7  ;;  %488 = vst.msk [vmem:[#allocation2 + $0x69] sm:$0xff] %vm438_vm1, %v455_v8  ;;  %v457_v10 = vld [vmem:[%s10494_s9 + $0x48] sm:$0xff]  ;;  %v458_v11 = vld [vmem:[%s10494_s9 + $0x50] sm:$0xff]  ;;  %s347_s12 = sadd.s32 %s10483_s27, %s9946_s11  ;;  %p11090_p10 = scmp.lt.s32.totalorder %s10102_s6, 31  ;;  %vm1509_vm6 = vcmask 392512  }
  0x1f   : > { %489 = vst.msk [vmem:[#allocation2 + $0x79] sm:$0xff] %vm438_vm1, %v456_v9  ;;  %v459_v12 = vld [vmem:[%s10494_s9 + $0x58] sm:$0xff]  ;;  %490 = vst.msk [vmem:[#allocation2 + $0x81] sm:$0xff] %vm438_vm1, %v457_v10  ;;  %v460_v13 = vld [vmem:[%s10494_s9 + $0x60] sm:$0xff]  ;;  %s9948_s13 = sshll.u32 %s347_s12, 3  ;;  %p426_p11 = scmp.eq.s32.totalorder %s10336_s18, 3 }
  0x20   : > { %491 = vst.msk [vmem:[#allocation2 + $0x89] sm:$0xff] %vm438_vm1, %v458_v11  ;;  %492 = vst.msk [vmem:[#allocation2 + $0x91] sm:$0xff] %vm438_vm1, %v459_v12  ;;  %v461_v14 = vld [vmem:[%s10494_s9 + $0x68] sm:$0xff]  ;;  %v462_v15 = vld [vmem:[%s10494_s9 + $0x70] sm:$0xff]  ;;  %s349_s16 = scalar_lea.vmem %s15447_s0, %s9948_s13  ;;  %s15980_s6 = smov (!%p11090_p10, %s10102_s6), 31  ;;  %vm1703_vm7 = vcmask 458112  }
  0x21   : > { %493 = vst.msk [vmem:[#allocation2 + $0xa1] sm:$0xff] %vm438_vm1, %v460_v13  ;;  %494 = vst.msk [vmem:[#allocation2 + $0xa9] sm:$0xff] %vm438_vm1, %v461_v14  ;;  %v463_v16 = vld [vmem:[%s10494_s9 + $0x78] sm:$0xff]  ;;  %v464_v17 = vld [vmem:[%s10494_s9 + $0x80] sm:$0xff]  ;;  %s15982_s6 = smov (!%p11090_p10, %s15980_s6), 31  ;;  %s10359_s18 = smov 40  }
  0x22   : > { %495 = vst.msk [vmem:[#allocation2 + $0xb1] sm:$0xff] %vm438_vm1, %v462_v15  ;;  %v465_v18 = vld [vmem:[%s10494_s9 + $0x88] sm:$0xff]  ;;  %496 = vst.msk [vmem:[#allocation2 + $0xb9] sm:$0xff] %vm438_vm1, %v463_v16  ;;  %v466_v19 = vld [vmem:[%s10494_s9 + $0x90] sm:$0xff]  ;;  %s9957_s25 = sshll.u32 %s15982_s6, 2  ;;  %s10361_s14 = smov 56  }
  0x23   : > { %497 = vst.msk [vmem:[#allocation2 + $0xc9] sm:$0xff] %vm438_vm1, %v464_v17  ;;  %498 = vst.msk [vmem:[#allocation2 + $0xd1] sm:$0xff] %vm438_vm1, %v465_v18  ;;  %v467_v20 = vld [vmem:[%s10494_s9 + $0x98] sm:$0xff]  ;;  %v468_v21 = vld [vmem:[%s10494_s9 + $0xa0] sm:$0xff]  ;;  %s375_s8 = sadd.s32 %s9957_s25, %s10483_s27  ;;  %s10360_s27 = smov 48   ;;  %vm1896_vm8 = vcmask 523712  }
  0x24   : > { %499 = vst.msk [vmem:[#allocation2 + $0xd9] sm:$0xff] %vm438_vm1, %v466_v19  ;;  %500 = vst.msk [vmem:[#allocation2 + $0xe1] sm:$0xff] %vm438_vm1, %v467_v20  ;;  %v469_v22 = vld [vmem:[%s10494_s9 + $0xa8] sm:$0xff]  ;;  %v470_v23 = vld [vmem:[%s10494_s9 + $0xb0] sm:$0xff]  ;;  %s10303_s13 = scalar_select %p426_p11, 0, 255 }
  0x25   : > { %501 = vst.msk [vmem:[#allocation2 + $0xf1] sm:$0xff] %vm438_vm1, %v468_v21  ;;  %v471_v24 = vld [vmem:[%s10494_s9 + $0xb8] sm:$0xff]  ;;  %v10546_v25 = vld [vmem:[#allocation2 + $0x29] sm:$0xff]  ;;  %502 = vst.msk [vmem:[#allocation2 + $0xf9] sm:$0xff] %vm438_vm1, %v469_v22  ;;  %vm2089_vm9 = vcmask 589312   ;;  %vm2170_vm10 = vcmask 588800  }
  0x26   : > { %v10548_v26 = vld [vmem:[#allocation2 + $0x31] sm:$0xff]  ;;  %503 = vst.msk [vmem:[#allocation2 + $0x101] sm:$0xff] %vm438_vm1, %v470_v23  ;;  %504 = vst.msk [vmem:[#allocation2 + $0x109] sm:$0xff] %vm438_vm1, %v471_v24  ;;  %649 = vrot.lane.b32.xlu0 %v10546_v25, %s10355_s19  ;;  %v10559_v27 = vld [vmem:[#allocation2 + $0x39] sm:$0xff]  ;;  %s10363_s6 = smov 112   ;;  %s10366_s7 = smov 80  }
  0x27   : > { %651 = vrot.lane.b32.xlu1 %v10548_v26, %s10355_s19  ;;  %v10561_v28 = vld [vmem:[#allocation2 + $0x41] sm:$0xff]  ;;  %v10295_v30 = vld [vmem:[%s349_s16 + $0x10] sm:%s10291_s17]  ;;  %v10572_v34 = vld [vmem:[#allocation2 + $0x59] sm:$0xff]  ;;  %s10367_s25 = smov 96   ;;  %vm9372_vm11 = vcmask 130048   ;;  %vm9381_vm12 = vcmask 261120  }
  0x28   : > { %v10292_v29 = vld [vmem:[%s349_s16] sm:%s10291_s17]  ;;  %441 = vst.msk [vmem:[#allocation2 + $0x11] sm:$0xff] %vm438_vm1, %v10295_v30  ;;  %v10298_v31 = vld [vmem:[%s349_s16 + $0x8] sm:%s10291_s17]  ;;  %v10570_v33 = vld [vmem:[#allocation2 + $0x51] sm:$0xff]  ;;  %vm9390_vm13 = vcmask 392192   ;;  %vm9399_vm14 = vcmask 523264  }
  0x29   : > { %439 = vst.msk [vmem:[#allocation2 + $0x1] sm:$0xff] %vm438_vm1, %v10292_v29  ;;  %440 = vst.msk [vmem:[#allocation2 + $0x9] sm:$0xff] %vm438_vm1, %v10298_v31  ;;  %v10301_v32 = vld [vmem:[%s349_s16 + $0x18] sm:%s10291_s17]  ;;  %v10579_v35 = vld [vmem:[#allocation2 + $0x61] sm:$0xff]  ;;  %vm9408_vm15 = vcmask 654336   ;;  %vm9417_vm0 = vcmask 785408  }
  0x2a   : > { %653 = vrot.lane.b32.xlu0 %v10559_v27, %s10355_s19  ;;  %442 = vst.msk [vmem:[#allocation2 + $0x19] sm:$0xff] %vm438_vm1, %v10301_v32  ;;  %v472_v36 = vld [vmem:[%s10494_s9 + $0xc0] sm:$0xff]  ;;  %v473_v37 = vld [vmem:[%s10494_s9 + $0xc8] sm:$0xff]  ;;  %v474_v39 = vld [vmem:[%s10494_s9 + $0xd0] sm:$0xff] }
  0x2b   : > { %655 = vrot.lane.b32.xlu1 %v10561_v28, %s10355_s19  ;;  %v10583_v38 = vld [vmem:[#allocation2 + $0x69] sm:$0xff]  ;;  %505 = vst.msk [vmem:[#allocation2 + $0x119] sm:$0xff] %vm438_vm1, %v472_v36  ;;  %506 = vst.msk [vmem:[#allocation2 + $0x121] sm:$0xff] %vm438_vm1, %v473_v37  ;;  %v475_v40 = vld [vmem:[%s10494_s9 + $0xd8] sm:$0xff] }
  0x2c   : > { %507 = vst.msk [vmem:[#allocation2 + $0x129] sm:$0xff] %vm438_vm1, %v474_v39  ;;  %508 = vst.msk [vmem:[#allocation2 + $0x131] sm:$0xff] %vm438_vm1, %v475_v40  ;;  %v10599_v45 = vld [vmem:[#allocation2 + $0x79] sm:$0xff]  ;;  %v10601_v46 = vld [vmem:[#allocation2 + $0x81] sm:$0xff] }
  0x2d   : > { %v10603_v47 = vld [vmem:[#allocation2 + $0x28] sm:$0xff]  ;;  %v10605_v48 = vld [vmem:[#allocation2 + $0x30] sm:$0xff]  ;;  %v10611_v49 = vld [vmem:[#allocation2 + $0x38] sm:$0xff] }
  0x2e   : > { %657 = vrot.lane.b32.xlu0 %v10570_v33, %s10355_s19  ;;  %549 = vst.msk [vmem:[#allocation3 + $0x20] sm:$0xff] %vm438_vm1, %v10603_v47  ;;  %550 = vst.msk [vmem:[#allocation3 + $0x28] sm:$0xff] %vm438_vm1, %v10605_v48  ;;  %v10613_v50 = vld [vmem:[#allocation2 + $0x40] sm:$0xff]  ;;  %v10619_v51 = vld [vmem:[#allocation2 + $0x50] sm:$0xff] }
  0x2f   : > { %659 = vrot.lane.b32.xlu1 %v10572_v34, %s10355_s19  ;;  %v579_v42 = vld [vmem:[#allocation2 + $0x11] sm:$0xff]  ;;  %551 = vst.msk [vmem:[#allocation3 + $0x30] sm:$0xff] %vm438_vm1, %v10611_v49  ;;  %552 = vst.msk [vmem:[#allocation3 + $0x38] sm:$0xff] %vm438_vm1, %v10613_v50  ;;  %v10625_v52 = vld [vmem:[#allocation2 + $0x89] sm:$0xff] }
  0x30   : > { %v577_v41 = vld [vmem:[#allocation2 + $0x1] sm:$0xff]  ;;  %v578_v43 = vld [vmem:[#allocation2 + $0x9] sm:$0xff]  ;;  %v10627_v53 = vld [vmem:[#allocation2 + $0x91] sm:$0xff]  ;;  %553 = vst.msk [vmem:[#allocation3 + $0x40] sm:$0xff] %vm438_vm1, %v10619_v51 }
  0x31   : > { %v580_v44 = vld [vmem:[#allocation2 + $0x19] sm:$0xff]  ;;  %v10637_v56 = vld [vmem:[#allocation2 + $0x68] sm:$0xff]  ;;  %v515_v58 = vld [vmem:[#allocation2 + $0x10] sm:$0xff] }
  0x32   : > { %661 = vrot.lane.b32.xlu0 %v10579_v35, %s10355_s19  ;;  %v10631_v54 = vld [vmem:[#allocation2 + $0x58] sm:$0xff]  ;;  %v10635_v55 = vld [vmem:[#allocation2 + $0x60] sm:$0xff]  ;;  %556 = vst.msk [vmem:[#allocation3 + $0x58] sm:$0xff] %vm438_vm1, %v10637_v56  ;;  %v514_v59 = vld [vmem:[#allocation2 + $0x8] sm:$0xff] }
  0x33   : > { %663 = vrot.lane.b32.xlu1 %v10583_v38, %s10355_s19  ;;  %554 = vst.msk [vmem:[#allocation3 + $0x48] sm:$0xff] %vm438_vm1, %v10631_v54  ;;  %v513_v57 = vld [vmem:[#allocation2] sm:$0xff]  ;;  %555 = vst.msk [vmem:[#allocation3 + $0x50] sm:$0xff] %vm438_vm1, %v10635_v55  ;;  %v516_v60 = vld [vmem:[#allocation2 + $0x18] sm:$0xff] }
  0x34   : > { %545 = vst.msk [vmem:[#allocation3] sm:$0xff] %vm438_vm1, %v513_v57  ;;  %v10644_v61 = vld [vmem:[#allocation2 + $0xa1] sm:$0xff]  ;;  %v10646_v62 = vld [vmem:[#allocation2 + $0xa9] sm:$0xff]  ;;  %547 = vst.msk [vmem:[#allocation3 + $0x10] sm:$0xff] %vm438_vm1, %v515_v58 }
  0x35   : > { %546 = vst.msk [vmem:[#allocation3 + $0x8] sm:$0xff] %vm438_vm1, %v514_v59  ;;  %548 = vst.msk [vmem:[#allocation3 + $0x18] sm:$0xff] %vm438_vm1, %v516_v60  ;;  %v10651_v63 = vld [vmem:[#allocation2 + $0x78] sm:$0xff]  ;;  %v10653_v1 = vld [vmem:[#allocation2 + $0x80] sm:$0xff] }
  0x36   : > { %641 = vrot.lane.b32.xlu0 %v577_v41, %s10355_s19  ;;  %v10655_v2 = vld [vmem:[#allocation2 + $0x88] sm:$0xff]  ;;  %557 = vst.msk [vmem:[#allocation3 + $0x60] sm:$0xff] %vm438_vm1, %v10651_v63  ;;  %558 = vst.msk [vmem:[#allocation3 + $0x68] sm:$0xff] %vm438_vm1, %v10653_v1  ;;  %v10667_v3 = vld [vmem:[#allocation2 + $0x90] sm:$0xff] }
  0x37   : > { %645 = vrot.lane.b32.xlu1 %v579_v42, %s10355_s19  ;;  %559 = vst.msk [vmem:[#allocation3 + $0x70] sm:$0xff] %vm438_vm1, %v10655_v2  ;;  %v10669_v4 = vld [vmem:[#allocation2 + $0xa0] sm:$0xff]  ;;  %v10671_v5 = vld [vmem:[#allocation2 + $0xa8] sm:$0xff]  ;;  %560 = vst.msk [vmem:[#allocation3 + $0x78] sm:$0xff] %vm438_vm1, %v10667_v3 }
  0x38   : > { %561 = vst.msk [vmem:[#allocation3 + $0x80] sm:$0xff] %vm438_vm1, %v10669_v4  ;;  %562 = vst.msk [vmem:[#allocation3 + $0x88] sm:$0xff] %vm438_vm1, %v10671_v5  ;;  %v10679_v6 = vld [vmem:[#allocation2 + $0xb0] sm:$0xff]  ;;  %v10681_v7 = vld [vmem:[#allocation2 + $0xb8] sm:$0xff] }
  0x39   : > { %v10683_v8 = vld [vmem:[#allocation2 + $0xc8] sm:$0xff]  ;;  %563 = vst.msk [vmem:[#allocation3 + $0x90] sm:$0xff] %vm438_vm1, %v10679_v6  ;;  %564 = vst.msk [vmem:[#allocation3 + $0x98] sm:$0xff] %vm438_vm1, %v10681_v7  ;;  %v10691_v9 = vld [vmem:[#allocation2 + $0xd0] sm:$0xff] }
  0x3a   : > { %643 = vrot.lane.b32.xlu0 %v578_v43, %s10355_s19  ;;  %565 = vst.msk [vmem:[#allocation3 + $0xa0] sm:$0xff] %vm438_vm1, %v10683_v8  ;;  %v10693_v10 = vld [vmem:[#allocation2 + $0xd8] sm:$0xff]  ;;  %v10695_v11 = vld [vmem:[#allocation2 + $0xe0] sm:$0xff]  ;;  %566 = vst.msk [vmem:[#allocation3 + $0xa8] sm:$0xff] %vm438_vm1, %v10691_v9 }
  0x3b   : > { %647 = vrot.lane.b32.xlu1 %v580_v44, %s10355_s19  ;;  %567 = vst.msk [vmem:[#allocation3 + $0xb0] sm:$0xff] %vm438_vm1, %v10693_v10  ;;  %568 = vst.msk [vmem:[#allocation3 + $0xb8] sm:$0xff] %vm438_vm1, %v10695_v11  ;;  %v10707_v12 = vld [vmem:[#allocation2 + $0xf0] sm:$0xff]  ;;  %v10711_v14 = vld [vmem:[#allocation2 + $0xb9] sm:$0xff] }
  0x3c   : > { %v10709_v13 = vld [vmem:[#allocation2 + $0xb1] sm:$0xff]  ;;  %569 = vst.msk [vmem:[#allocation3 + $0xc0] sm:$0xff] %vm438_vm1, %v10707_v12  ;;  %v10723_v16 = vld [vmem:[#allocation2 + $0x100] sm:$0xff]  ;;  %v10725_v17 = vld [vmem:[#allocation2 + $0xc9] sm:$0xff] }
  0x3d   : > { %v10715_v15 = vld [vmem:[#allocation2 + $0xf8] sm:$0xff]  ;;  %571 = vst.msk [vmem:[#allocation3 + $0xd0] sm:$0xff] %vm438_vm1, %v10723_v16  ;;  %v10731_v19 = vld [vmem:[#allocation2 + $0x108] sm:$0xff]  ;;  %v10747_v23 = vld [vmem:[#allocation2 + $0x120] sm:$0xff] }
  0x3e   : > { %665 = vrot.lane.b32.xlu0 %v10599_v45, %s10355_s19  ;;  %570 = vst.msk [vmem:[#allocation3 + $0xc8] sm:$0xff] %vm438_vm1, %v10715_v15  ;;  %v10727_v18 = vld [vmem:[#allocation2 + $0xd1] sm:$0xff]  ;;  %572 = vst.msk [vmem:[#allocation3 + $0xd8] sm:$0xff] %vm438_vm1, %v10731_v19  ;;  %v10741_v21 = vld [vmem:[#allocation2 + $0xd9] sm:$0xff] }
  0x3f   : > { %667 = vrot.lane.b32.xlu1 %v10601_v46, %s10355_s19  ;;  %v10739_v20 = vld [vmem:[#allocation2 + $0x118] sm:$0xff]  ;;  %v10743_v22 = vld [vmem:[#allocation2 + $0xe1] sm:$0xff]  ;;  %574 = vst.msk [vmem:[#allocation3 + $0xe8] sm:$0xff] %vm438_vm1, %v10747_v23  ;;  %v10763_v31 = vld [vmem:[#allocation2 + $0x130] sm:$0xff] }
  0x40   : > { %573 = vst.msk [vmem:[#allocation3 + $0xe0] sm:$0xff] %vm438_vm1, %v10739_v20  ;;  %v10755_v24 = vld [vmem:[#allocation2 + $0x128] sm:$0xff]  ;;  %v10757_v29 = vld [vmem:[#allocation2 + $0xf1] sm:$0xff]  ;;  %v10759_v30 = vld [vmem:[#allocation2 + $0xf9] sm:$0xff] }
  0x41   : > { %575 = vst.msk [vmem:[#allocation3 + $0xf0] sm:$0xff] %vm438_vm1, %v10755_v24  ;;  %576 = vst.msk [vmem:[#allocation3 + $0xf8] sm:$0xff] %vm438_vm1, %v10763_v31  ;;  %v476_v32 = vld [vmem:[%s10494_s9 + $0xe0] sm:$0xff]  ;;  %v477_v36 = vld [vmem:[%s10494_s9 + $0xe8] sm:$0xff] }
  0x42   : > { %669 = vrot.lane.b32.xlu0 %v10625_v52, %s10355_s19  ;;  %509 = vst.msk [vmem:[#allocation2 + $0x141] sm:$0xff] %vm438_vm1, %v476_v32  ;;  %v10774_v37 = vld [vmem:[#allocation2 + $0x101] sm:$0xff]  ;;  %v10776_v39 = vld [vmem:[#allocation2 + $0x109] sm:$0xff]  ;;  %510 = vst.msk [vmem:[#allocation2 + $0x149] sm:$0xff] %vm438_vm1, %v477_v36 }
  0x43   : > { %671 = vrot.lane.b32.xlu1 %v10627_v53, %s10355_s19  ;;  %v478_v40 = vld [vmem:[%s10494_s9 + $0xf0] sm:$0xff]  ;;  %v479_v41 = vld [vmem:[%s10494_s9 + $0xf8] sm:$0xff]  ;;  %v10788_v43 = vld [vmem:[#allocation2 + $0x121] sm:$0xff]  ;;  %s9959_s9 = sshll.u32 %s375_s8, 3 }
  0x44   : > { %511 = vst.msk [vmem:[#allocation2 + $0x151] sm:$0xff] %vm438_vm1, %v478_v40  ;;  %v10786_v42 = vld [vmem:[#allocation2 + $0x119] sm:$0xff]  ;;  %512 = vst.msk [vmem:[#allocation2 + $0x159] sm:$0xff] %vm438_vm1, %v479_v41  ;;  %v10795_v44 = vld [vmem:[#allocation2 + $0x129] sm:$0xff]  ;;  %s377_s12 = scalar_lea.vmem %s15449_s2, %s9959_s9 }
  0x45   : > { %v10797_v57 = vld [vmem:[#allocation2 + $0x131] sm:$0xff]  ;;  %v770_v58 = vld [vmem:[#allocation2 + $0x2] sm:$0xff]  ;;  %v773_v32 = vld [vmem:[#allocation2 + $0x1a] sm:$0xff] }
  0x46   : > { %673 = vrot.lane.b32.xlu0 %v10644_v61, %s10355_s19  ;;  %v771_v59 = vld [vmem:[#allocation2 + $0xa] sm:$0xff]  ;;  %v772_v60 = vld [vmem:[#allocation2 + $0x12] sm:$0xff]  ;;  %v10815_v41 = vld [vmem:[#allocation2 + $0x3a] sm:$0xff] }
  0x47   : > { %675 = vrot.lane.b32.xlu1 %v10646_v62, %s10355_s19  ;;  %v10807_v36 = vld [vmem:[#allocation2 + $0x2a] sm:$0xff]  ;;  %v10809_v40 = vld [vmem:[#allocation2 + $0x32] sm:$0xff]  ;;  %15554 = vst [vmem:[#allocation6_spill] sm:$0xff] %v10815_v41 }
  0x48   : > { %15552 = vst [vmem:[#allocation4_spill] sm:$0xff] %v10807_v36  ;;  %15553 = vst [vmem:[#allocation5_spill] sm:$0xff] %v10809_v40  ;;  %v10833_v0 = vld [vmem:[#allocation2 + $0x6a] sm:$0xff] }
  0x49   : > { %15559 = vst [vmem:[#allocation11_spill] sm:$0xff] %v10833_v0 }
  0x4a   : > { %677 = vrot.lane.b32.xlu0 %v10709_v13, %s10355_s19 }
  0x4b   : > { %679 = vrot.lane.b32.xlu1 %v10711_v14, %s10355_s19 }
  0x4e   : > { %681 = vrot.lane.b32.xlu0 %v10725_v17, %s10355_s19 }
  0x4f   : > { %683 = vrot.lane.b32.xlu1 %v10727_v18, %s10355_s19 }
  0x52   : > { %685 = vrot.lane.b32.xlu0 %v10741_v21, %s10355_s19 }
  0x53   : > { %687 = vrot.lane.b32.xlu1 %v10743_v22, %s10355_s19 }
  0x56   : > { %689 = vrot.lane.b32.xlu0 %v10757_v29, %s10355_s19 }
  0x57   : > { %691 = vrot.lane.b32.xlu1 %v10759_v30, %s10355_s19 }
  0x5a   : > { %693 = vrot.lane.b32.xlu0 %v10774_v37, %s10355_s19 }
  0x5b   : > { %695 = vrot.lane.b32.xlu1 %v10776_v39, %s10355_s19 }
  0x5e   : > { %697 = vrot.lane.b32.xlu0 %v10786_v42, %s10355_s19 }
  0x5f   : > { %699 = vrot.lane.b32.xlu1 %v10788_v43, %s10355_s19 }
  0x62   : > { %701 = vrot.lane.b32.xlu0 %v10795_v44, %s10355_s19 }
  0x63   : > { %703 = vrot.lane.b32.xlu1 %v10797_v57, %s10355_s19  ;;  %s10362_s19 = smov 64  }
  0x66   : > { %834 = vrot.lane.b32.xlu0 %v770_v58, %s10356_s26  ;;  %v10817_v58 = vld [vmem:[#allocation2 + $0x42] sm:$0xff] }
  0x67   : > { %836 = vrot.lane.b32.xlu1 %v771_v59, %s10356_s26  ;;  %15555 = vst [vmem:[#allocation7_spill] sm:$0xff] %v10817_v58  ;;  %v10823_v59 = vld [vmem:[#allocation2 + $0x52] sm:$0xff] }
  0x68   : > { %15556 = vst [vmem:[#allocation8_spill] sm:$0xff] %v10823_v59 }
  0x6a   : > { %838 = vrot.lane.b32.xlu0 %v772_v60, %s10356_s26  ;;  %v10825_v60 = vld [vmem:[#allocation2 + $0x5a] sm:$0xff] }
  0x6b   : > { %840 = vrot.lane.b32.xlu1 %v773_v32, %s10356_s26  ;;  %15557 = vst [vmem:[#allocation9_spill] sm:$0xff] %v10825_v60  ;;  %v10831_v32 = vld [vmem:[#allocation2 + $0x62] sm:$0xff] }
  0x6c   : > { %15558 = vst [vmem:[#allocation10_spill] sm:$0xff] %v10831_v32 }
  0x6e   : > { %842 = vrot.lane.b32.xlu0 %v10807_v36, %s10356_s26 }
  0x6f   : > { %844 = vrot.lane.b32.xlu1 %v10809_v40, %s10356_s26 }
  0x72   : > { %846 = vrot.lane.b32.xlu0 %v10815_v41, %s10356_s26  ;;  %v10841_v41 = vld [vmem:[#allocation2 + $0x82] sm:$0xff] }
  0x73   : > { %848 = vrot.lane.b32.xlu1 %v10817_v58, %s10356_s26  ;;  %v10839_v58 = vld [vmem:[#allocation2 + $0x7a] sm:$0xff]  ;;  %15561 = vst [vmem:[#allocation13_spill] sm:$0xff] %v10841_v41 }
  0x74   : > { %15560 = vst [vmem:[#allocation12_spill] sm:$0xff] %v10839_v58 }
  0x76   : > { %850 = vrot.lane.b32.xlu0 %v10823_v59, %s10356_s26  ;;  %v10849_v59 = vld [vmem:[#allocation2 + $0x92] sm:$0xff] }
  0x77   : > { %852 = vrot.lane.b32.xlu1 %v10825_v60, %s10356_s26  ;;  %v10847_v60 = vld [vmem:[#allocation2 + $0x8a] sm:$0xff]  ;;  %15563 = vst [vmem:[#allocation15_spill] sm:$0xff] %v10849_v59 }
  0x78   : > { %15562 = vst [vmem:[#allocation14_spill] sm:$0xff] %v10847_v60 }
  0x7a   : > { %854 = vrot.lane.b32.xlu0 %v10831_v32, %s10356_s26  ;;  %v10857_v32 = vld [vmem:[#allocation2 + $0xaa] sm:$0xff] }
  0x7b   : > { %856 = vrot.lane.b32.xlu1 %v10833_v0, %s10356_s26  ;;  %v10855_v0 = vld [vmem:[#allocation2 + $0xa2] sm:$0xff]  ;;  %15565 = vst [vmem:[#allocation17_spill] sm:$0xff] %v10857_v32 }
  0x7c   : > { %15564 = vst [vmem:[#allocation16_spill] sm:$0xff] %v10855_v0 }
  0x7e   : > { %858 = vrot.lane.b32.xlu0 %v10839_v58, %s10356_s26  ;;  %v10865_v58 = vld [vmem:[#allocation2 + $0xba] sm:$0xff] }
  0x7f   : > { %860 = vrot.lane.b32.xlu1 %v10841_v41, %s10356_s26  ;;  %v10863_v41 = vld [vmem:[#allocation2 + $0xb2] sm:$0xff]  ;;  %15567 = vst [vmem:[#allocation19_spill] sm:$0xff] %v10865_v58 }
  0x80   : > { %15566 = vst [vmem:[#allocation18_spill] sm:$0xff] %v10863_v41 }
  0x82   : > { %862 = vrot.lane.b32.xlu0 %v10847_v60, %s10356_s26  ;;  %v10873_v60 = vld [vmem:[#allocation2 + $0xd2] sm:$0xff] }
  0x83   : > { %864 = vrot.lane.b32.xlu1 %v10849_v59, %s10356_s26  ;;  %v10871_v59 = vld [vmem:[#allocation2 + $0xca] sm:$0xff]  ;;  %15569 = vst [vmem:[#allocation21_spill] sm:$0xff] %v10873_v60 }
  0x84   : > { %15568 = vst [vmem:[#allocation20_spill] sm:$0xff] %v10871_v59 }
  0x86   : > { %866 = vrot.lane.b32.xlu0 %v10855_v0, %s10356_s26  ;;  %v10881_v0 = vld [vmem:[#allocation2 + $0xe2] sm:$0xff] }
  0x87   : > { %868 = vrot.lane.b32.xlu1 %v10857_v32, %s10356_s26  ;;  %v10879_v32 = vld [vmem:[#allocation2 + $0xda] sm:$0xff]  ;;  %15571 = vst [vmem:[#allocation23_spill] sm:$0xff] %v10881_v0 }
  0x88   : > { %15570 = vst [vmem:[#allocation22_spill] sm:$0xff] %v10879_v32 }
  0x8a   : > { %870 = vrot.lane.b32.xlu0 %v10863_v41, %s10356_s26  ;;  %v10889_v41 = vld [vmem:[#allocation2 + $0xfa] sm:$0xff] }
  0x8b   : > { %872 = vrot.lane.b32.xlu1 %v10865_v58, %s10356_s26  ;;  %v10887_v58 = vld [vmem:[#allocation2 + $0xf2] sm:$0xff]  ;;  %15573 = vst [vmem:[#allocation25_spill] sm:$0xff] %v10889_v41 }
  0x8c   : > { %15572 = vst [vmem:[#allocation24_spill] sm:$0xff] %v10887_v58 }
  0x8e   : > { %874 = vrot.lane.b32.xlu0 %v10871_v59, %s10356_s26  ;;  %v10897_v59 = vld [vmem:[#allocation2 + $0x10a] sm:$0xff] }
  0x8f   : > { %876 = vrot.lane.b32.xlu1 %v10873_v60, %s10356_s26  ;;  %v10895_v60 = vld [vmem:[#allocation2 + $0x102] sm:$0xff]  ;;  %15575 = vst [vmem:[#allocation27_spill] sm:$0xff] %v10897_v59 }
  0x90   : > { %15574 = vst [vmem:[#allocation26_spill] sm:$0xff] %v10895_v60 }
  0x92   : > { %878 = vrot.lane.b32.xlu0 %v10879_v32, %s10356_s26 }
  0x93   : > { %880 = vrot.lane.b32.xlu1 %v10881_v0, %s10356_s26 }
  0x96   : > { %882 = vrot.lane.b32.xlu0 %v10887_v58, %s10356_s26  ;;  %v10905_v58 = vld [vmem:[#allocation2 + $0x11a] sm:$0xff] }
  0x97   : > { %884 = vrot.lane.b32.xlu1 %v10889_v41, %s10356_s26  ;;  %v10907_v41 = vld [vmem:[#allocation2 + $0x122] sm:$0xff] }
  0x98   : > { %v650_v40 = vpop.permute.xlu0 %649 }
  0x99   : > { %v652_v32 = vpop.permute.xlu1 %651  ;;  %742 = vst.msk [vmem:[#allocation3 + $0x20] sm:$0xff] %vm737_vm2, %v650_v40  ;;  %v10915_v40 = vld [vmem:[#allocation2 + $0x12a] sm:$0xff] }
  0x9a   : > { %743 = vst.msk [vmem:[#allocation3 + $0x28] sm:$0xff] %vm737_vm2, %v652_v32  ;;  %886 = vrot.lane.b32.xlu0 %v10895_v60, %s10356_s26  ;;  %v10917_v32 = vld [vmem:[#allocation2 + $0x132] sm:$0xff] }
  0x9b   : > { %888 = vrot.lane.b32.xlu1 %v10897_v59, %s10356_s26 }
  0x9c   : > { %v654_v0 = vpop.permute.xlu0 %653 }
  0x9d   : > { %v656_v36 = vpop.permute.xlu1 %655  ;;  %744 = vst.msk [vmem:[#allocation3 + $0x30] sm:$0xff] %vm737_vm2, %v654_v0 }
  0x9e   : > { %745 = vst.msk [vmem:[#allocation3 + $0x38] sm:$0xff] %vm737_vm2, %v656_v36  ;;  %890 = vrot.lane.b32.xlu0 %v10905_v58, %s10356_s26 }
  0x9f   : > { %892 = vrot.lane.b32.xlu1 %v10907_v41, %s10356_s26 }
  0xa0   : > { %v658_v59 = vpop.permute.xlu0 %657 }
  0xa1   : > { %v660_v60 = vpop.permute.xlu1 %659  ;;  %746 = vst.msk [vmem:[#allocation3 + $0x40] sm:$0xff] %vm737_vm2, %v658_v59 }
  0xa2   : > { %747 = vst.msk [vmem:[#allocation3 + $0x48] sm:$0xff] %vm737_vm2, %v660_v60  ;;  %894 = vrot.lane.b32.xlu0 %v10915_v40, %s10356_s26 }
  0xa3   : > { %896 = vrot.lane.b32.xlu1 %v10917_v32, %s10356_s26 }
  0xa4   : > { %v662_v0 = vpop.permute.xlu0 %661 }
  0xa5   : > { %v664_v36 = vpop.permute.xlu1 %663  ;;  %748 = vst.msk [vmem:[#allocation3 + $0x50] sm:$0xff] %vm737_vm2, %v662_v0 }
  0xa6   : > { %749 = vst.msk [vmem:[#allocation3 + $0x58] sm:$0xff] %vm737_vm2, %v664_v36  ;;  %1027 = vrot.lane.b32.xlu0 %v10603_v47, %s10357_s28 }
  0xa7   : > { %1029 = vrot.lane.b32.xlu1 %v10605_v48, %s10357_s28 }
  0xa8   : > { %v642_v59 = vpop.permute.xlu0 %641 }
  0xa9   : > { %v646_v60 = vpop.permute.xlu1 %645  ;;  %738 = vst.msk [vmem:[#allocation3] sm:$0xff] %vm737_vm2, %v642_v59 }
  0xaa   : > { %740 = vst.msk [vmem:[#allocation3 + $0x10] sm:$0xff] %vm737_vm2, %v646_v60  ;;  %1031 = vrot.lane.b32.xlu0 %v10611_v49, %s10357_s28 }
  0xab   : > { %1033 = vrot.lane.b32.xlu1 %v10613_v50, %s10357_s28 }
  0xac   : > { %v644_v0 = vpop.permute.xlu0 %643 }
  0xad   : > { %v648_v36 = vpop.permute.xlu1 %647  ;;  %739 = vst.msk [vmem:[#allocation3 + $0x8] sm:$0xff] %vm737_vm2, %v644_v0 }
  0xae   : > { %741 = vst.msk [vmem:[#allocation3 + $0x18] sm:$0xff] %vm737_vm2, %v648_v36  ;;  %1035 = vrot.lane.b32.xlu0 %v10619_v51, %s10357_s28 }
  0xaf   : > { %1037 = vrot.lane.b32.xlu1 %v10631_v54, %s10357_s28 }
  0xb0   : > { %v666_v47 = vpop.permute.xlu0 %665 }
  0xb1   : > { %v668_v48 = vpop.permute.xlu1 %667  ;;  %750 = vst.msk [vmem:[#allocation3 + $0x60] sm:$0xff] %vm737_vm2, %v666_v47 }
  0xb2   : > { %751 = vst.msk [vmem:[#allocation3 + $0x68] sm:$0xff] %vm737_vm2, %v668_v48  ;;  %1039 = vrot.lane.b32.xlu0 %v10635_v55, %s10357_s28 }
  0xb3   : > { %1041 = vrot.lane.b32.xlu1 %v10637_v56, %s10357_s28 }
  0xb4   : > { %v670_v49 = vpop.permute.xlu0 %669 }
  0xb5   : > { %v672_v50 = vpop.permute.xlu1 %671  ;;  %752 = vst.msk [vmem:[#allocation3 + $0x70] sm:$0xff] %vm737_vm2, %v670_v49 }
  0xb6   : > { %753 = vst.msk [vmem:[#allocation3 + $0x78] sm:$0xff] %vm737_vm2, %v672_v50  ;;  %1043 = vrot.lane.b32.xlu0 %v10651_v63, %s10357_s28 }
  0xb7   : > { %1045 = vrot.lane.b32.xlu1 %v10653_v1, %s10357_s28 }
  0xb8   : > { %v674_v59 = vpop.permute.xlu0 %673 }
  0xb9   : > { %v676_v60 = vpop.permute.xlu1 %675  ;;  %754 = vst.msk [vmem:[#allocation3 + $0x80] sm:$0xff] %vm737_vm2, %v674_v59 }
  0xba   : > { %755 = vst.msk [vmem:[#allocation3 + $0x88] sm:$0xff] %vm737_vm2, %v676_v60  ;;  %1047 = vrot.lane.b32.xlu0 %v10655_v2, %s10357_s28 }
  0xbb   : > { %1049 = vrot.lane.b32.xlu1 %v10667_v3, %s10357_s28 }
  0xbc   : > { %v678_v0 = vpop.permute.xlu0 %677 }
  0xbd   : > { %v680_v36 = vpop.permute.xlu1 %679  ;;  %756 = vst.msk [vmem:[#allocation3 + $0x90] sm:$0xff] %vm737_vm2, %v678_v0 }
  0xbe   : > { %757 = vst.msk [vmem:[#allocation3 + $0x98] sm:$0xff] %vm737_vm2, %v680_v36  ;;  %1051 = vrot.lane.b32.xlu0 %v10669_v4, %s10357_s28 }
  0xbf   : > { %1053 = vrot.lane.b32.xlu1 %v10671_v5, %s10357_s28 }
  0xc0   : > { %v682_v47 = vpop.permute.xlu0 %681 }
  0xc1   : > { %v684_v48 = vpop.permute.xlu1 %683  ;;  %758 = vst.msk [vmem:[#allocation3 + $0xa0] sm:$0xff] %vm737_vm2, %v682_v47 }
  0xc2   : > { %759 = vst.msk [vmem:[#allocation3 + $0xa8] sm:$0xff] %vm737_vm2, %v684_v48  ;;  %1055 = vrot.lane.b32.xlu0 %v10679_v6, %s10357_s28 }
  0xc3   : > { %1057 = vrot.lane.b32.xlu1 %v10681_v7, %s10357_s28 }
  0xc4   : > { %v686_v49 = vpop.permute.xlu0 %685 }
  0xc5   : > { %v688_v50 = vpop.permute.xlu1 %687  ;;  %760 = vst.msk [vmem:[#allocation3 + $0xb0] sm:$0xff] %vm737_vm2, %v686_v49 }
  0xc6   : > { %761 = vst.msk [vmem:[#allocation3 + $0xb8] sm:$0xff] %vm737_vm2, %v688_v50  ;;  %1059 = vrot.lane.b32.xlu0 %v10683_v8, %s10357_s28 }
  0xc7   : > { %1061 = vrot.lane.b32.xlu1 %v10691_v9, %s10357_s28 }
  0xc8   : > { %v690_v59 = vpop.permute.xlu0 %689 }
  0xc9   : > { %v692_v60 = vpop.permute.xlu1 %691  ;;  %762 = vst.msk [vmem:[#allocation3 + $0xc0] sm:$0xff] %vm737_vm2, %v690_v59 }
  0xca   : > { %763 = vst.msk [vmem:[#allocation3 + $0xc8] sm:$0xff] %vm737_vm2, %v692_v60  ;;  %1063 = vrot.lane.b32.xlu0 %v10693_v10, %s10357_s28 }
  0xcb   : > { %1065 = vrot.lane.b32.xlu1 %v10695_v11, %s10357_s28 }
  0xcc   : > { %v694_v0 = vpop.permute.xlu0 %693 }
  0xcd   : > { %v696_v36 = vpop.permute.xlu1 %695  ;;  %764 = vst.msk [vmem:[#allocation3 + $0xd0] sm:$0xff] %vm737_vm2, %v694_v0  ;;  %v11009_v0 = vld [vmem:[#allocation2 + $0x140] sm:$0xff] }
  0xce   : > { %765 = vst.msk [vmem:[#allocation3 + $0xd8] sm:$0xff] %vm737_vm2, %v696_v36  ;;  %1067 = vrot.lane.b32.xlu0 %v10707_v12, %s10357_s28  ;;  %v11011_v36 = vld [vmem:[#allocation2 + $0x148] sm:$0xff] }
  0xcf   : > { %1069 = vrot.lane.b32.xlu1 %v10715_v15, %s10357_s28 }
  0xd0   : > { %v698_v47 = vpop.permute.xlu0 %697 }
  0xd1   : > { %v700_v48 = vpop.permute.xlu1 %699  ;;  %766 = vst.msk [vmem:[#allocation3 + $0xe0] sm:$0xff] %vm737_vm2, %v698_v47 }
  0xd2   : > { %767 = vst.msk [vmem:[#allocation3 + $0xe8] sm:$0xff] %vm737_vm2, %v700_v48  ;;  %1071 = vrot.lane.b32.xlu0 %v10723_v16, %s10357_s28 }
  0xd3   : > { %1073 = vrot.lane.b32.xlu1 %v10731_v19, %s10357_s28 }
  0xd4   : > { %v702_v49 = vpop.permute.xlu0 %701 }
  0xd5   : > { %v704_v50 = vpop.permute.xlu1 %703  ;;  %768 = vst.msk [vmem:[#allocation3 + $0xf0] sm:$0xff] %vm737_vm2, %v702_v49  ;;  %v11019_v49 = vld [vmem:[#allocation2 + $0x150] sm:$0xff] }
  0xd6   : > { %769 = vst.msk [vmem:[#allocation3 + $0xf8] sm:$0xff] %vm737_vm2, %v704_v50  ;;  %1075 = vrot.lane.b32.xlu0 %v10739_v20, %s10357_s28  ;;  %v11021_v50 = vld [vmem:[#allocation2 + $0x158] sm:$0xff] }
  0xd7   : > { %1077 = vrot.lane.b32.xlu1 %v10747_v23, %s10357_s28 }
  0xd8   : > { %v835_v59 = vpop.permute.xlu0 %834 }
  0xd9   : > { %v837_v60 = vpop.permute.xlu1 %836  ;;  %931 = vst.msk [vmem:[#allocation3] sm:$0xff] %vm930_vm3, %v835_v59 }
  0xda   : > { %932 = vst.msk [vmem:[#allocation3 + $0x8] sm:$0xff] %vm930_vm3, %v837_v60  ;;  %1079 = vrot.lane.b32.xlu0 %v10755_v24, %s10357_s28 }
  0xdb   : > { %1081 = vrot.lane.b32.xlu1 %v10763_v31, %s10357_s28 }
  0xdc   : > { %v839_v47 = vpop.permute.xlu0 %838 }
  0xdd   : > { %v841_v48 = vpop.permute.xlu1 %840  ;;  %933 = vst.msk [vmem:[#allocation3 + $0x10] sm:$0xff] %vm930_vm3, %v839_v47 }
  0xde   : > { %934 = vst.msk [vmem:[#allocation3 + $0x18] sm:$0xff] %vm930_vm3, %v841_v48  ;;  %1083 = vrot.lane.b32.xlu0 %v11009_v0, %s10357_s28 }
  0xdf   : > { %1085 = vrot.lane.b32.xlu1 %v11011_v36, %s10357_s28 }
  0xe0   : > { %v843_v59 = vpop.permute.xlu0 %842 }
  0xe1   : > { %v845_v60 = vpop.permute.xlu1 %844  ;;  %935 = vst.msk [vmem:[#allocation3 + $0x20] sm:$0xff] %vm930_vm3, %v843_v59 }
  0xe2   : > { %936 = vst.msk [vmem:[#allocation3 + $0x28] sm:$0xff] %vm930_vm3, %v845_v60  ;;  %1087 = vrot.lane.b32.xlu0 %v11019_v49, %s10357_s28 }
  0xe3   : > { %1089 = vrot.lane.b32.xlu1 %v11021_v50, %s10357_s28 }
  0xe4   : > { %v847_v47 = vpop.permute.xlu0 %846 }
  0xe5   : > { %v849_v48 = vpop.permute.xlu1 %848  ;;  %937 = vst.msk [vmem:[#allocation3 + $0x30] sm:$0xff] %vm930_vm3, %v847_v47 }
  0xe6   : > { %938 = vst.msk [vmem:[#allocation3 + $0x38] sm:$0xff] %vm930_vm3, %v849_v48  ;;  %1220 = vrot.lane.b32.xlu0 %v10546_v25, %s10358_s29 }
  0xe7   : > { %1222 = vrot.lane.b32.xlu1 %v10548_v26, %s10358_s29 }
  0xe8   : > { %v851_v59 = vpop.permute.xlu0 %850 }
  0xe9   : > { %v853_v60 = vpop.permute.xlu1 %852  ;;  %939 = vst.msk [vmem:[#allocation3 + $0x40] sm:$0xff] %vm930_vm3, %v851_v59  ;;  %v10310_v59 = vld [vmem:[%s377_s12 + $0x10] sm:%s10303_s13] }
  0xea   : > { %940 = vst.msk [vmem:[#allocation3 + $0x48] sm:$0xff] %vm930_vm3, %v853_v60  ;;  %1224 = vrot.lane.b32.xlu0 %v10559_v27, %s10358_s29 }
  0xeb   : > { %1226 = vrot.lane.b32.xlu1 %v10561_v28, %s10358_s29  ;;  %446 = vst.msk [vmem:[#allocation2 + $0x179] sm:$0xff] %vm438_vm1, %v10310_v59  ;;  %v15587_v59 = vld [vmem:[#allocation14_spill] sm:$0xff] }
  0xec   : > { %v855_v47 = vpop.permute.xlu0 %854 }
  0xed   : > { %v857_v48 = vpop.permute.xlu1 %856  ;;  %941 = vst.msk [vmem:[#allocation3 + $0x50] sm:$0xff] %vm930_vm3, %v855_v47 }
  0xee   : > { %942 = vst.msk [vmem:[#allocation3 + $0x58] sm:$0xff] %vm930_vm3, %v857_v48  ;;  %1228 = vrot.lane.b32.xlu0 %v10570_v33, %s10358_s29  ;;  %v10313_v48 = vld [vmem:[%s377_s12 + $0x18] sm:%s10303_s13] }
  0xef   : > { %1230 = vrot.lane.b32.xlu1 %v10572_v34, %s10358_s29  ;;  %447 = vst.msk [vmem:[#allocation2 + $0x181] sm:$0xff] %vm438_vm1, %v10313_v48 }
  0xf0   : > { %v859_v25 = vpop.permute.xlu0 %858 }
  0xf1   : > { %v861_v26 = vpop.permute.xlu1 %860  ;;  %943 = vst.msk [vmem:[#allocation3 + $0x60] sm:$0xff] %vm930_vm3, %v859_v25 }
  0xf2   : > { %944 = vst.msk [vmem:[#allocation3 + $0x68] sm:$0xff] %vm930_vm3, %v861_v26  ;;  %1232 = vrot.lane.b32.xlu0 %v10579_v35, %s10358_s29 }
  0xf3   : > { %1234 = vrot.lane.b32.xlu1 %v10583_v38, %s10358_s29 }
  0xf4   : > { %v863_v27 = vpop.permute.xlu0 %862 }
  0xf5   : > { %v865_v28 = vpop.permute.xlu1 %864  ;;  %945 = vst.msk [vmem:[#allocation3 + $0x70] sm:$0xff] %vm930_vm3, %v863_v27 }
  0xf6   : > { %946 = vst.msk [vmem:[#allocation3 + $0x78] sm:$0xff] %vm930_vm3, %v865_v28  ;;  %1236 = vrot.lane.b32.xlu0 %v10599_v45, %s10358_s29 }
  0xf7   : > { %1238 = vrot.lane.b32.xlu1 %v10601_v46, %s10358_s29 }
  0xf8   : > { %v867_v33 = vpop.permute.xlu0 %866 }
  0xf9   : > { %v869_v34 = vpop.permute.xlu1 %868  ;;  %947 = vst.msk [vmem:[#allocation3 + $0x80] sm:$0xff] %vm930_vm3, %v867_v33  ;;  %v15577_v33 = vld [vmem:[#allocation4_spill] sm:$0xff] }
  0xfa   : > { %948 = vst.msk [vmem:[#allocation3 + $0x88] sm:$0xff] %vm930_vm3, %v869_v34  ;;  %1240 = vrot.lane.b32.xlu0 %v10625_v52, %s10358_s29  ;;  %v15578_v34 = vld [vmem:[#allocation5_spill] sm:$0xff] }
  0xfb   : > { %1242 = vrot.lane.b32.xlu1 %v10627_v53, %s10358_s29 }
  0xfc   : > { %v871_v35 = vpop.permute.xlu0 %870 }
  0xfd   : > { %v873_v38 = vpop.permute.xlu1 %872  ;;  %949 = vst.msk [vmem:[#allocation3 + $0x90] sm:$0xff] %vm930_vm3, %v871_v35 }
  0xfe   : > { %950 = vst.msk [vmem:[#allocation3 + $0x98] sm:$0xff] %vm930_vm3, %v873_v38  ;;  %1244 = vrot.lane.b32.xlu0 %v10644_v61, %s10358_s29 }
  0xff   : > { %1246 = vrot.lane.b32.xlu1 %v10646_v62, %s10358_s29 }
 0x100   : > { %v875_v45 = vpop.permute.xlu0 %874 }
 0x101   : > { %v877_v46 = vpop.permute.xlu1 %876  ;;  %951 = vst.msk [vmem:[#allocation3 + $0xa0] sm:$0xff] %vm930_vm3, %v875_v45  ;;  %v15579_v45 = vld [vmem:[#allocation6_spill] sm:$0xff] }
 0x102   : > { %952 = vst.msk [vmem:[#allocation3 + $0xa8] sm:$0xff] %vm930_vm3, %v877_v46  ;;  %1248 = vrot.lane.b32.xlu0 %v10709_v13, %s10358_s29  ;;  %v15580_v46 = vld [vmem:[#allocation7_spill] sm:$0xff] }
 0x103   : > { %1250 = vrot.lane.b32.xlu1 %v10711_v14, %s10358_s29 }
 0x104   : > { %v879_v52 = vpop.permute.xlu0 %878 }
 0x105   : > { %v881_v53 = vpop.permute.xlu1 %880  ;;  %953 = vst.msk [vmem:[#allocation3 + $0xb0] sm:$0xff] %vm930_vm3, %v879_v52 }
 0x106   : > { %954 = vst.msk [vmem:[#allocation3 + $0xb8] sm:$0xff] %vm930_vm3, %v881_v53  ;;  %1252 = vrot.lane.b32.xlu0 %v10725_v17, %s10358_s29 }
 0x107   : > { %1254 = vrot.lane.b32.xlu1 %v10727_v18, %s10358_s29 }
 0x108   : > { %v883_v61 = vpop.permute.xlu0 %882 }
 0x109   : > { %v885_v62 = vpop.permute.xlu1 %884  ;;  %955 = vst.msk [vmem:[#allocation3 + $0xc0] sm:$0xff] %vm930_vm3, %v883_v61  ;;  %v15581_v61 = vld [vmem:[#allocation8_spill] sm:$0xff] }
 0x10a   : > { %956 = vst.msk [vmem:[#allocation3 + $0xc8] sm:$0xff] %vm930_vm3, %v885_v62  ;;  %1256 = vrot.lane.b32.xlu0 %v10741_v21, %s10358_s29  ;;  %v15582_v62 = vld [vmem:[#allocation9_spill] sm:$0xff] }
 0x10b   : > { %1258 = vrot.lane.b32.xlu1 %v10743_v22, %s10358_s29 }
 0x10c   : > { %v887_v13 = vpop.permute.xlu0 %886 }
 0x10d   : > { %v889_v14 = vpop.permute.xlu1 %888  ;;  %957 = vst.msk [vmem:[#allocation3 + $0xd0] sm:$0xff] %vm930_vm3, %v887_v13 }
 0x10e   : > { %958 = vst.msk [vmem:[#allocation3 + $0xd8] sm:$0xff] %vm930_vm3, %v889_v14  ;;  %1260 = vrot.lane.b32.xlu0 %v10757_v29, %s10358_s29  ;;  %v10304_v29 = vld [vmem:[%s377_s12] sm:%s10303_s13] }
 0x10f   : > { %1262 = vrot.lane.b32.xlu1 %v10759_v30, %s10358_s29  ;;  %444 = vst.msk [vmem:[#allocation2 + $0x169] sm:$0xff] %vm438_vm1, %v10304_v29  ;;  %v15585_v29 = vld [vmem:[#allocation12_spill] sm:$0xff] }
 0x110   : > { %v891_v17 = vpop.permute.xlu0 %890 }
 0x111   : > { %v893_v18 = vpop.permute.xlu1 %892  ;;  %959 = vst.msk [vmem:[#allocation3 + $0xe0] sm:$0xff] %vm930_vm3, %v891_v17  ;;  %v15583_v17 = vld [vmem:[#allocation10_spill] sm:$0xff] }
 0x112   : > { %960 = vst.msk [vmem:[#allocation3 + $0xe8] sm:$0xff] %vm930_vm3, %v893_v18  ;;  %1264 = vrot.lane.b32.xlu0 %v10774_v37, %s10358_s29  ;;  %v15584_v18 = vld [vmem:[#allocation11_spill] sm:$0xff] }
 0x113   : > { %1266 = vrot.lane.b32.xlu1 %v10776_v39, %s10358_s29  ;;  %v10307_v39 = vld [vmem:[%s377_s12 + $0x8] sm:%s10303_s13] }
 0x114   : > { %v895_v21 = vpop.permute.xlu0 %894  ;;  %445 = vst.msk [vmem:[#allocation2 + $0x171] sm:$0xff] %vm438_vm1, %v10307_v39  ;;  %vm9426_vm1 = vcmask 916480  }
 0x115   : > { %v897_v22 = vpop.permute.xlu1 %896  ;;  %961 = vst.msk [vmem:[#allocation3 + $0xf0] sm:$0xff] %vm930_vm3, %v895_v21 }
 0x116   : > { %962 = vst.msk [vmem:[#allocation3 + $0xf8] sm:$0xff] %vm930_vm3, %v897_v22  ;;  %1268 = vrot.lane.b32.xlu0 %v10786_v42, %s10358_s29  ;;  %v11131_v42 = vld [vmem:[#allocation2 + $0x141] sm:$0xff] }
 0x117   : > { %1270 = vrot.lane.b32.xlu1 %v10788_v43, %s10358_s29  ;;  %v11133_v43 = vld [vmem:[#allocation2 + $0x149] sm:$0xff] }
 0x118   : > { %v1028_v30 = vpop.permute.xlu0 %1027 }
 0x119   : > { %v1030_v37 = vpop.permute.xlu1 %1029  ;;  %1124 = vst.msk [vmem:[#allocation3] sm:$0xff] %vm1123_vm4, %v1028_v30  ;;  %v15586_v30 = vld [vmem:[#allocation13_spill] sm:$0xff] }
 0x11a   : > { %1125 = vst.msk [vmem:[#allocation3 + $0x8] sm:$0xff] %vm1123_vm4, %v1030_v37  ;;  %1272 = vrot.lane.b32.xlu0 %v10795_v44, %s10358_s29  ;;  %v11143_v44 = vld [vmem:[#allocation2 + $0x151] sm:$0xff] }
 0x11b   : > { %1274 = vrot.lane.b32.xlu1 %v10797_v57, %s10358_s29  ;;  %v11145_v57 = vld [vmem:[#allocation2 + $0x159] sm:$0xff] }
 0x11c   : > { %v1032_v60 = vpop.permute.xlu0 %1031 }
 0x11d   : > { %v1034_v47 = vpop.permute.xlu1 %1033  ;;  %1126 = vst.msk [vmem:[#allocation3 + $0x10] sm:$0xff] %vm1123_vm4, %v1032_v60  ;;  %v15588_v60 = vld [vmem:[#allocation15_spill] sm:$0xff] }
 0x11e   : > { %1127 = vst.msk [vmem:[#allocation3 + $0x18] sm:$0xff] %vm1123_vm4, %v1034_v47  ;;  %1276 = vrot.lane.b32.xlu0 %v11131_v42, %s10358_s29 }
 0x11f   : > { %1278 = vrot.lane.b32.xlu1 %v11133_v43, %s10358_s29 }
 0x120   : > { %v1036_v25 = vpop.permute.xlu0 %1035 }
 0x121   : > { %v1038_v26 = vpop.permute.xlu1 %1037  ;;  %1128 = vst.msk [vmem:[#allocation3 + $0x20] sm:$0xff] %vm1123_vm4, %v1036_v25  ;;  %v15589_v25 = vld [vmem:[#allocation16_spill] sm:$0xff] }
 0x122   : > { %1129 = vst.msk [vmem:[#allocation3 + $0x28] sm:$0xff] %vm1123_vm4, %v1038_v26  ;;  %1280 = vrot.lane.b32.xlu0 %v11143_v44, %s10358_s29  ;;  %v15590_v26 = vld [vmem:[#allocation17_spill] sm:$0xff] }
 0x123   : > { %1282 = vrot.lane.b32.xlu1 %v11145_v57, %s10358_s29 }
 0x124   : > { %v1040_v27 = vpop.permute.xlu0 %1039 }
 0x125   : > { %v1042_v28 = vpop.permute.xlu1 %1041  ;;  %1130 = vst.msk [vmem:[#allocation3 + $0x30] sm:$0xff] %vm1123_vm4, %v1040_v27 }
 0x126   : > { %1131 = vst.msk [vmem:[#allocation3 + $0x38] sm:$0xff] %vm1123_vm4, %v1042_v28  ;;  %1413 = vrot.lane.b32.xlu0 %v15577_v33, %s10359_s18  ;;  %v15591_v33 = vld [vmem:[#allocation18_spill] sm:$0xff] }
 0x127   : > { %1415 = vrot.lane.b32.xlu1 %v15578_v34, %s10359_s18  ;;  %v15592_v34 = vld [vmem:[#allocation19_spill] sm:$0xff] }
 0x128   : > { %v1044_v35 = vpop.permute.xlu0 %1043 }
 0x129   : > { %v1046_v38 = vpop.permute.xlu1 %1045  ;;  %1132 = vst.msk [vmem:[#allocation3 + $0x40] sm:$0xff] %vm1123_vm4, %v1044_v35 }
 0x12a   : > { %1133 = vst.msk [vmem:[#allocation3 + $0x48] sm:$0xff] %vm1123_vm4, %v1046_v38  ;;  %1417 = vrot.lane.b32.xlu0 %v15579_v45, %s10359_s18  ;;  %v15593_v45 = vld [vmem:[#allocation20_spill] sm:$0xff] }
 0x12b   : > { %1419 = vrot.lane.b32.xlu1 %v15580_v46, %s10359_s18  ;;  %v15594_v46 = vld [vmem:[#allocation21_spill] sm:$0xff] }
 0x12c   : > { %v1048_v52 = vpop.permute.xlu0 %1047 }
 0x12d   : > { %v1050_v53 = vpop.permute.xlu1 %1049  ;;  %1134 = vst.msk [vmem:[#allocation3 + $0x50] sm:$0xff] %vm1123_vm4, %v1048_v52 }
 0x12e   : > { %1135 = vst.msk [vmem:[#allocation3 + $0x58] sm:$0xff] %vm1123_vm4, %v1050_v53  ;;  %1421 = vrot.lane.b32.xlu0 %v15581_v61, %s10359_s18  ;;  %v15595_v61 = vld [vmem:[#allocation22_spill] sm:$0xff] }
 0x12f   : > { %1423 = vrot.lane.b32.xlu1 %v15582_v62, %s10359_s18  ;;  %v15596_v62 = vld [vmem:[#allocation23_spill] sm:$0xff] }
 0x130   : > { %v1052_v13 = vpop.permute.xlu0 %1051 }
 0x131   : > { %v1054_v14 = vpop.permute.xlu1 %1053  ;;  %1136 = vst.msk [vmem:[#allocation3 + $0x60] sm:$0xff] %vm1123_vm4, %v1052_v13 }
 0x132   : > { %1137 = vst.msk [vmem:[#allocation3 + $0x68] sm:$0xff] %vm1123_vm4, %v1054_v14  ;;  %1425 = vrot.lane.b32.xlu0 %v15583_v17, %s10359_s18  ;;  %v15597_v17 = vld [vmem:[#allocation24_spill] sm:$0xff] }
 0x133   : > { %1427 = vrot.lane.b32.xlu1 %v15584_v18, %s10359_s18  ;;  %v15598_v18 = vld [vmem:[#allocation25_spill] sm:$0xff] }
 0x134   : > { %v1056_v21 = vpop.permute.xlu0 %1055 }
 0x135   : > { %v1058_v22 = vpop.permute.xlu1 %1057  ;;  %1138 = vst.msk [vmem:[#allocation3 + $0x70] sm:$0xff] %vm1123_vm4, %v1056_v21 }
 0x136   : > { %1139 = vst.msk [vmem:[#allocation3 + $0x78] sm:$0xff] %vm1123_vm4, %v1058_v22  ;;  %1429 = vrot.lane.b32.xlu0 %v15585_v29, %s10359_s18  ;;  %v15599_v29 = vld [vmem:[#allocation26_spill] sm:$0xff] }
 0x137   : > { %1431 = vrot.lane.b32.xlu1 %v15586_v30, %s10359_s18  ;;  %v15600_v30 = vld [vmem:[#allocation27_spill] sm:$0xff] }
 0x138   : > { %v1060_v37 = vpop.permute.xlu0 %1059 }
 0x139   : > { %v1062_v39 = vpop.permute.xlu1 %1061  ;;  %1140 = vst.msk [vmem:[#allocation3 + $0x80] sm:$0xff] %vm1123_vm4, %v1060_v37 }
 0x13a   : > { %1141 = vst.msk [vmem:[#allocation3 + $0x88] sm:$0xff] %vm1123_vm4, %v1062_v39  ;;  %1433 = vrot.lane.b32.xlu0 %v15587_v59, %s10359_s18 }
 0x13b   : > { %1435 = vrot.lane.b32.xlu1 %v15588_v60, %s10359_s18 }
 0x13c   : > { %v1064_v47 = vpop.permute.xlu0 %1063 }
 0x13d   : > { %v1066_v48 = vpop.permute.xlu1 %1065  ;;  %1142 = vst.msk [vmem:[#allocation3 + $0x90] sm:$0xff] %vm1123_vm4, %v1064_v47  ;;  %v11237_v47 = vld [vmem:[#allocation2 + $0x142] sm:$0xff] }
 0x13e   : > { %1143 = vst.msk [vmem:[#allocation3 + $0x98] sm:$0xff] %vm1123_vm4, %v1066_v48  ;;  %1437 = vrot.lane.b32.xlu0 %v15589_v25, %s10359_s18  ;;  %v11239_v48 = vld [vmem:[#allocation2 + $0x14a] sm:$0xff] }
 0x13f   : > { %1439 = vrot.lane.b32.xlu1 %v15590_v26, %s10359_s18 }
 0x140   : > { %v1068_v27 = vpop.permute.xlu0 %1067 }
 0x141   : > { %v1070_v28 = vpop.permute.xlu1 %1069  ;;  %1144 = vst.msk [vmem:[#allocation3 + $0xa0] sm:$0xff] %vm1123_vm4, %v1068_v27 }
 0x142   : > { %1145 = vst.msk [vmem:[#allocation3 + $0xa8] sm:$0xff] %vm1123_vm4, %v1070_v28  ;;  %1441 = vrot.lane.b32.xlu0 %v15591_v33, %s10359_s18 }
 0x143   : > { %1443 = vrot.lane.b32.xlu1 %v15592_v34, %s10359_s18 }
 0x144   : > { %v1072_v35 = vpop.permute.xlu0 %1071 }
 0x145   : > { %v1074_v38 = vpop.permute.xlu1 %1073  ;;  %1146 = vst.msk [vmem:[#allocation3 + $0xb0] sm:$0xff] %vm1123_vm4, %v1072_v35 }
 0x146   : > { %1147 = vst.msk [vmem:[#allocation3 + $0xb8] sm:$0xff] %vm1123_vm4, %v1074_v38  ;;  %1445 = vrot.lane.b32.xlu0 %v15593_v45, %s10359_s18 }
 0x147   : > { %1447 = vrot.lane.b32.xlu1 %v15594_v46, %s10359_s18  ;;  %v1574_v46 = vld [vmem:[#allocation2 + $0x180] sm:$0xff] }
 0x148   : > { %v1076_v52 = vpop.permute.xlu0 %1075 }
 0x149   : > { %v1078_v53 = vpop.permute.xlu1 %1077  ;;  %1148 = vst.msk [vmem:[#allocation3 + $0xc0] sm:$0xff] %vm1123_vm4, %v1076_v52 }
 0x14a   : > { %1149 = vst.msk [vmem:[#allocation3 + $0xc8] sm:$0xff] %vm1123_vm4, %v1078_v53  ;;  %1449 = vrot.lane.b32.xlu0 %v15595_v61, %s10359_s18 }
 0x14b   : > { %1451 = vrot.lane.b32.xlu1 %v15596_v62, %s10359_s18 }
 0x14c   : > { %v1080_v13 = vpop.permute.xlu0 %1079 }
 0x14d   : > { %v1082_v14 = vpop.permute.xlu1 %1081  ;;  %1150 = vst.msk [vmem:[#allocation3 + $0xd0] sm:$0xff] %vm1123_vm4, %v1080_v13  ;;  %v1738_v13 = vld [vmem:[#allocation2 + $0x61] sm:$0xff] }
 0x14e   : > { %1151 = vst.msk [vmem:[#allocation3 + $0xd8] sm:$0xff] %vm1123_vm4, %v1082_v14  ;;  %1453 = vrot.lane.b32.xlu0 %v15597_v17, %s10359_s18  ;;  %v1739_v14 = vld [vmem:[#allocation2 + $0x69] sm:$0xff] }
 0x14f   : > { %1455 = vrot.lane.b32.xlu1 %v15598_v18, %s10359_s18 }
 0x150   : > { %v1084_v21 = vpop.permute.xlu0 %1083 }
 0x151   : > { %v1086_v22 = vpop.permute.xlu1 %1085  ;;  %1152 = vst.msk [vmem:[#allocation3 + $0xe0] sm:$0xff] %vm1123_vm4, %v1084_v21  ;;  %v1740_v21 = vld [vmem:[#allocation2 + $0x79] sm:$0xff] }
 0x152   : > { %1153 = vst.msk [vmem:[#allocation3 + $0xe8] sm:$0xff] %vm1123_vm4, %v1086_v22  ;;  %1457 = vrot.lane.b32.xlu0 %v15599_v29, %s10359_s18  ;;  %v1741_v22 = vld [vmem:[#allocation2 + $0x81] sm:$0xff] }
 0x153   : > { %1459 = vrot.lane.b32.xlu1 %v15600_v30, %s10359_s18 }
 0x154   : > { %v1088_v37 = vpop.permute.xlu0 %1087 }
 0x155   : > { %v1090_v39 = vpop.permute.xlu1 %1089  ;;  %1154 = vst.msk [vmem:[#allocation3 + $0xf0] sm:$0xff] %vm1123_vm4, %v1088_v37  ;;  %v1742_v37 = vld [vmem:[#allocation2 + $0x89] sm:$0xff] }
 0x156   : > { %1155 = vst.msk [vmem:[#allocation3 + $0xf8] sm:$0xff] %vm1123_vm4, %v1090_v39  ;;  %1461 = vrot.lane.b32.xlu0 %v10905_v58, %s10359_s18  ;;  %v1743_v39 = vld [vmem:[#allocation2 + $0x91] sm:$0xff] }
 0x157   : > { %1463 = vrot.lane.b32.xlu1 %v10907_v41, %s10359_s18  ;;  %v11247_v41 = vld [vmem:[#allocation2 + $0x152] sm:$0xff] }
 0x158   : > { %v1221_v59 = vpop.permute.xlu0 %1220 }
 0x159   : > { %v1223_v60 = vpop.permute.xlu1 %1222  ;;  %1317 = vst.msk [vmem:[#allocation3] sm:$0xff] %vm1316_vm5, %v1221_v59 }
 0x15a   : > { %1318 = vst.msk [vmem:[#allocation3 + $0x8] sm:$0xff] %vm1316_vm5, %v1223_v60  ;;  %1465 = vrot.lane.b32.xlu0 %v10915_v40, %s10359_s18  ;;  %v11249_v40 = vld [vmem:[#allocation2 + $0x15a] sm:$0xff] }
 0x15b   : > { %1467 = vrot.lane.b32.xlu1 %v10917_v32, %s10359_s18 }
 0x15c   : > { %v1225_v58 = vpop.permute.xlu0 %1224 }
 0x15d   : > { %v1227_v25 = vpop.permute.xlu1 %1226  ;;  %1319 = vst.msk [vmem:[#allocation3 + $0x10] sm:$0xff] %vm1316_vm5, %v1225_v58  ;;  %v1744_v58 = vld [vmem:[#allocation2 + $0xa1] sm:$0xff] }
 0x15e   : > { %1320 = vst.msk [vmem:[#allocation3 + $0x18] sm:$0xff] %vm1316_vm5, %v1227_v25  ;;  %1469 = vrot.lane.b32.xlu0 %v11237_v47, %s10359_s18  ;;  %v1745_v25 = vld [vmem:[#allocation2 + $0xa9] sm:$0xff] }
 0x15f   : > { %1471 = vrot.lane.b32.xlu1 %v11239_v48, %s10359_s18 }
 0x160   : > { %v1229_v32 = vpop.permute.xlu0 %1228 }
 0x161   : > { %v1231_v26 = vpop.permute.xlu1 %1230  ;;  %1321 = vst.msk [vmem:[#allocation3 + $0x20] sm:$0xff] %vm1316_vm5, %v1229_v32 }
 0x162   : > { %1322 = vst.msk [vmem:[#allocation3 + $0x28] sm:$0xff] %vm1316_vm5, %v1231_v26  ;;  %1473 = vrot.lane.b32.xlu0 %v11247_v41, %s10359_s18 }
 0x163   : > { %1475 = vrot.lane.b32.xlu1 %v11249_v40, %s10359_s18 }
 0x164   : > { %v1233_v27 = vpop.permute.xlu0 %1232 }
 0x165   : > { %v1235_v28 = vpop.permute.xlu1 %1234  ;;  %1323 = vst.msk [vmem:[#allocation3 + $0x30] sm:$0xff] %vm1316_vm5, %v1233_v27  ;;  %v1746_v27 = vld [vmem:[#allocation2 + $0xb1] sm:$0xff] }
 0x166   : > { %1324 = vst.msk [vmem:[#allocation3 + $0x38] sm:$0xff] %vm1316_vm5, %v1235_v28  ;;  %1607 = vrot.lane.b32.xlu0 %v10619_v51, %s10360_s27  ;;  %v1747_v28 = vld [vmem:[#allocation2 + $0xb9] sm:$0xff] }
 0x167   : > { %1609 = vrot.lane.b32.xlu1 %v10631_v54, %s10360_s27 }
 0x168   : > { %v1237_v33 = vpop.permute.xlu0 %1236 }
 0x169   : > { %v1239_v34 = vpop.permute.xlu1 %1238  ;;  %1325 = vst.msk [vmem:[#allocation3 + $0x40] sm:$0xff] %vm1316_vm5, %v1237_v33 }
 0x16a   : > { %1326 = vst.msk [vmem:[#allocation3 + $0x48] sm:$0xff] %vm1316_vm5, %v1239_v34  ;;  %1611 = vrot.lane.b32.xlu0 %v10635_v55, %s10360_s27 }
 0x16b   : > { %1613 = vrot.lane.b32.xlu1 %v10637_v56, %s10360_s27 }
 0x16c   : > { %v1241_v35 = vpop.permute.xlu0 %1240 }
 0x16d   : > { %v1243_v38 = vpop.permute.xlu1 %1242  ;;  %1327 = vst.msk [vmem:[#allocation3 + $0x50] sm:$0xff] %vm1316_vm5, %v1241_v35  ;;  %v1748_v35 = vld [vmem:[#allocation2 + $0xc9] sm:$0xff] }
 0x16e   : > { %1328 = vst.msk [vmem:[#allocation3 + $0x58] sm:$0xff] %vm1316_vm5, %v1243_v38  ;;  %1615 = vrot.lane.b32.xlu0 %v10651_v63, %s10360_s27  ;;  %v1749_v38 = vld [vmem:[#allocation2 + $0xd1] sm:$0xff] }
 0x16f   : > { %1617 = vrot.lane.b32.xlu1 %v10653_v1, %s10360_s27 }
 0x170   : > { %v1245_v51 = vpop.permute.xlu0 %1244 }
 0x171   : > { %v1247_v54 = vpop.permute.xlu1 %1246  ;;  %1329 = vst.msk [vmem:[#allocation3 + $0x60] sm:$0xff] %vm1316_vm5, %v1245_v51 }
 0x172   : > { %1330 = vst.msk [vmem:[#allocation3 + $0x68] sm:$0xff] %vm1316_vm5, %v1247_v54  ;;  %1619 = vrot.lane.b32.xlu0 %v10655_v2, %s10360_s27 }
 0x173   : > { %1621 = vrot.lane.b32.xlu1 %v10667_v3, %s10360_s27 }
 0x174   : > { %v1249_v55 = vpop.permute.xlu0 %1248 }
 0x175   : > { %v1251_v56 = vpop.permute.xlu1 %1250  ;;  %1331 = vst.msk [vmem:[#allocation3 + $0x70] sm:$0xff] %vm1316_vm5, %v1249_v55  ;;  %v1750_v55 = vld [vmem:[#allocation2 + $0xd9] sm:$0xff] }
 0x176   : > { %1332 = vst.msk [vmem:[#allocation3 + $0x78] sm:$0xff] %vm1316_vm5, %v1251_v56  ;;  %1623 = vrot.lane.b32.xlu0 %v10669_v4, %s10360_s27  ;;  %v1751_v56 = vld [vmem:[#allocation2 + $0xe1] sm:$0xff] }
 0x177   : > { %1625 = vrot.lane.b32.xlu1 %v10671_v5, %s10360_s27 }
 0x178   : > { %v1253_v63 = vpop.permute.xlu0 %1252 }
 0x179   : > { %v1255_v1 = vpop.permute.xlu1 %1254  ;;  %1333 = vst.msk [vmem:[#allocation3 + $0x80] sm:$0xff] %vm1316_vm5, %v1253_v63 }
 0x17a   : > { %1334 = vst.msk [vmem:[#allocation3 + $0x88] sm:$0xff] %vm1316_vm5, %v1255_v1  ;;  %1627 = vrot.lane.b32.xlu0 %v10679_v6, %s10360_s27 }
 0x17b   : > { %1629 = vrot.lane.b32.xlu1 %v10681_v7, %s10360_s27 }
 0x17c   : > { %v1257_v2 = vpop.permute.xlu0 %1256 }
 0x17d   : > { %v1259_v3 = vpop.permute.xlu1 %1258  ;;  %1335 = vst.msk [vmem:[#allocation3 + $0x90] sm:$0xff] %vm1316_vm5, %v1257_v2  ;;  %v1752_v2 = vld [vmem:[#allocation2 + $0xf1] sm:$0xff] }
 0x17e   : > { %1336 = vst.msk [vmem:[#allocation3 + $0x98] sm:$0xff] %vm1316_vm5, %v1259_v3  ;;  %1631 = vrot.lane.b32.xlu0 %v10683_v8, %s10360_s27  ;;  %v1753_v3 = vld [vmem:[#allocation2 + $0xf9] sm:$0xff] }
 0x17f   : > { %1633 = vrot.lane.b32.xlu1 %v10691_v9, %s10360_s27 }
 0x180   : > { %v1261_v4 = vpop.permute.xlu0 %1260 }
 0x181   : > { %v1263_v5 = vpop.permute.xlu1 %1262  ;;  %1337 = vst.msk [vmem:[#allocation3 + $0xa0] sm:$0xff] %vm1316_vm5, %v1261_v4 }
 0x182   : > { %1338 = vst.msk [vmem:[#allocation3 + $0xa8] sm:$0xff] %vm1316_vm5, %v1263_v5  ;;  %1635 = vrot.lane.b32.xlu0 %v10693_v10, %s10360_s27 }
 0x183   : > { %1637 = vrot.lane.b32.xlu1 %v10695_v11, %s10360_s27 }
 0x184   : > { %v1265_v6 = vpop.permute.xlu0 %1264 }
 0x185   : > { %v1267_v7 = vpop.permute.xlu1 %1266  ;;  %1339 = vst.msk [vmem:[#allocation3 + $0xb0] sm:$0xff] %vm1316_vm5, %v1265_v6  ;;  %v1754_v6 = vld [vmem:[#allocation2 + $0x101] sm:$0xff] }
 0x186   : > { %1340 = vst.msk [vmem:[#allocation3 + $0xb8] sm:$0xff] %vm1316_vm5, %v1267_v7  ;;  %1639 = vrot.lane.b32.xlu0 %v10707_v12, %s10360_s27  ;;  %v1755_v7 = vld [vmem:[#allocation2 + $0x109] sm:$0xff] }
 0x187   : > { %1641 = vrot.lane.b32.xlu1 %v10715_v15, %s10360_s27 }
 0x188   : > { %v1269_v8 = vpop.permute.xlu0 %1268 }
 0x189   : > { %v1271_v9 = vpop.permute.xlu1 %1270  ;;  %1341 = vst.msk [vmem:[#allocation3 + $0xc0] sm:$0xff] %vm1316_vm5, %v1269_v8 }
 0x18a   : > { %1342 = vst.msk [vmem:[#allocation3 + $0xc8] sm:$0xff] %vm1316_vm5, %v1271_v9  ;;  %1643 = vrot.lane.b32.xlu0 %v10723_v16, %s10360_s27 }
 0x18b   : > { %1645 = vrot.lane.b32.xlu1 %v10731_v19, %s10360_s27 }
 0x18c   : > { %v1273_v10 = vpop.permute.xlu0 %1272 }
 0x18d   : > { %v1275_v11 = vpop.permute.xlu1 %1274  ;;  %1343 = vst.msk [vmem:[#allocation3 + $0xd0] sm:$0xff] %vm1316_vm5, %v1273_v10  ;;  %v1756_v10 = vld [vmem:[#allocation2 + $0x119] sm:$0xff] }
 0x18e   : > { %1344 = vst.msk [vmem:[#allocation3 + $0xd8] sm:$0xff] %vm1316_vm5, %v1275_v11  ;;  %1647 = vrot.lane.b32.xlu0 %v10739_v20, %s10360_s27  ;;  %v1757_v11 = vld [vmem:[#allocation2 + $0x121] sm:$0xff] }
 0x18f   : > { %1649 = vrot.lane.b32.xlu1 %v10747_v23, %s10360_s27 }
 0x190   : > { %v1277_v12 = vpop.permute.xlu0 %1276 }
 0x191   : > { %v1279_v15 = vpop.permute.xlu1 %1278  ;;  %1345 = vst.msk [vmem:[#allocation3 + $0xe0] sm:$0xff] %vm1316_vm5, %v1277_v12 }
 0x192   : > { %1346 = vst.msk [vmem:[#allocation3 + $0xe8] sm:$0xff] %vm1316_vm5, %v1279_v15  ;;  %1651 = vrot.lane.b32.xlu0 %v10755_v24, %s10360_s27  ;;  %v1571_v24 = vld [vmem:[#allocation2 + $0x168] sm:$0xff] }
 0x193   : > { %1653 = vrot.lane.b32.xlu1 %v10763_v31, %s10360_s27  ;;  %v1572_v31 = vld [vmem:[#allocation2 + $0x170] sm:$0xff] }
 0x194   : > { %v1281_v16 = vpop.permute.xlu0 %1280 }
 0x195   : > { %v1283_v19 = vpop.permute.xlu1 %1282  ;;  %1347 = vst.msk [vmem:[#allocation3 + $0xf0] sm:$0xff] %vm1316_vm5, %v1281_v16  ;;  %v2154_v16 = vld [vmem:[%s15450_s3] sm:$0xff] }
 0x196   : > { %1348 = vst.msk [vmem:[#allocation3 + $0xf8] sm:$0xff] %vm1316_vm5, %v1283_v19  ;;  %1655 = vrot.lane.b32.xlu0 %v11009_v0, %s10360_s27  ;;  %v2155_v19 = vld [vmem:[%s15450_s3 + $0x8] sm:$0xff] }
 0x197   : > { %1657 = vrot.lane.b32.xlu1 %v11011_v36, %s10360_s27  ;;  %v1573_v36 = vld [vmem:[#allocation2 + $0x178] sm:$0xff] }
 0x198   : > { %v1414_v20 = vpop.permute.xlu0 %1413 }
 0x199   : > { %v1416_v23 = vpop.permute.xlu1 %1415  ;;  %1510 = vst.msk [vmem:[#allocation3] sm:$0xff] %vm1509_vm6, %v1414_v20  ;;  %v10210_v20 = vpack.c.bf16 %v2155_v19, %v2154_v16  ;;  %v1945_v19 = vld [vmem:[#allocation2 + $0xf2] sm:$0xff] }
 0x19a   : > { %1511 = vst.msk [vmem:[#allocation3 + $0x8] sm:$0xff] %vm1509_vm6, %v1416_v23  ;;  %1659 = vrot.lane.b32.xlu0 %v11019_v49, %s10360_s27  ;;  %v1736_v49 = vld [vmem:[#allocation2 + $0x51] sm:$0xff]  ;;  %v1758_v23 = vld [vmem:[#allocation2 + $0x129] sm:$0xff] }
 0x19b   : > { %1661 = vrot.lane.b32.xlu1 %v11021_v50, %s10360_s27  ;;  %v1737_v50 = vld [vmem:[#allocation2 + $0x59] sm:$0xff]  ;;  %10211 = vmatprep.subr.bf16.mxu0 %v10210_v20 }
 0x19c   : > { %v1418_v45 = vpop.permute.xlu0 %1417  ;;  %10226 = vmatprep.subr.bf16.mxu1 %v10210_v20  ;;  %10213 = vmatpush3.bf16.msra.mxu0 %v10210_v20 }
 0x19d   : > { %v1420_v0 = vpop.permute.xlu1 %1419  ;;  %1512 = vst.msk [vmem:[#allocation3 + $0x10] sm:$0xff] %vm1509_vm6, %v1418_v45  ;;  %10231 = vmatpush3.bf16.msra.mxu1 %v10210_v20  ;;  %v1946_v20 = vld [vmem:[#allocation2 + $0xfa] sm:$0xff] }
 0x19e   : > { %1513 = vst.msk [vmem:[#allocation3 + $0x18] sm:$0xff] %vm1509_vm6, %v1420_v0  ;;  %1663 = vrot.lane.b32.xlu0 %v1571_v24, %s10360_s27  ;;  %v1759_v24 = vld [vmem:[#allocation2 + $0x131] sm:$0xff] }
 0x19f   : > { %1665 = vrot.lane.b32.xlu1 %v1572_v31, %s10360_s27  ;;  %v2156_v0 = vld [vmem:[%s15450_s3 + $0x10] sm:$0xff] }
 0x1a0   : > { %v1422_v52 = vpop.permute.xlu0 %1421 }
 0x1a1   : > { %v1424_v53 = vpop.permute.xlu1 %1423  ;;  %1514 = vst.msk [vmem:[#allocation3 + $0x20] sm:$0xff] %vm1509_vm6, %v1422_v52 }
 0x1a2   : > { %1515 = vst.msk [vmem:[#allocation3 + $0x28] sm:$0xff] %vm1509_vm6, %v1424_v53  ;;  %1667 = vrot.lane.b32.xlu0 %v1573_v36, %s10360_s27  ;;  %v2157_v36 = vld [vmem:[%s15450_s3 + $0x18] sm:$0xff] }
 0x1a3   : > { %1669 = vrot.lane.b32.xlu1 %v1574_v46, %s10360_s27  ;;  %v10214_v46 = vpack.c.bf16 %v2157_v36, %v2156_v0 }
 0x1a4   : > { %v1426_v61 = vpop.permute.xlu0 %1425 }
 0x1a5   : > { %v1428_v62 = vpop.permute.xlu1 %1427  ;;  %1516 = vst.msk [vmem:[#allocation3 + $0x30] sm:$0xff] %vm1509_vm6, %v1426_v61  ;;  %10215 = vmatprep.subr.bf16.mxu0 %v10214_v46  ;;  %10227 = vmatprep.subr.bf16.mxu1 %v10214_v46 }
 0x1a6   : > { %1517 = vst.msk [vmem:[#allocation3 + $0x38] sm:$0xff] %vm1509_vm6, %v1428_v62  ;;  %1800 = vrot.lane.b32.xlu0 %v1736_v49, %s10361_s14  ;;  %10217 = vmatpush3.bf16.msra.mxu0 %v10214_v46  ;;  %v2158_v49 = vld [vmem:[%s15450_s3 + $0x20] sm:$0xff] }
 0x1a7   : > { %1802 = vrot.lane.b32.xlu1 %v1737_v50, %s10361_s14  ;;  %v2159_v50 = vld [vmem:[%s15450_s3 + $0x28] sm:$0xff]  ;;  %10232 = vmatpush3.bf16.msra.mxu1 %v10214_v46  ;;  %v1949_v46 = vld [vmem:[#allocation2 + $0x11a] sm:$0xff] }
 0x1a8   : > { %v1430_v17 = vpop.permute.xlu0 %1429  ;;  %v10218_v61 = vpack.c.bf16 %v2159_v50, %v2158_v49  ;;  %v1951_v50 = vld [vmem:[#allocation2 + $0x12a] sm:$0xff] }
 0x1a9   : > { %v1432_v18 = vpop.permute.xlu1 %1431  ;;  %1518 = vst.msk [vmem:[#allocation3 + $0x40] sm:$0xff] %vm1509_vm6, %v1430_v17  ;;  %v1764_v17 = vld [vmem:[#allocation2 + $0x169] sm:$0xff] }
 0x1aa   : > { %1519 = vst.msk [vmem:[#allocation3 + $0x48] sm:$0xff] %vm1509_vm6, %v1432_v18  ;;  %1804 = vrot.lane.b32.xlu0 %v1738_v13, %s10361_s14  ;;  %10219 = vmatprep.subr.bf16.mxu0 %v10218_v61  ;;  %v1765_v18 = vld [vmem:[#allocation2 + $0x171] sm:$0xff] }
 0x1ab   : > { %1806 = vrot.lane.b32.xlu1 %v1739_v14, %s10361_s14  ;;  %10228 = vmatprep.subr.bf16.mxu1 %v10218_v61  ;;  %v2160_v14 = vld [vmem:[%s15450_s3 + $0x30] sm:$0xff] }
 0x1ac   : > { %v1434_v29 = vpop.permute.xlu0 %1433  ;;  %10221 = vmatpush3.bf16.msra.mxu0 %v10218_v61  ;;  %10233 = vmatpush3.bf16.msra.mxu1 %v10218_v61  ;;  %v1952_v61 = vld [vmem:[#allocation2 + $0x132] sm:$0xff] }
 0x1ad   : > { %v1436_v30 = vpop.permute.xlu1 %1435  ;;  %1520 = vst.msk [vmem:[#allocation3 + $0x50] sm:$0xff] %vm1509_vm6, %v1434_v29  ;;  %v2162_v29 = vld [vmem:[%s15450_s3 + $0x40] sm:$0xff] }
 0x1ae   : > { %1521 = vst.msk [vmem:[#allocation3 + $0x58] sm:$0xff] %vm1509_vm6, %v1436_v30  ;;  %1808 = vrot.lane.b32.xlu0 %v1740_v21, %s10361_s14 }
 0x1af   : > { %1810 = vrot.lane.b32.xlu1 %v1741_v22, %s10361_s14 }
 0x1b0   : > { %v1438_v59 = vpop.permute.xlu0 %1437 }
 0x1b1   : > { %v1440_v60 = vpop.permute.xlu1 %1439  ;;  %1522 = vst.msk [vmem:[#allocation3 + $0x60] sm:$0xff] %vm1509_vm6, %v1438_v59  ;;  %v1930_v59 = vld [vmem:[#allocation2 + $0x5a] sm:$0xff] }
 0x1b2   : > { %1523 = vst.msk [vmem:[#allocation3 + $0x68] sm:$0xff] %vm1509_vm6, %v1440_v60  ;;  %1812 = vrot.lane.b32.xlu0 %v1742_v37, %s10361_s14 }
 0x1b3   : > { %1814 = vrot.lane.b32.xlu1 %v1743_v39, %s10361_s14  ;;  %v1929_v39 = vld [vmem:[#allocation2 + $0x52] sm:$0xff] }
 0x1b4   : > { %v1442_v32 = vpop.permute.xlu0 %1441 }
 0x1b5   : > { %v1444_v26 = vpop.permute.xlu1 %1443  ;;  %1524 = vst.msk [vmem:[#allocation3 + $0x70] sm:$0xff] %vm1509_vm6, %v1442_v32  ;;  %v1932_v32 = vld [vmem:[#allocation2 + $0x6a] sm:$0xff] }
 0x1b6   : > { %1525 = vst.msk [vmem:[#allocation3 + $0x78] sm:$0xff] %vm1509_vm6, %v1444_v26  ;;  %1816 = vrot.lane.b32.xlu0 %v1744_v58, %s10361_s14 }
 0x1b7   : > { %1818 = vrot.lane.b32.xlu1 %v1745_v25, %s10361_s14  ;;  %v1931_v25 = vld [vmem:[#allocation2 + $0x62] sm:$0xff] }
 0x1b8   : > { %v1446_v33 = vpop.permute.xlu0 %1445 }
 0x1b9   : > { %v1448_v34 = vpop.permute.xlu1 %1447  ;;  %1526 = vst.msk [vmem:[#allocation3 + $0x80] sm:$0xff] %vm1509_vm6, %v1446_v33  ;;  %v1934_v33 = vld [vmem:[#allocation2 + $0x82] sm:$0xff] }
 0x1ba   : > { %1527 = vst.msk [vmem:[#allocation3 + $0x88] sm:$0xff] %vm1509_vm6, %v1448_v34  ;;  %1820 = vrot.lane.b32.xlu0 %v1746_v27, %s10361_s14 }
 0x1bb   : > { %1822 = vrot.lane.b32.xlu1 %v1747_v28, %s10361_s14  ;;  %v1933_v28 = vld [vmem:[#allocation2 + $0x7a] sm:$0xff] }
 0x1bc   : > { %v1450_v51 = vpop.permute.xlu0 %1449 }
 0x1bd   : > { %v1452_v54 = vpop.permute.xlu1 %1451  ;;  %1528 = vst.msk [vmem:[#allocation3 + $0x90] sm:$0xff] %vm1509_vm6, %v1450_v51  ;;  %v1936_v51 = vld [vmem:[#allocation2 + $0x92] sm:$0xff] }
 0x1be   : > { %1529 = vst.msk [vmem:[#allocation3 + $0x98] sm:$0xff] %vm1509_vm6, %v1452_v54  ;;  %1824 = vrot.lane.b32.xlu0 %v1748_v35, %s10361_s14 }
 0x1bf   : > { %1826 = vrot.lane.b32.xlu1 %v1749_v38, %s10361_s14  ;;  %v1935_v38 = vld [vmem:[#allocation2 + $0x8a] sm:$0xff] }
 0x1c0   : > { %v1454_v63 = vpop.permute.xlu0 %1453 }
 0x1c1   : > { %v1456_v1 = vpop.permute.xlu1 %1455  ;;  %1530 = vst.msk [vmem:[#allocation3 + $0xa0] sm:$0xff] %vm1509_vm6, %v1454_v63  ;;  %v1938_v63 = vld [vmem:[#allocation2 + $0xaa] sm:$0xff] }
 0x1c2   : > { %1531 = vst.msk [vmem:[#allocation3 + $0xa8] sm:$0xff] %vm1509_vm6, %v1456_v1  ;;  %1828 = vrot.lane.b32.xlu0 %v1750_v55, %s10361_s14 }
 0x1c3   : > { %1830 = vrot.lane.b32.xlu1 %v1751_v56, %s10361_s14  ;;  %v1937_v56 = vld [vmem:[#allocation2 + $0xa2] sm:$0xff] }
 0x1c4   : > { %v1458_v4 = vpop.permute.xlu0 %1457 }
 0x1c5   : > { %v1460_v5 = vpop.permute.xlu1 %1459  ;;  %1532 = vst.msk [vmem:[#allocation3 + $0xb0] sm:$0xff] %vm1509_vm6, %v1458_v4  ;;  %v1940_v4 = vld [vmem:[#allocation2 + $0xba] sm:$0xff] }
 0x1c6   : > { %1533 = vst.msk [vmem:[#allocation3 + $0xb8] sm:$0xff] %vm1509_vm6, %v1460_v5  ;;  %1832 = vrot.lane.b32.xlu0 %v1752_v2, %s10361_s14 }
 0x1c7   : > { %1834 = vrot.lane.b32.xlu1 %v1753_v3, %s10361_s14  ;;  %v1939_v3 = vld [vmem:[#allocation2 + $0xb2] sm:$0xff] }
 0x1c8   : > { %v1462_v8 = vpop.permute.xlu0 %1461 }
 0x1c9   : > { %v1464_v9 = vpop.permute.xlu1 %1463  ;;  %1534 = vst.msk [vmem:[#allocation3 + $0xc0] sm:$0xff] %vm1509_vm6, %v1462_v8  ;;  %v1942_v8 = vld [vmem:[#allocation2 + $0xd2] sm:$0xff] }
 0x1ca   : > { %1535 = vst.msk [vmem:[#allocation3 + $0xc8] sm:$0xff] %vm1509_vm6, %v1464_v9  ;;  %1836 = vrot.lane.b32.xlu0 %v1754_v6, %s10361_s14 }
 0x1cb   : > { %1838 = vrot.lane.b32.xlu1 %v1755_v7, %s10361_s14  ;;  %v1941_v7 = vld [vmem:[#allocation2 + $0xca] sm:$0xff] }
 0x1cc   : > { %v1466_v12 = vpop.permute.xlu0 %1465 }
 0x1cd   : > { %v1468_v15 = vpop.permute.xlu1 %1467  ;;  %1536 = vst.msk [vmem:[#allocation3 + $0xd0] sm:$0xff] %vm1509_vm6, %v1466_v12  ;;  %v1944_v12 = vld [vmem:[#allocation2 + $0xe2] sm:$0xff] }
 0x1ce   : > { %1537 = vst.msk [vmem:[#allocation3 + $0xd8] sm:$0xff] %vm1509_vm6, %v1468_v15  ;;  %1840 = vrot.lane.b32.xlu0 %v1756_v10, %s10361_s14 }
 0x1cf   : > { %1842 = vrot.lane.b32.xlu1 %v1757_v11, %s10361_s14  ;;  %v1943_v11 = vld [vmem:[#allocation2 + $0xda] sm:$0xff] }
 0x1d0   : > { %v1470_v31 = vpop.permute.xlu0 %1469 }
 0x1d1   : > { %v1472_v45 = vpop.permute.xlu1 %1471  ;;  %1538 = vst.msk [vmem:[#allocation3 + $0xe0] sm:$0xff] %vm1509_vm6, %v1470_v31  ;;  %v1947_v31 = vld [vmem:[#allocation2 + $0x102] sm:$0xff] }
 0x1d2   : > { %1539 = vst.msk [vmem:[#allocation3 + $0xe8] sm:$0xff] %vm1509_vm6, %v1472_v45  ;;  %1844 = vrot.lane.b32.xlu0 %v1758_v23, %s10361_s14  ;;  %v1948_v45 = vld [vmem:[#allocation2 + $0x10a] sm:$0xff] }
 0x1d3   : > { %1846 = vrot.lane.b32.xlu1 %v1759_v24, %s10361_s14 }
 0x1d4   : > { %v1474_v52 = vpop.permute.xlu0 %1473 }
 0x1d5   : > { %v1476_v53 = vpop.permute.xlu1 %1475  ;;  %1540 = vst.msk [vmem:[#allocation3 + $0xf0] sm:$0xff] %vm1509_vm6, %v1474_v52  ;;  %v1950_v52 = vld [vmem:[#allocation2 + $0x122] sm:$0xff] }
 0x1d6   : > { %1541 = vst.msk [vmem:[#allocation3 + $0xf8] sm:$0xff] %vm1509_vm6, %v1476_v53  ;;  %1848 = vrot.lane.b32.xlu0 %v11131_v42, %s10361_s14  ;;  %v2161_v42 = vld [vmem:[%s15450_s3 + $0x38] sm:$0xff] }
 0x1d7   : > { %1850 = vrot.lane.b32.xlu1 %v11133_v43, %s10361_s14  ;;  %v10222_v43 = vpack.c.bf16 %v2161_v42, %v2160_v14 }
 0x1d8   : > { %v1608_v62 = vpop.permute.xlu0 %1607 }
 0x1d9   : > { %v1610_v13 = vpop.permute.xlu1 %1609  ;;  %1704 = vst.msk [vmem:[#allocation3] sm:$0xff] %vm1703_vm7, %v1608_v62  ;;  %10223 = vmatprep.subr.bf16.mxu0 %v10222_v43  ;;  %10229 = vmatprep.subr.bf16.mxu1 %v10222_v43 }
 0x1da   : > { %1705 = vst.msk [vmem:[#allocation3 + $0x8] sm:$0xff] %vm1703_vm7, %v1610_v13  ;;  %1852 = vrot.lane.b32.xlu0 %v11143_v44, %s10361_s14  ;;  %10225 = vmatpush3.bf16.msra.mxu0 %v10222_v43  ;;  %v1766_v44 = vld [vmem:[#allocation2 + $0x179] sm:$0xff] }
 0x1db   : > { %1854 = vrot.lane.b32.xlu1 %v11145_v57, %s10361_s14  ;;  %10234 = vmatpush3.bf16.msra.mxu1 %v10222_v43  ;;  %v1767_v57 = vld [vmem:[#allocation2 + $0x181] sm:$0xff] }
 0x1dc   : > { %v1612_v21 = vpop.permute.xlu0 %1611  ;;  %10160 = vmatprep.subr.mxu0 %v2162_v29  ;;  %10230 = vmatprep.subr.mxu1 %v2162_v29 }
 0x1dd   : > { %v1614_v22 = vpop.permute.xlu1 %1613  ;;  %1706 = vst.msk [vmem:[#allocation3 + $0x10] sm:$0xff] %vm1703_vm7, %v1612_v21  ;;  %v1958_v21 = vld [vmem:[#allocation2 + $0x172] sm:$0xff] }
 0x1de   : > { %1707 = vst.msk [vmem:[#allocation3 + $0x18] sm:$0xff] %vm1703_vm7, %v1614_v22  ;;  %1856 = vrot.lane.b32.xlu0 %v1764_v17, %s10361_s14  ;;  %10161 = vmatpush3.msra.mxu0 %v2162_v29 }
 0x1df   : > { %1858 = vrot.lane.b32.xlu1 %v1765_v18, %s10361_s14  ;;  %10235 = vmatpush3.msra.mxu1 %v2162_v29  ;;  %v1957_v18 = vld [vmem:[#allocation2 + $0x16a] sm:$0xff]  ;;  %v1960_v29 = vld [vmem:[#allocation2 + $0x182] sm:$0xff] }
 0x1e0   : > { %v1616_v30 = vpop.permute.xlu0 %1615 }
 0x1e1   : > { %v1618_v37 = vpop.permute.xlu1 %1617  ;;  %1708 = vst.msk [vmem:[#allocation3 + $0x20] sm:$0xff] %vm1703_vm7, %v1616_v30 }
 0x1e2   : > { %1709 = vst.msk [vmem:[#allocation3 + $0x28] sm:$0xff] %vm1703_vm7, %v1618_v37  ;;  %1860 = vrot.lane.b32.xlu0 %v1766_v44, %s10361_s14 }
 0x1e3   : > { %1862 = vrot.lane.b32.xlu1 %v1767_v57, %s10361_s14 }
 0x1e4   : > { %v1620_v60 = vpop.permute.xlu0 %1619 }
 0x1e5   : > { %v1622_v58 = vpop.permute.xlu1 %1621  ;;  %1710 = vst.msk [vmem:[#allocation3 + $0x30] sm:$0xff] %vm1703_vm7, %v1620_v60 }
 0x1e6   : > { %1711 = vst.msk [vmem:[#allocation3 + $0x38] sm:$0xff] %vm1703_vm7, %v1622_v58  ;;  %1993 = vrot.lane.b32.xlu0 %v1929_v39, %s10362_s19 }
 0x1e7   : > { %1995 = vrot.lane.b32.xlu1 %v1930_v59, %s10362_s19 }
 0x1e8   : > { %v1624_v26 = vpop.permute.xlu0 %1623 }
 0x1e9   : > { %v1626_v27 = vpop.permute.xlu1 %1625  ;;  %1712 = vst.msk [vmem:[#allocation3 + $0x40] sm:$0xff] %vm1703_vm7, %v1624_v26 }
 0x1ea   : > { %1713 = vst.msk [vmem:[#allocation3 + $0x48] sm:$0xff] %vm1703_vm7, %v1626_v27  ;;  %1997 = vrot.lane.b32.xlu0 %v1931_v25, %s10362_s19 }
 0x1eb   : > { %1999 = vrot.lane.b32.xlu1 %v1932_v32, %s10362_s19 }
 0x1ec   : > { %v1628_v34 = vpop.permute.xlu0 %1627 }
 0x1ed   : > { %v1630_v35 = vpop.permute.xlu1 %1629  ;;  %1714 = vst.msk [vmem:[#allocation3 + $0x50] sm:$0xff] %vm1703_vm7, %v1628_v34 }
 0x1ee   : > { %1715 = vst.msk [vmem:[#allocation3 + $0x58] sm:$0xff] %vm1703_vm7, %v1630_v35  ;;  %2001 = vrot.lane.b32.xlu0 %v1933_v28, %s10362_s19 }
 0x1ef   : > { %2003 = vrot.lane.b32.xlu1 %v1934_v33, %s10362_s19 }
 0x1f0   : > { %v1632_v54 = vpop.permute.xlu0 %1631 }
 0x1f1   : > { %v1634_v55 = vpop.permute.xlu1 %1633  ;;  %1716 = vst.msk [vmem:[#allocation3 + $0x60] sm:$0xff] %vm1703_vm7, %v1632_v54 }
 0x1f2   : > { %1717 = vst.msk [vmem:[#allocation3 + $0x68] sm:$0xff] %vm1703_vm7, %v1634_v55  ;;  %2005 = vrot.lane.b32.xlu0 %v1935_v38, %s10362_s19 }
 0x1f3   : > { %2007 = vrot.lane.b32.xlu1 %v1936_v51, %s10362_s19 }
 0x1f4   : > { %v1636_v1 = vpop.permute.xlu0 %1635 }
 0x1f5   : > { %v1638_v2 = vpop.permute.xlu1 %1637  ;;  %1718 = vst.msk [vmem:[#allocation3 + $0x70] sm:$0xff] %vm1703_vm7, %v1636_v1 }
 0x1f6   : > { %1719 = vst.msk [vmem:[#allocation3 + $0x78] sm:$0xff] %vm1703_vm7, %v1638_v2  ;;  %2009 = vrot.lane.b32.xlu0 %v1937_v56, %s10362_s19 }
 0x1f7   : > { %2011 = vrot.lane.b32.xlu1 %v1938_v63, %s10362_s19 }
 0x1f8   : > { %v1640_v5 = vpop.permute.xlu0 %1639 }
 0x1f9   : > { %v1642_v6 = vpop.permute.xlu1 %1641  ;;  %1720 = vst.msk [vmem:[#allocation3 + $0x80] sm:$0xff] %vm1703_vm7, %v1640_v5 }
 0x1fa   : > { %1721 = vst.msk [vmem:[#allocation3 + $0x88] sm:$0xff] %vm1703_vm7, %v1642_v6  ;;  %2013 = vrot.lane.b32.xlu0 %v1939_v3, %s10362_s19 }
 0x1fb   : > { %2015 = vrot.lane.b32.xlu1 %v1940_v4, %s10362_s19 }
 0x1fc   : > { %v1644_v9 = vpop.permute.xlu0 %1643 }
 0x1fd   : > { %v1646_v10 = vpop.permute.xlu1 %1645  ;;  %1722 = vst.msk [vmem:[#allocation3 + $0x90] sm:$0xff] %vm1703_vm7, %v1644_v9 }
 0x1fe   : > { %1723 = vst.msk [vmem:[#allocation3 + $0x98] sm:$0xff] %vm1703_vm7, %v1646_v10  ;;  %2017 = vrot.lane.b32.xlu0 %v1941_v7, %s10362_s19 }
 0x1ff   : > { %2019 = vrot.lane.b32.xlu1 %v1942_v8, %s10362_s19 }
 0x200   : > { %v1648_v15 = vpop.permute.xlu0 %1647 }
 0x201   : > { %v1650_v16 = vpop.permute.xlu1 %1649  ;;  %1724 = vst.msk [vmem:[#allocation3 + $0xa0] sm:$0xff] %vm1703_vm7, %v1648_v15 }
 0x202   : > { %1725 = vst.msk [vmem:[#allocation3 + $0xa8] sm:$0xff] %vm1703_vm7, %v1650_v16  ;;  %2021 = vrot.lane.b32.xlu0 %v1943_v11, %s10362_s19 }
 0x203   : > { %2023 = vrot.lane.b32.xlu1 %v1944_v12, %s10362_s19 }
 0x204   : > { %v1652_v23 = vpop.permute.xlu0 %1651 }
 0x205   : > { %v1654_v24 = vpop.permute.xlu1 %1653  ;;  %1726 = vst.msk [vmem:[#allocation3 + $0xb0] sm:$0xff] %vm1703_vm7, %v1652_v23 }
 0x206   : > { %1727 = vst.msk [vmem:[#allocation3 + $0xb8] sm:$0xff] %vm1703_vm7, %v1654_v24  ;;  %2025 = vrot.lane.b32.xlu0 %v1945_v19, %s10362_s19 }
 0x207   : > { %2027 = vrot.lane.b32.xlu1 %v1946_v20, %s10362_s19 }
 0x208   : > { %v1656_v0 = vpop.permute.xlu0 %1655 }
 0x209   : > { %v1658_v36 = vpop.permute.xlu1 %1657  ;;  %1728 = vst.msk [vmem:[#allocation3 + $0xc0] sm:$0xff] %vm1703_vm7, %v1656_v0 }
 0x20a   : > { %1729 = vst.msk [vmem:[#allocation3 + $0xc8] sm:$0xff] %vm1703_vm7, %v1658_v36  ;;  %2029 = vrot.lane.b32.xlu0 %v1947_v31, %s10362_s19 }
 0x20b   : > { %2031 = vrot.lane.b32.xlu1 %v1948_v45, %s10362_s19 }
 0x20c   : > { %v1660_v53 = vpop.permute.xlu0 %1659 }
 0x20d   : > { %v1662_v49 = vpop.permute.xlu1 %1661  ;;  %1730 = vst.msk [vmem:[#allocation3 + $0xd0] sm:$0xff] %vm1703_vm7, %v1660_v53 }
 0x20e   : > { %1731 = vst.msk [vmem:[#allocation3 + $0xd8] sm:$0xff] %vm1703_vm7, %v1662_v49  ;;  %2033 = vrot.lane.b32.xlu0 %v1949_v46, %s10362_s19 }
 0x20f   : > { %2035 = vrot.lane.b32.xlu1 %v1950_v52, %s10362_s19 }
 0x210   : > { %v1664_v62 = vpop.permute.xlu0 %1663 }
 0x211   : > { %v1666_v13 = vpop.permute.xlu1 %1665  ;;  %1732 = vst.msk [vmem:[#allocation3 + $0xe0] sm:$0xff] %vm1703_vm7, %v1664_v62 }
 0x212   : > { %1733 = vst.msk [vmem:[#allocation3 + $0xe8] sm:$0xff] %vm1703_vm7, %v1666_v13  ;;  %2037 = vrot.lane.b32.xlu0 %v1951_v50, %s10362_s19 }
 0x213   : > { %2039 = vrot.lane.b32.xlu1 %v1952_v61, %s10362_s19 }
 0x214   : > { %v1668_v14 = vpop.permute.xlu0 %1667 }
 0x215   : > { %v1670_v42 = vpop.permute.xlu1 %1669  ;;  %1734 = vst.msk [vmem:[#allocation3 + $0xf0] sm:$0xff] %vm1703_vm7, %v1668_v14 }
 0x216   : > { %1735 = vst.msk [vmem:[#allocation3 + $0xf8] sm:$0xff] %vm1703_vm7, %v1670_v42  ;;  %2041 = vrot.lane.b32.xlu0 %v11237_v47, %s10362_s19 }
 0x217   : > { %2043 = vrot.lane.b32.xlu1 %v11239_v48, %s10362_s19  ;;  %v1959_v48 = vld [vmem:[#allocation2 + $0x17a] sm:$0xff] }
 0x218   : > { %v1801_v43 = vpop.permute.xlu0 %1800 }
 0x219   : > { %v1803_v17 = vpop.permute.xlu1 %1802  ;;  %1897 = vst.msk [vmem:[#allocation3] sm:$0xff] %vm1896_vm8, %v1801_v43 }
 0x21a   : > { %1898 = vst.msk [vmem:[#allocation3 + $0x8] sm:$0xff] %vm1896_vm8, %v1803_v17  ;;  %2045 = vrot.lane.b32.xlu0 %v11247_v41, %s10362_s19 }
 0x21b   : > { %2047 = vrot.lane.b32.xlu1 %v11249_v40, %s10362_s19 }
 0x21c   : > { %v1805_v22 = vpop.permute.xlu0 %1804 }
 0x21d   : > { %v1807_v47 = vpop.permute.xlu1 %1806  ;;  %1899 = vst.msk [vmem:[#allocation3 + $0x10] sm:$0xff] %vm1896_vm8, %v1805_v22 }
 0x21e   : > { %1900 = vst.msk [vmem:[#allocation3 + $0x18] sm:$0xff] %vm1896_vm8, %v1807_v47  ;;  %2049 = vrot.lane.b32.xlu0 %v1957_v18, %s10362_s19 }
 0x21f   : > { %2051 = vrot.lane.b32.xlu1 %v1958_v21, %s10362_s19 }
 0x220   : > { %v1809_v44 = vpop.permute.xlu0 %1808 }
 0x221   : > { %v1811_v57 = vpop.permute.xlu1 %1810  ;;  %1901 = vst.msk [vmem:[#allocation3 + $0x20] sm:$0xff] %vm1896_vm8, %v1809_v44 }
 0x222   : > { %1902 = vst.msk [vmem:[#allocation3 + $0x28] sm:$0xff] %vm1896_vm8, %v1811_v57  ;;  %2053 = vrot.lane.b32.xlu0 %v1959_v48, %s10362_s19 }
 0x223   : > { %2055 = vrot.lane.b32.xlu1 %v1960_v29, %s10362_s19 }
 0x224   : > { %v1813_v41 = vpop.permute.xlu0 %1812 }
 0x225   : > { %v1815_v40 = vpop.permute.xlu1 %1814  ;;  %1903 = vst.msk [vmem:[#allocation3 + $0x30] sm:$0xff] %vm1896_vm8, %v1813_v41 }
 0x226   : > { %1904 = vst.msk [vmem:[#allocation3 + $0x38] sm:$0xff] %vm1896_vm8, %v1815_v40 }
 0x228   : > { %v1817_v30 = vpop.permute.xlu0 %1816 }
 0x229   : > { %v1819_v37 = vpop.permute.xlu1 %1818  ;;  %1905 = vst.msk [vmem:[#allocation3 + $0x40] sm:$0xff] %vm1896_vm8, %v1817_v30 }
 0x22a   : > { %1906 = vst.msk [vmem:[#allocation3 + $0x48] sm:$0xff] %vm1896_vm8, %v1819_v37 }
 0x22c   : > { %v1821_v39 = vpop.permute.xlu0 %1820 }
 0x22d   : > { %v1823_v59 = vpop.permute.xlu1 %1822  ;;  %1907 = vst.msk [vmem:[#allocation3 + $0x50] sm:$0xff] %vm1896_vm8, %v1821_v39 }
 0x22e   : > { %1908 = vst.msk [vmem:[#allocation3 + $0x58] sm:$0xff] %vm1896_vm8, %v1823_v59 }
 0x230   : > { %v1825_v60 = vpop.permute.xlu0 %1824 }
 0x231   : > { %v1827_v58 = vpop.permute.xlu1 %1826  ;;  %1909 = vst.msk [vmem:[#allocation3 + $0x60] sm:$0xff] %vm1896_vm8, %v1825_v60 }
 0x232   : > { %1910 = vst.msk [vmem:[#allocation3 + $0x68] sm:$0xff] %vm1896_vm8, %v1827_v58 }
 0x234   : > { %v1829_v25 = vpop.permute.xlu0 %1828 }
 0x235   : > { %v1831_v32 = vpop.permute.xlu1 %1830  ;;  %1911 = vst.msk [vmem:[#allocation3 + $0x70] sm:$0xff] %vm1896_vm8, %v1829_v25 }
 0x236   : > { %1912 = vst.msk [vmem:[#allocation3 + $0x78] sm:$0xff] %vm1896_vm8, %v1831_v32 }
 0x238   : > { %v1833_v26 = vpop.permute.xlu0 %1832 }
 0x239   : > { %v1835_v27 = vpop.permute.xlu1 %1834  ;;  %1913 = vst.msk [vmem:[#allocation3 + $0x80] sm:$0xff] %vm1896_vm8, %v1833_v26 }
 0x23a   : > { %1914 = vst.msk [vmem:[#allocation3 + $0x88] sm:$0xff] %vm1896_vm8, %v1835_v27 }
 0x23c   : > { %v1837_v28 = vpop.permute.xlu0 %1836 }
 0x23d   : > { %v1839_v33 = vpop.permute.xlu1 %1838  ;;  %1915 = vst.msk [vmem:[#allocation3 + $0x90] sm:$0xff] %vm1896_vm8, %v1837_v28 }
 0x23e   : > { %1916 = vst.msk [vmem:[#allocation3 + $0x98] sm:$0xff] %vm1896_vm8, %v1839_v33 }
 0x240   : > { %v1841_v34 = vpop.permute.xlu0 %1840 }
 0x241   : > { %v1843_v35 = vpop.permute.xlu1 %1842  ;;  %1917 = vst.msk [vmem:[#allocation3 + $0xa0] sm:$0xff] %vm1896_vm8, %v1841_v34 }
 0x242   : > { %1918 = vst.msk [vmem:[#allocation3 + $0xa8] sm:$0xff] %vm1896_vm8, %v1843_v35 }
 0x244   : > { %v1845_v38 = vpop.permute.xlu0 %1844 }
 0x245   : > { %v1847_v51 = vpop.permute.xlu1 %1846  ;;  %1919 = vst.msk [vmem:[#allocation3 + $0xb0] sm:$0xff] %vm1896_vm8, %v1845_v38 }
 0x246   : > { %1920 = vst.msk [vmem:[#allocation3 + $0xb8] sm:$0xff] %vm1896_vm8, %v1847_v51 }
 0x248   : > { %v1849_v54 = vpop.permute.xlu0 %1848 }
 0x249   : > { %v1851_v55 = vpop.permute.xlu1 %1850  ;;  %1921 = vst.msk [vmem:[#allocation3 + $0xc0] sm:$0xff] %vm1896_vm8, %v1849_v54 }
 0x24a   : > { %1922 = vst.msk [vmem:[#allocation3 + $0xc8] sm:$0xff] %vm1896_vm8, %v1851_v55 }
 0x24c   : > { %v1853_v56 = vpop.permute.xlu0 %1852 }
 0x24d   : > { %v1855_v63 = vpop.permute.xlu1 %1854  ;;  %1923 = vst.msk [vmem:[#allocation3 + $0xd0] sm:$0xff] %vm1896_vm8, %v1853_v56 }
 0x24e   : > { %1924 = vst.msk [vmem:[#allocation3 + $0xd8] sm:$0xff] %vm1896_vm8, %v1855_v63 }
 0x250   : > { %v1857_v1 = vpop.permute.xlu0 %1856 }
 0x251   : > { %v1859_v2 = vpop.permute.xlu1 %1858  ;;  %1925 = vst.msk [vmem:[#allocation3 + $0xe0] sm:$0xff] %vm1896_vm8, %v1857_v1 }
 0x252   : > { %1926 = vst.msk [vmem:[#allocation3 + $0xe8] sm:$0xff] %vm1896_vm8, %v1859_v2 }
 0x254   : > { %v1861_v3 = vpop.permute.xlu0 %1860 }
 0x255   : > { %v1863_v4 = vpop.permute.xlu1 %1862  ;;  %1927 = vst.msk [vmem:[#allocation3 + $0xf0] sm:$0xff] %vm1896_vm8, %v1861_v3 }
 0x256   : > { %1928 = vst.msk [vmem:[#allocation3 + $0xf8] sm:$0xff] %vm1896_vm8, %v1863_v4 }
 0x258   : > { %v1994_v5 = vpop.permute.xlu0 %1993 }
 0x259   : > { %v1996_v6 = vpop.permute.xlu1 %1995  ;;  %2090 = vst.msk [vmem:[#allocation3] sm:$0xff] %vm2089_vm9, %v1994_v5  ;;  %v11605_v5 = vld [vmem:[%s15451_s4] ss:$0 sm:$0xff] }
 0x25a   : > { %2091 = vst.msk [vmem:[#allocation3 + $0x8] sm:$0xff] %vm2089_vm9, %v1996_v6 }
 0x25c   : > { %v1998_v7 = vpop.permute.xlu0 %1997 }
 0x25d   : > { %v2000_v8 = vpop.permute.xlu1 %1999  ;;  %2092 = vst.msk [vmem:[#allocation3 + $0x10] sm:$0xff] %vm2089_vm9, %v1998_v7 }
 0x25e   : > { %2093 = vst.msk [vmem:[#allocation3 + $0x18] sm:$0xff] %vm2089_vm9, %v2000_v8 }
 0x260   : > { %v2002_v9 = vpop.permute.xlu0 %2001  ;;  %v2122_v11 = vld [vmem:[#allocation3] sm:$0xff] }
 0x261   : > { %v2004_v10 = vpop.permute.xlu1 %2003  ;;  %v2123_v12 = vld [vmem:[#allocation3 + $0x8] sm:$0xff]  ;;  %2094 = vst.msk [vmem:[#allocation3 + $0x20] sm:$0xff] %vm2089_vm9, %v2002_v9  ;;  %10162 = vmatprep.mubr.msk.f32.mxu0 %vm2170_vm10, %v2122_v11 }
 0x262   : > { %2095 = vst.msk [vmem:[#allocation3 + $0x28] sm:$0xff] %vm2089_vm9, %v2004_v10  ;;  %10163 = vmatmul.mubr.msk.f32.vlgmr.msra.gmra.mrb[0].mxu0 %vm2170_vm10, %v2123_v12 }
 0x264   : > { %v2006_v15 = vpop.permute.xlu0 %2005  ;;  %v2124_v19 = vld [vmem:[#allocation3 + $0x10] sm:$0xff] }
 0x265   : > { %v2008_v16 = vpop.permute.xlu1 %2007  ;;  %v2125_v20 = vld [vmem:[#allocation3 + $0x18] sm:$0xff]  ;;  %2096 = vst.msk [vmem:[#allocation3 + $0x30] sm:$0xff] %vm2089_vm9, %v2006_v15  ;;  %10165 = vmatprep.mubr.msk.f32.mxu0 %vm2170_vm10, %v2124_v19 }
 0x266   : > { %2097 = vst.msk [vmem:[#allocation3 + $0x38] sm:$0xff] %vm2089_vm9, %v2008_v16  ;;  %10166 = vmatmul.mubr.msk.f32.gmra.mrb[2].mxu0 %vm2170_vm10, %v2125_v20 }
 0x268   : > { %v2010_v23 = vpop.permute.xlu0 %2009  ;;  %v2126_v31 = vld [vmem:[#allocation3 + $0x20] sm:$0xff] }
 0x269   : > { %v2012_v24 = vpop.permute.xlu1 %2011  ;;  %v2127_v45 = vld [vmem:[#allocation3 + $0x28] sm:$0xff]  ;;  %2098 = vst.msk [vmem:[#allocation3 + $0x40] sm:$0xff] %vm2089_vm9, %v2010_v23  ;;  %10168 = vmatprep.mubr.msk.f32.mxu0 %vm2170_vm10, %v2126_v31 }
 0x26a   : > { %2099 = vst.msk [vmem:[#allocation3 + $0x48] sm:$0xff] %vm2089_vm9, %v2012_v24  ;;  %10169 = vmatmul.mubr.msk.f32.gmra.mrb[4].mxu0 %vm2170_vm10, %v2127_v45 }
 0x26c   : > { %v2014_v0 = vpop.permute.xlu0 %2013  ;;  %v2128_v46 = vld [vmem:[#allocation3 + $0x30] sm:$0xff] }
 0x26d   : > { %v2016_v36 = vpop.permute.xlu1 %2015  ;;  %v2129_v52 = vld [vmem:[#allocation3 + $0x38] sm:$0xff]  ;;  %2100 = vst.msk [vmem:[#allocation3 + $0x50] sm:$0xff] %vm2089_vm9, %v2014_v0  ;;  %10171 = vmatprep.mubr.msk.f32.mxu0 %vm2170_vm10, %v2128_v46 }
 0x26e   : > { %2101 = vst.msk [vmem:[#allocation3 + $0x58] sm:$0xff] %vm2089_vm9, %v2016_v36  ;;  %10172 = vmatmul.mubr.msk.f32.gmra.mrb[6].mxu0 %vm2170_vm10, %v2129_v52 }
 0x270   : > { %v2018_v53 = vpop.permute.xlu0 %2017  ;;  %v2130_v50 = vld [vmem:[#allocation3 + $0x40] sm:$0xff] }
 0x271   : > { %v2020_v49 = vpop.permute.xlu1 %2019  ;;  %v2131_v61 = vld [vmem:[#allocation3 + $0x48] sm:$0xff]  ;;  %2102 = vst.msk [vmem:[#allocation3 + $0x60] sm:$0xff] %vm2089_vm9, %v2018_v53  ;;  %10174 = vmatprep.mubr.msk.f32.mxu0 %vm2170_vm10, %v2130_v50 }
 0x272   : > { %2103 = vst.msk [vmem:[#allocation3 + $0x68] sm:$0xff] %vm2089_vm9, %v2020_v49  ;;  %10175 = vmatmul.mubr.msk.f32.gmra.mrb[8].mxu0 %vm2170_vm10, %v2131_v61 }
 0x274   : > { %v2022_v62 = vpop.permute.xlu0 %2021  ;;  %v2132_v14 = vld [vmem:[#allocation3 + $0x50] sm:$0xff] }
 0x275   : > { %v2024_v13 = vpop.permute.xlu1 %2023  ;;  %v2133_v42 = vld [vmem:[#allocation3 + $0x58] sm:$0xff]  ;;  %2104 = vst.msk [vmem:[#allocation3 + $0x70] sm:$0xff] %vm2089_vm9, %v2022_v62  ;;  %10177 = vmatprep.mubr.msk.f32.mxu0 %vm2170_vm10, %v2132_v14 }
 0x276   : > { %2105 = vst.msk [vmem:[#allocation3 + $0x78] sm:$0xff] %vm2089_vm9, %v2024_v13  ;;  %10178 = vmatmul.mubr.msk.f32.gmra.mrb[10].mxu0 %vm2170_vm10, %v2133_v42 }
 0x278   : > { %v2026_v43 = vpop.permute.xlu0 %2025  ;;  %v2134_v18 = vld [vmem:[#allocation3 + $0x60] sm:$0xff] }
 0x279   : > { %v2028_v17 = vpop.permute.xlu1 %2027  ;;  %v2135_v21 = vld [vmem:[#allocation3 + $0x68] sm:$0xff]  ;;  %2106 = vst.msk [vmem:[#allocation3 + $0x80] sm:$0xff] %vm2089_vm9, %v2026_v43  ;;  %10180 = vmatprep.mubr.msk.f32.mxu0 %vm2170_vm10, %v2134_v18 }
 0x27a   : > { %2107 = vst.msk [vmem:[#allocation3 + $0x88] sm:$0xff] %vm2089_vm9, %v2028_v17  ;;  %10181 = vmatmul.mubr.msk.f32.gmra.mrb[12].mxu0 %vm2170_vm10, %v2135_v21 }
 0x27c   : > { %v2030_v22 = vpop.permute.xlu0 %2029  ;;  %v2136_v48 = vld [vmem:[#allocation3 + $0x70] sm:$0xff] }
 0x27d   : > { %v2032_v47 = vpop.permute.xlu1 %2031  ;;  %v2137_v29 = vld [vmem:[#allocation3 + $0x78] sm:$0xff]  ;;  %2108 = vst.msk [vmem:[#allocation3 + $0x90] sm:$0xff] %vm2089_vm9, %v2030_v22  ;;  %10183 = vmatprep.mubr.msk.f32.mxu0 %vm2170_vm10, %v2136_v48 }
 0x27e   : > { %2109 = vst.msk [vmem:[#allocation3 + $0x98] sm:$0xff] %vm2089_vm9, %v2032_v47  ;;  %10184 = vmatmul.mubr.msk.f32.gmra.mrb[14].mxu0 %vm2170_vm10, %v2137_v29 }
 0x280   : > { %v2034_v44 = vpop.permute.xlu0 %2033  ;;  %v2138_v41 = vld [vmem:[#allocation3 + $0x80] sm:$0xff] }
 0x281   : > { %v2036_v57 = vpop.permute.xlu1 %2035  ;;  %v2139_v40 = vld [vmem:[#allocation3 + $0x88] sm:$0xff]  ;;  %2110 = vst.msk [vmem:[#allocation3 + $0xa0] sm:$0xff] %vm2089_vm9, %v2034_v44  ;;  %10186 = vmatprep.mubr.msk.f32.mxu1 %vm2170_vm10, %v2138_v41 }
 0x282   : > { %2111 = vst.msk [vmem:[#allocation3 + $0xa8] sm:$0xff] %vm2089_vm9, %v2036_v57  ;;  %10187 = vmatmul.mubr.msk.f32.vlgmr.msra.gmra.mrb[0].mxu1 %vm2170_vm10, %v2139_v40 }
 0x284   : > { %v2038_v30 = vpop.permute.xlu0 %2037  ;;  %v2140_v39 = vld [vmem:[#allocation3 + $0x90] sm:$0xff] }
 0x285   : > { %v2040_v37 = vpop.permute.xlu1 %2039  ;;  %v2141_v59 = vld [vmem:[#allocation3 + $0x98] sm:$0xff]  ;;  %2112 = vst.msk [vmem:[#allocation3 + $0xb0] sm:$0xff] %vm2089_vm9, %v2038_v30  ;;  %10189 = vmatprep.mubr.msk.f32.mxu1 %vm2170_vm10, %v2140_v39 }
 0x286   : > { %2113 = vst.msk [vmem:[#allocation3 + $0xb8] sm:$0xff] %vm2089_vm9, %v2040_v37  ;;  %10190 = vmatmul.mubr.msk.f32.gmra.mrb[2].mxu1 %vm2170_vm10, %v2141_v59 }
 0x288   : > { %v2042_v60 = vpop.permute.xlu0 %2041  ;;  %v2142_v25 = vld [vmem:[#allocation3 + $0xa0] sm:$0xff] }
 0x289   : > { %v2044_v58 = vpop.permute.xlu1 %2043  ;;  %v2143_v32 = vld [vmem:[#allocation3 + $0xa8] sm:$0xff]  ;;  %2114 = vst.msk [vmem:[#allocation3 + $0xc0] sm:$0xff] %vm2089_vm9, %v2042_v60  ;;  %10192 = vmatprep.mubr.msk.f32.mxu1 %vm2170_vm10, %v2142_v25 }
 0x28a   : > { %2115 = vst.msk [vmem:[#allocation3 + $0xc8] sm:$0xff] %vm2089_vm9, %v2044_v58  ;;  %10193 = vmatmul.mubr.msk.f32.gmra.mrb[4].mxu1 %vm2170_vm10, %v2143_v32 }
 0x28c   : > { %v2046_v26 = vpop.permute.xlu0 %2045  ;;  %v2144_v28 = vld [vmem:[#allocation3 + $0xb0] sm:$0xff] }
 0x28d   : > { %v2048_v27 = vpop.permute.xlu1 %2047  ;;  %v2145_v33 = vld [vmem:[#allocation3 + $0xb8] sm:$0xff]  ;;  %2116 = vst.msk [vmem:[#allocation3 + $0xd0] sm:$0xff] %vm2089_vm9, %v2046_v26  ;;  %10195 = vmatprep.mubr.msk.f32.mxu1 %vm2170_vm10, %v2144_v28 }
 0x28e   : > { %2117 = vst.msk [vmem:[#allocation3 + $0xd8] sm:$0xff] %vm2089_vm9, %v2048_v27  ;;  %10196 = vmatmul.mubr.msk.f32.gmra.mrb[6].mxu1 %vm2170_vm10, %v2145_v33 }
 0x290   : > { %v2050_v34 = vpop.permute.xlu0 %2049  ;;  %v2146_v38 = vld [vmem:[#allocation3 + $0xc0] sm:$0xff] }
 0x291   : > { %v2052_v35 = vpop.permute.xlu1 %2051  ;;  %v2147_v51 = vld [vmem:[#allocation3 + $0xc8] sm:$0xff]  ;;  %2118 = vst.msk [vmem:[#allocation3 + $0xe0] sm:$0xff] %vm2089_vm9, %v2050_v34  ;;  %10198 = vmatprep.mubr.msk.f32.mxu1 %vm2170_vm10, %v2146_v38 }
 0x292   : > { %2119 = vst.msk [vmem:[#allocation3 + $0xe8] sm:$0xff] %vm2089_vm9, %v2052_v35  ;;  %10199 = vmatmul.mubr.msk.f32.gmra.mrb[8].mxu1 %vm2170_vm10, %v2147_v51 }
 0x294   : > { %v2148_v54 = vld [vmem:[#allocation3 + $0xd0] sm:$0xff]  ;;  %v2054_v56 = vpop.permute.xlu0 %2053 }
 0x295   : > { %v2149_v55 = vld [vmem:[#allocation3 + $0xd8] sm:$0xff]  ;;  %v2056_v63 = vpop.permute.xlu1 %2055  ;;  %10201 = vmatprep.mubr.msk.f32.mxu1 %vm2170_vm10, %v2148_v54  ;;  %2120 = vst.msk [vmem:[#allocation3 + $0xf0] sm:$0xff] %vm2089_vm9, %v2054_v56 }
 0x296   : > { %2121 = vst.msk [vmem:[#allocation3 + $0xf8] sm:$0xff] %vm2089_vm9, %v2056_v63  ;;  %10202 = vmatmul.mubr.msk.f32.gmra.mrb[10].mxu1 %vm2170_vm10, %v2149_v55 }
 0x298   : > { %v2150_v1 = vld [vmem:[#allocation3 + $0xe0] sm:$0xff] }
 0x299   : > { %v2151_v2 = vld [vmem:[#allocation3 + $0xe8] sm:$0xff]  ;;  %10204 = vmatprep.mubr.msk.f32.mxu1 %vm2170_vm10, %v2150_v1 }
 0x29a   : > { %10205 = vmatmul.mubr.msk.f32.gmra.mrb[12].mxu1 %vm2170_vm10, %v2151_v2 }
 0x29c   : > { %v2152_v3 = vld [vmem:[#allocation3 + $0xf0] sm:$0xff] }
 0x29d   : > { %v2153_v4 = vld [vmem:[#allocation3 + $0xf8] sm:$0xff]  ;;  %10207 = vmatprep.mubr.msk.f32.mxu1 %vm2170_vm10, %v2152_v3 }
 0x29e   : > { %10208 = vmatmul.mubr.msk.f32.gmra.mrb[14].mxu1 %vm2170_vm10, %v2153_v4 }
 0x335   : > { %v10164_v6 = vpop.f32.mrb[0].mxu0 }
 0x336   : > { %v2339_v7 = vadd.f32 %v10164_v6, %v11605_v5  ;;  %v2333_v8 = vpop.f32.mrb[1].mxu0 }
 0x337   : > { %v2334_v9 = vadd.f32 %v11605_v5, %v2333_v8 }
 0x338   : > { %v11609_v10 = vmax.f32 %v2339_v7, 0.0 }
 0x339   : > { %v11611_v11 = vmax.f32 %v2334_v9, 0.0  ;;  %v10167_v12 = vpop.f32.mrb[2].mxu0 }
 0x33a   : > { %v2349_v15 = vadd.f32 %v10167_v12, %v11605_v5  ;;  %2558 = vrot.lane.b32.xlu1 %v11609_v10, %s10363_s6  ;;  %v2343_v16 = vpop.f32.mrb[3].mxu0 }
 0x33b   : > { %v2344_v19 = vadd.f32 %v11605_v5, %v2343_v16  ;;  %2556 = vrot.lane.b32.xlu0 %v11611_v11, %s10363_s6 }
 0x33c   : > { %v11619_v20 = vmax.f32 %v2349_v15, 0.0 }
 0x33d   : > { %v11621_v23 = vmax.f32 %v2344_v19, 0.0  ;;  %v10170_v24 = vpop.f32.mrb[4].mxu0 }
 0x33e   : > { %15601 = vst [vmem:[#allocation4_spill] sm:$0xff] %v11619_v20  ;;  %v2359_v31 = vadd.f32 %v10170_v24, %v11605_v5  ;;  %2562 = vrot.lane.b32.xlu1 %v11619_v20, %s10363_s6  ;;  %v2353_v45 = vpop.f32.mrb[5].mxu0 }
 0x33f   : > { %15602 = vst [vmem:[#allocation5_spill] sm:$0xff] %v11621_v23  ;;  %v2354_v0 = vadd.f32 %v11605_v5, %v2353_v45  ;;  %2560 = vrot.lane.b32.xlu0 %v11621_v23, %s10363_s6 }
 0x340   : > { %v11629_v36 = vmax.f32 %v2359_v31, 0.0 }
 0x341   : > { %v11631_v46 = vmax.f32 %v2354_v0, 0.0  ;;  %v10173_v52 = vpop.f32.mrb[6].mxu0 }
 0x342   : > { %v2369_v53 = vadd.f32 %v10173_v52, %v11605_v5  ;;  %2566 = vrot.lane.b32.xlu1 %v11629_v36, %s10363_s6  ;;  %v2363_v49 = vpop.f32.mrb[7].mxu0 }
 0x343   : > { %v2364_v50 = vadd.f32 %v11605_v5, %v2363_v49  ;;  %2564 = vrot.lane.b32.xlu0 %v11631_v46, %s10363_s6 }
 0x344   : > { %v11639_v61 = vmax.f32 %v2369_v53, 0.0 }
 0x345   : > { %v11641_v62 = vmax.f32 %v2364_v50, 0.0  ;;  %v10176_v13 = vpop.f32.mrb[8].mxu0 }
 0x346   : > { %15603 = vst [vmem:[#allocation6_spill] sm:$0xff] %v11639_v61  ;;  %v2379_v14 = vadd.f32 %v10176_v13, %v11605_v5  ;;  %2570 = vrot.lane.b32.xlu1 %v11639_v61, %s10363_s6  ;;  %v2373_v42 = vpop.f32.mrb[9].mxu0 }
 0x347   : > { %15604 = vst [vmem:[#allocation7_spill] sm:$0xff] %v11641_v62  ;;  %v2374_v43 = vadd.f32 %v11605_v5, %v2373_v42  ;;  %2568 = vrot.lane.b32.xlu0 %v11641_v62, %s10363_s6 }
 0x348   : > { %v11649_v17 = vmax.f32 %v2379_v14, 0.0 }
 0x349   : > { %v11651_v18 = vmax.f32 %v2374_v43, 0.0  ;;  %v10179_v21 = vpop.f32.mrb[10].mxu0 }
 0x34a   : > { %v2389_v22 = vadd.f32 %v10179_v21, %v11605_v5  ;;  %2574 = vrot.lane.b32.xlu1 %v11649_v17, %s10363_s6  ;;  %v2383_v47 = vpop.f32.mrb[11].mxu0 }
 0x34b   : > { %v2384_v48 = vadd.f32 %v11605_v5, %v2383_v47  ;;  %2572 = vrot.lane.b32.xlu0 %v11651_v18, %s10363_s6 }
 0x34c   : > { %v11659_v29 = vmax.f32 %v2389_v22, 0.0 }
 0x34d   : > { %v11661_v44 = vmax.f32 %v2384_v48, 0.0  ;;  %v10182_v57 = vpop.f32.mrb[12].mxu0 }
 0x34e   : > { %15605 = vst [vmem:[#allocation8_spill] sm:$0xff] %v11659_v29  ;;  %v2399_v41 = vadd.f32 %v10182_v57, %v11605_v5  ;;  %2578 = vrot.lane.b32.xlu1 %v11659_v29, %s10363_s6  ;;  %v2393_v40 = vpop.f32.mrb[13].mxu0 }
 0x34f   : > { %15606 = vst [vmem:[#allocation9_spill] sm:$0xff] %v11661_v44  ;;  %v2394_v30 = vadd.f32 %v11605_v5, %v2393_v40  ;;  %2576 = vrot.lane.b32.xlu0 %v11661_v44, %s10363_s6 }
 0x350   : > { %v11669_v37 = vmax.f32 %v2399_v41, 0.0 }
 0x351   : > { %v11671_v39 = vmax.f32 %v2394_v30, 0.0  ;;  %v10185_v59 = vpop.f32.mrb[14].mxu0 }
 0x352   : > { %v2409_v60 = vadd.f32 %v10185_v59, %v11605_v5  ;;  %2582 = vrot.lane.b32.xlu1 %v11669_v37, %s10363_s6  ;;  %v2403_v58 = vpop.f32.mrb[15].mxu0 }
 0x353   : > { %v2404_v25 = vadd.f32 %v11605_v5, %v2403_v58  ;;  %2580 = vrot.lane.b32.xlu0 %v11671_v39, %s10363_s6 }
 0x354   : > { %v11679_v32 = vmax.f32 %v2409_v60, 0.0 }
 0x355   : > { %v11681_v26 = vmax.f32 %v2404_v25, 0.0  ;;  %v10188_v27 = vpop.f32.mrb[0].mxu1 }
 0x356   : > { %15607 = vst [vmem:[#allocation10_spill] sm:$0xff] %v11679_v32  ;;  %v2419_v28 = vadd.f32 %v10188_v27, %v11605_v5  ;;  %v2413_v33 = vpop.f32.mrb[1].mxu1  ;;  %2586 = vrot.lane.b32.xlu1 %v11679_v32, %s10363_s6 }
 0x357   : > { %15608 = vst [vmem:[#allocation11_spill] sm:$0xff] %v11681_v26  ;;  %v2414_v34 = vadd.f32 %v11605_v5, %v2413_v33  ;;  %2584 = vrot.lane.b32.xlu0 %v11681_v26, %s10363_s6 }
 0x358   : > { %v11689_v35 = vmax.f32 %v2419_v28, 0.0  ;;  %v10364_v28 = vmov 1983009808  }
 0x359   : > { %v11691_v38 = vmax.f32 %v2414_v34, 0.0  ;;  %v10191_v51 = vpop.f32.mrb[2].mxu1  ;;  %v2654_v33 = vunpack.c.l.s4 %v10364_v28  ;;  %v2656_v34 = vlaneseq }
 0x35a   : > { %v2429_v54 = vadd.f32 %v10191_v51, %v11605_v5  ;;  %v2423_v55 = vpop.f32.mrb[3].mxu1  ;;  %2590 = vrot.lane.b32.xlu1 %v11689_v35, %s10363_s6 }
 0x35b   : > { %v2424_v56 = vadd.f32 %v11605_v5, %v2423_v55  ;;  %2588 = vrot.lane.b32.xlu0 %v11691_v38, %s10363_s6  ;;  %v2657_v55 = vshrl.u32 %v2656_v34, 7 }
 0x35c   : > { %v11699_v63 = vmax.f32 %v2429_v54, 0.0  ;;  %v2655_v54 = vunpack.c.0.s8 %v2654_v33 }
 0x35d   : > { %v11701_v1 = vmax.f32 %v2424_v56, 0.0  ;;  %v10194_v2 = vpop.f32.mrb[4].mxu1  ;;  %v15617_v56 = vmov 0.0  }
 0x35e   : > { %15609 = vst [vmem:[#allocation12_spill] sm:$0xff] %v11699_v63  ;;  %v2439_v3 = vadd.f32 %v10194_v2, %v11605_v5  ;;  %v2433_v4 = vpop.f32.mrb[5].mxu1  ;;  %2594 = vrot.lane.b32.xlu1 %v11699_v63, %s10363_s6 }
 0x35f   : > { %15610 = vst [vmem:[#allocation13_spill] sm:$0xff] %v11701_v1  ;;  %v2434_v6 = vadd.f32 %v11605_v5, %v2433_v4  ;;  %2592 = vrot.lane.b32.xlu0 %v11701_v1, %s10363_s6  ;;  %v10365_v4 = vmov 1934713408  }
 0x360   : > { %v11709_v7 = vmax.f32 %v2439_v3, 0.0  ;;  %v11768_v3 = vsub.s32 %v2655_v54, %v2657_v55 }
 0x361   : > { %v11711_v8 = vmax.f32 %v2434_v6, 0.0  ;;  %v10197_v9 = vpop.f32.mrb[6].mxu1  ;;  %v2685_v6 = vunpack.c.l.s4 %v10365_v4 }
 0x362   : > { %v2449_v12 = vadd.f32 %v10197_v9, %v11605_v5  ;;  %v2443_v15 = vpop.f32.mrb[7].mxu1  ;;  %2598 = vrot.lane.b32.xlu1 %v11709_v7, %s10363_s6 }
 0x363   : > { %v2444_v16 = vadd.f32 %v11605_v5, %v2443_v15  ;;  %2596 = vrot.lane.b32.xlu0 %v11711_v8, %s10363_s6  ;;  %v2686_v15 = vunpack.c.0.s8 %v2685_v6 }
 0x364   : > { %v11719_v19 = vmax.f32 %v2449_v12, 0.0 }
 0x365   : > { %v11721_v24 = vmax.f32 %v2444_v16, 0.0  ;;  %v10200_v31 = vpop.f32.mrb[8].mxu1 }
 0x366   : > { %15611 = vst [vmem:[#allocation14_spill] sm:$0xff] %v11719_v19  ;;  %v2459_v45 = vadd.f32 %v10200_v31, %v11605_v5  ;;  %v2453_v0 = vpop.f32.mrb[9].mxu1  ;;  %2602 = vrot.lane.b32.xlu1 %v11719_v19, %s10363_s6  ;;  %v2659_v31 = vrot.slane %v11611_v11, %v11768_v3 }
 0x367   : > { %15612 = vst [vmem:[#allocation15_spill] sm:$0xff] %v11721_v24  ;;  %v2454_v52 = vadd.f32 %v11605_v5, %v2453_v0  ;;  %2600 = vrot.lane.b32.xlu0 %v11721_v24, %s10363_s6 }
 0x368   : > { %v11729_v53 = vmax.f32 %v2459_v45, 0.0 }
 0x369   : > { %v11731_v49 = vmax.f32 %v2454_v52, 0.0  ;;  %v10203_v50 = vpop.f32.mrb[10].mxu1  ;;  %v11777_v52 = vsub.s32 %v2686_v15, %v2657_v55  ;;  %v2916_v55 = vcombine.high %v11631_v46, %v15617_v56  ;;  %v2923_v15 = vrot.slane %v11631_v46, %v11768_v3 }
 0x36a   : > { %v2469_v13 = vadd.f32 %v10203_v50, %v11605_v5  ;;  %v2463_v14 = vpop.f32.mrb[11].mxu1  ;;  %2606 = vrot.lane.b32.xlu1 %v11729_v53, %s10363_s6 }
 0x36b   : > { %v2464_v42 = vadd.f32 %v11605_v5, %v2463_v14  ;;  %2604 = vrot.lane.b32.xlu0 %v11731_v49, %s10363_s6  ;;  %v2930_v6 = vrot.slane %v2916_v55, %v11768_v3 }
 0x36c   : > { %v11739_v43 = vmax.f32 %v2469_v13, 0.0 }
 0x36d   : > { %v11741_v21 = vmax.f32 %v2464_v42, 0.0  ;;  %v10206_v22 = vpop.f32.mrb[12].mxu1 }
 0x36e   : > { %15613 = vst [vmem:[#allocation16_spill] sm:$0xff] %v11739_v43  ;;  %v2479_v47 = vadd.f32 %v10206_v22, %v11605_v5  ;;  %v2473_v48 = vpop.f32.mrb[13].mxu1  ;;  %2610 = vrot.lane.b32.xlu1 %v11739_v43, %s10363_s6 }
 0x36f   : > { %15614 = vst [vmem:[#allocation17_spill] sm:$0xff] %v11741_v21  ;;  %v2474_v57 = vadd.f32 %v11605_v5, %v2473_v48  ;;  %2608 = vrot.lane.b32.xlu0 %v11741_v21, %s10363_s6 }
 0x370   : > { %v11749_v41 = vmax.f32 %v2479_v47, 0.0 }
 0x371   : > { %v11751_v40 = vmax.f32 %v2474_v57, 0.0  ;;  %v10209_v30 = vpop.f32.mrb[14].mxu1 }
 0x372   : > { %2614 = vrot.lane.b32.xlu1 %v11749_v41, %s10363_s6  ;;  %v2489_v59 = vadd.f32 %v10209_v30, %v11605_v5  ;;  %v2483_v60 = vpop.f32.mrb[15].mxu1 }
 0x373   : > { %2612 = vrot.lane.b32.xlu0 %v11751_v40, %s10363_s6  ;;  %v2484_v58 = vadd.f32 %v11605_v5, %v2483_v60  ;;  %v2652_v5 = vcombine.high %v11611_v11, %v15617_v56 }
 0x374   : > { %v11759_v25 = vmax.f32 %v2489_v59, 0.0 }
 0x375   : > { %v11761_v27 = vmax.f32 %v2484_v58, 0.0  ;;  %v2666_v12 = vrot.slane %v2652_v5, %v11768_v3 }
 0x376   : > { %15615 = vst [vmem:[#allocation18_spill] sm:$0xff] %v11759_v25  ;;  %2618 = vrot.lane.b32.xlu1 %v11759_v25, %s10363_s6 }
 0x377   : > { %15616 = vst [vmem:[#allocation19_spill] sm:$0xff] %v11761_v27  ;;  %2616 = vrot.lane.b32.xlu0 %v11761_v27, %s10363_s6 }
 0x3ad   : > { %v2557_v51 = vpop.permute.xlu0 %2556 }
 0x3ae   : > { %v2667_v2 = vcombine.high %v2557_v51, %v15617_v56  ;;  %v2674_v16 = vrot.slane %v2557_v51, %v11768_v3 }
 0x3b0   : > { %v2681_v9 = vrot.slane %v2667_v2, %v11768_v3  ;;  %v2682_v50 = vcombine.low %v2659_v31, %v2674_v16  ;;  %v2683_v13 = vcombine.high %v2659_v31, %v2674_v16 }
 0x3b1   : > { %v11783_v48 = vpop.permute.xlu0 %2560 }
 0x3b2   : > { %v2698_v45 = vcombine.low %v2666_v12, %v2681_v9  ;;  %v2699_v0 = vcombine.high %v2666_v12, %v2681_v9  ;;  %v2690_v22 = vrot.slane %v2682_v50, %v11777_v52  ;;  %v2697_v47 = vrot.slane %v2683_v13, %v11777_v52  ;;  %15618 = vst [vmem:[#allocation20_spill] sm:$0xff] %v11783_v48 }
 0x3b4   : > { %v2706_v14 = vrot.slane %v2698_v45, %v11777_v52  ;;  %v2713_v42 = vrot.slane %v2699_v0, %v11777_v52  ;;  %v4764_v59 = vcombine.low %v2690_v22, %v2697_v47  ;;  %v9997_v11 = vcombine.high %v2690_v22, %v2697_v47 }
 0x3b5   : > { %v2565_v28 = vpop.permute.xlu0 %2564 }
 0x3b6   : > { %v4780_v57 = vcombine.low %v2706_v14, %v2713_v42  ;;  %v9998_v30 = vcombine.high %v2706_v14, %v2713_v42  ;;  %v4771_v33 = vrot.slane %v4764_v59, %v11768_v3  ;;  %v4779_v34 = vrot.slane %v9997_v11, %v11768_v3 }
 0x3b7   : > { %v2931_v54 = vcombine.high %v2565_v28, %v15617_v56  ;;  %v2938_v12 = vrot.slane %v2565_v28, %v11768_v3 }
 0x3b8   : > { %v4787_v60 = vrot.slane %v4780_v57, %v11768_v3  ;;  %v4795_v58 = vrot.slane %v9998_v30, %v11768_v3  ;;  %v4796_v2 = vcombine.low %v4771_v33, %v4779_v34 }
 0x3b9   : > { %v2945_v4 = vrot.slane %v2931_v54, %v11768_v3  ;;  %v2946_v50 = vcombine.low %v2923_v15, %v2938_v12  ;;  %v2947_v13 = vcombine.high %v2923_v15, %v2938_v12  ;;  %v11821_v11 = vpop.permute.xlu0 %2568  ;;  %v3180_v12 = vcombine.high %v11651_v18, %v15617_v56 }
 0x3ba   : > { %v4804_v51 = vcombine.low %v4787_v60, %v4795_v58  ;;  %v4803_v9 = vrot.slane %v4796_v2, %v11777_v52  ;;  %15620 = vst [vmem:[#allocation22_spill] sm:$0xff] %v11821_v11 }
 0x3bb   : > { %v2962_v16 = vcombine.low %v2930_v6, %v2945_v4  ;;  %v2963_v31 = vcombine.high %v2930_v6, %v2945_v4  ;;  %v2954_v57 = vrot.slane %v2946_v50, %v11777_v52  ;;  %v2961_v30 = vrot.slane %v2947_v13, %v11777_v52 }
 0x3bc   : > { %v11793_v5 = vrot.slane %v4804_v51, %v11777_v52 }
 0x3bd   : > { %v2970_v22 = vrot.slane %v2962_v16, %v11777_v52  ;;  %v2977_v46 = vrot.slane %v2963_v31, %v11777_v52  ;;  %v4964_v33 = vcombine.low %v2954_v57, %v2961_v30  ;;  %v10005_v34 = vcombine.high %v2954_v57, %v2961_v30  ;;  %v2573_v55 = vpop.permute.xlu0 %2572 }
 0x3be   : > { %v11802_v45 = vcombine.low %v4803_v9, %v11793_v5  ;;  %v4813_v0 = vcombine.high %v4803_v9, %v11793_v5  ;;  %v3195_v9 = vcombine.high %v2573_v55, %v15617_v56  ;;  %v3202_v13 = vrot.slane %v2573_v55, %v11768_v3 }
 0x3bf   : > { %v4980_v60 = vcombine.low %v2970_v22, %v2977_v46  ;;  %v10006_v58 = vcombine.high %v2970_v22, %v2977_v46  ;;  %v4971_v2 = vrot.slane %v4964_v33, %v11768_v3  ;;  %v4979_v4 = vrot.slane %v10005_v34, %v11768_v3 }
 0x3c0   : > { %v11807_v14 = vrot.slane %v11802_v45, %v11768_v3  ;;  %v11810_v42 = vrot.slane %v4813_v0, %v11768_v3  ;;  %v3209_v31 = vrot.slane %v3195_v9, %v11768_v3  ;;  %v3194_v0 = vrot.slane %v3180_v12, %v11768_v3 }
 0x3c1   : > { %v4987_v51 = vrot.slane %v4980_v60, %v11768_v3  ;;  %v4995_v54 = vrot.slane %v10006_v58, %v11768_v3  ;;  %v4996_v15 = vcombine.low %v4971_v2, %v4979_v4  ;;  %v3187_v22 = vrot.slane %v11651_v18, %v11768_v3 }
 0x3c2   : > { %v6394_v47 = vcombine.low %v11807_v14, %v11810_v42  ;;  %v3226_v46 = vcombine.low %v3194_v0, %v3209_v31 }
 0x3c3   : > { %v5004_v6 = vcombine.low %v4987_v51, %v4995_v54  ;;  %v5003_v50 = vrot.slane %v4996_v15, %v11777_v52  ;;  %v3210_v30 = vcombine.low %v3187_v22, %v3202_v13  ;;  %v3211_v60 = vcombine.high %v3187_v22, %v3202_v13  ;;  %v11852_v51 = vpop.permute.xlu0 %2576 }
 0x3c4   : > { %v11819_v59 = vrot.slane %v6394_v47, %v11777_v52  ;;  %v3227_v47 = vcombine.high %v3194_v0, %v3209_v31  ;;  %v3234_v33 = vrot.slane %v3226_v46, %v11777_v52  ;;  %15621 = vst [vmem:[#allocation23_spill] sm:$0xff] %v11852_v51 }
 0x3c5   : > { %v11834_v16 = vrot.slane %v5004_v6, %v11777_v52  ;;  %v3218_v54 = vrot.slane %v3210_v30, %v11777_v52  ;;  %v3225_v55 = vrot.slane %v3211_v60, %v11777_v52 }
 0x3c6   : > { %15619 = vst [vmem:[#allocation21_spill] sm:$0xff] %v11819_v59  ;;  %v6426_v28 = vcombine.high %v11819_v59, %v15617_v56  ;;  %v3241_v34 = vrot.slane %v3227_v47, %v11777_v52 }
 0x3c7   : > { %v11843_v57 = vcombine.low %v5003_v50, %v11834_v16  ;;  %v5013_v58 = vcombine.high %v5003_v50, %v11834_v16  ;;  %v5164_v12 = vcombine.low %v3218_v54, %v3225_v55  ;;  %v10013_v15 = vcombine.high %v3218_v54, %v3225_v55  ;;  %v2581_v31 = vpop.permute.xlu0 %2580 }
 0x3c8   : > { %8484 = vrot.lane.b32.xlu0 %v6426_v28, %s10356_s26  ;;  %v5180_v4 = vcombine.low %v3234_v33, %v3241_v34  ;;  %v10014_v6 = vcombine.high %v3234_v33, %v3241_v34  ;;  %v3459_v60 = vcombine.high %v2581_v31, %v15617_v56  ;;  %v3444_v33 = vcombine.high %v11671_v39, %v15617_v56 }
 0x3c9   : > { %v11848_v28 = vrot.slane %v11843_v57, %v11768_v3  ;;  %v11855_v18 = vrot.slane %v5013_v58, %v11768_v3  ;;  %v5171_v22 = vrot.slane %v5164_v12, %v11768_v3  ;;  %v5179_v46 = vrot.slane %v10013_v15, %v11768_v3 }
 0x3ca   : > { %v5187_v50 = vrot.slane %v5180_v4, %v11768_v3  ;;  %v5195_v13 = vrot.slane %v10014_v6, %v11768_v3  ;;  %v3473_v54 = vrot.slane %v3459_v60, %v11768_v3  ;;  %v3458_v4 = vrot.slane %v3444_v33, %v11768_v3 }
 0x3cb   : > { %v6658_v2 = vcombine.low %v11848_v28, %v11855_v18  ;;  %v11871_v30 = vpop.permute.xlu0 %2584  ;;  %v5196_v58 = vcombine.low %v5171_v22, %v5179_v46  ;;  %v3466_v6 = vrot.slane %v2581_v31, %v11768_v3  ;;  %v3451_v15 = vrot.slane %v11671_v39, %v11768_v3 }
 0x3cc   : > { %v5204_v47 = vcombine.low %v5187_v50, %v5195_v13  ;;  %15623 = vst [vmem:[#allocation25_spill] sm:$0xff] %v11871_v30  ;;  %v3491_v50 = vcombine.high %v3458_v4, %v3473_v54 }
 0x3cd   : > { %v11862_v9 = vrot.slane %v6658_v2, %v11777_v52  ;;  %v5203_v55 = vrot.slane %v5196_v58, %v11777_v52  ;;  %v3474_v46 = vcombine.low %v3451_v15, %v3466_v6 }
 0x3ce   : > { %v11877_v34 = vrot.slane %v5204_v47, %v11777_v52  ;;  %v3475_v47 = vcombine.high %v3451_v15, %v3466_v6  ;;  %v3505_v33 = vrot.slane %v3491_v50, %v11777_v52 }
 0x3cf   : > { %15622 = vst [vmem:[#allocation24_spill] sm:$0xff] %v11862_v9  ;;  %v6690_v0 = vcombine.high %v11862_v9, %v15617_v56  ;;  %v2589_v2 = vpop.permute.xlu0 %2588 }
 0x3d0   : > { %v11884_v12 = vcombine.low %v5203_v55, %v11877_v34  ;;  %v5213_v13 = vcombine.high %v5203_v55, %v11877_v34  ;;  %v3489_v55 = vrot.slane %v3475_v47, %v11777_v52  ;;  %v3723_v50 = vcombine.high %v2589_v2, %v15617_v56 }
 0x3d1   : > { %8486 = vrot.lane.b32.xlu1 %v6690_v0, %s10356_s26  ;;  %v3490_v0 = vcombine.low %v3458_v4, %v3473_v54  ;;  %v3482_v54 = vrot.slane %v3474_v46, %v11777_v52  ;;  %v3708_v47 = vcombine.high %v11691_v38, %v15617_v56 }
 0x3d2   : > { %v11891_v22 = vrot.slane %v11884_v12, %v11768_v3  ;;  %v11896_v31 = vrot.slane %v5213_v13, %v11768_v3 }
 0x3d3   : > { %v11893_v60 = vpop.permute.xlu0 %2592  ;;  %v3498_v58 = vrot.slane %v3490_v0, %v11777_v52  ;;  %v5364_v59 = vcombine.low %v3482_v54, %v3489_v55  ;;  %v10021_v0 = vcombine.high %v3482_v54, %v3489_v55  ;;  %v3722_v55 = vrot.slane %v3708_v47, %v11768_v3 }
 0x3d4   : > { %15624 = vst [vmem:[#allocation26_spill] sm:$0xff] %v11893_v60  ;;  %v6922_v39 = vcombine.low %v11891_v22, %v11896_v31 }
 0x3d5   : > { %v5380_v6 = vcombine.low %v3498_v58, %v3505_v33  ;;  %v10022_v15 = vcombine.high %v3498_v58, %v3505_v33  ;;  %v5379_v58 = vrot.slane %v10021_v0, %v11768_v3  ;;  %v3737_v33 = vrot.slane %v3723_v50, %v11768_v3 }
 0x3d6   : > { %v11905_v4 = vrot.slane %v6922_v39, %v11777_v52  ;;  %v5371_v39 = vrot.slane %v5364_v59, %v11768_v3 }
 0x3d7   : > { %v2597_v9 = vpop.permute.xlu0 %2596  ;;  %v5387_v25 = vrot.slane %v5380_v6, %v11768_v3  ;;  %v5395_v46 = vrot.slane %v10022_v15, %v11768_v3  ;;  %v3715_v6 = vrot.slane %v11691_v38, %v11768_v3  ;;  %v3754_v15 = vcombine.low %v3722_v55, %v3737_v33 }
 0x3d8   : > { %15625 = vst [vmem:[#allocation27_spill] sm:$0xff] %v11905_v4  ;;  %v6954_v13 = vcombine.high %v11905_v4, %v15617_v56  ;;  %v5396_v43 = vcombine.low %v5371_v39, %v5379_v58  ;;  %v3755_v19 = vcombine.high %v3722_v55, %v3737_v33  ;;  %v3972_v33 = vcombine.high %v11711_v8, %v15617_v56 }
 0x3d9   : > { %v5404_v54 = vcombine.low %v5387_v25, %v5395_v46  ;;  %v3762_v25 = vrot.slane %v3754_v15, %v11777_v52  ;;  %v3994_v20 = vrot.slane %v2597_v9, %v11768_v3 }
 0x3da   : > { %8488 = vrot.lane.b32.xlu0 %v6954_v13, %s10356_s26  ;;  %v3730_v13 = vrot.slane %v2589_v2, %v11768_v3  ;;  %v5403_v50 = vrot.slane %v5396_v43, %v11777_v52  ;;  %v3769_v46 = vrot.slane %v3755_v19, %v11777_v52  ;;  %v3987_v2 = vcombine.high %v2597_v9, %v15617_v56 }
 0x3db   : > { %v11918_v4 = vpop.permute.xlu0 %2600  ;;  %v11925_v63 = vrot.slane %v5404_v54, %v11777_v52  ;;  %v4236_v19 = vcombine.high %v11731_v49, %v15617_v56  ;;  %v4243_v9 = vrot.slane %v11731_v49, %v11768_v3 }
 0x3dc   : > { %15626 = vst [vmem:[#allocation28_spill] sm:$0xff] %v11918_v4  ;;  %v3738_v59 = vcombine.low %v3715_v6, %v3730_v13  ;;  %v3739_v0 = vcombine.high %v3715_v6, %v3730_v13  ;;  %v5580_v55 = vcombine.low %v3762_v25, %v3769_v46  ;;  %v10030_v6 = vcombine.high %v3762_v25, %v3769_v46 }
 0x3dd   : > { %v11932_v47 = vcombine.low %v5403_v50, %v11925_v63  ;;  %v5413_v43 = vcombine.high %v5403_v50, %v11925_v63  ;;  %v4001_v15 = vrot.slane %v3987_v2, %v11768_v3  ;;  %v3986_v50 = vrot.slane %v3972_v33, %v11768_v3 }
 0x3de   : > { %v3746_v38 = vrot.slane %v3738_v59, %v11777_v52  ;;  %v3753_v39 = vrot.slane %v3739_v0, %v11777_v52  ;;  %v4250_v25 = vrot.slane %v4236_v19, %v11768_v3  ;;  %v5587_v46 = vrot.slane %v5580_v55, %v11768_v3 }
 0x3df   : > { %v2605_v32 = vpop.permute.xlu0 %2604  ;;  %v11942_v54 = vrot.slane %v11932_v47, %v11768_v3  ;;  %v11950_v59 = vrot.slane %v5413_v43, %v11768_v3  ;;  %v5595_v43 = vrot.slane %v10030_v6, %v11768_v3  ;;  %v4019_v60 = vcombine.high %v3986_v50, %v4001_v15 }
 0x3e0   : > { %v4251_v58 = vcombine.high %v2605_v32, %v15617_v56  ;;  %v5564_v0 = vcombine.low %v3746_v38, %v3753_v39  ;;  %v10029_v61 = vcombine.high %v3746_v38, %v3753_v39  ;;  %v4258_v2 = vrot.slane %v2605_v32, %v11768_v3 }
 0x3e1   : > { %v7186_v4 = vcombine.low %v11942_v54, %v11950_v59  ;;  %v4500_v6 = vcombine.high %v11751_v40, %v15617_v56 }
 0x3e2   : > { %v4265_v29 = vrot.slane %v4251_v58, %v11768_v3  ;;  %v4018_v58 = vcombine.low %v3986_v50, %v4001_v15  ;;  %v5571_v39 = vrot.slane %v5564_v0, %v11768_v3  ;;  %v5579_v19 = vrot.slane %v10029_v61, %v11768_v3 }
 0x3e3   : > { %v11946_v13 = vpop.permute.xlu0 %2608  ;;  %v11964_v38 = vrot.slane %v7186_v4, %v11777_v52  ;;  %v4266_v4 = vcombine.low %v4243_v9, %v4258_v2  ;;  %v4267_v15 = vcombine.high %v4243_v9, %v4258_v2  ;;  %v5604_v50 = vcombine.low %v5587_v46, %v5595_v43 }
 0x3e4   : > { %15627 = vst [vmem:[#allocation29_spill] sm:$0xff] %v11946_v13  ;;  %v3979_v13 = vrot.slane %v11711_v8, %v11768_v3  ;;  %v4282_v33 = vcombine.low %v4250_v25, %v4265_v29  ;;  %v4283_v8 = vcombine.high %v4250_v25, %v4265_v29  ;;  %v4026_v49 = vrot.slane %v4018_v58, %v11777_v52 }
 0x3e5   : > { %15628 = vst [vmem:[#allocation30_spill] sm:$0xff] %v11964_v38  ;;  %v7218_v32 = vcombine.high %v11964_v38, %v15617_v56  ;;  %v4033_v0 = vrot.slane %v4019_v60, %v11777_v52  ;;  %v5596_v25 = vcombine.low %v5571_v39, %v5579_v19  ;;  %v4514_v60 = vrot.slane %v4500_v6, %v11768_v3 }
 0x3e6   : > { %v4002_v55 = vcombine.low %v3979_v13, %v3994_v20  ;;  %v4003_v51 = vcombine.high %v3979_v13, %v3994_v20  ;;  %v4507_v20 = vrot.slane %v11751_v40, %v11768_v3  ;;  %v4290_v61 = vrot.slane %v4282_v33, %v11777_v52 }
 0x3e7   : > { %v2613_v30 = vpop.permute.xlu0 %2612  ;;  %8490 = vrot.lane.b32.xlu1 %v7218_v32, %s10356_s26  ;;  %v4297_v13 = vrot.slane %v4283_v8, %v11777_v52  ;;  %v4274_v43 = vrot.slane %v4266_v4, %v11777_v52  ;;  %v4281_v58 = vrot.slane %v4267_v15, %v11777_v52  ;;  %v11990_v40 = vrot.slane %v5604_v50, %v11777_v52 }
 0x3e8   : > { %v4515_v29 = vcombine.high %v2613_v30, %v15617_v56  ;;  %v4010_v38 = vrot.slane %v4002_v55, %v11777_v52  ;;  %v4017_v46 = vrot.slane %v4003_v51, %v11777_v52  ;;  %v4522_v2 = vrot.slane %v2613_v30, %v11768_v3 }
 0x3e9   : > { %v5780_v33 = vcombine.low %v4026_v49, %v4033_v0  ;;  %v10038_v8 = vcombine.high %v4026_v49, %v4033_v0  ;;  %v5980_v39 = vcombine.low %v4290_v61, %v4297_v13  ;;  %v5603_v51 = vrot.slane %v5596_v25, %v11777_v52 }
 0x3ea   : > { %v4529_v9 = vrot.slane %v4515_v29, %v11768_v3  ;;  %v4530_v19 = vcombine.low %v4507_v20, %v4522_v2  ;;  %v4531_v55 = vcombine.high %v4507_v20, %v4522_v2  ;;  %v5764_v30 = vcombine.low %v4010_v38, %v4017_v46 }
 0x3eb   : > { %v10046_v11 = vcombine.high %v4290_v61, %v4297_v13  ;;  %v10037_v27 = vcombine.high %v4010_v38, %v4017_v46  ;;  %v5964_v4 = vcombine.low %v4274_v43, %v4281_v58  ;;  %v10045_v21 = vcombine.high %v4274_v43, %v4281_v58 }
 0x3ec   : > { %v4546_v32 = vcombine.low %v4514_v60, %v4529_v9  ;;  %v4547_v6 = vcombine.high %v4514_v60, %v4529_v9  ;;  %v4538_v29 = vrot.slane %v4530_v19, %v11777_v52  ;;  %v4545_v50 = vrot.slane %v4531_v55, %v11777_v52 }
 0x3ed   : > { %v11998_v0 = vcombine.low %v5603_v51, %v11990_v40  ;;  %v5787_v20 = vrot.slane %v5780_v33, %v11768_v3  ;;  %v5795_v25 = vrot.slane %v10038_v8, %v11768_v3  ;;  %v5987_v61 = vrot.slane %v5980_v39, %v11768_v3  ;;  %v12014_v33 = vpop.permute.xlu1 %2558 }
 0x3ee   : > { %v4554_v15 = vrot.slane %v4546_v32, %v11777_v52  ;;  %v4561_v49 = vrot.slane %v4547_v6, %v11777_v52  ;;  %v5613_v38 = vcombine.high %v5603_v51, %v11990_v40  ;;  %v5995_v13 = vrot.slane %v10046_v11, %v11768_v3 }
 0x3ef   : > { %v12007_v60 = vrot.slane %v11998_v0, %v11768_v3  ;;  %v5771_v43 = vrot.slane %v5764_v30, %v11768_v3  ;;  %v5779_v58 = vrot.slane %v10037_v27, %v11768_v3  ;;  %v5971_v8 = vrot.slane %v5964_v4, %v11768_v3 }
 0x3f0   : > { %v6180_v46 = vcombine.low %v4554_v15, %v4561_v49  ;;  %v10054_v2 = vcombine.high %v4554_v15, %v4561_v49  ;;  %v12012_v9 = vrot.slane %v5613_v38, %v11768_v3  ;;  %v5979_v39 = vrot.slane %v10045_v21, %v11768_v3 }
 0x3f1   : > { %v6164_v11 = vcombine.low %v4538_v29, %v4545_v50  ;;  %v10053_v19 = vcombine.high %v4538_v29, %v4545_v50  ;;  %v5804_v55 = vcombine.low %v5787_v20, %v5795_v25  ;;  %v6004_v51 = vcombine.low %v5987_v61, %v5995_v13  ;;  %v12032_v20 = vpop.permute.xlu1 %2562 }
 0x3f2   : > { %v7450_v32 = vcombine.low %v12007_v60, %v12012_v9  ;;  %v6187_v30 = vrot.slane %v6180_v46, %v11768_v3  ;;  %v6195_v27 = vrot.slane %v10054_v2, %v11768_v3  ;;  %v5796_v6 = vcombine.low %v5771_v43, %v5779_v58  ;;  %15630 = vst [vmem:[#allocation32_spill] sm:$0xff] %v12032_v20 }
 0x3f3   : > { %v5996_v49 = vcombine.low %v5971_v8, %v5979_v39  ;;  %v6171_v4 = vrot.slane %v6164_v11, %v11768_v3  ;;  %v6179_v21 = vrot.slane %v10053_v19, %v11768_v3  ;;  %v12028_v29 = vrot.slane %v5804_v55, %v11777_v52 }
 0x3f4   : > { %v12023_v15 = vrot.slane %v7450_v32, %v11777_v52  ;;  %v12035_v25 = vrot.slane %v6004_v51, %v11777_v52  ;;  %v6204_v61 = vcombine.low %v6187_v30, %v6195_v27  ;;  %v5803_v38 = vrot.slane %v5796_v6, %v11777_v52 }
 0x3f5   : > { %v6003_v13 = vrot.slane %v5996_v49, %v11777_v52  ;;  %v6196_v46 = vcombine.low %v6171_v4, %v6179_v21  ;;  %v12052_v11 = vpop.permute.xlu1 %2566  ;;  %v6923_v4 = vcombine.high %v11891_v22, %v11896_v31  ;;  %v6395_v31 = vcombine.high %v11807_v14, %v11810_v42 }
 0x3f6   : > { %15629 = vst [vmem:[#allocation31_spill] sm:$0xff] %v12023_v15  ;;  %v7482_v50 = vcombine.high %v12023_v15, %v15617_v56  ;;  %v12041_v2 = vcombine.low %v5803_v38, %v12028_v29  ;;  %v5813_v43 = vcombine.high %v5803_v38, %v12028_v29  ;;  %v12045_v58 = vrot.slane %v6204_v61, %v11777_v52 }
 0x3f7   : > { %v12048_v8 = vcombine.low %v6003_v13, %v12035_v25  ;;  %v6203_v19 = vrot.slane %v6196_v46, %v11777_v52  ;;  %v6013_v32 = vcombine.high %v6003_v13, %v12035_v25  ;;  %v7187_v42 = vcombine.high %v11942_v54, %v11950_v59 }
 0x3f8   : > { %8492 = vrot.lane.b32.xlu0 %v7482_v50, %s10356_s26  ;;  %v7691_v39 = vrot.slane %v12041_v2, %v11768_v3  ;;  %v7706_v55 = vrot.slane %v5813_v43, %v11768_v3  ;;  %v4566_v15 = vcombine.high %v11749_v41, %v15617_v56 }
 0x3f9   : > { %v7955_v51 = vrot.slane %v12048_v8, %v11768_v3  ;;  %v12060_v27 = vcombine.low %v6203_v19, %v12045_v58  ;;  %v7970_v6 = vrot.slane %v6013_v32, %v11768_v3  ;;  %v6213_v49 = vcombine.high %v6203_v19, %v12045_v58  ;;  %v12072_v13 = vpop.permute.xlu1 %2570 }
 0x3fa   : > { %v7714_v30 = vcombine.low %v7691_v39, %v7706_v55  ;;  %15632 = vst [vmem:[#allocation34_spill] sm:$0xff] %v12072_v13 }
 0x3fb   : > { %v8219_v50 = vrot.slane %v12060_v27, %v11768_v3  ;;  %v7978_v61 = vcombine.low %v7955_v51, %v7970_v6  ;;  %v8234_v38 = vrot.slane %v6213_v49, %v11768_v3  ;;  %v6659_v49 = vcombine.high %v11848_v28, %v11855_v18 }
 0x3fc   : > { %v12067_v21 = vrot.slane %v7714_v30, %v11777_v52  ;;  %v6937_v28 = vrot.slane %v6923_v4, %v11777_v52  ;;  %v7451_v18 = vcombine.high %v12007_v60, %v12012_v9  ;;  %v7979_v60 = vcombine.high %v7955_v51, %v7970_v6 }
 0x3fd   : > { %v12077_v43 = vrot.slane %v7978_v61, %v11777_v52  ;;  %v8242_v19 = vcombine.low %v8219_v50, %v8234_v38  ;;  %v12092_v61 = vpop.permute.xlu1 %2574  ;;  %v6673_v14 = vrot.slane %v6659_v49, %v11777_v52  ;;  %v2733_v9 = vcombine.high %v12014_v33, %v15617_v56 }
 0x3fe   : > { %15631 = vst [vmem:[#allocation33_spill] sm:$0xff] %v12067_v21  ;;  %v7746_v46 = vcombine.high %v12067_v21, %v15617_v56  ;;  %v7465_v4 = vrot.slane %v7451_v18, %v11777_v52  ;;  %v2725_v51 = vrot.slane %v11609_v10, %v11768_v3  ;;  %v2982_v6 = vcombine.high %v11629_v36, %v15617_v56 }
 0x3ff   : > { %15633 = vst [vmem:[#allocation35_spill] sm:$0xff] %v12077_v43  ;;  %v8010_v22 = vcombine.high %v12077_v43, %v15617_v56  ;;  %v12085_v32 = vrot.slane %v8242_v19, %v11777_v52  ;;  %v7156_v19 = vcombine.high %v11932_v47, %v15617_v56  ;;  %v7201_v47 = vrot.slane %v7187_v42, %v11777_v52 }
 0x400   : > { %8494 = vrot.lane.b32.xlu1 %v7746_v46, %s10356_s26  ;;  %v6409_v46 = vrot.slane %v6395_v31, %v11777_v52 }
 0x401   : > { %15634 = vst [vmem:[#allocation36_spill] sm:$0xff] %v12085_v32  ;;  %8496 = vrot.lane.b32.xlu0 %v8010_v22, %s10356_s26  ;;  %v8274_v30 = vcombine.high %v12085_v32, %v15617_v56  ;;  %v10073_v22 = vcombine.high %v11925_v63, %v15617_v56  ;;  %v12108_v31 = vpop.permute.xlu1 %2578  ;;  %v7715_v63 = vcombine.high %v7691_v39, %v7706_v55 }
 0x402   : > { %15635 = vst [vmem:[#allocation37_spill] sm:$0xff] %v12108_v31  ;;  %v2718_v39 = vcombine.high %v11609_v10, %v15617_v56  ;;  %v2740_v55 = vrot.slane %v12014_v33, %v11768_v3  ;;  %v3510_v10 = vcombine.high %v11669_v37, %v15617_v56  ;;  %v6427_v32 = vcombine.high %v6409_v46, %v15617_v56 }
 0x403   : > { %v12114_v54 = vrot.slane %v10073_v22, %v11768_v3  ;;  %v12126_v49 = vrot.slane %v7715_v63, %v11777_v52  ;;  %v12135_v22 = vrot.slane %v7979_v60, %v11777_v52 }
 0x404   : > { %8498 = vrot.lane.b32.xlu1 %v8274_v30, %s10356_s26  ;;  %v12111_v30 = vrot.slane %v7156_v19, %v11768_v3  ;;  %v8243_v19 = vcombine.high %v8219_v50, %v8234_v38  ;;  %v2747_v50 = vrot.slane %v2733_v9, %v11768_v3  ;;  %v3246_v38 = vcombine.high %v11649_v17, %v15617_v56 }
 0x405   : > { %8516 = vrot.lane.b32.xlu0 %v6409_v46, %s10358_s29  ;;  %v12132_v42 = vpop.permute.xlu1 %2582  ;;  %v2732_v63 = vrot.slane %v2718_v39, %v11768_v3  ;;  %v2748_v60 = vcombine.low %v2725_v51, %v2740_v55  ;;  %v2749_v59 = vcombine.high %v2725_v51, %v2740_v55  ;;  %v12158_v9 = vrot.slane %v11629_v36, %v11768_v3 }
 0x406   : > { %v12149_v33 = vrot.slane %v8243_v19, %v11777_v52  ;;  %v12164_v19 = vrot.slane %v2982_v6, %v11768_v3  ;;  %v3774_v39 = vcombine.high %v11689_v35, %v15617_v56  ;;  %v12172_v55 = vrot.slane %v11649_v17, %v11768_v3 }
 0x407   : > { %v2764_v18 = vcombine.low %v2732_v63, %v2747_v50  ;;  %v2765_v43 = vcombine.high %v2732_v63, %v2747_v50  ;;  %v12175_v36 = vrot.slane %v3246_v38, %v11768_v3  ;;  %v12179_v46 = vrot.slane %v11669_v37, %v11768_v3 }
 0x408   : > { %8518 = vrot.lane.b32.xlu1 %v6673_v14, %s10358_s29  ;;  %v6691_v51 = vcombine.high %v6673_v14, %v15617_v56  ;;  %v12184_v6 = vrot.slane %v3510_v10, %v11768_v3  ;;  %v4038_v50 = vcombine.high %v11709_v7, %v15617_v56  ;;  %v2756_v17 = vrot.slane %v2748_v60, %v11777_v52 }
 0x409   : > { %8520 = vrot.lane.b32.xlu0 %v6937_v28, %s10358_s29  ;;  %v12168_v21 = vpop.permute.xlu1 %2586  ;;  %v2763_v63 = vrot.slane %v2749_v59, %v11777_v52  ;;  %v12192_v38 = vrot.slane %v11689_v35, %v11768_v3  ;;  %v4302_v37 = vcombine.high %v11729_v53, %v15617_v56  ;;  %v6364_v14 = vcombine.high %v11802_v45, %v15617_v56 }
 0x40a   : > { %15636 = vst [vmem:[#allocation38_spill] sm:$0xff] %v12168_v21  ;;  %v12201_v10 = vrot.slane %v3774_v39, %v11768_v3  ;;  %v12205_v59 = vrot.slane %v11709_v7, %v11768_v3  ;;  %v2772_v35 = vrot.slane %v2764_v18, %v11777_v52  ;;  %v2779_v60 = vrot.slane %v2765_v43, %v11777_v52 }
 0x40b   : > { %v10061_v45 = vcombine.high %v11793_v5, %v15617_v56  ;;  %v6628_v39 = vcombine.high %v11843_v57, %v15617_v56  ;;  %v12218_v7 = vrot.slane %v4038_v50, %v11768_v3  ;;  %v12222_v18 = vrot.slane %v11729_v53, %v11768_v3 }
 0x40c   : > { %8522 = vrot.lane.b32.xlu1 %v7201_v47, %s10358_s29  ;;  %v4814_v43 = vcombine.low %v2756_v17, %v2763_v63  ;;  %v7483_v5 = vcombine.high %v7465_v4, %v15617_v56  ;;  %v12234_v57 = vrot.slane %v6364_v14, %v11768_v3  ;;  %v10065_v53 = vcombine.high %v11834_v16, %v15617_v56 }
 0x40d   : > { %8524 = vrot.lane.b32.xlu0 %v7465_v4, %s10358_s29  ;;  %v12240_v50 = vrot.slane %v11749_v41, %v11768_v3  ;;  %v9999_v21 = vcombine.high %v2756_v17, %v2763_v63  ;;  %v4830_v31 = vcombine.low %v2772_v35, %v2779_v60  ;;  %v7747_v4 = vcombine.high %v12126_v49, %v15617_v56 }
 0x40e   : > { %v12251_v14 = vrot.slane %v10061_v45, %v11768_v3  ;;  %v12254_v16 = vrot.slane %v6628_v39, %v11768_v3  ;;  %v12257_v41 = vrot.slane %v4814_v43, %v11768_v3  ;;  %v10000_v17 = vcombine.high %v2772_v35, %v2779_v60 }
 0x40f   : > { %v8011_v63 = vcombine.high %v12135_v22, %v15617_v56  ;;  %v7420_v35 = vcombine.high %v11998_v0, %v15617_v56  ;;  %v12275_v60 = vrot.slane %v9999_v21, %v11768_v3  ;;  %v12278_v45 = vrot.slane %v4830_v31, %v11768_v3 }
 0x410   : > { %8526 = vrot.lane.b32.xlu1 %v12126_v49, %s10358_s29  ;;  %v6410_v49 = vcombine.low %v12234_v57, %v12251_v14  ;;  %v10077_v21 = vcombine.high %v11990_v40, %v15617_v56  ;;  %v7684_v31 = vcombine.high %v12041_v2, %v15617_v56  ;;  %v7948_v2 = vcombine.high %v12048_v8, %v15617_v56 }
 0x411   : > { %8528 = vrot.lane.b32.xlu0 %v12135_v22, %s10358_s29  ;;  %v3004_v22 = vrot.slane %v12052_v11, %v11768_v3  ;;  %v12309_v40 = vrot.slane %v7420_v35, %v11768_v3  ;;  %v3532_v20 = vrot.slane %v12132_v42, %v11768_v3 }
 0x412   : > { %v12327_v8 = vrot.slane %v10077_v21, %v11768_v3 }
 0x414   : > { %8530 = vrot.lane.b32.xlu1 %v12149_v33, %s10358_s29  ;;  %v7466_v21 = vcombine.low %v12309_v40, %v12327_v8 }
 0x415   : > { %8548 = vrot.lane.b32.xlu0 %v6427_v32, %s10360_s27  ;;  %v6955_v32 = vcombine.high %v6937_v28, %v15617_v56  ;;  %v7219_v28 = vcombine.high %v7201_v47, %v15617_v56  ;;  %v12229_v47 = vrot.slane %v4302_v37, %v11768_v3  ;;  %v12245_v37 = vrot.slane %v4566_v15, %v11768_v3 }
 0x416   : > { %v12382_v1 = vrot.slane %v7466_v21, %v11777_v52 }
 0x418   : > { %8550 = vrot.lane.b32.xlu1 %v6691_v51, %s10360_s27  ;;  %v12224_v51 = vpop.permute.xlu1 %2590 }
 0x419   : > { %8552 = vrot.lane.b32.xlu0 %v6955_v32, %s10360_s27  ;;  %v6892_v32 = vcombine.high %v11884_v12, %v15617_v56  ;;  %v10069_v12 = vcombine.high %v11877_v34, %v15617_v56  ;;  %v2997_v34 = vcombine.high %v12052_v11, %v15617_v56  ;;  %v12297_v11 = vrot.slane %v10000_v17, %v11768_v3 }
 0x41a   : > { %v3012_v17 = vcombine.low %v12158_v9, %v3004_v22 }
 0x41b   : > { %v12262_v15 = vrot.slane %v6892_v32, %v11768_v3  ;;  %v12285_v43 = vrot.slane %v10069_v12, %v11768_v3  ;;  %v8275_v32 = vcombine.high %v12149_v33, %v15617_v56  ;;  %v12305_v12 = vrot.slane %v6410_v49, %v11777_v52 }
 0x41c   : > { %8554 = vrot.lane.b32.xlu1 %v7219_v28, %s10360_s27  ;;  %v12270_v28 = vrot.slane %v10065_v53, %v11768_v3  ;;  %v12282_v39 = vpop.permute.xlu1 %2594  ;;  %v3261_v53 = vcombine.high %v12092_v61, %v15617_v56  ;;  %v10085_v49 = vcombine.high %v12035_v25, %v15617_v56  ;;  %v3525_v25 = vcombine.high %v12132_v42, %v15617_v56 }
 0x41d   : > { %8556 = vrot.lane.b32.xlu0 %v7483_v5, %s10360_s27  ;;  %15637 = vst [vmem:[#allocation39_spill] sm:$0xff] %v12282_v39  ;;  %v3011_v5 = vrot.slane %v2997_v34, %v11768_v3  ;;  %v6938_v33 = vcombine.low %v12262_v15, %v12285_v43  ;;  %v3013_v34 = vcombine.high %v12158_v9, %v3004_v22 }
 0x41e   : > { %v6674_v0 = vcombine.low %v12254_v16, %v12270_v28  ;;  %v8212_v9 = vcombine.high %v12060_v27, %v15617_v56  ;;  %v3275_v22 = vrot.slane %v3261_v53, %v11768_v3  ;;  %v12348_v27 = vrot.slane %v7948_v2, %v11768_v3 }
 0x41f   : > { %v10089_v53 = vcombine.high %v12045_v58, %v15617_v56  ;;  %v3029_v39 = vcombine.high %v12164_v19, %v3011_v5  ;;  %v15638_v2 = vcombine.low %v12111_v30, %v12114_v54  ;;  %v12369_v58 = vrot.slane %v10085_v49, %v11768_v3 }
 0x420   : > { %8558 = vrot.lane.b32.xlu1 %v7747_v4, %s10360_s27  ;;  %v10081_v4 = vcombine.high %v12028_v29, %v15617_v56  ;;  %v12324_v35 = vrot.slane %v6674_v0, %v11777_v52  ;;  %v12330_v29 = vrot.slane %v7684_v31, %v11768_v3  ;;  %v12341_v0 = vrot.slane %v6938_v33, %v11777_v52 }
 0x421   : > { %8560 = vrot.lane.b32.xlu0 %v8011_v63, %s10360_s27  ;;  %v3268_v63 = vrot.slane %v12092_v61, %v11768_v3  ;;  %v3028_v61 = vcombine.low %v12164_v19, %v3011_v5  ;;  %v3020_v42 = vrot.slane %v3012_v17, %v11777_v52  ;;  %v3027_v5 = vrot.slane %v3013_v34, %v11777_v52 }
 0x422   : > { %v12351_v31 = vrot.slane %v10081_v4, %v11768_v3  ;;  %v12366_v4 = vrot.slane %v15638_v2, %v11777_v52  ;;  %v3539_v24 = vrot.slane %v3525_v25, %v11768_v3  ;;  %v3293_v2 = vcombine.high %v12175_v36, %v3275_v22 }
 0x423   : > { %v3276_v33 = vcombine.low %v12172_v55, %v3268_v63  ;;  %v3277_v13 = vcombine.high %v12172_v55, %v3268_v63  ;;  %v12374_v55 = vrot.slane %v8212_v9, %v11768_v3  ;;  %v3292_v63 = vcombine.low %v12175_v36, %v3275_v22 }
 0x424   : > { %8562 = vrot.lane.b32.xlu1 %v8275_v32, %s10360_s27  ;;  %v12338_v32 = vpop.permute.xlu1 %2598  ;;  %v7730_v19 = vcombine.low %v12330_v29, %v12351_v31  ;;  %v7994_v49 = vcombine.low %v12348_v27, %v12369_v58  ;;  %v12389_v9 = vrot.slane %v10089_v53, %v11768_v3  ;;  %v3036_v17 = vrot.slane %v3028_v61, %v11777_v52 }
 0x425   : > { %8580 = vrot.lane.b32.xlu0 %v12305_v12, %s10362_s19  ;;  %v3043_v34 = vrot.slane %v3029_v39, %v11777_v52  ;;  %v3540_v25 = vcombine.low %v12179_v46, %v3532_v20  ;;  %v3541_v36 = vcombine.high %v12179_v46, %v3532_v20  ;;  %v3284_v21 = vrot.slane %v3276_v33, %v11777_v52 }
 0x426   : > { %v3291_v26 = vrot.slane %v3277_v13, %v11777_v52  ;;  %v12402_v53 = vrot.slane %v7730_v19, %v11777_v52  ;;  %v8258_v61 = vcombine.low %v12374_v55, %v12389_v9  ;;  %v4846_v39 = vcombine.low %v12257_v41, %v12275_v60 }
 0x427   : > { %v5014_v44 = vcombine.low %v3020_v42, %v3027_v5  ;;  %v3556_v20 = vcombine.low %v12184_v6, %v3539_v24  ;;  %v3557_v46 = vcombine.high %v12184_v6, %v3539_v24  ;;  %v10007_v33 = vcombine.high %v3020_v42, %v3027_v5 }
 0x428   : > { %8582 = vrot.lane.b32.xlu1 %v12324_v35, %s10362_s19  ;;  %v12395_v22 = vpop.permute.xlu1 %2602  ;;  %v3300_v13 = vrot.slane %v3292_v63, %v11777_v52  ;;  %v12413_v62 = vrot.slane %v7994_v49, %v11777_v52  ;;  %v5030_v19 = vcombine.low %v3036_v17, %v3043_v34  ;;  %v3548_v23 = vrot.slane %v3540_v25, %v11777_v52 }
 0x429   : > { %8584 = vrot.lane.b32.xlu0 %v12341_v0, %s10362_s19  ;;  %15639 = vst [vmem:[#allocation40_spill] sm:$0xff] %v12395_v22  ;;  %v3307_v22 = vrot.slane %v3293_v2, %v11777_v52  ;;  %v3555_v41 = vrot.slane %v3541_v36, %v11777_v52  ;;  %v3789_v60 = vcombine.high %v12224_v51, %v15617_v56 }
 0x42a   : > { %v10008_v24 = vcombine.high %v3036_v17, %v3043_v34  ;;  %v5214_v6 = vcombine.low %v3284_v21, %v3291_v26  ;;  %v10015_v42 = vcombine.high %v3284_v21, %v3291_v26  ;;  %v12424_v5 = vrot.slane %v8258_v61, %v11777_v52 }
 0x42b   : > { %v5021_v63 = vrot.slane %v5014_v44, %v11768_v3  ;;  %v3564_v2 = vrot.slane %v3556_v20, %v11777_v52  ;;  %v3571_v49 = vrot.slane %v3557_v46, %v11777_v52  ;;  %v3796_v25 = vrot.slane %v12224_v51, %v11768_v3 }
 0x42c   : > { %8586 = vrot.lane.b32.xlu1 %v12366_v4, %s10362_s19  ;;  %v12431_v36 = vpop.permute.xlu1 %2606  ;;  %v5029_v17 = vrot.slane %v10007_v33, %v11768_v3  ;;  %v5230_v26 = vcombine.low %v3300_v13, %v3307_v22  ;;  %v10016_v34 = vcombine.high %v3300_v13, %v3307_v22  ;;  %v6428_v21 = vcombine.high %v12305_v12, %v15617_v56 }
 0x42d   : > { %8588 = vrot.lane.b32.xlu0 %v12382_v1, %s10362_s19  ;;  %v5037_v44 = vrot.slane %v5030_v19, %v11768_v3  ;;  %v5414_v61 = vcombine.low %v3548_v23, %v3555_v41  ;;  %v10023_v20 = vcombine.high %v3548_v23, %v3555_v41  ;;  %v3803_v46 = vrot.slane %v3789_v60, %v11768_v3 }
 0x42e   : > { %v5045_v51 = vrot.slane %v10008_v24, %v11768_v3  ;;  %v5221_v48 = vrot.slane %v5214_v6, %v11768_v3  ;;  %v5229_v33 = vrot.slane %v10015_v42, %v11768_v3  ;;  %v6692_v12 = vcombine.high %v12324_v35, %v15617_v56 }
 0x42f   : > { %v5430_v22 = vcombine.low %v3564_v2, %v3571_v49  ;;  %v10024_v13 = vcombine.high %v3564_v2, %v3571_v49  ;;  %v3804_v19 = vcombine.low %v12192_v38, %v3796_v25  ;;  %v3805_v23 = vcombine.high %v12192_v38, %v3796_v25 }
 0x430   : > { %8590 = vrot.lane.b32.xlu1 %v12402_v53, %s10362_s19  ;;  %v4854_v41 = vcombine.low %v12278_v45, %v12297_v11  ;;  %v5237_v60 = vrot.slane %v5230_v26, %v11768_v3  ;;  %v5245_v24 = vrot.slane %v10016_v34, %v11768_v3  ;;  %v6956_v6 = vcombine.high %v12341_v0, %v15617_v56  ;;  %v12459_v49 = vpop.permute.xlu1 %2610 }
 0x431   : > { %8592 = vrot.lane.b32.xlu0 %v12413_v62, %s10362_s19  ;;  %v5421_v35 = vrot.slane %v5414_v61, %v11768_v3  ;;  %v5429_v42 = vrot.slane %v10023_v20, %v11768_v3  ;;  %v3820_v2 = vcombine.low %v12201_v10, %v3803_v46  ;;  %v3821_v38 = vcombine.high %v12201_v10, %v3803_v46 }
 0x432   : > { %15640 = vst [vmem:[#allocation41_spill] sm:$0xff] %v12459_v49  ;;  %v5046_v45 = vcombine.low %v5021_v63, %v5029_v17  ;;  %v5054_v11 = vcombine.low %v5037_v44, %v5045_v51  ;;  %v5246_v25 = vcombine.low %v5221_v48, %v5229_v33  ;;  %v7220_v0 = vcombine.high %v12366_v4, %v15617_v56 }
 0x433   : > { %v5437_v26 = vrot.slane %v5430_v22, %v11768_v3  ;;  %v5445_v34 = vrot.slane %v10024_v13, %v11768_v3  ;;  %v3819_v61 = vrot.slane %v3805_v23, %v11777_v52  ;;  %v12469_v10 = vrot.slane %v4846_v39, %v11777_v52 }
 0x434   : > { %8594 = vrot.lane.b32.xlu1 %v12424_v5, %s10362_s19  ;;  %v12472_v63 = vrot.slane %v4854_v41, %v11777_v52  ;;  %v5254_v48 = vcombine.low %v5237_v60, %v5245_v24  ;;  %v7484_v17 = vcombine.high %v12382_v1, %v15617_v56  ;;  %v5446_v4 = vcombine.low %v5421_v35, %v5429_v42  ;;  %v2615_v23 = vpop.permute.xlu1 %2614 }
 0x435   : > { %8612 = vrot.lane.b32.xlu0 %v6428_v21, %s10366_s7  ;;  %v3812_v21 = vrot.slane %v3804_v19, %v11777_v52  ;;  %v3828_v44 = vrot.slane %v3820_v2, %v11777_v52  ;;  %v3835_v20 = vrot.slane %v3821_v38, %v11777_v52  ;;  %v4053_v46 = vcombine.high %v12338_v32, %v15617_v56 }
 0x436   : > { %v12482_v39 = vrot.slane %v5046_v45, %v11777_v52  ;;  %v12485_v51 = vrot.slane %v5054_v11, %v11777_v52  ;;  %v12488_v33 = vrot.slane %v5246_v25, %v11777_v52  ;;  %v7748_v1 = vcombine.high %v12402_v53, %v15617_v56 }
 0x437   : > { %v5614_v22 = vcombine.low %v3812_v21, %v3819_v61  ;;  %v10031_v13 = vcombine.high %v3812_v21, %v3819_v61  ;;  %v4317_v19 = vcombine.high %v12431_v36, %v15617_v56  ;;  %v12496_v41 = vrot.slane %v5254_v48, %v11777_v52 }
 0x438   : > { %8614 = vrot.lane.b32.xlu1 %v6692_v12, %s10366_s7  ;;  %v5454_v12 = vcombine.low %v5437_v26, %v5445_v34  ;;  %v4060_v60 = vrot.slane %v12338_v32, %v11768_v3  ;;  %v8012_v24 = vcombine.high %v12413_v62, %v15617_v56  ;;  %v6411_v53 = vcombine.high %v12234_v57, %v12251_v14 }
 0x439   : > { %8616 = vrot.lane.b32.xlu0 %v6956_v6, %s10366_s7  ;;  %v12506_v6 = vrot.slane %v5446_v4, %v11777_v52  ;;  %v5630_v35 = vcombine.low %v3828_v44, %v3835_v20  ;;  %v4067_v42 = vrot.slane %v4053_v46, %v11768_v3  ;;  %v4324_v2 = vrot.slane %v12431_v36, %v11768_v3 }
 0x43a   : > { %v10032_v38 = vcombine.high %v3828_v44, %v3835_v20  ;;  %v4581_v32 = vcombine.high %v2615_v23, %v15617_v56  ;;  %v8276_v62 = vcombine.high %v12424_v5, %v15617_v56  ;;  %v6675_v57 = vcombine.high %v12254_v16, %v12270_v28 }
 0x43b   : > { %v12518_v14 = vrot.slane %v5454_v12, %v11777_v52  ;;  %v5621_v45 = vrot.slane %v5614_v22, %v11768_v3  ;;  %v5629_v11 = vrot.slane %v10031_v13, %v11768_v3  ;;  %v4331_v36 = vrot.slane %v4317_v19, %v11768_v3 }
 0x43c   : > { %8618 = vrot.lane.b32.xlu1 %v7220_v0, %s10366_s7  ;;  %v4068_v25 = vcombine.low %v12205_v59, %v4060_v60  ;;  %v4069_v0 = vcombine.high %v12205_v59, %v4060_v60  ;;  %v12526_v26 = vrot.slane %v6411_v53, %v11777_v52  ;;  %v6939_v16 = vcombine.high %v12262_v15, %v12285_v43 }
 0x43d   : > { %8620 = vrot.lane.b32.xlu0 %v7484_v17, %s10366_s7  ;;  %v4084_v28 = vcombine.low %v12218_v7, %v4067_v42  ;;  %v4085_v5 = vcombine.high %v12218_v7, %v4067_v42  ;;  %v4332_v34 = vcombine.low %v12222_v18, %v4324_v2  ;;  %v4333_v21 = vcombine.high %v12222_v18, %v4324_v2 }
 0x43e   : > { %v5637_v61 = vrot.slane %v5630_v35, %v11768_v3  ;;  %v5645_v59 = vrot.slane %v10032_v38, %v11768_v3  ;;  %v4595_v48 = vrot.slane %v4581_v32, %v11768_v3  ;;  %v12541_v15 = vrot.slane %v6675_v57, %v11777_v52 }
 0x43f   : > { %v5646_v43 = vcombine.low %v5621_v45, %v5629_v11  ;;  %v4348_v7 = vcombine.low %v12229_v47, %v4331_v36  ;;  %v4349_v17 = vcombine.high %v12229_v47, %v4331_v36  ;;  %v4588_v18 = vrot.slane %v2615_v23, %v11768_v3 }
 0x440   : > { %8622 = vrot.lane.b32.xlu1 %v7748_v1, %s10366_s7  ;;  %v4076_v4 = vrot.slane %v4068_v25, %v11777_v52  ;;  %v4083_v44 = vrot.slane %v4069_v0, %v11777_v52  ;;  %v12549_v20 = vrot.slane %v6939_v16, %v11777_v52  ;;  %v7467_v46 = vcombine.high %v12309_v40, %v12327_v8 }
 0x441   : > { %8624 = vrot.lane.b32.xlu0 %v8012_v24, %s10366_s7  ;;  %v4092_v1 = vrot.slane %v4084_v28, %v11777_v52  ;;  %v4099_v12 = vrot.slane %v4085_v5, %v11777_v52  ;;  %v4340_v47 = vrot.slane %v4332_v34, %v11777_v52  ;;  %v4347_v22 = vrot.slane %v4333_v21, %v11777_v52 }
 0x442   : > { %v4612_v13 = vcombine.low %v12245_v37, %v4595_v48  ;;  %v4613_v19 = vcombine.high %v12245_v37, %v4595_v48  ;;  %v15641_v23 = vcombine.high %v12111_v30, %v12114_v54  ;;  %v7731_v8 = vcombine.high %v12330_v29, %v12351_v31 }
 0x443   : > { %v4356_v60 = vrot.slane %v4348_v7, %v11777_v52  ;;  %v4363_v24 = vrot.slane %v4349_v17, %v11777_v52  ;;  %v4596_v53 = vcombine.low %v12240_v50, %v4588_v18  ;;  %v4597_v37 = vcombine.high %v12240_v50, %v4588_v18 }
 0x444   : > { %8626 = vrot.lane.b32.xlu1 %v8276_v62, %s10366_s7  ;;  %v12567_v40 = vrot.slane %v15641_v23, %v11777_v52  ;;  %v5814_v35 = vcombine.low %v4076_v4, %v4083_v44  ;;  %v10039_v42 = vcombine.high %v4076_v4, %v4083_v44  ;;  %v12576_v2 = vrot.slane %v7467_v46, %v11777_v52 }
 0x445   : > { %8644 = vrot.lane.b32.xlu0 %v12526_v26, %s10367_s25  ;;  %v7995_v30 = vcombine.high %v12348_v27, %v12369_v58  ;;  %v5830_v54 = vcombine.low %v4092_v1, %v4099_v12  ;;  %v10040_v29 = vcombine.high %v4092_v1, %v4099_v12  ;;  %v6014_v31 = vcombine.low %v4340_v47, %v4347_v22 }
 0x446   : > { %v10047_v38 = vcombine.high %v4340_v47, %v4347_v22  ;;  %v4620_v32 = vrot.slane %v4612_v13, %v11777_v52  ;;  %v4627_v62 = vrot.slane %v4613_v19, %v11777_v52  ;;  %v12587_v50 = vrot.slane %v7731_v8, %v11777_v52 }
 0x447   : > { %v8259_v57 = vcombine.high %v12374_v55, %v12389_v9  ;;  %v5654_v45 = vcombine.low %v5637_v61, %v5645_v59  ;;  %v6030_v11 = vcombine.low %v4356_v60, %v4363_v24  ;;  %v4604_v27 = vrot.slane %v4596_v53, %v11777_v52 }
 0x448   : > { %8646 = vrot.lane.b32.xlu1 %v12541_v15, %s10367_s25  ;;  %v4611_v58 = vrot.slane %v4597_v37, %v11777_v52  ;;  %v12594_v36 = vrot.slane %v5646_v43, %v11777_v52  ;;  %v5821_v25 = vrot.slane %v5814_v35, %v11768_v3  ;;  %v10048_v0 = vcombine.high %v4356_v60, %v4363_v24 }
 0x449   : > { %8648 = vrot.lane.b32.xlu0 %v12549_v20, %s10367_s25  ;;  %v12598_v16 = vrot.slane %v7995_v30, %v11777_v52  ;;  %v5829_v55 = vrot.slane %v10039_v42, %v11768_v3  ;;  %v5837_v9 = vrot.slane %v5830_v54, %v11768_v3  ;;  %v5845_v28 = vrot.slane %v10040_v29, %v11768_v3 }
 0x44a   : > { %v6021_v5 = vrot.slane %v6014_v31, %v11768_v3  ;;  %v6029_v34 = vrot.slane %v10047_v38, %v11768_v3  ;;  %v6230_v21 = vcombine.low %v4620_v32, %v4627_v62  ;;  %v10056_v61 = vcombine.high %v4620_v32, %v4627_v62 }
 0x44b   : > { %v12610_v59 = vrot.slane %v8259_v57, %v11777_v52  ;;  %v12613_v48 = vrot.slane %v5654_v45, %v11777_v52  ;;  %v6037_v43 = vrot.slane %v6030_v11, %v11768_v3  ;;  %v6214_v7 = vcombine.low %v4604_v27, %v4611_v58 }
 0x44c   : > { %8650 = vrot.lane.b32.xlu1 %v12567_v40, %s10367_s25  ;;  %v10055_v17 = vcombine.high %v4604_v27, %v4611_v58  ;;  %v6045_v18 = vrot.slane %v10048_v0, %v11768_v3  ;;  %v6429_v4 = vcombine.high %v12526_v26, %v15617_v56  ;;  %v12623_v44 = vcombine.low %v12469_v10, %v12472_v63 }
 0x44d   : > { %8652 = vrot.lane.b32.xlu0 %v12576_v2, %s10367_s25  ;;  %v4863_v46 = vcombine.high %v12469_v10, %v12472_v63  ;;  %v5846_v1 = vcombine.low %v5821_v25, %v5829_v55  ;;  %v5854_v12 = vcombine.low %v5837_v9, %v5845_v28  ;;  %v12629_v47 = vcombine.low %v12482_v39, %v12485_v51 }
 0x44e   : > { %v5063_v22 = vcombine.high %v12482_v39, %v12485_v51  ;;  %v6046_v26 = vcombine.low %v6021_v5, %v6029_v34  ;;  %v6237_v13 = vrot.slane %v6230_v21, %v11768_v3  ;;  %v6245_v19 = vrot.slane %v10056_v61, %v11768_v3 }
 0x44f   : > { %v6693_v23 = vcombine.high %v12541_v15, %v15617_v56  ;;  %v6221_v10 = vrot.slane %v6214_v7, %v11768_v3  ;;  %v6229_v8 = vrot.slane %v10055_v17, %v11768_v3  ;;  %v12642_v60 = vcombine.low %v12488_v33, %v12496_v41 }
 0x450   : > { %8654 = vrot.lane.b32.xlu1 %v12587_v50, %s10367_s25  ;;  %v5263_v39 = vcombine.high %v12488_v33, %v12496_v41  ;;  %v6054_v24 = vcombine.low %v6037_v43, %v6045_v18  ;;  %v6957_v53 = vcombine.high %v12549_v20, %v15617_v56  ;;  %v12651_v15 = vrot.slane %v12623_v44, %v11768_v3 }
 0x451   : > { %8656 = vrot.lane.b32.xlu0 %v12598_v16, %s10367_s25  ;;  %v12654_v37 = vrot.slane %v4863_v46, %v11768_v3  ;;  %v12658_v35 = vrot.slane %v12629_v47, %v11768_v3  ;;  %v12661_v42 = vrot.slane %v5063_v22, %v11768_v3  ;;  %v12665_v33 = vcombine.low %v12506_v6, %v12518_v14  ;;  %v12759_v22 = vpop.permute.xlu0 %2616 }
 0x452   : > { %v5463_v20 = vcombine.high %v12506_v6, %v12518_v14  ;;  %v5853_v30 = vrot.slane %v5846_v1, %v11777_v52  ;;  %v12671_v54 = vrot.slane %v5854_v12, %v11777_v52  ;;  %v6254_v29 = vcombine.low %v6237_v13, %v6245_v19 }
 0x453   : > { %v7221_v31 = vcombine.high %v12567_v40, %v15617_v56  ;;  %v6246_v38 = vcombine.low %v6221_v10, %v6229_v8  ;;  %v12678_v32 = vrot.slane %v12642_v60, %v11768_v3  ;;  %v12681_v62 = vrot.slane %v5263_v39, %v11768_v3  ;;  %v12775_v8 = vpop.permute.xlu1 %2618 }
 0x454   : > { %8658 = vrot.lane.b32.xlu1 %v12610_v59, %s10367_s25  ;;  %v12685_v6 = vcombine.low %v12594_v36, %v12613_v48  ;;  %v12688_v57 = vrot.slane %v6054_v24, %v11777_v52  ;;  %v7485_v45 = vcombine.high %v12576_v2, %v15617_v56  ;;  %v6460_v40 = vcombine.low %v12651_v15, %v12654_v37 }
 0x455   : > { %8676 = vrot.lane.b32.xlu0 %v6429_v4, %s10363_s6  ;;  %v5663_v11 = vcombine.high %v12594_v36, %v12613_v48  ;;  %v6053_v27 = vrot.slane %v6046_v26, %v11777_v52  ;;  %v6724_v58 = vcombine.low %v12658_v35, %v12661_v42  ;;  %v12702_v25 = vrot.slane %v12665_v33, %v11768_v3 }
 0x456   : > { %v12705_v0 = vrot.slane %v5463_v20, %v11768_v3  ;;  %v12708_v2 = vrot.slane %v6254_v29, %v11777_v52  ;;  %v7749_v36 = vcombine.high %v12587_v50, %v15617_v56  ;;  %v12714_v55 = vcombine.low %v5853_v30, %v12671_v54  ;;  %15645 = vst [vmem:[#allocation45_spill] sm:$0xff] %v12775_v8 }
 0x457   : > { %v5863_v9 = vcombine.high %v5853_v30, %v12671_v54  ;;  %v6253_v28 = vrot.slane %v6246_v38, %v11777_v52  ;;  %v8013_v5 = vcombine.high %v12598_v16, %v15617_v56  ;;  %v6988_v34 = vcombine.low %v12678_v32, %v12681_v62  ;;  %v12790_v30 = vpop.permute.xlu0 %8484 }
 0x458   : > { %8678 = vrot.lane.b32.xlu1 %v6693_v23, %s10363_s6  ;;  %v12724_v21 = vrot.slane %v12685_v6, %v11768_v3  ;;  %v12728_v50 = vrot.slane %v6460_v40, %v11777_v52  ;;  %v12731_v61 = vrot.slane %v5663_v11, %v11768_v3  ;;  %v12734_v43 = vcombine.low %v6053_v27, %v12688_v57 }
 0x459   : > { %8680 = vrot.lane.b32.xlu0 %v6957_v53, %s10363_s6  ;;  %v6063_v16 = vcombine.high %v6053_v27, %v12688_v57  ;;  %v8277_v7 = vcombine.high %v12610_v59, %v15617_v56  ;;  %v12740_v17 = vrot.slane %v6724_v58, %v11777_v52  ;;  %v7252_v18 = vcombine.low %v12702_v25, %v12705_v0 }
 0x45a   : > { %15642 = vst [vmem:[#allocation42_spill] sm:$0xff] %v12728_v50  ;;  %v12747_v4 = vrot.slane %v12714_v55, %v11768_v3  ;;  %v12750_v46 = vrot.slane %v5863_v9, %v11768_v3  ;;  %v12753_v1 = vcombine.low %v6253_v28, %v12708_v2  ;;  %v6263_v59 = vcombine.high %v6253_v28, %v12708_v2 }
 0x45b   : > { %15643 = vst [vmem:[#allocation43_spill] sm:$0xff] %v12740_v17  ;;  %v12757_v12 = vrot.slane %v6988_v34, %v11777_v52  ;;  %v6492_v26 = vcombine.high %v12728_v50, %v15617_v56  ;;  %v7516_v13 = vcombine.low %v12724_v21, %v12731_v61  ;;  %v12768_v19 = vrot.slane %v12734_v43, %v11768_v3  ;;  %v12810_v58 = vpop.permute.xlu0 %8488 }
 0x45c   : > { %8682 = vrot.lane.b32.xlu1 %v7221_v31, %s10363_s6  ;;  %v12771_v23 = vrot.slane %v6063_v16, %v11768_v3  ;;  %v6756_v10 = vcombine.high %v12740_v17, %v15617_v56  ;;  %v12779_v39 = vrot.slane %v7252_v18, %v11777_v52  ;;  %v7780_v24 = vcombine.low %v12747_v4, %v12750_v46 }
 0x45d   : > { %8684 = vrot.lane.b32.xlu0 %v7485_v45, %s10363_s6  ;;  %15644 = vst [vmem:[#allocation44_spill] sm:$0xff] %v12757_v12  ;;  %v12785_v53 = vrot.slane %v12753_v1, %v11768_v3  ;;  %v12788_v20 = vrot.slane %v6263_v59, %v11768_v3  ;;  %15647 = vst [vmem:[#allocation47_spill] sm:$0xff] %v12790_v30  ;;  %v7020_v29 = vcombine.high %v12757_v12, %v15617_v56  ;;  %v12800_v45 = vpop.permute.xlu1 %8486  ;;  %v15673_v12 = vld [vmem:[#allocation17_spill] sm:$0xff] }
 0x45e   : > { %15646 = vst [vmem:[#allocation46_spill] sm:$0xff] %v12779_v39  ;;  %v12796_v31 = vrot.slane %v7516_v13, %v11777_v52  ;;  %v8044_v38 = vcombine.low %v12768_v19, %v12771_v23  ;;  %15649 = vst [vmem:[#allocation49_spill] sm:$0xff] %v12800_v45  ;;  %v7284_v40 = vcombine.high %v12779_v39, %v15617_v56 }
 0x45f   : > { %v12806_v11 = vrot.slane %v7780_v24, %v11777_v52  ;;  %v8308_v27 = vcombine.low %v12785_v53, %v12788_v20  ;;  %15651 = vst [vmem:[#allocation51_spill] sm:$0xff] %v12810_v58  ;;  %v6461_v18 = vcombine.high %v12651_v15, %v12654_v37  ;;  %v6725_v13 = vcombine.high %v12658_v35, %v12661_v42  ;;  %v15659_v35 = vld [vmem:[#allocation20_spill] sm:$0xff] }
 0x460   : > { %8686 = vrot.lane.b32.xlu1 %v7749_v36, %s10363_s6  ;;  %15648 = vst [vmem:[#allocation48_spill] sm:$0xff] %v12796_v31  ;;  %v7548_v36 = vcombine.high %v12796_v31, %v15617_v56  ;;  %v12816_v9 = vrot.slane %v8044_v38, %v11777_v52  ;;  %v7253_v38 = vcombine.high %v12702_v25, %v12705_v0 }
 0x461   : > { %8688 = vrot.lane.b32.xlu0 %v8013_v5, %s10363_s6  ;;  %15650 = vst [vmem:[#allocation50_spill] sm:$0xff] %v12806_v11  ;;  %v12818_v28 = vpop.permute.xlu1 %8490  ;;  %v7812_v5 = vcombine.high %v12806_v11, %v15617_v56  ;;  %v12824_v34 = vrot.slane %v8308_v27, %v11777_v52  ;;  %v6475_v24 = vrot.slane %v6461_v18, %v11777_v52 }
 0x462   : > { %15652 = vst [vmem:[#allocation52_spill] sm:$0xff] %v12816_v9  ;;  %15653 = vst [vmem:[#allocation53_spill] sm:$0xff] %v12818_v28  ;;  %v6739_v37 = vrot.slane %v6725_v13, %v11777_v52  ;;  %v2799_v42 = vcombine.high %v15659_v35, %v15617_v56  ;;  %v7267_v0 = vrot.slane %v7253_v38, %v11777_v52 }
 0x463   : > { %15654 = vst [vmem:[#allocation54_spill] sm:$0xff] %v12824_v34  ;;  %v8045_v13 = vcombine.high %v12768_v19, %v12771_v23  ;;  %v15666_v23 = vld [vmem:[#allocation7_spill] sm:$0xff]  ;;  %v6493_v17 = vcombine.high %v6475_v24, %v15617_v56  ;;  %v4368_v50 = vcombine.high %v15673_v12, %v15617_v56 }
 0x464   : > { %8690 = vrot.lane.b32.xlu1 %v8277_v7, %s10363_s6  ;;  %v8076_v7 = vcombine.high %v12816_v9, %v15617_v56  ;;  %v2813_v18 = vrot.slane %v2799_v42, %v11768_v3  ;;  %v8309_v42 = vcombine.high %v12785_v53, %v12788_v20 }
 0x465   : > { %8708 = vrot.lane.b32.xlu0 %v6492_v26, %s10356_s26  ;;  %v8340_v26 = vcombine.high %v12824_v34, %v15617_v56  ;;  %v12894_v19 = vrot.slane %v8045_v13, %v11777_v52  ;;  %v15669_v13 = vld [vmem:[#allocation11_spill] sm:$0xff] }
 0x468   : > { %8710 = vrot.lane.b32.xlu1 %v6756_v10, %s10356_s26 }
 0x469   : > { %8712 = vrot.lane.b32.xlu0 %v7020_v29, %s10356_s26  ;;  %v6989_v29 = vcombine.high %v12678_v32, %v12681_v62  ;;  %v7517_v32 = vcombine.high %v12724_v21, %v12731_v61  ;;  %v15661_v62 = vld [vmem:[#allocation5_spill] sm:$0xff] }
 0x46a   : > { %v12826_v16 = vpop.permute.xlu0 %8492  ;;  %v2791_v21 = vrot.slane %v15661_v62, %v11768_v3 }
 0x46b   : > { %15655 = vst [vmem:[#allocation55_spill] sm:$0xff] %v12826_v16  ;;  %v7003_v27 = vrot.slane %v6989_v29, %v11777_v52 }
 0x46c   : > { %8714 = vrot.lane.b32.xlu1 %v7284_v40, %s10356_s26 }
 0x46d   : > { %8716 = vrot.lane.b32.xlu0 %v7548_v36, %s10356_s26  ;;  %v2784_v36 = vcombine.high %v15661_v62, %v15617_v56 }
 0x46f   : > { %v2798_v29 = vrot.slane %v2784_v36, %v11768_v3  ;;  %v3048_v36 = vcombine.high %v15666_v23, %v15617_v56 }
 0x470   : > { %8718 = vrot.lane.b32.xlu1 %v7812_v5, %s10356_s26  ;;  %v2806_v5 = vrot.slane %v15659_v35, %v11768_v3 }
 0x471   : > { %8720 = vrot.lane.b32.xlu0 %v8076_v7, %s10356_s26  ;;  %v7781_v7 = vcombine.high %v12747_v4, %v12750_v46  ;;  %v2831_v62 = vcombine.high %v2798_v29, %v2813_v18 }
 0x472   : > { %v12833_v59 = vpop.permute.xlu1 %8494  ;;  %v2814_v38 = vcombine.low %v2791_v21, %v2806_v5  ;;  %v2815_v35 = vcombine.high %v2791_v21, %v2806_v5  ;;  %v15667_v5 = vld [vmem:[#allocation9_spill] sm:$0xff] }
 0x473   : > { %15656 = vst [vmem:[#allocation56_spill] sm:$0xff] %v12833_v59  ;;  %v12840_v10 = vpop.permute.xlu0 %8496  ;;  %v12887_v46 = vrot.slane %v7781_v7, %v11777_v52  ;;  %v3312_v7 = vcombine.high %v15667_v5, %v15617_v56  ;;  %v2845_v9 = vrot.slane %v2831_v62, %v11777_v52  ;;  %v15672_v62 = vld [vmem:[#allocation15_spill] sm:$0xff] }
 0x474   : > { %15657 = vst [vmem:[#allocation57_spill] sm:$0xff] %v12840_v10  ;;  %8722 = vrot.lane.b32.xlu1 %v8340_v26, %s10356_s26  ;;  %v12876_v26 = vrot.slane %v7517_v32, %v11777_v52  ;;  %v2830_v32 = vcombine.low %v2798_v29, %v2813_v18  ;;  %v2822_v21 = vrot.slane %v2814_v38, %v11777_v52 }
 0x475   : > { %8740 = vrot.lane.b32.xlu0 %v6475_v24, %s10358_s29  ;;  %v2829_v53 = vrot.slane %v2815_v35, %v11777_v52  ;;  %v12909_v18 = vrot.slane %v8309_v42, %v11777_v52  ;;  %v3576_v29 = vcombine.high %v15669_v13, %v15617_v56  ;;  %v12917_v38 = vrot.slane %v15666_v23, %v11768_v3  ;;  %v15670_v35 = vld [vmem:[#allocation13_spill] sm:$0xff] }
 0x476   : > { %v12847_v15 = vpop.permute.xlu1 %8498  ;;  %v2838_v11 = vrot.slane %v2830_v32, %v11777_v52  ;;  %v3840_v39 = vcombine.high %v15670_v35, %v15617_v56  ;;  %v12927_v42 = vrot.slane %v3048_v36, %v11768_v3  ;;  %v12931_v32 = vrot.slane %v15667_v5, %v11768_v3 }
 0x477   : > { %15658 = vst [vmem:[#allocation58_spill] sm:$0xff] %v12847_v15  ;;  %v12854_v40 = vpop.permute.xlu0 %8516  ;;  %v4104_v23 = vcombine.high %v15672_v62, %v15617_v56  ;;  %v12942_v24 = vrot.slane %v15669_v13, %v11768_v3  ;;  %v6757_v5 = vcombine.high %v6739_v37, %v15617_v56 }
 0x478   : > { %15660 = vst [vmem:[#allocation20_spill] sm:$0xff] %v12854_v40  ;;  %8742 = vrot.lane.b32.xlu1 %v6739_v37, %s10358_s29  ;;  %v12956_v13 = vrot.slane %v3840_v39, %v11768_v3  ;;  %v6430_v37 = vcombine.high %v12623_v44, %v15617_v56  ;;  %v12973_v39 = vrot.slane %v15673_v12, %v11768_v3 }
 0x479   : > { %8744 = vrot.lane.b32.xlu0 %v7003_v27, %s10358_s29 }
 0x47a   : > { %v12865_v25 = vpop.permute.xlu1 %8518 }
 0x47b   : > { %15662 = vst [vmem:[#allocation5_spill] sm:$0xff] %v12865_v25  ;;  %v12873_v61 = vpop.permute.xlu0 %8520  ;;  %v4880_v25 = vcombine.low %v2838_v11, %v2845_v9 }
 0x47c   : > { %15663 = vst [vmem:[#allocation59_spill] sm:$0xff] %v12873_v61  ;;  %8746 = vrot.lane.b32.xlu1 %v7267_v0, %s10358_s29  ;;  %v10002_v61 = vcombine.high %v2838_v11, %v2845_v9  ;;  %v12969_v11 = vrot.slane %v4104_v23, %v11768_v3  ;;  %v12976_v9 = vrot.slane %v4368_v50, %v11768_v3 }
 0x47d   : > { %8748 = vrot.lane.b32.xlu0 %v12876_v26, %s10358_s29  ;;  %v12993_v50 = vrot.slane %v4880_v25, %v11768_v3  ;;  %v10066_v25 = vcombine.high %v12485_v51, %v15617_v56  ;;  %v7813_v51 = vcombine.high %v12887_v46, %v15617_v56 }
 0x47e   : > { %v12884_v4 = vpop.permute.xlu1 %8522 }
 0x47f   : > { %15664 = vst [vmem:[#allocation60_spill] sm:$0xff] %v12884_v4  ;;  %v12891_v34 = vpop.permute.xlu0 %8524  ;;  %v12949_v4 = vrot.slane %v3576_v29, %v11768_v3  ;;  %v10062_v29 = vcombine.high %v12472_v63, %v15617_v56 }
 0x480   : > { %15665 = vst [vmem:[#allocation61_spill] sm:$0xff] %v12891_v34  ;;  %8750 = vrot.lane.b32.xlu1 %v12887_v46, %s10358_s29  ;;  %v10001_v34 = vcombine.high %v2822_v21, %v2829_v53  ;;  %v7486_v46 = vcombine.high %v12685_v6, %v15617_v56 }
 0x481   : > { %8752 = vrot.lane.b32.xlu0 %v12894_v19, %s10358_s29 }
 0x482   : > { %v12906_v20 = vpop.permute.xlu1 %8526  ;;  %v12990_v12 = vrot.slane %v10001_v34, %v11768_v3  ;;  %v13010_v34 = vrot.slane %v6430_v37, %v11768_v3 }
 0x483   : > { %15668 = vst [vmem:[#allocation7_spill] sm:$0xff] %v12906_v20  ;;  %v12921_v31 = vpop.permute.xlu0 %8528  ;;  %v12938_v20 = vrot.slane %v3312_v7, %v11768_v3  ;;  %v12953_v7 = vrot.slane %v15670_v35, %v11768_v3  ;;  %v6694_v35 = vcombine.high %v12629_v47, %v15617_v56  ;;  %v7549_v47 = vcombine.high %v12876_v26, %v15617_v56 }
 0x484   : > { %15671 = vst [vmem:[#allocation9_spill] sm:$0xff] %v12921_v31  ;;  %8754 = vrot.lane.b32.xlu1 %v12909_v18, %s10358_s29  ;;  %v4864_v31 = vcombine.low %v2822_v21, %v2829_v53  ;;  %v12966_v21 = vrot.slane %v15672_v62, %v11768_v3  ;;  %v7285_v53 = vcombine.high %v7267_v0, %v15617_v56  ;;  %v15677_v0 = vld [vmem:[#allocation19_spill] sm:$0xff] }
 0x485   : > { %8772 = vrot.lane.b32.xlu0 %v6493_v17, %s10360_s27  ;;  %v7021_v17 = vcombine.high %v7003_v27, %v15617_v56  ;;  %v6958_v62 = vcombine.high %v12642_v60, %v15617_v56  ;;  %v13002_v23 = vcombine.high %v15677_v0, %v15617_v56  ;;  %v13016_v60 = vrot.slane %v15677_v0, %v11768_v3 }
 0x486   : > { %v12945_v36 = vpop.permute.xlu1 %8530  ;;  %v12979_v27 = vrot.slane %v4864_v31, %v11768_v3  ;;  %v12996_v31 = vrot.slane %v10002_v61, %v11768_v3  ;;  %v15679_v61 = vld [vmem:[#allocation22_spill] sm:$0xff]  ;;  %v10070_v26 = vcombine.high %v12496_v41, %v15617_v56  ;;  %v13033_v0 = vrot.slane %v6694_v35, %v11768_v3 }
 0x487   : > { %15674 = vst [vmem:[#allocation11_spill] sm:$0xff] %v12945_v36  ;;  %v12958_v15 = vpop.permute.xlu0 %8548  ;;  %v8077_v35 = vcombine.high %v12894_v19, %v15617_v56  ;;  %v10078_v19 = vcombine.high %v12613_v48, %v15617_v56  ;;  %v15683_v48 = vld [vmem:[#allocation23_spill] sm:$0xff] }
 0x488   : > { %15675 = vst [vmem:[#allocation13_spill] sm:$0xff] %v12958_v15  ;;  %8774 = vrot.lane.b32.xlu1 %v6757_v5, %s10360_s27  ;;  %v3063_v5 = vcombine.high %v15679_v61, %v15617_v56 }
 0x489   : > { %8776 = vrot.lane.b32.xlu0 %v7021_v17, %s10360_s27  ;;  %v3070_v17 = vrot.slane %v15679_v61, %v11768_v3  ;;  %v13054_v61 = vrot.slane %v10066_v25, %v11768_v3  ;;  %v8341_v25 = vcombine.high %v12909_v18, %v15617_v56 }
 0x48a   : > { %v12982_v44 = vpop.permute.xlu1 %8550  ;;  %v13059_v41 = vrot.slane %v3063_v5, %v11768_v3 }
 0x48b   : > { %15676 = vst [vmem:[#allocation15_spill] sm:$0xff] %v12982_v44  ;;  %v13004_v63 = vpop.permute.xlu0 %8552  ;;  %v7222_v44 = vcombine.high %v12665_v33, %v15617_v56  ;;  %v3078_v6 = vcombine.low %v12917_v38, %v3070_v17 }
 0x48c   : > { %15678 = vst [vmem:[#allocation17_spill] sm:$0xff] %v13004_v63  ;;  %8778 = vrot.lane.b32.xlu1 %v7285_v53, %s10360_s27  ;;  %v13030_v53 = vrot.slane %v10062_v29, %v11768_v3  ;;  %v3327_v63 = vcombine.high %v15683_v48, %v15617_v56 }
 0x48d   : > { %8780 = vrot.lane.b32.xlu0 %v7549_v47, %s10360_s27  ;;  %v13042_v47 = vrot.slane %v6958_v62, %v11768_v3  ;;  %v10074_v62 = vcombine.high %v12518_v14, %v15617_v56  ;;  %v6740_v14 = vcombine.low %v13033_v0, %v13054_v61  ;;  %v13075_v5 = vrot.slane %v7222_v44, %v11768_v3 }
 0x48e   : > { %v13025_v37 = vpop.permute.xlu1 %8554  ;;  %v6476_v33 = vcombine.low %v13010_v34, %v13030_v53  ;;  %v10082_v44 = vcombine.high %v12671_v54, %v15617_v56 }
 0x48f   : > { %15680 = vst [vmem:[#allocation19_spill] sm:$0xff] %v13025_v37  ;;  %v13046_v29 = vpop.permute.xlu0 %8556  ;;  %v13063_v37 = vrot.slane %v10070_v26, %v11768_v3  ;;  %v7750_v26 = vcombine.high %v12714_v55, %v15617_v56  ;;  %v13094_v55 = vrot.slane %v10074_v62, %v11768_v3 }
 0x490   : > { %15681 = vst [vmem:[#allocation22_spill] sm:$0xff] %v13046_v29  ;;  %8782 = vrot.lane.b32.xlu1 %v7813_v51, %s10360_s27  ;;  %v3079_v29 = vcombine.high %v12917_v38, %v3070_v17  ;;  %v13090_v36 = vrot.slane %v6476_v33, %v11777_v52  ;;  %v8014_v38 = vcombine.high %v12734_v43, %v15617_v56 }
 0x491   : > { %8784 = vrot.lane.b32.xlu0 %v8077_v35, %s10360_s27  ;;  %v7004_v35 = vcombine.low %v13042_v47, %v13063_v37  ;;  %v13101_v17 = vrot.slane %v3078_v6, %v11777_v52  ;;  %v13106_v33 = vrot.slane %v10078_v19, %v11768_v3  ;;  %v13115_v43 = vrot.slane %v6740_v14, %v11777_v52 }
 0x492   : > { %v13068_v51 = vpop.permute.xlu1 %8558  ;;  %v7268_v54 = vcombine.low %v13075_v5, %v13094_v55  ;;  %v13120_v6 = vrot.slane %v7750_v26, %v11768_v3  ;;  %v8278_v19 = vcombine.high %v12753_v1, %v15617_v56  ;;  %v13125_v15 = vrot.slane %v3079_v29, %v11777_v52 }
 0x493   : > { %15682 = vst [vmem:[#allocation62_spill] sm:$0xff] %v13068_v51  ;;  %v13085_v51 = vrot.slane %v7486_v46, %v11768_v3  ;;  %v13087_v18 = vpop.permute.xlu0 %8560  ;;  %v15685_v46 = vld [vmem:[#allocation25_spill] sm:$0xff]  ;;  %v13131_v14 = vrot.slane %v7004_v35, %v11777_v52  ;;  %v13140_v1 = vrot.slane %v8014_v38, %v11768_v3  ;;  %v13143_v29 = vrot.slane %v10082_v44, %v11768_v3 }
 0x494   : > { %15684 = vst [vmem:[#allocation23_spill] sm:$0xff] %v13087_v18  ;;  %8786 = vrot.lane.b32.xlu1 %v8341_v25, %s10360_s27  ;;  %v3591_v18 = vcombine.high %v15685_v46, %v15617_v56  ;;  %v10086_v25 = vcombine.high %v12688_v57, %v15617_v56  ;;  %v3334_v57 = vrot.slane %v15683_v48, %v11768_v3 }
 0x495   : > { %8804 = vrot.lane.b32.xlu0 %v13090_v36, %s10362_s19  ;;  %v7532_v26 = vcombine.low %v13085_v51, %v13106_v33  ;;  %v3094_v48 = vcombine.low %v12927_v42, %v13059_v41  ;;  %v3095_v35 = vcombine.high %v12927_v42, %v13059_v41  ;;  %v13159_v44 = vrot.slane %v7268_v54, %v11777_v52 }
 0x496   : > { %v13112_v62 = vpop.permute.xlu1 %8562  ;;  %v3605_v10 = vrot.slane %v3591_v18, %v11768_v3  ;;  %v7796_v59 = vcombine.low %v13120_v6, %v13143_v29  ;;  %v13167_v42 = vrot.slane %v8278_v19, %v11768_v3  ;;  %v5064_v41 = vcombine.low %v13101_v17, %v13125_v15 }
 0x497   : > { %15686 = vst [vmem:[#allocation25_spill] sm:$0xff] %v13112_v62  ;;  %v3341_v62 = vrot.slane %v3327_v63, %v11768_v3  ;;  %v13133_v40 = vpop.permute.xlu0 %8580  ;;  %v10090_v63 = vcombine.high %v12708_v2, %v15617_v56  ;;  %v13162_v2 = vrot.slane %v10086_v25, %v11768_v3  ;;  %v3342_v18 = vcombine.low %v12931_v32, %v3334_v57 }
 0x498   : > { %15687 = vst [vmem:[#allocation63_spill] sm:$0xff] %v13133_v40  ;;  %8806 = vrot.lane.b32.xlu1 %v13115_v43, %s10362_s19  ;;  %v3598_v40 = vrot.slane %v15685_v46, %v11768_v3  ;;  %15689 = vst [vmem:[#allocation65_spill] sm:$0xff] %v13167_v42  ;;  %v3343_v46 = vcombine.high %v12931_v32, %v3334_v57  ;;  %v13178_v25 = vrot.slane %v7532_v26, %v11777_v52 }
 0x499   : > { %8808 = vrot.lane.b32.xlu0 %v13131_v14, %s10362_s19  ;;  %v3359_v54 = vcombine.high %v12938_v20, %v3341_v62  ;;  %v8060_v19 = vcombine.low %v13140_v1, %v13162_v2  ;;  %v13185_v28 = vrot.slane %v10090_v63, %v11768_v3  ;;  %v3102_v26 = vrot.slane %v3094_v48, %v11777_v52 }
 0x49a   : > { %v13156_v38 = vpop.permute.xlu1 %8582  ;;  %v3606_v32 = vcombine.low %v12942_v24, %v3598_v40  ;;  %v3607_v57 = vcombine.high %v12942_v24, %v3598_v40  ;;  %v13198_v63 = vrot.slane %v7796_v59, %v11777_v52  ;;  %v10009_v40 = vcombine.high %v13101_v17, %v13125_v15  ;;  %v15693_v24 = vld [vmem:[#allocation26_spill] sm:$0xff] }
 0x49b   : > { %15688 = vst [vmem:[#allocation64_spill] sm:$0xff] %v13156_v38  ;;  %v3358_v38 = vcombine.low %v12938_v20, %v3341_v62  ;;  %v13175_v16 = vpop.permute.xlu0 %8584  ;;  %15691 = vst [vmem:[#allocation67_spill] sm:$0xff] %v13185_v28  ;;  %v3622_v20 = vcombine.low %v12949_v4, %v3605_v10  ;;  %v3623_v62 = vcombine.high %v12949_v4, %v3605_v10 }
 0x49c   : > { %15690 = vst [vmem:[#allocation66_spill] sm:$0xff] %v13175_v16  ;;  %8810 = vrot.lane.b32.xlu1 %v13159_v44, %s10362_s19  ;;  %v3109_v16 = vrot.slane %v3095_v35, %v11777_v52  ;;  %v8324_v45 = vcombine.low %v13167_v42, %v13185_v28  ;;  %v3350_v10 = vrot.slane %v3342_v18, %v11777_v52 }
 0x49d   : > { %8812 = vrot.lane.b32.xlu0 %v13178_v25, %s10362_s19  ;;  %v3357_v4 = vrot.slane %v3343_v46, %v11777_v52  ;;  %v3862_v48 = vrot.slane %v15693_v24, %v11768_v3  ;;  %v13209_v35 = vrot.slane %v5064_v41, %v11768_v3  ;;  %v3373_v59 = vrot.slane %v3359_v54, %v11777_v52 }
 0x49e   : > { %v13195_v58 = vpop.permute.xlu1 %8586  ;;  %v13216_v8 = vrot.slane %v8060_v19, %v11777_v52  ;;  %v3614_v15 = vrot.slane %v3606_v32, %v11777_v52  ;;  %v3621_v17 = vrot.slane %v3607_v57, %v11777_v52  ;;  %v3630_v18 = vrot.slane %v3622_v20, %v11777_v52 }
 0x49f   : > { %15692 = vst [vmem:[#allocation68_spill] sm:$0xff] %v13195_v58  ;;  %v3366_v58 = vrot.slane %v3358_v38, %v11777_v52  ;;  %v13213_v30 = vpop.permute.xlu0 %8588  ;;  %v3637_v41 = vrot.slane %v3623_v62, %v11777_v52  ;;  %v5080_v46 = vcombine.low %v3102_v26, %v3109_v16  ;;  %v10010_v38 = vcombine.high %v3102_v26, %v3109_v16 }
 0x4a0   : > { %15694 = vst [vmem:[#allocation26_spill] sm:$0xff] %v13213_v30  ;;  %8814 = vrot.lane.b32.xlu1 %v13198_v63, %s10362_s19  ;;  %v3855_v54 = vcombine.high %v15693_v24, %v15617_v56  ;;  %v13231_v30 = vrot.slane %v8324_v45, %v11777_v52  ;;  %v5264_v32 = vcombine.low %v3350_v10, %v3357_v4 }
 0x4a1   : > { %8816 = vrot.lane.b32.xlu0 %v13216_v8, %s10362_s19  ;;  %v10017_v49 = vcombine.high %v3350_v10, %v3357_v4  ;;  %v3870_v57 = vcombine.low %v12953_v7, %v3862_v48  ;;  %v3871_v20 = vcombine.high %v12953_v7, %v3862_v48  ;;  %v5079_v62 = vrot.slane %v10009_v40, %v11768_v3 }
 0x4a2   : > { %v13228_v19 = vpop.permute.xlu1 %8590  ;;  %v5280_v16 = vcombine.low %v3366_v58, %v3373_v59  ;;  %v10018_v26 = vcombine.high %v3366_v58, %v3373_v59  ;;  %v6494_v24 = vcombine.high %v13090_v36, %v15617_v56  ;;  %v5464_v45 = vcombine.low %v3614_v15, %v3621_v17 }
 0x4a3   : > { %15695 = vst [vmem:[#allocation69_spill] sm:$0xff] %v13228_v19  ;;  %v13236_v42 = vpop.permute.xlu0 %8592  ;;  %v10025_v19 = vcombine.high %v3614_v15, %v3621_v17  ;;  %v5480_v28 = vcombine.low %v3630_v18, %v3637_v41  ;;  %v10026_v10 = vcombine.high %v3630_v18, %v3637_v41  ;;  %v5087_v4 = vrot.slane %v5080_v46, %v11768_v3 }
 0x4a4   : > { %15696 = vst [vmem:[#allocation70_spill] sm:$0xff] %v13236_v42  ;;  %8818 = vrot.lane.b32.xlu1 %v13231_v30, %s10362_s19  ;;  %v5095_v7 = vrot.slane %v10010_v38, %v11768_v3  ;;  %v3869_v40 = vrot.slane %v3855_v54, %v11768_v3  ;;  %v6758_v36 = vcombine.high %v13115_v43, %v15617_v56 }
 0x4a5   : > { %8836 = vrot.lane.b32.xlu0 %v6494_v24, %s10366_s7  ;;  %v5271_v48 = vrot.slane %v5264_v32, %v11768_v3  ;;  %v5279_v59 = vrot.slane %v10017_v49, %v11768_v3  ;;  %v3878_v15 = vrot.slane %v3870_v57, %v11777_v52  ;;  %v3885_v17 = vrot.slane %v3871_v20, %v11777_v52 }
 0x4a6   : > { %v13246_v58 = vpop.permute.xlu1 %8594  ;;  %v5096_v18 = vcombine.low %v13209_v35, %v5079_v62  ;;  %v5287_v41 = vrot.slane %v5280_v16, %v11768_v3  ;;  %v5295_v46 = vrot.slane %v10018_v26, %v11768_v3  ;;  %v7022_v54 = vcombine.high %v13131_v14, %v15617_v56 }
 0x4a7   : > { %15697 = vst [vmem:[#allocation71_spill] sm:$0xff] %v13246_v58  ;;  %v13257_v38 = vpop.permute.xlu0 %8612  ;;  %v5471_v43 = vrot.slane %v5464_v45, %v11768_v3  ;;  %v5479_v49 = vrot.slane %v10025_v19, %v11768_v3  ;;  %v5487_v32 = vrot.slane %v5480_v28, %v11768_v3  ;;  %v5495_v57 = vrot.slane %v10026_v10, %v11768_v3 }
 0x4a8   : > { %15698 = vst [vmem:[#allocation72_spill] sm:$0xff] %v13257_v38  ;;  %8838 = vrot.lane.b32.xlu1 %v6758_v36, %s10366_s7  ;;  %v5104_v35 = vcombine.low %v5087_v4, %v5095_v7  ;;  %v3886_v20 = vcombine.low %v12956_v13, %v3869_v40  ;;  %v3887_v62 = vcombine.high %v12956_v13, %v3869_v40  ;;  %v15703_v36 = vld [vmem:[#allocation28_spill] sm:$0xff] }
 0x4a9   : > { %8840 = vrot.lane.b32.xlu0 %v7022_v54, %s10366_s7  ;;  %v7286_v14 = vcombine.high %v13159_v44, %v15617_v56  ;;  %v13275_v26 = vrot.slane %v13002_v23, %v11768_v3  ;;  %v5296_v19 = vcombine.low %v5271_v48, %v5279_v59  ;;  %v5664_v28 = vcombine.low %v3878_v15, %v3885_v17 }
 0x4aa   : > { %v13269_v16 = vpop.permute.xlu1 %8614  ;;  %v10033_v24 = vcombine.high %v3878_v15, %v3885_v17  ;;  %v15700_v45 = vcombine.low %v12979_v27, %v12990_v12  ;;  %v15701_v13 = vcombine.low %v12993_v50, %v12996_v31  ;;  %v5304_v44 = vcombine.low %v5287_v41, %v5295_v46  ;;  %v15705_v46 = vld [vmem:[#allocation29_spill] sm:$0xff] }
 0x4ab   : > { %15699 = vst [vmem:[#allocation73_spill] sm:$0xff] %v13269_v16  ;;  %v13289_v7 = vpop.permute.xlu0 %8616  ;;  %v7550_v23 = vcombine.high %v13178_v25, %v15617_v56  ;;  %v13295_v40 = vrot.slane %v5096_v18, %v11777_v52  ;;  %v5496_v27 = vcombine.low %v5471_v43, %v5479_v49  ;;  %v5504_v12 = vcombine.low %v5487_v32, %v5495_v57 }
 0x4ac   : > { %v13281_v10 = vrot.slane %v15700_v45, %v11777_v52  ;;  %v13287_v4 = vrot.slane %v15701_v13, %v11777_v52  ;;  %15702 = vst [vmem:[#allocation74_spill] sm:$0xff] %v13289_v7  ;;  %8842 = vrot.lane.b32.xlu1 %v7286_v14, %s10366_s7  ;;  %v4119_v48 = vcombine.high %v15703_v36, %v15617_v56 }
 0x4ad   : > { %v13300_v50 = vrot.slane %v5104_v35, %v11777_v52  ;;  %v13303_v31 = vrot.slane %v3886_v20, %v11777_v52  ;;  %v13306_v59 = vrot.slane %v3887_v62, %v11777_v52  ;;  %8844 = vrot.lane.b32.xlu0 %v7550_v23, %s10366_s7  ;;  %v7814_v15 = vcombine.high %v13198_v63, %v15617_v56 }
 0x4ae   : > { %v13309_v25 = vpop.permute.xlu1 %8618  ;;  %v13314_v17 = vrot.slane %v5296_v19, %v11777_v52  ;;  %v13317_v18 = vrot.slane %v5664_v28, %v11768_v3  ;;  %v13320_v41 = vrot.slane %v10033_v24, %v11768_v3  ;;  %v4383_v54 = vcombine.high %v15705_v46, %v15617_v56 }
 0x4af   : > { %15704 = vst [vmem:[#allocation28_spill] sm:$0xff] %v13309_v25  ;;  %v13325_v43 = vrot.slane %v5304_v44, %v11777_v52  ;;  %v4126_v49 = vrot.slane %v15703_v36, %v11768_v3  ;;  %v13329_v32 = vpop.permute.xlu0 %8620  ;;  %v8078_v63 = vcombine.high %v13216_v8, %v15617_v56  ;;  %v6477_v57 = vcombine.high %v13010_v34, %v13030_v53 }
 0x4b0   : > { %15706 = vst [vmem:[#allocation29_spill] sm:$0xff] %v13329_v32  ;;  %8846 = vrot.lane.b32.xlu1 %v7814_v15, %s10366_s7  ;;  %v13337_v35 = vrot.slane %v5496_v27, %v11777_v52  ;;  %v13340_v20 = vrot.slane %v5504_v12, %v11777_v52  ;;  %v4133_v62 = vrot.slane %v4119_v48, %v11768_v3 }
 0x4b1   : > { %v4390_v14 = vrot.slane %v15705_v46, %v11768_v3  ;;  %v5680_v19 = vcombine.low %v13303_v31, %v13306_v59  ;;  %v4647_v8 = vcombine.high %v12759_v22, %v15617_v56  ;;  %8848 = vrot.lane.b32.xlu0 %v8078_v63, %s10366_s7  ;;  %v8342_v53 = vcombine.high %v13231_v30, %v15617_v56 }
 0x4b2   : > { %v13350_v34 = vpop.permute.xlu1 %8622  ;;  %v6741_v28 = vcombine.high %v13033_v0, %v13054_v61  ;;  %v10034_v24 = vcombine.high %v13303_v31, %v13306_v59  ;;  %v5696_v45 = vcombine.low %v13317_v18, %v13320_v41  ;;  %v4397_v13 = vrot.slane %v4383_v54, %v11768_v3 }
 0x4b3   : > { %15707 = vst [vmem:[#allocation75_spill] sm:$0xff] %v13350_v34  ;;  %v4654_v44 = vrot.slane %v12759_v22, %v11768_v3  ;;  %v4134_v23 = vcombine.low %v12966_v21, %v4126_v49  ;;  %v4135_v27 = vcombine.high %v12966_v21, %v4126_v49  ;;  %v13365_v12 = vpop.permute.xlu0 %8624  ;;  %v13368_v30 = vrot.slane %v6477_v57, %v11777_v52 }
 0x4b4   : > { %15708 = vst [vmem:[#allocation76_spill] sm:$0xff] %v13365_v12  ;;  %8850 = vrot.lane.b32.xlu1 %v8342_v53, %s10366_s7  ;;  %v7005_v0 = vcombine.high %v13042_v47, %v13063_v37  ;;  %v4150_v61 = vcombine.low %v12969_v11, %v4133_v62  ;;  %v4151_v36 = vcombine.high %v12969_v11, %v4133_v62 }
 0x4b5   : > { %v4398_v22 = vcombine.low %v12973_v39, %v4390_v14  ;;  %v4399_v48 = vcombine.high %v12973_v39, %v4390_v14  ;;  %v13378_v21 = vrot.slane %v5680_v19, %v11768_v3  ;;  %v4661_v31 = vrot.slane %v4647_v8, %v11768_v3  ;;  %8868 = vrot.lane.b32.xlu0 %v13368_v30, %s10367_s25 }
 0x4b6   : > { %v13383_v59 = vpop.permute.xlu1 %8626  ;;  %v13386_v37 = vrot.slane %v6741_v28, %v11777_v52  ;;  %v7269_v11 = vcombine.high %v13075_v5, %v13094_v55  ;;  %v4414_v47 = vcombine.low %v12976_v9, %v4397_v13  ;;  %v4415_v39 = vcombine.high %v12976_v9, %v4397_v13 }
 0x4b7   : > { %15709 = vst [vmem:[#allocation77_spill] sm:$0xff] %v13383_v59  ;;  %v4662_v15 = vcombine.low %v13016_v60, %v4654_v44  ;;  %v4663_v46 = vcombine.high %v13016_v60, %v4654_v44  ;;  %v4142_v54 = vrot.slane %v4134_v23, %v11777_v52  ;;  %v4149_v49 = vrot.slane %v4135_v27, %v11777_v52  ;;  %v13396_v63 = vpop.permute.xlu0 %8644 }
 0x4b8   : > { %15710 = vst [vmem:[#allocation78_spill] sm:$0xff] %v13396_v63  ;;  %v13399_v57 = vrot.slane %v7005_v0, %v11777_v52  ;;  %8870 = vrot.lane.b32.xlu1 %v13386_v37, %s10367_s25  ;;  %v7533_v5 = vcombine.high %v13085_v51, %v13106_v33  ;;  %v4158_v9 = vrot.slane %v4150_v61, %v11777_v52 }
 0x4b9   : > { %v4165_v55 = vrot.slane %v4151_v36, %v11777_v52  ;;  %v4406_v60 = vrot.slane %v4398_v22, %v11777_v52  ;;  %v4413_v62 = vrot.slane %v4399_v48, %v11777_v52  ;;  %v4678_v14 = vcombine.low %v13275_v26, %v4661_v31 }
 0x4ba   : > { %v4679_v19 = vcombine.high %v13275_v26, %v4661_v31  ;;  %8872 = vrot.lane.b32.xlu0 %v13399_v57, %s10367_s25  ;;  %v13413_v8 = vpop.permute.xlu1 %8646  ;;  %v13416_v53 = vrot.slane %v7269_v11, %v11777_v52  ;;  %v7797_v51 = vcombine.high %v13120_v6, %v13143_v29  ;;  %v4422_v33 = vrot.slane %v4414_v47, %v11777_v52  ;;  %v15714_v47 = vld [vmem:[#allocation67_spill] sm:$0xff] }
 0x4bb   : > { %15711 = vst [vmem:[#allocation79_spill] sm:$0xff] %v13413_v8  ;;  %v4429_v28 = vrot.slane %v4415_v39, %v11777_v52  ;;  %v4670_v13 = vrot.slane %v4662_v15, %v11777_v52  ;;  %v4677_v44 = vrot.slane %v4663_v46, %v11777_v52  ;;  %v5695_v26 = vrot.slane %v10034_v24, %v11768_v3  ;;  %v13425_v27 = vpop.permute.xlu0 %8648  ;;  %v15715_v39 = vld [vmem:[#allocation65_spill] sm:$0xff] }
 0x4bc   : > { %v5864_v23 = vcombine.low %v4142_v54, %v4149_v49  ;;  %15712 = vst [vmem:[#allocation80_spill] sm:$0xff] %v13425_v27  ;;  %v13428_v0 = vrot.slane %v7533_v5, %v11777_v52  ;;  %8874 = vrot.lane.b32.xlu1 %v13416_v53, %s10367_s25  ;;  %v8061_v6 = vcombine.high %v13140_v1, %v13162_v2 }
 0x4bd   : > { %v10041_v29 = vcombine.high %v4142_v54, %v4149_v49  ;;  %v5880_v61 = vcombine.low %v4158_v9, %v4165_v55  ;;  %v10042_v36 = vcombine.high %v4158_v9, %v4165_v55  ;;  %v6064_v22 = vcombine.low %v4406_v60, %v4413_v62 }
 0x4be   : > { %v4686_v48 = vrot.slane %v4678_v14, %v11777_v52  ;;  %v4693_v24 = vrot.slane %v4679_v19, %v11777_v52  ;;  %8876 = vrot.lane.b32.xlu0 %v13428_v0, %s10367_s25  ;;  %v13438_v31 = vpop.permute.xlu1 %8650  ;;  %v13441_v11 = vrot.slane %v7797_v51, %v11777_v52  ;;  %v8325_v15 = vcombine.high %v15715_v39, %v15714_v47 }
 0x4bf   : > { %15713 = vst [vmem:[#allocation81_spill] sm:$0xff] %v13438_v31  ;;  %v10049_v1 = vcombine.high %v4406_v60, %v4413_v62  ;;  %v6080_v2 = vcombine.low %v4422_v33, %v4429_v28  ;;  %v10050_v46 = vcombine.high %v4422_v33, %v4429_v28  ;;  %v6264_v54 = vcombine.low %v4670_v13, %v4677_v44  ;;  %v13452_v55 = vpop.permute.xlu0 %8652 }
 0x4c0   : > { %v13449_v49 = vrot.slane %v5696_v45, %v11777_v52  ;;  %v5704_v5 = vcombine.low %v13378_v21, %v5695_v26  ;;  %v10057_v9 = vcombine.high %v4670_v13, %v4677_v44  ;;  %15716 = vst [vmem:[#allocation67_spill] sm:$0xff] %v13452_v55  ;;  %v13455_v14 = vrot.slane %v8061_v6, %v11777_v52 }
 0x4c1   : > { %8878 = vrot.lane.b32.xlu1 %v13441_v11, %s10367_s25  ;;  %v5871_v60 = vrot.slane %v5864_v23, %v11768_v3  ;;  %v5879_v62 = vrot.slane %v10041_v29, %v11768_v3  ;;  %v5887_v19 = vrot.slane %v5880_v61, %v11768_v3  ;;  %v5895_v18 = vrot.slane %v10042_v36, %v11768_v3 }
 0x4c2   : > { %v6071_v41 = vrot.slane %v6064_v22, %v11768_v3  ;;  %v6280_v45 = vcombine.low %v4686_v48, %v4693_v24  ;;  %v10058_v21 = vcombine.high %v4686_v48, %v4693_v24  ;;  %8880 = vrot.lane.b32.xlu0 %v13455_v14, %s10367_s25  ;;  %v13466_v51 = vpop.permute.xlu1 %8654  ;;  %v13469_v33 = vrot.slane %v8325_v15, %v11777_v52 }
 0x4c3   : > { %15717 = vst [vmem:[#allocation65_spill] sm:$0xff] %v13466_v51  ;;  %v6079_v28 = vrot.slane %v10049_v1, %v11768_v3  ;;  %v6087_v13 = vrot.slane %v6080_v2, %v11768_v3  ;;  %v6095_v44 = vrot.slane %v10050_v46, %v11768_v3  ;;  %v6271_v26 = vrot.slane %v6264_v54, %v11768_v3  ;;  %v13476_v6 = vpop.permute.xlu0 %8656 }
 0x4c4   : > { %v6279_v23 = vrot.slane %v10057_v9, %v11768_v3  ;;  %15718 = vst [vmem:[#allocation82_spill] sm:$0xff] %v13476_v6  ;;  %v6495_v29 = vcombine.high %v13368_v30, %v15617_v56  ;;  %v13484_v61 = vcombine.low %v13281_v10, %v13287_v4  ;;  %v4913_v36 = vcombine.high %v13281_v10, %v13287_v4 }
 0x4c5   : > { %8882 = vrot.lane.b32.xlu1 %v13469_v33, %s10367_s25  ;;  %v13489_v22 = vrot.slane %v5704_v5, %v11777_v52  ;;  %v5896_v48 = vcombine.low %v5871_v60, %v5879_v62  ;;  %v13493_v24 = vcombine.low %v13295_v40, %v13300_v50  ;;  %v5113_v30 = vcombine.high %v13295_v40, %v13300_v50 }
 0x4c6   : > { %v5904_v47 = vcombine.low %v5887_v19, %v5895_v18  ;;  %v6287_v39 = vrot.slane %v6280_v45, %v11768_v3  ;;  %v6295_v15 = vrot.slane %v10058_v21, %v11768_v3  ;;  %8900 = vrot.lane.b32.xlu0 %v6495_v29, %s10363_s6  ;;  %v13500_v1 = vpop.permute.xlu1 %8658  ;;  %v6759_v10 = vcombine.high %v13386_v37, %v15617_v56 }
 0x4c7   : > { %15719 = vst [vmem:[#allocation83_spill] sm:$0xff] %v13500_v1  ;;  %v6096_v2 = vcombine.low %v6071_v41, %v6079_v28  ;;  %v6104_v46 = vcombine.low %v6087_v13, %v6095_v44  ;;  %v13506_v54 = vcombine.low %v13314_v17, %v13325_v43  ;;  %v5313_v40 = vcombine.high %v13314_v17, %v13325_v43  ;;  %v13510_v9 = vpop.permute.xlu0 %8676 }
 0x4c8   : > { %v6296_v5 = vcombine.low %v6271_v26, %v6279_v23  ;;  %15720 = vst [vmem:[#allocation84_spill] sm:$0xff] %v13510_v9  ;;  %v7023_v60 = vcombine.high %v13399_v57, %v15617_v56  ;;  %v13517_v37 = vrot.slane %v13484_v61, %v11768_v3  ;;  %v13520_v62 = vrot.slane %v4913_v36, %v11768_v3 }
 0x4c9   : > { %8902 = vrot.lane.b32.xlu1 %v6759_v10, %s10363_s6  ;;  %v13524_v19 = vrot.slane %v13493_v24, %v11768_v3  ;;  %v13527_v17 = vrot.slane %v5113_v30, %v11768_v3  ;;  %v13531_v18 = vcombine.low %v13337_v35, %v13340_v20  ;;  %v5513_v57 = vcombine.high %v13337_v35, %v13340_v20 }
 0x4ca   : > { %v5903_v41 = vrot.slane %v5896_v48, %v11777_v52  ;;  %v13537_v45 = vrot.slane %v5904_v47, %v11777_v52  ;;  %v6304_v21 = vcombine.low %v6287_v39, %v6295_v15  ;;  %8904 = vrot.lane.b32.xlu0 %v7023_v60, %s10363_s6  ;;  %v13540_v28 = vpop.permute.xlu1 %8678  ;;  %v7287_v13 = vcombine.high %v13416_v53, %v15617_v56 }
 0x4cb   : > { %15721 = vst [vmem:[#allocation85_spill] sm:$0xff] %v13540_v28  ;;  %v6103_v44 = vrot.slane %v6096_v2, %v11777_v52  ;;  %v13547_v26 = vrot.slane %v13506_v54, %v11768_v3  ;;  %v13550_v35 = vrot.slane %v5313_v40, %v11768_v3  ;;  %v13554_v23 = vcombine.low %v13449_v49, %v13489_v22  ;;  %v13559_v36 = vpop.permute.xlu0 %8680 }
 0x4cc   : > { %v13557_v29 = vrot.slane %v6104_v46, %v11777_v52  ;;  %15722 = vst [vmem:[#allocation86_spill] sm:$0xff] %v13559_v36  ;;  %v7551_v53 = vcombine.high %v13428_v0, %v15617_v56  ;;  %v6526_v48 = vcombine.low %v13517_v37, %v13520_v62  ;;  %v5713_v30 = vcombine.high %v13449_v49, %v13489_v22 }
 0x4cd   : > { %8906 = vrot.lane.b32.xlu1 %v7287_v13, %s10363_s6  ;;  %v6303_v47 = vrot.slane %v6296_v5, %v11777_v52  ;;  %v6790_v39 = vcombine.low %v13524_v19, %v13527_v17  ;;  %v13573_v15 = vrot.slane %v13531_v18, %v11768_v3  ;;  %v13576_v10 = vrot.slane %v5513_v57, %v11768_v3 }
 0x4ce   : > { %v13579_v0 = vrot.slane %v6304_v21, %v11777_v52  ;;  %8908 = vrot.lane.b32.xlu0 %v7551_v53, %s10363_s6  ;;  %v13582_v2 = vpop.permute.xlu1 %8682  ;;  %v7815_v49 = vcombine.high %v13441_v11, %v15617_v56  ;;  %v13587_v46 = vcombine.low %v5903_v41, %v13537_v45  ;;  %v5913_v40 = vcombine.high %v5903_v41, %v13537_v45 }
 0x4cf   : > { %15723 = vst [vmem:[#allocation87_spill] sm:$0xff] %v13582_v2  ;;  %v8079_v5 = vcombine.high %v13455_v14, %v15617_v56  ;;  %v7054_v60 = vcombine.low %v13547_v26, %v13550_v35  ;;  %v13596_v57 = vrot.slane %v13554_v23, %v11768_v3  ;;  %v13598_v21 = vpop.permute.xlu0 %8684  ;;  %v13602_v11 = vrot.slane %v6526_v48, %v11777_v52 }
 0x4d0   : > { %15724 = vst [vmem:[#allocation88_spill] sm:$0xff] %v13598_v21  ;;  %v13605_v13 = vrot.slane %v5713_v30, %v11768_v3  ;;  %v13608_v41 = vcombine.low %v6103_v44, %v13557_v29  ;;  %v6113_v14 = vcombine.high %v6103_v44, %v13557_v29  ;;  %v8343_v53 = vcombine.high %v13469_v33, %v15617_v56 }
 0x4d1   : > { %8910 = vrot.lane.b32.xlu1 %v7815_v49, %s10363_s6  ;;  %15725 = vst [vmem:[#allocation89_spill] sm:$0xff] %v13602_v11  ;;  %v13614_v2 = vrot.slane %v6790_v39, %v11777_v52  ;;  %v7318_v49 = vcombine.low %v13573_v15, %v13576_v10  ;;  %v13623_v30 = vrot.slane %v13587_v46, %v11768_v3 }
 0x4d2   : > { %8912 = vrot.lane.b32.xlu0 %v8079_v5, %s10363_s6  ;;  %v13619_v48 = vpop.permute.xlu1 %8686  ;;  %v13626_v21 = vrot.slane %v5913_v40, %v11768_v3  ;;  %v13629_v44 = vcombine.low %v6303_v47, %v13579_v0  ;;  %v6313_v33 = vcombine.high %v6303_v47, %v13579_v0  ;;  %v13633_v39 = vrot.slane %v7054_v60, %v11777_v52 }
 0x4d3   : > { %15726 = vst [vmem:[#allocation90_spill] sm:$0xff] %v13614_v2  ;;  %15727 = vst [vmem:[#allocation91_spill] sm:$0xff] %v13619_v48  ;;  %v13635_v28 = vpop.permute.xlu0 %8688  ;;  %v6558_v5 = vcombine.high %v13602_v11, %v15617_v56  ;;  %v7582_v48 = vcombine.low %v13596_v57, %v13605_v13  ;;  %v13644_v40 = vrot.slane %v13608_v41, %v11768_v3 }
 0x4d4   : > { %15728 = vst [vmem:[#allocation92_spill] sm:$0xff] %v13633_v39  ;;  %15729 = vst [vmem:[#allocation93_spill] sm:$0xff] %v13635_v28  ;;  %v13647_v36 = vrot.slane %v6113_v14, %v11768_v3  ;;  %v6822_v47 = vcombine.high %v13614_v2, %v15617_v56  ;;  %v13655_v28 = vrot.slane %v7318_v49, %v11777_v52 }
 0x4d5   : > { %8914 = vrot.lane.b32.xlu1 %v8343_v53, %s10363_s6  ;;  %v7846_v53 = vcombine.low %v13623_v30, %v13626_v21  ;;  %v13661_v1 = vrot.slane %v13629_v44, %v11768_v3  ;;  %v13664_v14 = vrot.slane %v6313_v33, %v11768_v3  ;;  %v13672_v49 = vrot.slane %v7582_v48, %v11777_v52 }
 0x4d6   : > { %8932 = vrot.lane.b32.xlu0 %v6558_v5, %s10356_s26  ;;  %v13652_v60 = vpop.permute.xlu1 %8690  ;;  %15731 = vst [vmem:[#allocation95_spill] sm:$0xff] %v13655_v28  ;;  %v7086_v5 = vcombine.high %v13633_v39, %v15617_v56  ;;  %v7350_v33 = vcombine.high %v13655_v28, %v15617_v56 }
 0x4d7   : > { %15730 = vst [vmem:[#allocation94_spill] sm:$0xff] %v13652_v60  ;;  %v13666_v9 = vpop.permute.xlu0 %8708  ;;  %15733 = vst [vmem:[#allocation97_spill] sm:$0xff] %v13672_v49  ;;  %v8110_v60 = vcombine.low %v13644_v40, %v13647_v36  ;;  %v8374_v6 = vcombine.low %v13661_v1, %v13664_v14  ;;  %v7614_v48 = vcombine.high %v13672_v49, %v15617_v56 }
 0x4d8   : > { %15732 = vst [vmem:[#allocation96_spill] sm:$0xff] %v13666_v9  ;;  %v13682_v9 = vrot.slane %v7846_v53, %v11777_v52 }
 0x4d9   : > { %8934 = vrot.lane.b32.xlu1 %v6822_v47, %s10356_s26  ;;  %v13700_v31 = vrot.slane %v8374_v6, %v11777_v52  ;;  %v6791_v6 = vcombine.high %v13524_v19, %v13527_v17  ;;  %v7583_v17 = vcombine.high %v13596_v57, %v13605_v13 }
 0x4da   : > { %8936 = vrot.lane.b32.xlu0 %v7086_v5, %s10356_s26  ;;  %v13677_v51 = vpop.permute.xlu1 %8710  ;;  %15735 = vst [vmem:[#allocation99_spill] sm:$0xff] %v13682_v9  ;;  %v13692_v5 = vrot.slane %v8110_v60, %v11777_v52  ;;  %v7878_v53 = vcombine.high %v13682_v9, %v15617_v56  ;;  %v6527_v60 = vcombine.high %v13517_v37, %v13520_v62 }
 0x4db   : > { %15734 = vst [vmem:[#allocation98_spill] sm:$0xff] %v13677_v51  ;;  %v13686_v47 = vpop.permute.xlu0 %8712  ;;  %15739 = vst [vmem:[#allocation103_spill] sm:$0xff] %v13700_v31  ;;  %v6805_v62 = vrot.slane %v6791_v6, %v11777_v52  ;;  %v13751_v13 = vrot.slane %v7583_v17, %v11777_v52  ;;  %v8375_v17 = vcombine.high %v13661_v1, %v13664_v14  ;;  %v15753_v14 = vld [vmem:[#allocation10_spill] sm:$0xff] }
 0x4dc   : > { %15736 = vst [vmem:[#allocation100_spill] sm:$0xff] %v13686_v47  ;;  %15737 = vst [vmem:[#allocation101_spill] sm:$0xff] %v13692_v5  ;;  %v8142_v47 = vcombine.high %v13692_v5, %v15617_v56 }
 0x4dd   : > { %8938 = vrot.lane.b32.xlu1 %v7350_v33, %s10356_s26 }
 0x4de   : > { %8940 = vrot.lane.b32.xlu0 %v7614_v48, %s10356_s26  ;;  %v13695_v51 = vpop.permute.xlu1 %8714  ;;  %v8406_v48 = vcombine.high %v13700_v31, %v15617_v56 }
 0x4df   : > { %15738 = vst [vmem:[#allocation102_spill] sm:$0xff] %v13695_v51  ;;  %v13702_v55 = vpop.permute.xlu0 %8716 }
 0x4e0   : > { %15740 = vst [vmem:[#allocation104_spill] sm:$0xff] %v13702_v55  ;;  %v6541_v55 = vrot.slane %v6527_v60, %v11777_v52 }
 0x4e1   : > { %8942 = vrot.lane.b32.xlu1 %v7878_v53, %s10356_s26  ;;  %v7055_v53 = vcombine.high %v13547_v26, %v13550_v35  ;;  %v15745_v26 = vld [vmem:[#allocation32_spill] sm:$0xff] }
 0x4e2   : > { %8944 = vrot.lane.b32.xlu0 %v8142_v47, %s10356_s26  ;;  %v13710_v33 = vpop.permute.xlu1 %8718  ;;  %v7319_v47 = vcombine.high %v13573_v15, %v13576_v10  ;;  %v2865_v35 = vcombine.high %v15745_v26, %v15617_v56  ;;  %v7847_v15 = vcombine.high %v13623_v30, %v13626_v21  ;;  %v15747_v10 = vld [vmem:[#allocation4_spill] sm:$0xff] }
 0x4e3   : > { %15741 = vst [vmem:[#allocation105_spill] sm:$0xff] %v13710_v33  ;;  %v13716_v51 = vpop.permute.xlu0 %8720  ;;  %v7069_v19 = vrot.slane %v7055_v53, %v11777_v52  ;;  %v2850_v6 = vcombine.high %v15747_v10, %v15617_v56  ;;  %v2872_v53 = vrot.slane %v15745_v26, %v11768_v3  ;;  %v2857_v21 = vrot.slane %v15747_v10, %v11768_v3 }
 0x4e4   : > { %15742 = vst [vmem:[#allocation106_spill] sm:$0xff] %v13716_v51  ;;  %v13765_v26 = vrot.slane %v7847_v15, %v11777_v52  ;;  %v15752_v15 = vld [vmem:[#allocation8_spill] sm:$0xff] }
 0x4e5   : > { %8946 = vrot.lane.b32.xlu1 %v8406_v48, %s10356_s26  ;;  %v13740_v48 = vrot.slane %v7319_v47, %v11777_v52  ;;  %v8111_v47 = vcombine.high %v13644_v40, %v13647_v36  ;;  %v15750_v36 = vld [vmem:[#allocation6_spill] sm:$0xff] }
 0x4e6   : > { %8964 = vrot.lane.b32.xlu0 %v6541_v55, %s10358_s29  ;;  %v13723_v37 = vpop.permute.xlu1 %8722  ;;  %v3114_v40 = vcombine.high %v15750_v36, %v15617_v56 }
 0x4e7   : > { %15743 = vst [vmem:[#allocation107_spill] sm:$0xff] %v13723_v37  ;;  %v13728_v33 = vpop.permute.xlu0 %8740  ;;  %v2881_v37 = vcombine.high %v2857_v21, %v2872_v53  ;;  %v13775_v10 = vrot.slane %v8111_v47, %v11777_v52  ;;  %v13792_v47 = vrot.slane %v15750_v36, %v11768_v3  ;;  %v13810_v36 = vrot.slane %v15752_v15, %v11768_v3 }
 0x4e8   : > { %15744 = vst [vmem:[#allocation108_spill] sm:$0xff] %v13728_v33  ;;  %v13799_v27 = vrot.slane %v3114_v40, %v11768_v3 }
 0x4e9   : > { %8966 = vrot.lane.b32.xlu1 %v6805_v62, %s10358_s29 }
 0x4ea   : > { %8968 = vrot.lane.b32.xlu0 %v7069_v19, %s10358_s29  ;;  %v13737_v60 = vpop.permute.xlu1 %8742 }
 0x4eb   : > { %15746 = vst [vmem:[#allocation32_spill] sm:$0xff] %v13737_v60  ;;  %v13748_v57 = vpop.permute.xlu0 %8744  ;;  %v2879_v60 = vrot.slane %v2865_v35, %v11768_v3  ;;  %v2880_v35 = vcombine.low %v2857_v21, %v2872_v53  ;;  %v13788_v21 = vrot.slane %v8375_v17, %v11777_v52  ;;  %v6559_v17 = vcombine.high %v6541_v55, %v15617_v56 }
 0x4ec   : > { %15748 = vst [vmem:[#allocation4_spill] sm:$0xff] %v13748_v57  ;;  %v2864_v57 = vrot.slane %v2850_v6, %v11768_v3  ;;  %v3642_v6 = vcombine.high %v15753_v14, %v15617_v56 }
 0x4ed   : > { %8970 = vrot.lane.b32.xlu1 %v13740_v48, %s10358_s29  ;;  %v2888_v59 = vrot.slane %v2880_v35, %v11777_v52 }
 0x4ee   : > { %8972 = vrot.lane.b32.xlu0 %v13751_v13, %s10358_s29  ;;  %v13762_v30 = vpop.permute.xlu1 %8746  ;;  %v2896_v51 = vcombine.low %v2864_v57, %v2879_v60  ;;  %v2897_v1 = vcombine.high %v2864_v57, %v2879_v60  ;;  %v15756_v60 = vld [vmem:[#allocation14_spill] sm:$0xff]  ;;  %v13822_v55 = vrot.slane %v3642_v6, %v11768_v3 }
 0x4ef   : > { %15749 = vst [vmem:[#allocation109_spill] sm:$0xff] %v13762_v30  ;;  %v13772_v33 = vpop.permute.xlu0 %8748  ;;  %v3378_v30 = vcombine.high %v15752_v15, %v15617_v56  ;;  %v4170_v57 = vcombine.high %v15756_v60, %v15617_v56 }
 0x4f0   : > { %15751 = vst [vmem:[#allocation6_spill] sm:$0xff] %v13772_v33  ;;  %v15755_v33 = vld [vmem:[#allocation12_spill] sm:$0xff]  ;;  %v2904_v40 = vrot.slane %v2896_v51, %v11777_v52  ;;  %v2911_v35 = vrot.slane %v2897_v1, %v11777_v52 }
 0x4f1   : > { %8974 = vrot.lane.b32.xlu1 %v13765_v26, %s10358_s29  ;;  %v3906_v8 = vcombine.high %v15755_v33, %v15617_v56  ;;  %v13813_v34 = vrot.slane %v3378_v30, %v11768_v3  ;;  %v6823_v30 = vcombine.high %v6805_v62, %v15617_v56  ;;  %v13832_v51 = vrot.slane %v15755_v33, %v11768_v3 }
 0x4f2   : > { %8976 = vrot.lane.b32.xlu0 %v13775_v10, %s10358_s29  ;;  %v13785_v53 = vpop.permute.xlu1 %8750  ;;  %v13842_v6 = vrot.slane %v4170_v57, %v11768_v3  ;;  %v7087_v62 = vcombine.high %v7069_v19, %v15617_v56  ;;  %v6496_v33 = vcombine.high %v13484_v61, %v15617_v56  ;;  %v10004_v19 = vcombine.high %v2904_v40, %v2911_v35 }
 0x4f3   : > { %15754 = vst [vmem:[#allocation8_spill] sm:$0xff] %v13785_v53  ;;  %v2895_v53 = vrot.slane %v2881_v37, %v11777_v52  ;;  %v13803_v63 = vpop.permute.xlu0 %8752  ;;  %v13819_v37 = vrot.slane %v15753_v14, %v11768_v3  ;;  %v13835_v1 = vrot.slane %v3906_v8, %v11768_v3  ;;  %v13839_v14 = vrot.slane %v15756_v60, %v11768_v3 }
 0x4f4   : > { %15757 = vst [vmem:[#allocation10_spill] sm:$0xff] %v13803_v63  ;;  %v15758_v63 = vld [vmem:[#allocation16_spill] sm:$0xff]  ;;  %v4930_v60 = vcombine.low %v2904_v40, %v2911_v35  ;;  %v7351_v61 = vcombine.high %v13740_v48, %v15617_v56  ;;  %v10067_v40 = vcombine.high %v13300_v50, %v15617_v56 }
 0x4f5   : > { %8978 = vrot.lane.b32.xlu1 %v13788_v21, %s10358_s29  ;;  %v4434_v12 = vcombine.high %v15758_v63, %v15617_v56  ;;  %v4914_v25 = vcombine.low %v2888_v59, %v2895_v53  ;;  %v13852_v8 = vrot.slane %v15758_v63, %v11768_v3  ;;  %v10063_v63 = vcombine.high %v13287_v4, %v15617_v56 }
 0x4f6   : > { %8996 = vrot.lane.b32.xlu0 %v6559_v17, %s10360_s27  ;;  %v13827_v15 = vpop.permute.xlu1 %8754  ;;  %v10003_v17 = vcombine.high %v2888_v59, %v2895_v53  ;;  %v6760_v59 = vcombine.high %v13493_v24, %v15617_v56 }
 0x4f7   : > { %15759 = vst [vmem:[#allocation12_spill] sm:$0xff] %v13827_v15  ;;  %v13844_v32 = vpop.permute.xlu0 %8772  ;;  %v15761_v15 = vld [vmem:[#allocation34_spill] sm:$0xff]  ;;  %v13859_v53 = vrot.slane %v4434_v12, %v11768_v3  ;;  %v7024_v12 = vcombine.high %v13506_v54, %v15617_v56  ;;  %v13879_v35 = vrot.slane %v4914_v25, %v11768_v3  ;;  %v13893_v54 = vrot.slane %v4930_v60, %v11768_v3 }
 0x4f8   : > { %15760 = vst [vmem:[#allocation14_spill] sm:$0xff] %v13844_v32  ;;  %v3129_v57 = vcombine.high %v15761_v15, %v15617_v56  ;;  %v15763_v32 = vld [vmem:[#allocation18_spill] sm:$0xff]  ;;  %v3136_v24 = vrot.slane %v15761_v15, %v11768_v3  ;;  %v13882_v48 = vrot.slane %v10003_v17, %v11768_v3  ;;  %v13890_v15 = vrot.slane %v6496_v33, %v11768_v3 }
 0x4f9   : > { %8998 = vrot.lane.b32.xlu1 %v6823_v30, %s10360_s27  ;;  %v13870_v16 = vcombine.high %v15763_v32, %v15617_v56  ;;  %v10071_v25 = vcombine.high %v13325_v43, %v15617_v56  ;;  %v13901_v17 = vrot.slane %v6760_v59, %v11768_v3  ;;  %v7879_v33 = vcombine.high %v13765_v26, %v15617_v56 }
 0x4fa   : > { %9000 = vrot.lane.b32.xlu0 %v7087_v62, %s10360_s27  ;;  %v13862_v30 = vpop.permute.xlu1 %8774  ;;  %v7615_v62 = vcombine.high %v13751_v13, %v15617_v56  ;;  %v13896_v50 = vrot.slane %v3129_v57, %v11768_v3  ;;  %v13912_v60 = vrot.slane %v10063_v63, %v11768_v3  ;;  %v7288_v57 = vcombine.high %v13531_v18, %v15617_v56 }
 0x4fb   : > { %15762 = vst [vmem:[#allocation16_spill] sm:$0xff] %v13862_v30  ;;  %v13884_v4 = vpop.permute.xlu0 %8776  ;;  %v13904_v30 = vrot.slane %v10004_v19, %v11768_v3  ;;  %v3144_v43 = vcombine.low %v13792_v47, %v3136_v24  ;;  %v13918_v59 = vrot.slane %v7024_v12, %v11768_v3  ;;  %v13921_v19 = vrot.slane %v10067_v40, %v11768_v3 }
 0x4fc   : > { %15764 = vst [vmem:[#allocation34_spill] sm:$0xff] %v13884_v4  ;;  %v8143_v63 = vcombine.high %v13775_v10, %v15617_v56  ;;  %v6542_v18 = vcombine.low %v13890_v15, %v13912_v60  ;;  %v10075_v12 = vcombine.high %v13340_v20, %v15617_v56  ;;  %v3160_v40 = vcombine.low %v13799_v27, %v13896_v50 }
 0x4fd   : > { %9002 = vrot.lane.b32.xlu1 %v7351_v61, %s10360_s27  ;;  %v7552_v61 = vcombine.high %v13554_v23, %v15617_v56  ;;  %v13938_v23 = vrot.slane %v10071_v25, %v11768_v3  ;;  %v10079_v10 = vcombine.high %v13489_v22, %v15617_v56  ;;  %v8407_v20 = vcombine.high %v13788_v21, %v15617_v56 }
 0x4fe   : > { %9004 = vrot.lane.b32.xlu0 %v7615_v62, %s10360_s27  ;;  %v13907_v13 = vpop.permute.xlu1 %8778  ;;  %v3145_v62 = vcombine.high %v13792_v47, %v3136_v24  ;;  %v6806_v47 = vcombine.low %v13901_v17, %v13921_v19  ;;  %v3161_v24 = vcombine.high %v13799_v27, %v13896_v50  ;;  %v7816_v25 = vcombine.high %v13587_v46, %v15617_v56 }
 0x4ff   : > { %15765 = vst [vmem:[#allocation18_spill] sm:$0xff] %v13907_v13  ;;  %v13926_v26 = vpop.permute.xlu0 %8780  ;;  %v13952_v13 = vrot.slane %v7288_v57, %v11768_v3  ;;  %v7070_v27 = vcombine.low %v13918_v59, %v13938_v23  ;;  %v13963_v50 = vrot.slane %v7552_v61, %v11768_v3  ;;  %v13968_v21 = vrot.slane %v6542_v18, %v11777_v52 }
 0x500   : > { %15766 = vst [vmem:[#allocation110_spill] sm:$0xff] %v13926_v26  ;;  %v15768_v26 = vld [vmem:[#allocation37_spill] sm:$0xff]  ;;  %v13972_v46 = vrot.slane %v10075_v12, %v11768_v3  ;;  %v8080_v57 = vcombine.high %v13608_v41, %v15617_v56  ;;  %v13981_v7 = vrot.slane %v6806_v47, %v11777_v52  ;;  %v13984_v18 = vrot.slane %v10079_v10, %v11768_v3 }
 0x501   : > { %9006 = vrot.lane.b32.xlu1 %v7879_v33, %s10360_s27  ;;  %v3393_v4 = vcombine.high %v15768_v26, %v15617_v56  ;;  %v3400_v22 = vrot.slane %v15768_v26, %v11768_v3  ;;  %v10083_v26 = vcombine.high %v13537_v45, %v15617_v56  ;;  %v13995_v41 = vrot.slane %v7816_v25, %v11768_v3 }
 0x502   : > { %9008 = vrot.lane.b32.xlu0 %v8143_v63, %s10360_s27  ;;  %v13947_v33 = vpop.permute.xlu1 %8782  ;;  %v7334_v45 = vcombine.low %v13952_v13, %v13972_v46  ;;  %v8344_v47 = vcombine.high %v13629_v44, %v15617_v56  ;;  %v10091_v10 = vcombine.high %v13579_v0, %v15617_v56  ;;  %v14009_v25 = vrot.slane %v7070_v27, %v11777_v52 }
 0x503   : > { %15767 = vst [vmem:[#allocation111_spill] sm:$0xff] %v13947_v33  ;;  %v13965_v63 = vpop.permute.xlu0 %8784  ;;  %v15770_v33 = vld [vmem:[#allocation38_spill] sm:$0xff]  ;;  %v3407_v58 = vrot.slane %v3393_v4, %v11768_v3  ;;  %v7598_v0 = vcombine.low %v13963_v50, %v13984_v18  ;;  %v14016_v44 = vrot.slane %v8080_v57, %v11768_v3  ;;  %v3408_v4 = vcombine.low %v13810_v36, %v3400_v22 }
 0x504   : > { %15769 = vst [vmem:[#allocation37_spill] sm:$0xff] %v13965_v63  ;;  %v3657_v61 = vcombine.high %v15770_v33, %v15617_v56  ;;  %v3152_v63 = vrot.slane %v3144_v43, %v11777_v52  ;;  %v14019_v43 = vrot.slane %v10083_v26, %v11768_v3  ;;  %v14032_v57 = vrot.slane %v7334_v45, %v11777_v52 }
 0x505   : > { %9010 = vrot.lane.b32.xlu1 %v8407_v20, %s10360_s27  ;;  %v10087_v20 = vcombine.high %v13557_v29, %v15617_v56  ;;  %v3159_v29 = vrot.slane %v3145_v62, %v11777_v52  ;;  %v3409_v62 = vcombine.high %v13810_v36, %v3400_v22  ;;  %v14037_v42 = vrot.slane %v8344_v47, %v11768_v3 }
 0x506   : > { %9028 = vrot.lane.b32.xlu0 %v13968_v21, %s10362_s19  ;;  %v13990_v12 = vpop.permute.xlu1 %8786  ;;  %v7862_v26 = vcombine.low %v13995_v41, %v14019_v43  ;;  %v14040_v36 = vrot.slane %v10091_v10, %v11768_v3  ;;  %v3168_v22 = vrot.slane %v3160_v40, %v11777_v52  ;;  %v14051_v47 = vrot.slane %v7598_v0, %v11777_v52 }
 0x507   : > { %15771 = vst [vmem:[#allocation38_spill] sm:$0xff] %v13990_v12  ;;  %v3664_v12 = vrot.slane %v15770_v33, %v11768_v3  ;;  %v14006_v38 = vpop.permute.xlu0 %8804  ;;  %v3671_v33 = vrot.slane %v3657_v61, %v11768_v3  ;;  %v14025_v27 = vrot.slane %v10087_v20, %v11768_v3  ;;  %v3175_v61 = vrot.slane %v3161_v24, %v11777_v52 }
 0x508   : > { %15772 = vst [vmem:[#allocation112_spill] sm:$0xff] %v14006_v38  ;;  %v3424_v20 = vcombine.low %v13813_v34, %v3407_v58  ;;  %v3416_v24 = vrot.slane %v3408_v4, %v11777_v52  ;;  %v3423_v10 = vrot.slane %v3409_v62, %v11777_v52  ;;  %v8390_v4 = vcombine.low %v14037_v42, %v14040_v36 }
 0x509   : > { %9030 = vrot.lane.b32.xlu1 %v13981_v7, %s10362_s19  ;;  %v3672_v45 = vcombine.low %v13819_v37, %v3664_v12  ;;  %v3673_v9 = vcombine.high %v13819_v37, %v3664_v12  ;;  %v8126_v40 = vcombine.low %v14016_v44, %v14025_v27  ;;  %v5114_v12 = vcombine.low %v3152_v63, %v3159_v29 }
 0x50a   : > { %9032 = vrot.lane.b32.xlu0 %v14009_v25, %s10362_s19  ;;  %v14029_v38 = vpop.permute.xlu1 %8806  ;;  %v10011_v62 = vcombine.high %v3152_v63, %v3159_v29  ;;  %v3432_v28 = vrot.slane %v3424_v20, %v11777_v52  ;;  %v5130_v39 = vcombine.low %v3168_v22, %v3175_v61  ;;  %v10012_v63 = vcombine.high %v3168_v22, %v3175_v61 }
 0x50b   : > { %15773 = vst [vmem:[#allocation113_spill] sm:$0xff] %v14029_v38  ;;  %v3425_v38 = vcombine.high %v13813_v34, %v3407_v58  ;;  %v14048_v49 = vpop.permute.xlu0 %8808  ;;  %v3688_v58 = vcombine.low %v13822_v55, %v3671_v33  ;;  %v3689_v34 = vcombine.high %v13822_v55, %v3671_v33  ;;  %v15776_v33 = vld [vmem:[#allocation39_spill] sm:$0xff]  ;;  %v3680_v2 = vrot.slane %v3672_v45, %v11777_v52 }
 0x50c   : > { %15774 = vst [vmem:[#allocation114_spill] sm:$0xff] %v14048_v49  ;;  %v14068_v49 = vrot.slane %v7862_v26, %v11777_v52  ;;  %v3921_v37 = vcombine.high %v15776_v33, %v15617_v56  ;;  %v3687_v11 = vrot.slane %v3673_v9, %v11777_v52  ;;  %v14081_v26 = vrot.slane %v8126_v40, %v11777_v52 }
 0x50d   : > { %9034 = vrot.lane.b32.xlu1 %v14032_v57, %s10362_s19  ;;  %v3439_v55 = vrot.slane %v3425_v38, %v11777_v52  ;;  %v5314_v29 = vcombine.low %v3416_v24, %v3423_v10  ;;  %v3696_v38 = vrot.slane %v3688_v58, %v11777_v52  ;;  %v3703_v20 = vrot.slane %v3689_v34, %v11777_v52 }
 0x50e   : > { %9036 = vrot.lane.b32.xlu0 %v14051_v47, %s10362_s19  ;;  %v14065_v0 = vpop.permute.xlu1 %8810  ;;  %v5121_v31 = vrot.slane %v5114_v12, %v11768_v3  ;;  %v10019_v5 = vcombine.high %v3416_v24, %v3423_v10  ;;  %v3928_v9 = vrot.slane %v15776_v33, %v11768_v3  ;;  %v14095_v40 = vrot.slane %v8390_v4, %v11777_v52 }
 0x50f   : > { %15775 = vst [vmem:[#allocation115_spill] sm:$0xff] %v14065_v0  ;;  %v14078_v0 = vpop.permute.xlu0 %8812  ;;  %v5129_v22 = vrot.slane %v10011_v62, %v11768_v3  ;;  %v5330_v61 = vcombine.low %v3432_v28, %v3439_v55  ;;  %v10020_v58 = vcombine.high %v3432_v28, %v3439_v55  ;;  %v3935_v34 = vrot.slane %v3921_v37, %v11768_v3 }
 0x510   : > { %15777 = vst [vmem:[#allocation39_spill] sm:$0xff] %v14078_v0  ;;  %v5137_v12 = vrot.slane %v5130_v39, %v11768_v3  ;;  %v5514_v24 = vcombine.low %v3680_v2, %v3687_v11  ;;  %v10027_v10 = vcombine.high %v3680_v2, %v3687_v11  ;;  %v6560_v33 = vcombine.high %v13968_v21, %v15617_v56 }
 0x511   : > { %9038 = vrot.lane.b32.xlu1 %v14068_v49, %s10362_s19  ;;  %v5145_v4 = vrot.slane %v10012_v63, %v11768_v3  ;;  %v5321_v62 = vrot.slane %v5314_v29, %v11768_v3  ;;  %v10028_v28 = vcombine.high %v3696_v38, %v3703_v20  ;;  %v5329_v37 = vrot.slane %v10019_v5, %v11768_v3 }
 0x512   : > { %9040 = vrot.lane.b32.xlu0 %v14081_v26, %s10362_s19  ;;  %v14092_v45 = vpop.permute.xlu1 %8814  ;;  %v3936_v39 = vcombine.low %v13832_v51, %v3928_v9  ;;  %v3937_v2 = vcombine.high %v13832_v51, %v3928_v9  ;;  %v6824_v21 = vcombine.high %v13981_v7, %v15617_v56  ;;  %v5337_v55 = vrot.slane %v5330_v61, %v11768_v3 }
 0x513   : > { %15778 = vst [vmem:[#allocation116_spill] sm:$0xff] %v14092_v45  ;;  %v14100_v0 = vpop.permute.xlu0 %8816  ;;  %v5530_v45 = vcombine.low %v3696_v38, %v3703_v20  ;;  %v5345_v63 = vrot.slane %v10020_v58, %v11768_v3  ;;  %v3952_v29 = vcombine.low %v13835_v1, %v3935_v34  ;;  %v3953_v38 = vcombine.high %v13835_v1, %v3935_v34 }
 0x514   : > { %15779 = vst [vmem:[#allocation117_spill] sm:$0xff] %v14100_v0  ;;  %v4954_v5 = vcombine.low %v13893_v54, %v13904_v30  ;;  %v5521_v51 = vrot.slane %v5514_v24, %v11768_v3  ;;  %v5529_v20 = vrot.slane %v10027_v10, %v11768_v3  ;;  %v7088_v7 = vcombine.high %v14009_v25, %v15617_v56 }
 0x515   : > { %9042 = vrot.lane.b32.xlu1 %v14095_v40, %s10362_s19  ;;  %v5146_v61 = vcombine.low %v5121_v31, %v5129_v22  ;;  %v5154_v58 = vcombine.low %v5137_v12, %v5145_v4  ;;  %v5545_v1 = vrot.slane %v10028_v28, %v11768_v3  ;;  %v5346_v34 = vcombine.low %v5321_v62, %v5329_v37 }
 0x516   : > { %9060 = vrot.lane.b32.xlu0 %v6560_v33, %s10366_s7  ;;  %v14112_v11 = vpop.permute.xlu1 %8818  ;;  %v5537_v33 = vrot.slane %v5530_v45, %v11768_v3  ;;  %v3944_v30 = vrot.slane %v3936_v39, %v11777_v52  ;;  %v3951_v54 = vrot.slane %v3937_v2, %v11777_v52  ;;  %v7352_v25 = vcombine.high %v14032_v57, %v15617_v56  ;;  %v15782_v2 = vld [vmem:[#allocation40_spill] sm:$0xff] }
 0x517   : > { %15780 = vst [vmem:[#allocation118_spill] sm:$0xff] %v14112_v11  ;;  %v14124_v9 = vpop.permute.xlu0 %8836  ;;  %v14140_v31 = vrot.slane %v15763_v32, %v11768_v3  ;;  %v5354_v22 = vcombine.low %v5337_v55, %v5345_v63  ;;  %v3960_v45 = vrot.slane %v3952_v29, %v11777_v52  ;;  %v3967_v12 = vrot.slane %v3953_v38, %v11777_v52 }
 0x518   : > { %v14146_v10 = vrot.slane %v13870_v16, %v11768_v3  ;;  %v15781_v4 = vcombine.low %v13879_v35, %v13882_v48  ;;  %v5546_v57 = vcombine.low %v5521_v51, %v5529_v20  ;;  %v7616_v32 = vcombine.high %v14051_v47, %v15617_v56  ;;  %v15784_v51 = vld [vmem:[#allocation41_spill] sm:$0xff] }
 0x519   : > { %9062 = vrot.lane.b32.xlu1 %v6824_v21, %s10366_s7  ;;  %v14160_v37 = vrot.slane %v4954_v5, %v11777_v52  ;;  %v14163_v16 = vrot.slane %v5146_v61, %v11777_v52  ;;  %v5554_v39 = vcombine.low %v5537_v33, %v5545_v1  ;;  %v4185_v35 = vcombine.high %v15782_v2, %v15617_v56 }
 0x51a   : > { %9064 = vrot.lane.b32.xlu0 %v7088_v7, %s10366_s7  ;;  %v14134_v24 = vpop.permute.xlu1 %8838  ;;  %v14152_v62 = vrot.slane %v15781_v4, %v11777_v52  ;;  %v14168_v48 = vrot.slane %v5154_v58, %v11777_v52  ;;  %v14171_v21 = vrot.slane %v5346_v34, %v11777_v52  ;;  %v5714_v55 = vcombine.low %v3944_v30, %v3951_v54 }
 0x51b   : > { %v14154_v28 = vpop.permute.xlu0 %8840  ;;  %v7880_v63 = vcombine.high %v14068_v49, %v15617_v56  ;;  %v14179_v29 = vrot.slane %v5354_v22, %v11777_v52  ;;  %v10035_v38 = vcombine.high %v3944_v30, %v3951_v54  ;;  %v5730_v5 = vcombine.low %v3960_v45, %v3967_v12  ;;  %v15786_v22 = vld [vmem:[#allocation45_spill] sm:$0xff] }
 0x51c   : > { %v4449_v20 = vcombine.high %v15784_v51, %v15617_v56  ;;  %v14184_v7 = vrot.slane %v5546_v57, %v11777_v52  ;;  %v4192_v61 = vrot.slane %v15782_v2, %v11768_v3  ;;  %v8144_v33 = vcombine.high %v14081_v26, %v15617_v56 }
 0x51d   : > { %9066 = vrot.lane.b32.xlu1 %v7352_v25, %s10366_s7  ;;  %v6543_v49 = vcombine.high %v13890_v15, %v13912_v60  ;;  %v14196_v1 = vrot.slane %v5554_v39, %v11777_v52  ;;  %v10036_v34 = vcombine.high %v3960_v45, %v3967_v12  ;;  %v4199_v30 = vrot.slane %v4185_v35, %v11768_v3 }
 0x51e   : > { %9068 = vrot.lane.b32.xlu0 %v7616_v32, %s10366_s7  ;;  %v14174_v47 = vpop.permute.xlu1 %8842  ;;  %v4456_v54 = vrot.slane %v15784_v51, %v11768_v3  ;;  %v14202_v25 = vrot.slane %v5714_v55, %v11768_v3  ;;  %v4713_v26 = vcombine.high %v15786_v22, %v15617_v56  ;;  %v8408_v15 = vcombine.high %v14095_v40, %v15617_v56 }
 0x51f   : > { %15783 = vst [vmem:[#allocation40_spill] sm:$0xff] %v14174_v47  ;;  %v14188_v58 = vpop.permute.xlu0 %8844  ;;  %v6807_v60 = vcombine.high %v13901_v17, %v13921_v19  ;;  %v14214_v45 = vrot.slane %v10035_v38, %v11768_v3  ;;  %v14217_v12 = vrot.slane %v5730_v5, %v11768_v3  ;;  %v4463_v57 = vrot.slane %v4449_v20, %v11768_v3 }
 0x520   : > { %15785 = vst [vmem:[#allocation41_spill] sm:$0xff] %v14188_v58  ;;  %v4720_v32 = vrot.slane %v15786_v22, %v11768_v3  ;;  %v4200_v39 = vcombine.low %v13839_v14, %v4192_v61  ;;  %v4201_v2 = vcombine.high %v13839_v14, %v4192_v61  ;;  %v14227_v40 = vrot.slane %v6543_v49, %v11777_v52 }
 0x521   : > { %9070 = vrot.lane.b32.xlu1 %v7880_v63, %s10366_s7  ;;  %v7071_v17 = vcombine.high %v13918_v59, %v13938_v23  ;;  %v4216_v19 = vcombine.low %v13842_v6, %v4199_v30  ;;  %v4217_v55 = vcombine.high %v13842_v6, %v4199_v30  ;;  %v4464_v63 = vcombine.low %v13852_v8, %v4456_v54 }
 0x522   : > { %9072 = vrot.lane.b32.xlu0 %v8144_v33, %s10366_s7  ;;  %v14207_v4 = vpop.permute.xlu1 %8846  ;;  %v4465_v38 = vcombine.high %v13852_v8, %v4456_v54  ;;  %v14237_v14 = vrot.slane %v10036_v34, %v11768_v3  ;;  %v4727_v5 = vrot.slane %v4713_v26, %v11768_v3  ;;  %v14245_v59 = vrot.slane %v6807_v60, %v11777_v52 }
 0x523   : > { %15787 = vst [vmem:[#allocation45_spill] sm:$0xff] %v14207_v4  ;;  %v14224_v35 = vpop.permute.xlu0 %8848  ;;  %v7335_v6 = vcombine.high %v13952_v13, %v13972_v46  ;;  %v4480_v23 = vcombine.low %v13859_v53, %v4463_v57  ;;  %v4481_v8 = vcombine.high %v13859_v53, %v4463_v57  ;;  %v4728_v20 = vcombine.low %v14140_v31, %v4720_v32 }
 0x524   : > { %15788 = vst [vmem:[#allocation119_spill] sm:$0xff] %v14224_v35  ;;  %v4729_v61 = vcombine.high %v14140_v31, %v4720_v32  ;;  %v4208_v33 = vrot.slane %v4200_v39, %v11777_v52  ;;  %v4215_v49 = vrot.slane %v4201_v2, %v11777_v52  ;;  %v14258_v30 = vrot.slane %v7071_v17, %v11777_v52 }
 0x525   : > { %9074 = vrot.lane.b32.xlu1 %v8408_v15, %s10366_s7  ;;  %v7599_v13 = vcombine.high %v13963_v50, %v13984_v18  ;;  %v4224_v53 = vrot.slane %v4216_v19, %v11777_v52  ;;  %v4231_v46 = vrot.slane %v4217_v55, %v11777_v52  ;;  %v4472_v31 = vrot.slane %v4464_v63, %v11777_v52 }
 0x526   : > { %9092 = vrot.lane.b32.xlu0 %v14227_v40, %s10367_s25  ;;  %v14242_v51 = vpop.permute.xlu1 %8850  ;;  %v4479_v54 = vrot.slane %v4465_v38, %v11777_v52  ;;  %v4744_v22 = vcombine.low %v14146_v10, %v4727_v5  ;;  %v4745_v26 = vcombine.high %v14146_v10, %v4727_v5  ;;  %v14275_v60 = vrot.slane %v7335_v6, %v11777_v52 }
 0x527   : > { %15789 = vst [vmem:[#allocation120_spill] sm:$0xff] %v14242_v51  ;;  %v14255_v34 = vpop.permute.xlu0 %8868  ;;  %v7863_v50 = vcombine.high %v13995_v41, %v14019_v43  ;;  %v4488_v18 = vrot.slane %v4480_v23, %v11777_v52  ;;  %v4495_v57 = vrot.slane %v4481_v8, %v11777_v52  ;;  %v4736_v32 = vrot.slane %v4728_v20, %v11777_v52 }
 0x528   : > { %15790 = vst [vmem:[#allocation121_spill] sm:$0xff] %v14255_v34  ;;  %v4743_v39 = vrot.slane %v4729_v61, %v11777_v52  ;;  %v5746_v10 = vcombine.low %v14202_v25, %v14214_v45  ;;  %v5914_v2 = vcombine.low %v4208_v33, %v4215_v49  ;;  %v14288_v19 = vrot.slane %v7599_v13, %v11777_v52 }
 0x529   : > { %9094 = vrot.lane.b32.xlu1 %v14245_v59, %s10367_s25  ;;  %v8127_v41 = vcombine.high %v14016_v44, %v14025_v27  ;;  %v10043_v43 = vcombine.high %v4208_v33, %v4215_v49  ;;  %v5930_v55 = vcombine.low %v4224_v53, %v4231_v46  ;;  %v10044_v63 = vcombine.high %v4224_v53, %v4231_v46 }
 0x52a   : > { %9096 = vrot.lane.b32.xlu0 %v14258_v30, %s10367_s25  ;;  %v14272_v15 = vpop.permute.xlu1 %8870  ;;  %v6114_v38 = vcombine.low %v4472_v31, %v4479_v54  ;;  %v4752_v5 = vrot.slane %v4744_v22, %v11777_v52  ;;  %v4759_v25 = vrot.slane %v4745_v26, %v11777_v52  ;;  %v14301_v6 = vrot.slane %v7863_v50, %v11777_v52 }
 0x52b   : > { %15791 = vst [vmem:[#allocation122_spill] sm:$0xff] %v14272_v15  ;;  %v8391_v23 = vcombine.high %v14037_v42, %v14040_v36  ;;  %v10051_v44 = vcombine.high %v4472_v31, %v4479_v54  ;;  %v6130_v27 = vcombine.low %v4488_v18, %v4495_v57  ;;  %v10052_v8 = vcombine.high %v4488_v18, %v4495_v57 }
 0x52c   : > { %v14285_v17 = vpop.permute.xlu0 %8872  ;;  %v6314_v20 = vcombine.low %v4736_v32, %v4743_v39  ;;  %v14306_v61 = vrot.slane %v5746_v10, %v11777_v52  ;;  %v5754_v33 = vcombine.low %v14217_v12, %v14237_v14  ;;  %v10059_v49 = vcombine.high %v4736_v32, %v4743_v39 }
 0x52d   : > { %15792 = vst [vmem:[#allocation123_spill] sm:$0xff] %v14285_v17  ;;  %9098 = vrot.lane.b32.xlu1 %v14275_v60, %s10367_s25  ;;  %v14313_v53 = vrot.slane %v8127_v41, %v11777_v52  ;;  %v5921_v42 = vrot.slane %v5914_v2, %v11768_v3  ;;  %v5929_v36 = vrot.slane %v10043_v43, %v11768_v3 }
 0x52e   : > { %9100 = vrot.lane.b32.xlu0 %v14288_v19, %s10367_s25  ;;  %v14298_v45 = vpop.permute.xlu1 %8874  ;;  %v5937_v46 = vrot.slane %v5930_v55, %v11768_v3  ;;  %v5945_v31 = vrot.slane %v10044_v63, %v11768_v3  ;;  %v6121_v54 = vrot.slane %v6114_v38, %v11768_v3  ;;  %v6330_v12 = vcombine.low %v4752_v5, %v4759_v25 }
 0x52f   : > { %15793 = vst [vmem:[#allocation124_spill] sm:$0xff] %v14298_v45  ;;  %v10060_v14 = vcombine.high %v4752_v5, %v4759_v25  ;;  %v14327_v26 = vrot.slane %v8391_v23, %v11777_v52  ;;  %v6129_v50 = vrot.slane %v10051_v44, %v11768_v3  ;;  %v6137_v18 = vrot.slane %v6130_v27, %v11768_v3 }
 0x530   : > { %v14310_v13 = vpop.permute.xlu0 %8876  ;;  %v6145_v57 = vrot.slane %v10052_v8, %v11768_v3  ;;  %v6321_v32 = vrot.slane %v6314_v20, %v11768_v3  ;;  %v6329_v39 = vrot.slane %v10059_v49, %v11768_v3  ;;  %v6561_v2 = vcombine.high %v14227_v40, %v15617_v56 }
 0x531   : > { %15794 = vst [vmem:[#allocation125_spill] sm:$0xff] %v14310_v13  ;;  %9102 = vrot.lane.b32.xlu1 %v14301_v6, %s10367_s25  ;;  %v14342_v41 = vcombine.low %v14152_v62, %v14160_v37  ;;  %v4963_v43 = vcombine.high %v14152_v62, %v14160_v37  ;;  %v14347_v55 = vrot.slane %v5754_v33, %v11777_v52 }
 0x532   : > { %9104 = vrot.lane.b32.xlu0 %v14313_v53, %s10367_s25  ;;  %v5946_v63 = vcombine.low %v5921_v42, %v5929_v36  ;;  %v14351_v38 = vcombine.low %v14163_v16, %v14168_v48  ;;  %v5163_v40 = vcombine.high %v14163_v16, %v14168_v48  ;;  %v5954_v5 = vcombine.low %v5937_v46, %v5945_v31 }
 0x533   : > { %v14324_v22 = vpop.permute.xlu1 %8878  ;;  %v6337_v25 = vrot.slane %v6330_v12, %v11768_v3  ;;  %v6345_v23 = vrot.slane %v10060_v14, %v11768_v3  ;;  %v6825_v62 = vcombine.high %v14245_v59, %v15617_v56  ;;  %v6146_v27 = vcombine.low %v6121_v54, %v6129_v50 }
 0x534   : > { %15795 = vst [vmem:[#allocation126_spill] sm:$0xff] %v14324_v22  ;;  %v14334_v10 = vpop.permute.xlu0 %8880  ;;  %v6154_v8 = vcombine.low %v6137_v18, %v6145_v57  ;;  %v14364_v20 = vcombine.low %v14171_v21, %v14179_v29  ;;  %v5363_v16 = vcombine.high %v14171_v21, %v14179_v29  ;;  %v6346_v33 = vcombine.low %v6321_v32, %v6329_v39 }
 0x535   : > { %15796 = vst [vmem:[#allocation127_spill] sm:$0xff] %v14334_v10  ;;  %9106 = vrot.lane.b32.xlu1 %v14327_v26, %s10367_s25  ;;  %v7089_v42 = vcombine.high %v14258_v30, %v15617_v56  ;;  %v14375_v59 = vrot.slane %v14342_v41, %v11768_v3  ;;  %v14378_v36 = vrot.slane %v4963_v43, %v11768_v3 }
 0x536   : > { %9124 = vrot.lane.b32.xlu0 %v6561_v2, %s10363_s6  ;;  %v14382_v46 = vrot.slane %v14351_v38, %v11768_v3  ;;  %v14385_v21 = vrot.slane %v5163_v40, %v11768_v3  ;;  %v14389_v31 = vcombine.low %v14184_v7, %v14196_v1  ;;  %v5563_v30 = vcombine.high %v14184_v7, %v14196_v1 }
 0x537   : > { %v14358_v44 = vpop.permute.xlu1 %8882  ;;  %v5953_v54 = vrot.slane %v5946_v63, %v11777_v52  ;;  %v14395_v12 = vrot.slane %v5954_v5, %v11777_v52  ;;  %v6354_v14 = vcombine.low %v6337_v25, %v6345_v23  ;;  %v7353_v18 = vcombine.high %v14275_v60, %v15617_v56 }
 0x538   : > { %15797 = vst [vmem:[#allocation128_spill] sm:$0xff] %v14358_v44  ;;  %v14368_v49 = vpop.permute.xlu0 %8900  ;;  %v6153_v57 = vrot.slane %v6146_v27, %v11777_v52  ;;  %v14405_v32 = vrot.slane %v14364_v20, %v11768_v3  ;;  %v14408_v7 = vrot.slane %v5363_v16, %v11768_v3  ;;  %v14412_v39 = vcombine.low %v14306_v61, %v14347_v55 }
 0x539   : > { %15798 = vst [vmem:[#allocation129_spill] sm:$0xff] %v14368_v49  ;;  %9126 = vrot.lane.b32.xlu1 %v6825_v62, %s10363_s6  ;;  %v14415_v2 = vrot.slane %v6154_v8, %v11777_v52  ;;  %v7617_v60 = vcombine.high %v14288_v19, %v15617_v56  ;;  %v6592_v63 = vcombine.low %v14375_v59, %v14378_v36 }
 0x53a   : > { %9128 = vrot.lane.b32.xlu0 %v7089_v42, %s10363_s6  ;;  %v5763_v40 = vcombine.high %v14306_v61, %v14347_v55  ;;  %v6353_v5 = vrot.slane %v6346_v33, %v11777_v52  ;;  %v6856_v25 = vcombine.low %v14382_v46, %v14385_v21  ;;  %v14431_v23 = vrot.slane %v14389_v31, %v11768_v3 }
 0x53b   : > { %v14398_v50 = vpop.permute.xlu1 %8902  ;;  %v14434_v62 = vrot.slane %v5563_v30, %v11768_v3  ;;  %v14437_v19 = vrot.slane %v6354_v14, %v11777_v52  ;;  %v7881_v61 = vcombine.high %v14301_v6, %v15617_v56  ;;  %v14445_v8 = vcombine.low %v5953_v54, %v14395_v12 }
 0x53c   : > { %15799 = vst [vmem:[#allocation130_spill] sm:$0xff] %v14398_v50  ;;  %v14417_v43 = vpop.permute.xlu0 %8904  ;;  %v5963_v16 = vcombine.high %v5953_v54, %v14395_v12  ;;  %v8145_v33 = vcombine.high %v14313_v53, %v15617_v56  ;;  %v7120_v42 = vcombine.low %v14405_v32, %v14408_v7  ;;  %v14454_v30 = vrot.slane %v14412_v39, %v11768_v3 }
 0x53d   : > { %15800 = vst [vmem:[#allocation131_spill] sm:$0xff] %v14417_v43  ;;  %9130 = vrot.lane.b32.xlu1 %v7353_v18, %s10363_s6  ;;  %v14460_v6 = vrot.slane %v6592_v63, %v11777_v52  ;;  %v14463_v18 = vrot.slane %v5763_v40, %v11768_v3  ;;  %v14466_v54 = vcombine.low %v6153_v57, %v14415_v2 }
 0x53e   : > { %9132 = vrot.lane.b32.xlu0 %v7617_v60, %s10363_s6  ;;  %v6163_v53 = vcombine.high %v6153_v57, %v14415_v2  ;;  %v8409_v60 = vcombine.high %v14327_v26, %v15617_v56  ;;  %v14472_v44 = vrot.slane %v6856_v25, %v11777_v52  ;;  %v14481_v40 = vrot.slane %v14445_v8, %v11768_v3 }
 0x53f   : > { %v14440_v27 = vpop.permute.xlu1 %8906  ;;  %v14484_v10 = vrot.slane %v5963_v16, %v11768_v3  ;;  %v14487_v57 = vcombine.low %v6353_v5, %v14437_v19  ;;  %v6363_v26 = vcombine.high %v6353_v5, %v14437_v19  ;;  %v14491_v25 = vrot.slane %v7120_v42, %v11777_v52 }
 0x540   : > { %15801 = vst [vmem:[#allocation132_spill] sm:$0xff] %v14440_v27  ;;  %v14456_v14 = vpop.permute.xlu0 %8908  ;;  %v8153_v16 = vrot.slane %v14466_v54, %v11768_v3  ;;  %v8168_v22 = vrot.slane %v6163_v53, %v11768_v3  ;;  %v6888_v5 = vcombine.high %v14472_v44, %v15617_v56  ;;  %v7882_v47 = vcombine.high %v14445_v8, %v15617_v56 }
 0x541   : > { %15802 = vst [vmem:[#allocation133_spill] sm:$0xff] %v14456_v14  ;;  %9134 = vrot.lane.b32.xlu1 %v7881_v61, %s10363_s6  ;;  %v7384_v61 = vcombine.low %v14431_v23, %v14434_v62  ;;  %v8417_v35 = vrot.slane %v14487_v57, %v11768_v3  ;;  %v8432_v11 = vrot.slane %v6363_v26, %v11768_v3 }
 0x542   : > { %9136 = vrot.lane.b32.xlu0 %v8145_v33, %s10363_s6  ;;  %v6624_v33 = vcombine.high %v14460_v6, %v15617_v56  ;;  %v7152_v53 = vcombine.high %v14491_v25, %v15617_v56 }
 0x543   : > { %v14477_v63 = vpop.permute.xlu1 %8910  ;;  %v8440_v14 = vcombine.low %v8417_v35, %v8432_v11 }
 0x544   : > { %15803 = vst [vmem:[#allocation134_spill] sm:$0xff] %v14477_v63  ;;  %v14493_v51 = vpop.permute.xlu0 %8912  ;;  %v7648_v63 = vcombine.low %v14454_v30, %v14463_v18 }
 0x545   : > { %15804 = vst [vmem:[#allocation135_spill] sm:$0xff] %v14493_v51  ;;  %9138 = vrot.lane.b32.xlu1 %v8409_v60, %s10363_s6  ;;  %v14509_v51 = vrot.slane %v7384_v61, %v11777_v52  ;;  %v7912_v60 = vcombine.low %v14481_v40, %v14484_v10  ;;  %v8176_v61 = vcombine.low %v8153_v16, %v8168_v22 }
 0x546   : > { %9156 = vrot.lane.b32.xlu0 %v6624_v33, %s10356_s26  ;;  %v14522_v33 = vrot.slane %v7648_v63, %v11777_v52 }
 0x547   : > { %v14506_v42 = vpop.permute.xlu1 %8914  ;;  %v7416_v0 = vcombine.high %v14509_v51, %v15617_v56  ;;  %v14530_v26 = vrot.slane %v7912_v60, %v11777_v52  ;;  %v14538_v63 = vrot.slane %v8176_v61, %v11777_v52  ;;  %v14546_v60 = vrot.slane %v8440_v14, %v11777_v52 }
 0x548   : > { %15805 = vst [vmem:[#allocation136_spill] sm:$0xff] %v14506_v42  ;;  %v14516_v4 = vpop.permute.xlu0 %8932  ;;  %v6857_v14 = vcombine.high %v14382_v46, %v14385_v21  ;;  %v7649_v21 = vcombine.high %v14454_v30, %v14463_v18  ;;  %v8441_v18 = vcombine.high %v8417_v35, %v8432_v11 }
 0x549   : > { %9158 = vrot.lane.b32.xlu1 %v6888_v5, %s10356_s26  ;;  %v7680_v5 = vcombine.high %v14522_v33, %v15617_v56  ;;  %v7944_v43 = vcombine.high %v14530_v26, %v15617_v56  ;;  %v8208_v50 = vcombine.high %v14538_v63, %v15617_v56 }
 0x54a   : > { %9160 = vrot.lane.b32.xlu0 %v7152_v53, %s10356_s26 }
 0x54b   : > { %v14525_v42 = vpop.permute.xlu1 %8934 }
 0x54c   : > { %v14532_v27 = vpop.permute.xlu0 %8936 }
 0x54d   : > { %9162 = vrot.lane.b32.xlu1 %v7416_v0, %s10356_s26  ;;  %v6593_v0 = vcombine.high %v14375_v59, %v14378_v36  ;;  %v6871_v36 = vrot.slane %v6857_v14, %v11777_v52 }
 0x54e   : > { %9164 = vrot.lane.b32.xlu0 %v7680_v5, %s10356_s26  ;;  %v8472_v5 = vcombine.high %v14546_v60, %v15617_v56 }
 0x54f   : > { %v14541_v53 = vpop.permute.xlu1 %8938  ;;  %v6607_v45 = vrot.slane %v6593_v0, %v11777_v52  ;;  %v7913_v0 = vcombine.high %v14481_v40, %v14484_v10  ;;  %v8455_v40 = vrot.slane %v8441_v18, %v11777_v52  ;;  %v6889_v35 = vcombine.high %v6871_v36, %v15617_v56 }
 0x550   : > { %v14548_v13 = vpop.permute.xlu0 %8940 }
 0x551   : > { %9166 = vrot.lane.b32.xlu1 %v7944_v43, %s10356_s26  ;;  %v7121_v43 = vcombine.high %v14405_v32, %v14408_v7  ;;  %v7927_v30 = vrot.slane %v7913_v0, %v11777_v52  ;;  %v7090_v0 = vcombine.high %v14364_v20, %v15617_v56 }
 0x552   : > { %9168 = vrot.lane.b32.xlu0 %v8208_v50, %s10356_s26  ;;  %v7385_v50 = vcombine.high %v14431_v23, %v14434_v62  ;;  %v7663_v23 = vrot.slane %v7649_v21, %v11777_v52  ;;  %v8177_v62 = vcombine.high %v8153_v16, %v8168_v22  ;;  %v6625_v16 = vcombine.high %v6607_v45, %v15617_v56 }
 0x553   : > { %v14556_v61 = vpop.permute.xlu1 %8942  ;;  %v7135_v46 = vrot.slane %v7121_v43, %v11777_v52  ;;  %v6562_v21 = vcombine.high %v14342_v41, %v15617_v56 }
 0x554   : > { %v14562_v49 = vpop.permute.xlu0 %8944  ;;  %v7399_v7 = vrot.slane %v7385_v50, %v11777_v52  ;;  %v8191_v50 = vrot.slane %v8177_v62, %v11777_v52 }
 0x555   : > { %9170 = vrot.lane.b32.xlu1 %v8472_v5, %s10356_s26  ;;  %v7153_v18 = vcombine.high %v7135_v46, %v15617_v56  ;;  %v14627_v15 = vrot.slane %v6562_v21, %v11768_v3  ;;  %v7945_v21 = vcombine.high %v7927_v30, %v15617_v56  ;;  %s9963_s26 = sshll.u32 %s10487_s30, 1 }
 0x556   : > { %9188 = vrot.lane.b32.xlu0 %v6607_v45, %s10358_s29  ;;  %v10064_v45 = vcombine.high %v14160_v37, %v15617_v56  ;;  %v7417_v20 = vcombine.high %v7399_v7, %v15617_v56  ;;  %v14632_v37 = vrot.slane %v7090_v0, %v11768_v3 }
 0x557   : > { %v14569_v59 = vpop.permute.xlu1 %8946 }
 0x558   : > { %v14574_v17 = vpop.permute.xlu0 %8964 }
 0x559   : > { %9190 = vrot.lane.b32.xlu1 %v6871_v36, %s10358_s29  ;;  %v10072_v36 = vcombine.high %v14179_v29, %v15617_v56  ;;  %v14639_v29 = vrot.slane %v10064_v45, %v11768_v3 }
 0x55a   : > { %9192 = vrot.lane.b32.xlu0 %v7135_v46, %s10358_s29  ;;  %v10068_v46 = vcombine.high %v14168_v48, %v15617_v56  ;;  %v7354_v48 = vcombine.high %v14389_v31, %v15617_v56  ;;  %v10076_v31 = vcombine.high %v14196_v1, %v15617_v56 }
 0x55b   : > { %v14581_v32 = vpop.permute.xlu1 %8966 }
 0x55c   : > { %v14586_v5 = vpop.permute.xlu0 %8968  ;;  %v14656_v45 = vrot.slane %v10068_v46, %v11768_v3  ;;  %v14674_v46 = vrot.slane %v7354_v48, %v11768_v3 }
 0x55d   : > { %9194 = vrot.lane.b32.xlu1 %v7399_v7, %s10358_s29 }
 0x55e   : > { %9196 = vrot.lane.b32.xlu0 %v7663_v23, %s10358_s29 }
 0x55f   : > { %v14591_v14 = vpop.permute.xlu1 %8970 }
 0x560   : > { %v14594_v43 = vpop.permute.xlu0 %8972 }
 0x561   : > { %9198 = vrot.lane.b32.xlu1 %v7927_v30, %s10358_s29  ;;  %v10080_v30 = vcombine.high %v14347_v55, %v15617_v56  ;;  %v8473_v55 = vcombine.high %v8455_v40, %v15617_v56 }
 0x562   : > { %9200 = vrot.lane.b32.xlu0 %v8191_v50, %s10358_s29 }
 0x563   : > { %v14599_v10 = vpop.permute.xlu1 %8974 }
 0x564   : > { %v8977_v22 = vpop.permute.xlu0 %8976 }
 0x565   : > { %9202 = vrot.lane.b32.xlu1 %v8455_v40, %s10358_s29  ;;  %v15806_v40 = vld [vmem:[#allocation101_spill] sm:$0xff] }
 0x566   : > { %9220 = vrot.lane.b32.xlu0 %v6625_v16, %s10360_s27  ;;  %v6826_v16 = vcombine.high %v14351_v38, %v15617_v56  ;;  %v7681_v38 = vcombine.high %v7663_v23, %v15617_v56  ;;  %v6608_v23 = vcombine.low %v14627_v15, %v14639_v29  ;;  %v9497_v48 = vsel %vm9372_vm11, %v15806_v40, %v14562_v49 }
 0x567   : > { %v14605_v11 = vpop.permute.xlu1 %8978  ;;  %v9505_v58 = vsel %vm9381_vm12, %v9497_v48, %v8977_v22  ;;  %v10088_v49 = vcombine.high %v14415_v2, %v15617_v56  ;;  %v10092_v48 = vcombine.high %v14437_v19, %v15617_v56 }
 0x568   : > { %v14612_v62 = vpop.permute.xlu0 %8996  ;;  %v14642_v7 = vrot.slane %v6826_v16, %v11768_v3  ;;  %v7618_v16 = vcombine.high %v14412_v39, %v15617_v56  ;;  %v14678_v1 = vrot.slane %v6608_v23, %v11777_v52  ;;  %v14697_v23 = vrot.slane %v10076_v31, %v11768_v3  ;;  %v15807_v31 = vld [vmem:[#allocation103_spill] sm:$0xff] }
 0x569   : > { %9222 = vrot.lane.b32.xlu1 %v6889_v35, %s10360_s27  ;;  %v9498_v40 = vsel %vm9372_vm11, %v15807_v31, %v14569_v59  ;;  %v15809_v31 = vld [vmem:[#allocation90_spill] sm:$0xff] }
 0x56a   : > { %9224 = vrot.lane.b32.xlu0 %v7153_v18, %s10360_s27  ;;  %v14646_v18 = vrot.slane %v10072_v36, %v11768_v3  ;;  %v6872_v39 = vcombine.low %v14642_v7, %v14656_v45  ;;  %v7400_v22 = vcombine.low %v14674_v46, %v14697_v23 }
 0x56b   : > { %v14623_v41 = vpop.permute.xlu1 %8998 }
 0x56c   : > { %v14634_v35 = vpop.permute.xlu0 %9000  ;;  %v7136_v36 = vcombine.low %v14632_v37, %v14646_v18  ;;  %v14704_v8 = vrot.slane %v6872_v39, %v11777_v52  ;;  %v8410_v39 = vcombine.high %v14487_v57, %v15617_v56 }
 0x56d   : > { %9226 = vrot.lane.b32.xlu1 %v7417_v20, %s10360_s27 }
 0x56e   : > { %9228 = vrot.lane.b32.xlu0 %v7681_v38, %s10360_s27  ;;  %v8209_v38 = vcombine.high %v8191_v50, %v15617_v56  ;;  %v14683_v50 = vrot.slane %v7618_v16, %v11768_v3  ;;  %v8146_v16 = vcombine.high %v14466_v54, %v15617_v56 }
 0x56f   : > { %v14651_v0 = vpop.permute.xlu1 %9002 }
 0x570   : > { %v14666_v20 = vpop.permute.xlu0 %9004 }
 0x571   : > { %9230 = vrot.lane.b32.xlu1 %v7945_v21, %s10360_s27  ;;  %v14686_v21 = vrot.slane %v10080_v30, %v11768_v3 }
 0x572   : > { %9232 = vrot.lane.b32.xlu0 %v8209_v38, %s10360_s27  ;;  %v14694_v38 = vrot.slane %v7136_v36, %v11777_v52  ;;  %v10084_v36 = vcombine.high %v14395_v12, %v15617_v56  ;;  %v9506_v12 = vsel %vm9381_vm12, %v9498_v40, %v14605_v11  ;;  %v14738_v11 = vrot.slane %v8146_v16, %v11768_v3 }
 0x573   : > { %v14680_v34 = vpop.permute.xlu1 %9006  ;;  %v9492_v40 = vsel %vm9372_vm11, %v15809_v31, %v14525_v42  ;;  %v7408_v42 = vrot.slane %v7400_v22, %v11777_v52 }
 0x574   : > { %v9009_v30 = vpop.permute.xlu0 %9008  ;;  %v14751_v19 = vrot.slane %v10084_v36, %v11768_v3  ;;  %v9500_v16 = vsel %vm9381_vm12, %v9492_v40, %v14581_v32 }
 0x575   : > { %9234 = vrot.lane.b32.xlu1 %v8473_v55, %s10360_s27  ;;  %v14714_v54 = vsel %vm9390_vm13, %v9505_v58, %v9009_v30  ;;  %v15808_v55 = vld [vmem:[#allocation89_spill] sm:$0xff]  ;;  %v14728_v58 = vrot.slane %v7882_v47, %v11768_v3  ;;  %s15360_s27 = scalar_lea.vmem %s15452_s5, %s9963_s26 }
 0x576   : > { %v9491_v2 = vsel %vm9372_vm11, %v15808_v55, %v14516_v4  ;;  %9252 = vrot.lane.b32.xlu0 %v14678_v1, %s10362_s19  ;;  %v7664_v4 = vcombine.low %v14683_v50, %v14686_v21 }
 0x577   : > { %v9011_v59 = vpop.permute.xlu1 %9010  ;;  %v9499_v57 = vsel %vm9381_vm12, %v9491_v2, %v14574_v17  ;;  %v14748_v17 = vrot.slane %v10088_v49, %v11768_v3  ;;  %v9508_v49 = vsel %vm9390_vm13, %v9500_v16, %v14623_v41  ;;  %v7928_v32 = vcombine.low %v14728_v58, %v14751_v19  ;;  %v15812_v16 = vld [vmem:[#allocation97_spill] sm:$0xff] }
 0x578   : > { %v9514_v30 = vsel %vm9390_vm13, %v9506_v12, %v9011_v59  ;;  %v9507_v47 = vsel %vm9390_vm13, %v9499_v57, %v14612_v62  ;;  %v9029_v55 = vpop.permute.xlu0 %9028  ;;  %v14758_v12 = vrot.slane %v8410_v39, %v11768_v3  ;;  %v15810_v62 = vld [vmem:[#allocation92_spill] sm:$0xff]  ;;  %v14770_v57 = vrot.slane %v10092_v48, %v11768_v3 }
 0x579   : > { %9254 = vrot.lane.b32.xlu1 %v14704_v8, %s10362_s19  ;;  %v9515_v2 = vsel %vm9399_vm14, %v9507_v47, %v9029_v55  ;;  %v9493_v59 = vsel %vm9372_vm11, %v15810_v62, %v14532_v27  ;;  %v15811_v27 = vld [vmem:[#allocation95_spill] sm:$0xff]  ;;  %v7672_v47 = vrot.slane %v7664_v4, %v11777_v52  ;;  %v8192_v48 = vcombine.low %v14738_v11, %v14748_v17 }
 0x57a   : > { %9256 = vrot.lane.b32.xlu0 %v14694_v38, %s10362_s19  ;;  %v9501_v22 = vsel %vm9381_vm12, %v9493_v59, %v14586_v5  ;;  %v9494_v31 = vsel %vm9372_vm11, %v15811_v27, %v14541_v53  ;;  %v9495_v53 = vsel %vm9372_vm11, %v15812_v16, %v14548_v13  ;;  %v7936_v62 = vrot.slane %v7928_v32, %v11777_v52 }
 0x57b   : > { %v9031_v36 = vpop.permute.xlu1 %9030  ;;  %v9509_v41 = vsel %vm9390_vm13, %v9501_v22, %v14634_v35  ;;  %v9502_v5 = vsel %vm9381_vm12, %v9494_v31, %v14591_v14  ;;  %v8456_v59 = vcombine.low %v14758_v12, %v14770_v57  ;;  %v9503_v14 = vsel %vm9381_vm12, %v9495_v53, %v14594_v43 }
 0x57c   : > { %v9516_v39 = vsel %vm9399_vm14, %v9508_v49, %v9031_v36  ;;  %v9033_v40 = vpop.permute.xlu0 %9032  ;;  %v9510_v35 = vsel %vm9390_vm13, %v9502_v5, %v14651_v0  ;;  %v15813_v36 = vld [vmem:[#allocation99_spill] sm:$0xff]  ;;  %v9511_v0 = vsel %vm9390_vm13, %v9503_v14, %v14666_v20  ;;  %v8200_v27 = vrot.slane %v8192_v48, %v11777_v52 }
 0x57d   : > { %9258 = vrot.lane.b32.xlu1 %v7408_v42, %s10362_s19  ;;  %v9517_v55 = vsel %vm9399_vm14, %v9509_v41, %v9033_v40  ;;  %v9496_v13 = vsel %vm9372_vm11, %v15813_v36, %v14556_v61  ;;  %v8464_v61 = vrot.slane %v8456_v59, %v11777_v52  ;;  %v6626_v48 = vcombine.high %v14678_v1, %v15617_v56 }
 0x57e   : > { %9260 = vrot.lane.b32.xlu0 %v7672_v47, %s10362_s19  ;;  %v9504_v32 = vsel %vm9381_vm12, %v9496_v13, %v14599_v10  ;;  %v7946_v36 = vcombine.high %v7936_v62, %v15617_v56 }
 0x57f   : > { %v9035_v4 = vpop.permute.xlu1 %9034  ;;  %v9512_v43 = vsel %vm9390_vm13, %v9504_v32, %v14680_v34  ;;  %v6890_v34 = vcombine.high %v14704_v8, %v15617_v56  ;;  %v7682_v8 = vcombine.high %v7672_v47, %v15617_v56 }
 0x580   : > { %v9518_v49 = vsel %vm9399_vm14, %v9510_v35, %v9035_v4  ;;  %v9037_v22 = vpop.permute.xlu0 %9036  ;;  %v7154_v35 = vcombine.high %v14694_v38, %v15617_v56  ;;  %v7418_v4 = vcombine.high %v7408_v42, %v15617_v56  ;;  %v6609_v42 = vcombine.high %v14627_v15, %v14639_v29 }
 0x581   : > { %9262 = vrot.lane.b32.xlu1 %v7936_v62, %s10362_s19  ;;  %v9519_v31 = vsel %vm9399_vm14, %v9511_v0, %v9037_v22  ;;  %v8210_v0 = vcombine.high %v8200_v27, %v15617_v56  ;;  %v6873_v62 = vcombine.high %v14642_v7, %v14656_v45  ;;  %v7137_v15 = vcombine.high %v14632_v37, %v14646_v18 }
 0x582   : > { %9264 = vrot.lane.b32.xlu0 %v8200_v27, %s10362_s19  ;;  %v6623_v27 = vrot.slane %v6609_v42, %v11777_v52  ;;  %v7401_v7 = vcombine.high %v14674_v46, %v14697_v23  ;;  %v7665_v37 = vcombine.high %v14683_v50, %v14686_v21  ;;  %v7929_v46 = vcombine.high %v14728_v58, %v14751_v19 }
 0x583   : > { %v9039_v41 = vpop.permute.xlu1 %9038  ;;  %v8193_v50 = vcombine.high %v14738_v11, %v14748_v17  ;;  %v8457_v58 = vcombine.high %v14758_v12, %v14770_v57 }
 0x584   : > { %v9520_v20 = vsel %vm9399_vm14, %v9512_v43, %v9039_v41  ;;  %v9041_v40 = vpop.permute.xlu0 %9040  ;;  %v7151_v41 = vrot.slane %v7137_v15, %v11777_v52 }
 0x585   : > { %9266 = vrot.lane.b32.xlu1 %v8464_v61, %s10362_s19  ;;  %v9521_v10 = vsel %vm9399_vm14, %v14714_v54, %v9041_v40  ;;  %v8471_v17 = vrot.slane %v8457_v58, %v11777_v52 }
 0x586   : > { %9284 = vrot.lane.b32.xlu0 %v6626_v48, %s10366_s7  ;;  %v7679_v48 = vrot.slane %v7665_v37, %v11777_v52 }
 0x587   : > { %v9043_v5 = vpop.permute.xlu1 %9042 }
 0x588   : > { %v9522_v16 = vsel %vm9399_vm14, %v9514_v30, %v9043_v5  ;;  %v9061_v53 = vpop.permute.xlu0 %9060  ;;  %v7943_v5 = vrot.slane %v7929_v46, %v11777_v52 }
 0x589   : > { %9286 = vrot.lane.b32.xlu1 %v6890_v34, %s10366_s7  ;;  %v9523_v1 = vsel %vm9408_vm15, %v9515_v2, %v9061_v53 }
 0x58a   : > { %9288 = vrot.lane.b32.xlu0 %v7154_v35, %s10366_s7 }
 0x58b   : > { %v9063_v54 = vpop.permute.xlu1 %9062 }
 0x58c   : > { %v9524_v59 = vsel %vm9408_vm15, %v9516_v39, %v9063_v54  ;;  %v9065_v14 = vpop.permute.xlu0 %9064  ;;  %v6627_v54 = vcombine.high %v6623_v27, %v15617_v56 }
 0x58d   : > { %9290 = vrot.lane.b32.xlu1 %v7418_v4, %s10366_s7  ;;  %v9525_v30 = vsel %vm9408_vm15, %v9517_v55, %v9065_v14  ;;  %v8474_v55 = vcombine.high %v8464_v61, %v15617_v56 }
 0x58e   : > { %9292 = vrot.lane.b32.xlu0 %v7682_v8, %s10366_s7 }
 0x58f   : > { %v9067_v38 = vpop.permute.xlu1 %9066 }
 0x590   : > { %v9526_v2 = vsel %vm9408_vm15, %v9518_v49, %v9067_v38  ;;  %v9069_v13 = vpop.permute.xlu0 %9068 }
 0x591   : > { %9294 = vrot.lane.b32.xlu1 %v7946_v36, %s10366_s7  ;;  %v9527_v39 = vsel %vm9408_vm15, %v9519_v31, %v9069_v13  ;;  %v6887_v31 = vrot.slane %v6873_v62, %v11777_v52  ;;  %v7683_v13 = vcombine.high %v7679_v48, %v15617_v56 }
 0x592   : > { %9296 = vrot.lane.b32.xlu0 %v8210_v0, %s10366_s7 }
 0x593   : > { %v9071_v47 = vpop.permute.xlu1 %9070  ;;  %v6891_v4 = vcombine.high %v6887_v31, %v15617_v56 }
 0x594   : > { %v9528_v49 = vsel %vm9408_vm15, %v9520_v20, %v9071_v47  ;;  %v9073_v22 = vpop.permute.xlu0 %9072  ;;  %v7415_v20 = vrot.slane %v7401_v7, %v11777_v52 }
 0x595   : > { %9298 = vrot.lane.b32.xlu1 %v8474_v55, %s10366_s7  ;;  %v9529_v29 = vsel %vm9408_vm15, %v9521_v10, %v9073_v22 }
 0x596   : > { %9316 = vrot.lane.b32.xlu0 %v6623_v27, %s10367_s25  ;;  %v7419_v38 = vcombine.high %v7415_v20, %v15617_v56  ;;  %v8475_v27 = vcombine.high %v8471_v17, %v15617_v56 }
 0x597   : > { %v9075_v32 = vpop.permute.xlu1 %9074 }
 0x598   : > { %v9530_v45 = vsel %vm9408_vm15, %v9522_v16, %v9075_v32  ;;  %v9093_v43 = vpop.permute.xlu0 %9092  ;;  %v8207_v16 = vrot.slane %v8193_v50, %v11777_v52  ;;  %v7155_v52 = vcombine.high %v7151_v41, %v15617_v56 }
 0x599   : > { %9318 = vrot.lane.b32.xlu1 %v6887_v31, %s10367_s25  ;;  %v9531_v18 = vsel %vm9417_vm0, %v9523_v1, %v9093_v43 }
 0x59a   : > { %9320 = vrot.lane.b32.xlu0 %v7151_v41, %s10367_s25  ;;  %v8211_v62 = vcombine.high %v8207_v16, %v15617_v56 }
 0x59b   : > { %v9095_v61 = vpop.permute.xlu1 %9094 }
 0x59c   : > { %v9532_v23 = vsel %vm9417_vm0, %v9524_v59, %v9095_v61  ;;  %v9097_v40 = vpop.permute.xlu0 %9096 }
 0x59d   : > { %9322 = vrot.lane.b32.xlu1 %v7415_v20, %s10367_s25  ;;  %v9533_v21 = vsel %vm9417_vm0, %v9525_v30, %v9097_v40 }
 0x59e   : > { %9324 = vrot.lane.b32.xlu0 %v7679_v48, %s10367_s25 }
 0x59f   : > { %v9099_v10 = vpop.permute.xlu1 %9098 }
 0x5a0   : > { %v9534_v19 = vsel %vm9417_vm0, %v9526_v2, %v9099_v10  ;;  %v9101_v34 = vpop.permute.xlu0 %9100 }
 0x5a1   : > { %9326 = vrot.lane.b32.xlu1 %v7943_v5, %s10367_s25  ;;  %v9535_v53 = vsel %vm9417_vm0, %v9527_v39, %v9101_v34  ;;  %v7947_v39 = vcombine.high %v7943_v5, %v15617_v56 }
 0x5a2   : > { %9328 = vrot.lane.b32.xlu0 %v8207_v16, %s10367_s25 }
 0x5a3   : > { %v9103_v11 = vpop.permute.xlu1 %9102 }
 0x5a4   : > { %v9536_v35 = vsel %vm9417_vm0, %v9528_v49, %v9103_v11  ;;  %v9105_v1 = vpop.permute.xlu0 %9104 }
 0x5a5   : > { %9330 = vrot.lane.b32.xlu1 %v8471_v17, %s10367_s25  ;;  %v9537_v12 = vsel %vm9417_vm0, %v9529_v29, %v9105_v1 }
 0x5a6   : > { %9348 = vrot.lane.b32.xlu0 %v6627_v54, %s10363_s6 }
 0x5a7   : > { %v9107_v57 = vpop.permute.xlu1 %9106 }
 0x5a8   : > { %v9538_v59 = vsel %vm9417_vm0, %v9530_v45, %v9107_v57  ;;  %v9125_v14 = vpop.permute.xlu0 %9124 }
 0x5a9   : > { %9350 = vrot.lane.b32.xlu1 %v6891_v4, %s10363_s6  ;;  %v14891_v8 = vsel %vm9426_vm1, %v9531_v18, %v9125_v14 }
 0x5aa   : > { %9352 = vrot.lane.b32.xlu0 %v7155_v52, %s10363_s6 }
 0x5ab   : > { %v9127_v30 = vpop.permute.xlu1 %9126 }
 0x5ac   : > { %v14896_v36 = vsel %vm9426_vm1, %v9532_v23, %v9127_v30  ;;  %v9129_v2 = vpop.permute.xlu0 %9128 }
 0x5ad   : > { %9354 = vrot.lane.b32.xlu1 %v7419_v38, %s10363_s6  ;;  %v14901_v0 = vsel %vm9426_vm1, %v9533_v21, %v9129_v2 }
 0x5ae   : > { %9356 = vrot.lane.b32.xlu0 %v7683_v13, %s10363_s6 }
 0x5af   : > { %v9131_v42 = vpop.permute.xlu1 %9130 }
 0x5b0   : > { %v14906_v47 = vsel %vm9426_vm1, %v9534_v19, %v9131_v42  ;;  %v9133_v55 = vpop.permute.xlu0 %9132 }
 0x5b1   : > { %9358 = vrot.lane.b32.xlu1 %v7947_v39, %s10363_s6  ;;  %v14911_v49 = vsel %vm9426_vm1, %v9535_v53, %v9133_v55 }
 0x5b2   : > { %15814 = vst [vmem:[#allocation101_spill] sm:$0xff] %v14911_v49  ;;  %9360 = vrot.lane.b32.xlu0 %v8211_v62, %s10363_s6 }
 0x5b3   : > { %v9135_v22 = vpop.permute.xlu1 %9134 }
 0x5b4   : > { %v14916_v15 = vsel %vm9426_vm1, %v9536_v35, %v9135_v22  ;;  %v9137_v29 = vpop.permute.xlu0 %9136 }
 0x5b5   : > { %15815 = vst [vmem:[#allocation103_spill] sm:$0xff] %v14916_v15  ;;  %9362 = vrot.lane.b32.xlu1 %v8475_v27, %s10363_s6  ;;  %v14920_v32 = vsel %vm9426_vm1, %v9537_v12, %v9137_v29  ;;  %v15822_v27 = vld [vmem:[#allocation47_spill] sm:$0xff]  ;;  %v15823_v29 = vld [vmem:[#allocation21_spill] sm:$0xff]  ;;  %v15900_v15 = vld [vmem:[#allocation46_spill] sm:$0xff] }
 0x5b6   : > { %15816 = vst [vmem:[#allocation89_spill] sm:$0xff] %v14920_v32 }
 0x5b7   : > { %v9139_v31 = vpop.permute.xlu1 %9138 }
 0x5b8   : > { %v14923_v7 = vsel %vm9426_vm1, %v9538_v59, %v9139_v31  ;;  %v9157_v45 = vpop.permute.xlu0 %9156  ;;  %v9373_v31 = vsel %vm9372_vm11, %v15823_v29, %v15822_v27  ;;  %v15839_v27 = vld [vmem:[#allocation59_spill] sm:$0xff] }
 0x5b9   : > { %15817 = vst [vmem:[#allocation90_spill] sm:$0xff] %v14923_v7  ;;  %v9547_v46 = vsel %vm9372_vm11, %v14460_v6, %v9157_v45  ;;  %v15824_v45 = vld [vmem:[#allocation49_spill] sm:$0xff] }
 0x5ba   : > { %v15877_v7 = vld [vmem:[#allocation65_spill] sm:$0xff] }
 0x5bb   : > { %v9159_v43 = vpop.permute.xlu1 %9158 }
 0x5bc   : > { %v9161_v41 = vpop.permute.xlu0 %9160  ;;  %v9548_v48 = vsel %vm9372_vm11, %v14472_v44, %v9159_v43  ;;  %v15825_v43 = vld [vmem:[#allocation24_spill] sm:$0xff] }
 0x5bd   : > { %v9549_v10 = vsel %vm9372_vm11, %v14491_v25, %v9161_v41  ;;  %v9374_v41 = vsel %vm9372_vm11, %v15825_v43, %v15824_v45  ;;  %v15840_v45 = vld [vmem:[#allocation5_spill] sm:$0xff] }
 0x5be   : > { %v9383_v43 = vsel %vm9381_vm12, %v9374_v41, %v15840_v45  ;;  %v15851_v45 = vld [vmem:[#allocation23_spill] sm:$0xff] }
 0x5bf   : > { %v9163_v37 = vpop.permute.xlu1 %9162 }
 0x5c0   : > { %v9165_v18 = vpop.permute.xlu0 %9164  ;;  %v9550_v6 = vsel %vm9372_vm11, %v14509_v51, %v9163_v37  ;;  %v15826_v37 = vld [vmem:[#allocation51_spill] sm:$0xff] }
 0x5c1   : > { %v9551_v44 = vsel %vm9372_vm11, %v14522_v33, %v9165_v18  ;;  %v15827_v18 = vld [vmem:[#allocation27_spill] sm:$0xff] }
 0x5c3   : > { %v9167_v61 = vpop.permute.xlu1 %9166 }
 0x5c4   : > { %v9169_v56 = vpop.permute.xlu0 %9168  ;;  %v9552_v25 = vsel %vm9372_vm11, %v14530_v26, %v9167_v61  ;;  %v9375_v61 = vsel %vm9372_vm11, %v15827_v18, %v15826_v37  ;;  %v15841_v37 = vld [vmem:[#allocation61_spill] sm:$0xff] }
 0x5c5   : > { %v9553_v51 = vsel %vm9372_vm11, %v14538_v63, %v9169_v56  ;;  %v15828_v56 = vld [vmem:[#allocation53_spill] sm:$0xff]  ;;  %v9384_v29 = vsel %vm9381_vm12, %v9375_v61, %v15839_v27  ;;  %v15850_v27 = vld [vmem:[#allocation19_spill] sm:$0xff] }
 0x5c7   : > { %v9171_v20 = vpop.permute.xlu1 %9170 }
 0x5c8   : > { %v9189_v23 = vpop.permute.xlu0 %9188  ;;  %v9554_v33 = vsel %vm9372_vm11, %v14546_v60, %v9171_v20  ;;  %v15829_v20 = vld [vmem:[#allocation30_spill] sm:$0xff] }
 0x5c9   : > { %v14928_v40 = vsel %vm9381_vm12, %v9547_v46, %v9189_v23  ;;  %v9376_v46 = vsel %vm9372_vm11, %v15829_v20, %v15828_v56  ;;  %v15830_v23 = vld [vmem:[#allocation55_spill] sm:$0xff]  ;;  %v15842_v56 = vld [vmem:[#allocation60_spill] sm:$0xff] }
 0x5ca   : > { %v9385_v20 = vsel %vm9381_vm12, %v9376_v46, %v15842_v56  ;;  %v15852_v56 = vld [vmem:[#allocation62_spill] sm:$0xff] }
 0x5cb   : > { %v9191_v50 = vpop.permute.xlu1 %9190 }
 0x5cc   : > { %v14933_v21 = vsel %vm9381_vm12, %v9548_v48, %v9191_v50  ;;  %v9193_v5 = vpop.permute.xlu0 %9192  ;;  %v15831_v48 = vld [vmem:[#allocation31_spill] sm:$0xff] }
 0x5cd   : > { %v14938_v58 = vsel %vm9381_vm12, %v9549_v10, %v9193_v5  ;;  %v9377_v50 = vsel %vm9372_vm11, %v15831_v48, %v15830_v23  ;;  %v15832_v10 = vld [vmem:[#allocation56_spill] sm:$0xff]  ;;  %v15833_v5 = vld [vmem:[#allocation33_spill] sm:$0xff] }
 0x5ce   : > { %v9386_v18 = vsel %vm9381_vm12, %v9377_v50, %v15841_v37  ;;  %v15843_v23 = vld [vmem:[#allocation9_spill] sm:$0xff] }
 0x5cf   : > { %v9195_v19 = vpop.permute.xlu1 %9194 }
 0x5d0   : > { %v14943_v34 = vsel %vm9381_vm12, %v9550_v6, %v9195_v19  ;;  %v9197_v16 = vpop.permute.xlu0 %9196  ;;  %v9378_v6 = vsel %vm9372_vm11, %v15833_v5, %v15832_v10  ;;  %v15834_v19 = vld [vmem:[#allocation57_spill] sm:$0xff] }
 0x5d1   : > { %v14948_v53 = vsel %vm9381_vm12, %v9551_v44, %v9197_v16  ;;  %v15835_v44 = vld [vmem:[#allocation35_spill] sm:$0xff] }
 0x5d2   : > { %v9379_v16 = vsel %vm9372_vm11, %v15835_v44, %v15834_v19  ;;  %v15845_v19 = vld [vmem:[#allocation13_spill] sm:$0xff]  ;;  %v15846_v44 = vld [vmem:[#allocation11_spill] sm:$0xff] }
 0x5d3   : > { %v9199_v11 = vpop.permute.xlu1 %9198  ;;  %v9388_v48 = vsel %vm9381_vm12, %v9379_v16, %v15843_v23 }
 0x5d4   : > { %v14953_v17 = vsel %vm9381_vm12, %v9552_v25, %v9199_v11  ;;  %v9201_v35 = vpop.permute.xlu0 %9200  ;;  %v15836_v11 = vld [vmem:[#allocation20_spill] sm:$0xff]  ;;  %v9397_v37 = vsel %vm9390_vm13, %v9388_v48, %v15851_v45  ;;  %v15860_v45 = vld [vmem:[#allocation69_spill] sm:$0xff] }
 0x5d5   : > { %v14958_v1 = vsel %vm9381_vm12, %v9553_v51, %v9201_v35  ;;  %v9382_v51 = vsel %vm9381_vm12, %v9373_v31, %v15836_v11  ;;  %v15837_v35 = vld [vmem:[#allocation58_spill] sm:$0xff]  ;;  %v15844_v31 = vld [vmem:[#allocation7_spill] sm:$0xff]  ;;  %v15847_v11 = vld [vmem:[#allocation17_spill] sm:$0xff] }
 0x5d6   : > { %v9387_v10 = vsel %vm9381_vm12, %v9378_v6, %v15844_v31  ;;  %v9391_v61 = vsel %vm9390_vm13, %v9382_v51, %v15845_v19  ;;  %v9393_v50 = vsel %vm9390_vm13, %v9384_v29, %v15847_v11  ;;  %v9394_v6 = vsel %vm9390_vm13, %v9385_v20, %v15850_v27  ;;  %v15854_v31 = vld [vmem:[#allocation25_spill] sm:$0xff]  ;;  %v15855_v19 = vld [vmem:[#allocation66_spill] sm:$0xff] }
 0x5d7   : > { %v9203_v54 = vpop.permute.xlu1 %9202  ;;  %v9396_v51 = vsel %vm9390_vm13, %v9387_v10, %v15852_v56  ;;  %v15857_v11 = vld [vmem:[#allocation26_spill] sm:$0xff] }
 0x5d8   : > { %v14963_v12 = vsel %vm9381_vm12, %v9554_v33, %v9203_v54  ;;  %v14965_v57 = vpop.permute.xlu0 %9220  ;;  %v15838_v33 = vld [vmem:[#allocation36_spill] sm:$0xff] }
 0x5d9   : > { %15818 = vst [vmem:[#allocation92_spill] sm:$0xff] %v14963_v12  ;;  %v9380_v54 = vsel %vm9372_vm11, %v15838_v33, %v15837_v35  ;;  %v15848_v35 = vld [vmem:[#allocation15_spill] sm:$0xff]  ;;  %v15849_v33 = vld [vmem:[#allocation22_spill] sm:$0xff] }
 0x5da   : > { %v9389_v41 = vsel %vm9381_vm12, %v9380_v54, %v15846_v44  ;;  %v9392_v46 = vsel %vm9390_vm13, %v9383_v43, %v15848_v35  ;;  %v9395_v16 = vsel %vm9390_vm13, %v9386_v18, %v15849_v33  ;;  %v15853_v54 = vld [vmem:[#allocation63_spill] sm:$0xff]  ;;  %v9402_v18 = vsel %vm9399_vm14, %v9393_v50, %v15855_v19  ;;  %v15856_v44 = vld [vmem:[#allocation64_spill] sm:$0xff]  ;;  %v15859_v33 = vld [vmem:[#allocation70_spill] sm:$0xff] }
 0x5db   : > { %v14967_v26 = vpop.permute.xlu1 %9222  ;;  %v9400_v29 = vsel %vm9399_vm14, %v9391_v61, %v15853_v54  ;;  %v9398_v43 = vsel %vm9390_vm13, %v9389_v41, %v15854_v31  ;;  %v9401_v20 = vsel %vm9399_vm14, %v9392_v46, %v15856_v44  ;;  %v9404_v48 = vsel %vm9399_vm14, %v9395_v16, %v15857_v11  ;;  %v15858_v35 = vld [vmem:[#allocation68_spill] sm:$0xff]  ;;  %v15862_v54 = vld [vmem:[#allocation71_spill] sm:$0xff]  ;;  %v15863_v31 = vld [vmem:[#allocation74_spill] sm:$0xff] }
 0x5dc   : > { %v14969_v4 = vpop.permute.xlu0 %9224  ;;  %v9403_v10 = vsel %vm9399_vm14, %v9394_v6, %v15858_v35  ;;  %v9406_v27 = vsel %vm9399_vm14, %v9397_v37, %v15859_v33  ;;  %v9405_v61 = vsel %vm9399_vm14, %v9396_v51, %v15860_v45  ;;  %v15861_v41 = vld [vmem:[#allocation72_spill] sm:$0xff]  ;;  %v9407_v46 = vsel %vm9399_vm14, %v9398_v43, %v15862_v54  ;;  %v15864_v19 = vld [vmem:[#allocation73_spill] sm:$0xff]  ;;  %v15868_v45 = vld [vmem:[#allocation75_spill] sm:$0xff] }
 0x5dd   : > { %v9409_v50 = vsel %vm9408_vm15, %v9400_v29, %v15861_v41  ;;  %v9411_v16 = vsel %vm9408_vm15, %v9402_v18, %v15863_v31  ;;  %v9410_v6 = vsel %vm9408_vm15, %v9401_v20, %v15864_v19  ;;  %v15865_v44 = vld [vmem:[#allocation29_spill] sm:$0xff]  ;;  %v15866_v11 = vld [vmem:[#allocation28_spill] sm:$0xff]  ;;  %v9414_v29 = vsel %vm9408_vm15, %v9405_v61, %v15868_v45  ;;  %v15870_v43 = vld [vmem:[#allocation78_spill] sm:$0xff] }
 0x5de   : > { %v9413_v37 = vsel %vm9408_vm15, %v9404_v48, %v15865_v44  ;;  %v9412_v51 = vsel %vm9408_vm15, %v9403_v10, %v15866_v11  ;;  %v15867_v35 = vld [vmem:[#allocation76_spill] sm:$0xff]  ;;  %v9418_v18 = vsel %vm9417_vm0, %v9409_v50, %v15870_v43  ;;  %v15871_v54 = vld [vmem:[#allocation77_spill] sm:$0xff]  ;;  %v15873_v19 = vld [vmem:[#allocation79_spill] sm:$0xff]  ;;  %v9423_v50 = vsel %vm9417_vm0, %v9414_v29, %v15877_v7 }
 0x5df   : > { %v14971_v59 = vpop.permute.xlu1 %9226  ;;  %v9415_v33 = vsel %vm9408_vm15, %v9406_v27, %v15867_v35  ;;  %v9416_v20 = vsel %vm9408_vm15, %v9407_v46, %v15871_v54  ;;  %v15872_v31 = vld [vmem:[#allocation80_spill] sm:$0xff]  ;;  %v9419_v10 = vsel %vm9417_vm0, %v9410_v6, %v15873_v19  ;;  %v15874_v44 = vld [vmem:[#allocation67_spill] sm:$0xff]  ;;  %v15875_v11 = vld [vmem:[#allocation81_spill] sm:$0xff] }
 0x5e0   : > { %v14973_v63 = vpop.permute.xlu0 %9228  ;;  %v9420_v48 = vsel %vm9417_vm0, %v9411_v16, %v15872_v31  ;;  %v9422_v27 = vsel %vm9417_vm0, %v9413_v37, %v15874_v44  ;;  %v9421_v61 = vsel %vm9417_vm0, %v9412_v51, %v15875_v11  ;;  %v15876_v35 = vld [vmem:[#allocation82_spill] sm:$0xff]  ;;  %v15879_v46 = vld [vmem:[#allocation84_spill] sm:$0xff]  ;;  %v15880_v54 = vld [vmem:[#allocation83_spill] sm:$0xff] }
 0x5e1   : > { %v9424_v45 = vsel %vm9417_vm0, %v9415_v33, %v15876_v35  ;;  %v15115_v16 = vsel %vm9426_vm1, %v9418_v18, %v15879_v46  ;;  %v9425_v6 = vsel %vm9417_vm0, %v9416_v20, %v15880_v54  ;;  %v15881_v31 = vld [vmem:[#allocation86_spill] sm:$0xff]  ;;  %v15882_v51 = vld [vmem:[#allocation85_spill] sm:$0xff]  ;;  %v15883_v33 = vld [vmem:[#allocation88_spill] sm:$0xff] }
 0x5e2   : > { %v15121_v37 = vsel %vm9426_vm1, %v9420_v48, %v15881_v31  ;;  %v15125_v19 = vsel %vm9426_vm1, %v9419_v10, %v15882_v51  ;;  %v15129_v7 = vsel %vm9426_vm1, %v9422_v27, %v15883_v33  ;;  %v15884_v29 = vld [vmem:[#allocation87_spill] sm:$0xff]  ;;  %v15885_v18 = vld [vmem:[#allocation93_spill] sm:$0xff]  ;;  %v15889_v10 = vld [vmem:[#allocation96_spill] sm:$0xff] }
 0x5e3   : > { %v14975_v14 = vpop.permute.xlu1 %9230  ;;  %v15133_v44 = vsel %vm9426_vm1, %v9421_v61, %v15884_v29  ;;  %v15137_v11 = vsel %vm9426_vm1, %v9424_v45, %v15885_v18  ;;  %v15887_v20 = vld [vmem:[#allocation91_spill] sm:$0xff]  ;;  %v15890_v46 = vld [vmem:[#allocation42_spill] sm:$0xff]  ;;  %v15893_v61 = vld [vmem:[#allocation100_spill] sm:$0xff] }
 0x5e4   : > { %v14977_v52 = vpop.permute.xlu0 %9232  ;;  %15886 = vst [vmem:[#allocation49_spill] sm:$0xff] %v15137_v11  ;;  %v15141_v48 = vsel %vm9426_vm1, %v9423_v50, %v15887_v20  ;;  %v9435_v54 = vsel %vm9372_vm11, %v15890_v46, %v15889_v10  ;;  %v15891_v27 = vld [vmem:[#allocation94_spill] sm:$0xff]  ;;  %v15894_v51 = vld [vmem:[#allocation44_spill] sm:$0xff]  ;;  %v15896_v29 = vld [vmem:[#allocation43_spill] sm:$0xff] }
 0x5e5   : > { %v15150_v31 = vsel %vm9426_vm1, %v9425_v6, %v15891_v27  ;;  %v9437_v33 = vsel %vm9372_vm11, %v15894_v51, %v15893_v61  ;;  %v15895_v45 = vld [vmem:[#allocation98_spill] sm:$0xff]  ;;  %v15897_v50 = vld [vmem:[#allocation104_spill] sm:$0xff]  ;;  %v15903_v27 = vld [vmem:[#allocation105_spill] sm:$0xff] }
 0x5e6   : > { %15892 = vst [vmem:[#allocation51_spill] sm:$0xff] %v15150_v31  ;;  %v9436_v18 = vsel %vm9372_vm11, %v15896_v29, %v15895_v45  ;;  %v15898_v20 = vld [vmem:[#allocation48_spill] sm:$0xff]  ;;  %v15901_v46 = vld [vmem:[#allocation106_spill] sm:$0xff]  ;;  %v15906_v29 = vld [vmem:[#allocation107_spill] sm:$0xff] }
 0x5e7   : > { %v14979_v30 = vpop.permute.xlu1 %9234  ;;  %v9439_v32 = vsel %vm9372_vm11, %v15898_v20, %v15897_v50  ;;  %v15904_v31 = vld [vmem:[#allocation50_spill] sm:$0xff]  ;;  %v15908_v20 = vld [vmem:[#allocation4_spill] sm:$0xff] }
 0x5e8   : > { %15819 = vst [vmem:[#allocation95_spill] sm:$0xff] %v14979_v30  ;;  %v14981_v60 = vpop.permute.xlu0 %9252  ;;  %v9440_v61 = vsel %vm9372_vm11, %v15904_v31, %v15903_v27  ;;  %v15907_v11 = vld [vmem:[#allocation54_spill] sm:$0xff]  ;;  %v15912_v27 = vld [vmem:[#allocation8_spill] sm:$0xff]  ;;  %v15921_v30 = vld [vmem:[#allocation115_spill] sm:$0xff] }
 0x5e9   : > { %v9442_v50 = vsel %vm9372_vm11, %v15907_v11, %v15906_v29  ;;  %v15914_v11 = vld [vmem:[#allocation34_spill] sm:$0xff]  ;;  %v15915_v29 = vld [vmem:[#allocation16_spill] sm:$0xff] }
 0x5eb   : > { %v14983_v38 = vpop.permute.xlu1 %9254 }
 0x5ec   : > { %v14985_v2 = vpop.permute.xlu0 %9256 }
 0x5ef   : > { %v14987_v13 = vpop.permute.xlu1 %9258 }
 0x5f0   : > { %v14989_v42 = vpop.permute.xlu0 %9260 }
 0x5f3   : > { %v14991_v39 = vpop.permute.xlu1 %9262 }
 0x5f4   : > { %v14993_v55 = vpop.permute.xlu0 %9264 }
 0x5f5   : > { %15820 = vst [vmem:[#allocation97_spill] sm:$0xff] %v14993_v55  ;;  %v9448_v55 = vsel %vm9381_vm12, %v9440_v61, %v15912_v27  ;;  %v15920_v27 = vld [vmem:[#allocation113_spill] sm:$0xff] }
 0x5f7   : > { %v14995_v62 = vpop.permute.xlu1 %9266 }
 0x5f8   : > { %15821 = vst [vmem:[#allocation99_spill] sm:$0xff] %v14995_v62  ;;  %v14997_v22 = vpop.permute.xlu0 %9284  ;;  %v15905_v62 = vld [vmem:[#allocation108_spill] sm:$0xff] }
 0x5f9   : > { %v9443_v45 = vsel %vm9381_vm12, %v9435_v54, %v15905_v62  ;;  %v15913_v62 = vld [vmem:[#allocation14_spill] sm:$0xff] }
 0x5fa   : > { %v9451_v54 = vsel %vm9390_vm13, %v9443_v45, %v15913_v62 }
 0x5fb   : > { %v15020_v25 = vpop.permute.xlu1 %9286 }
 0x5fc   : > { %v15039_v5 = vpop.permute.xlu0 %9288 }
 0x5ff   : > { %v15057_v23 = vpop.permute.xlu1 %9290 }
 0x600   : > { %v15075_v56 = vpop.permute.xlu0 %9292 }
 0x603   : > { %v15093_v41 = vpop.permute.xlu1 %9294 }
 0x604   : > { %15869 = vst [vmem:[#allocation47_spill] sm:$0xff] %v15093_v41  ;;  %v15111_v43 = vpop.permute.xlu0 %9296  ;;  %v15911_v41 = vld [vmem:[#allocation109_spill] sm:$0xff] }
 0x605   : > { %15878 = vst [vmem:[#allocation21_spill] sm:$0xff] %v15111_v43  ;;  %v15902_v43 = vld [vmem:[#allocation52_spill] sm:$0xff] }
 0x606   : > { %v9441_v6 = vsel %vm9372_vm11, %v15902_v43, %v15901_v46  ;;  %v15910_v43 = vld [vmem:[#allocation6_spill] sm:$0xff] }
 0x607   : > { %v15143_v35 = vpop.permute.xlu1 %9298  ;;  %v9447_v46 = vsel %vm9381_vm12, %v9439_v32, %v15910_v43  ;;  %v15919_v43 = vld [vmem:[#allocation114_spill] sm:$0xff] }
 0x608   : > { %15888 = vst [vmem:[#allocation24_spill] sm:$0xff] %v15143_v35  ;;  %v15899_v35 = vld [vmem:[#allocation102_spill] sm:$0xff]  ;;  %v15170_v51 = vpop.permute.xlu0 %9316 }
 0x609   : > { %v9438_v10 = vsel %vm9372_vm11, %v15900_v15, %v15899_v35  ;;  %v9445_v15 = vsel %vm9381_vm12, %v9437_v33, %v15908_v20  ;;  %v15909_v35 = vld [vmem:[#allocation32_spill] sm:$0xff]  ;;  %v15916_v20 = vld [vmem:[#allocation110_spill] sm:$0xff] }
 0x60a   : > { %v9444_v49 = vsel %vm9381_vm12, %v9436_v18, %v15909_v35  ;;  %v9446_v31 = vsel %vm9381_vm12, %v9438_v10, %v15911_v41  ;;  %v9453_v33 = vsel %vm9390_vm13, %v9445_v15, %v15914_v11  ;;  %v9455_v32 = vsel %vm9390_vm13, %v9447_v46, %v15916_v20  ;;  %v15917_v35 = vld [vmem:[#allocation18_spill] sm:$0xff]  ;;  %v15918_v10 = vld [vmem:[#allocation112_spill] sm:$0xff] }
 0x60b   : > { %v15189_v12 = vpop.permute.xlu1 %9318  ;;  %v9452_v18 = vsel %vm9390_vm13, %v9444_v49, %v15915_v29  ;;  %v9454_v41 = vsel %vm9390_vm13, %v9446_v31, %v15917_v35  ;;  %v9459_v61 = vsel %vm9399_vm14, %v9451_v54, %v15918_v10  ;;  %v9461_v45 = vsel %vm9399_vm14, %v9453_v33, %v15919_v43  ;;  %v15922_v49 = vld [vmem:[#allocation39_spill] sm:$0xff]  ;;  %v15923_v29 = vld [vmem:[#allocation41_spill] sm:$0xff]  ;;  %v15924_v20 = vld [vmem:[#allocation40_spill] sm:$0xff] }
 0x60c   : > { %v9460_v62 = vsel %vm9399_vm14, %v9452_v18, %v15920_v27  ;;  %v9462_v15 = vsel %vm9399_vm14, %v9454_v41, %v15921_v30  ;;  %v15207_v11 = vpop.permute.xlu0 %9320  ;;  %v9463_v46 = vsel %vm9399_vm14, %v9455_v32, %v15922_v49  ;;  %v9467_v31 = vsel %vm9408_vm15, %v9459_v61, %v14124_v9  ;;  %v15925_v35 = vld [vmem:[#allocation121_spill] sm:$0xff]  ;;  %v15926_v10 = vld [vmem:[#allocation122_spill] sm:$0xff]  ;;  %v15927_v9 = vld [vmem:[#allocation123_spill] sm:$0xff] }
 0x60d   : > { %v9469_v54 = vsel %vm9408_vm15, %v9461_v45, %v14154_v28  ;;  %v9468_v33 = vsel %vm9408_vm15, %v9460_v62, %v14134_v24  ;;  %v9471_v18 = vsel %vm9408_vm15, %v9463_v46, %v15923_v29  ;;  %v9470_v30 = vsel %vm9408_vm15, %v9462_v15, %v15924_v20  ;;  %v15928_v61 = vld [vmem:[#allocation124_spill] sm:$0xff]  ;;  %v15929_v45 = vld [vmem:[#allocation129_spill] sm:$0xff]  ;;  %v15930_v62 = vld [vmem:[#allocation130_spill] sm:$0xff] }
 0x60e   : > { %v9475_v41 = vsel %vm9417_vm0, %v9467_v31, %v15925_v35  ;;  %v9476_v32 = vsel %vm9417_vm0, %v9468_v33, %v15926_v10  ;;  %v9477_v28 = vsel %vm9417_vm0, %v9469_v54, %v15927_v9  ;;  %v9478_v24 = vsel %vm9417_vm0, %v9470_v30, %v15928_v61  ;;  %v15931_v49 = vld [vmem:[#allocation10_spill] sm:$0xff]  ;;  %v15932_v31 = vld [vmem:[#allocation125_spill] sm:$0xff]  ;;  %v15933_v29 = vld [vmem:[#allocation131_spill] sm:$0xff] }
 0x60f   : > { %v15225_v43 = vpop.permute.xlu1 %9322  ;;  %v9483_v27 = vsel %vm9426_vm1, %v9475_v41, %v15929_v45  ;;  %v9484_v15 = vsel %vm9426_vm1, %v9476_v32, %v15930_v62  ;;  %v9449_v46 = vsel %vm9381_vm12, %v9441_v6, %v15931_v49  ;;  %v9479_v33 = vsel %vm9417_vm0, %v9471_v18, %v15932_v31  ;;  %v15934_v35 = vld [vmem:[#allocation132_spill] sm:$0xff]  ;;  %v15936_v9 = vld [vmem:[#allocation37_spill] sm:$0xff]  ;;  %v15937_v61 = vld [vmem:[#allocation111_spill] sm:$0xff] }
 0x610   : > { %v9485_v20 = vsel %vm9426_vm1, %v9477_v28, %v15933_v29  ;;  %v9486_v54 = vsel %vm9426_vm1, %v9478_v24, %v15934_v35  ;;  %v15243_v10 = vpop.permute.xlu0 %9324  ;;  %v15935_v30 = vld [vmem:[#allocation12_spill] sm:$0xff]  ;;  %v9457_v32 = vsel %vm9390_vm13, %v9449_v46, %v15936_v9  ;;  %v9456_v6 = vsel %vm9390_vm13, %v9448_v55, %v15937_v61  ;;  %v15938_v45 = vld [vmem:[#allocation133_spill] sm:$0xff]  ;;  %v15939_v62 = vld [vmem:[#allocation38_spill] sm:$0xff] }
 0x611   : > { %v9450_v41 = vsel %vm9381_vm12, %v9442_v50, %v15935_v30  ;;  %v9487_v18 = vsel %vm9426_vm1, %v9479_v33, %v15938_v45  ;;  %v15940_v49 = vld [vmem:[#allocation116_spill] sm:$0xff]  ;;  %v9635_v31 = vcombine.low %v15115_v16, %v9483_v27  ;;  %v9652_v29 = vcombine.low %v15125_v19, %v9484_v15  ;;  %v15941_v35 = vld [vmem:[#allocation117_spill] sm:$0xff]  ;;  %v15945_v27 = vld [vmem:[#allocation126_spill] sm:$0xff] }
 0x612   : > { %v9458_v28 = vsel %vm9390_vm13, %v9450_v41, %v15939_v62  ;;  %v9464_v24 = vsel %vm9399_vm14, %v9456_v6, %v15940_v49  ;;  %v9465_v46 = vsel %vm9399_vm14, %v9457_v32, %v15941_v35  ;;  %v15942_v30 = vld [vmem:[#allocation45_spill] sm:$0xff]  ;;  %v9669_v33 = vcombine.low %v15121_v37, %v9485_v20  ;;  %v15943_v41 = vld [vmem:[#allocation118_spill] sm:$0xff]  ;;  %v15944_v6 = vld [vmem:[#allocation119_spill] sm:$0xff] }
 0x613   : > { %v15259_v50 = vpop.permute.xlu1 %9326  ;;  %v9472_v55 = vsel %vm9408_vm15, %v9464_v24, %v15942_v30  ;;  %v9686_v9 = vcombine.low %v15133_v44, %v9486_v54  ;;  %v9466_v61 = vsel %vm9399_vm14, %v9458_v28, %v15943_v41  ;;  %v9473_v16 = vsel %vm9408_vm15, %v9465_v46, %v15944_v6  ;;  %v15946_v32 = vld [vmem:[#allocation120_spill] sm:$0xff]  ;;  %v15947_v49 = vld [vmem:[#allocation127_spill] sm:$0xff]  ;;  %v15948_v44 = vld [vmem:[#allocation134_spill] sm:$0xff] }
 0x614   : > { %v9480_v19 = vsel %vm9417_vm0, %v9472_v55, %v15945_v27  ;;  %v9703_v15 = vcombine.low %v15129_v7, %v9487_v18  ;;  %v15274_v45 = vpop.permute.xlu0 %9328  ;;  %v9474_v62 = vsel %vm9408_vm15, %v9466_v61, %v15946_v32  ;;  %v9481_v37 = vsel %vm9417_vm0, %v9473_v16, %v15947_v49  ;;  %v15949_v24 = vld [vmem:[#allocation128_spill] sm:$0xff]  ;;  %v15950_v41 = vld [vmem:[#allocation135_spill] sm:$0xff] }
 0x615   : > { %v15282_v20 = vsel %vm9426_vm1, %v9480_v19, %v15948_v44  ;;  %v9563_v54 = vsel %vm9390_vm13, %v14928_v40, %v14965_v57  ;;  %v9643_v28 = vrot.slane %v9635_v31, %v11768_v3  ;;  %v9482_v7 = vsel %vm9417_vm0, %v9474_v62, %v15949_v24  ;;  %v15951_v6 = vld [vmem:[#allocation136_spill] sm:$0xff]  ;;  %v15955_v24 = vld [vmem:[#allocation47_spill] sm:$0xff] }
 0x616   : > { %v9660_v18 = vrot.slane %v9652_v29, %v11768_v3  ;;  %v9571_v35 = vsel %vm9399_vm14, %v9563_v54, %v14981_v60  ;;  %v15296_v30 = vrot.slane %v9669_v33, %v11768_v3  ;;  %v15299_v55 = vrot.slane %v9686_v9, %v11768_v3 }
 0x617   : > { %v15293_v46 = vpop.permute.xlu1 %9330  ;;  %v9564_v40 = vsel %vm9390_vm13, %v14933_v21, %v14967_v26  ;;  %v9579_v57 = vsel %vm9408_vm15, %v9571_v35, %v14997_v22  ;;  %v15307_v31 = vrot.slane %v9703_v15, %v11768_v3  ;;  %v9720_v60 = vcombine.low %v15141_v48, %v15282_v20 }
 0x618   : > { %v9572_v29 = vsel %vm9399_vm14, %v9564_v40, %v14983_v38  ;;  %v9587_v33 = vsel %vm9417_vm0, %v9579_v57, %v15170_v51  ;;  %v9349_v9 = vpop.permute.xlu0 %9348  ;;  %v15317_v61 = vsel %vm9426_vm1, %v9481_v37, %v15950_v41  ;;  %v9565_v21 = vsel %vm9390_vm13, %v14938_v58, %v14969_v4  ;;  %v15958_v41 = vld [vmem:[#allocation99_spill] sm:$0xff] }
 0x619   : > { %v9580_v26 = vsel %vm9408_vm15, %v9572_v29, %v15020_v25  ;;  %v9595_v22 = vsel %vm9426_vm1, %v9587_v33, %v9349_v9  ;;  %v15327_v38 = vsel %vm9426_vm1, %v9482_v7, %v15951_v6  ;;  %v9573_v51 = vsel %vm9399_vm14, %v9565_v21, %v14985_v2  ;;  %v15957_v33 = vld [vmem:[#allocation49_spill] sm:$0xff] }
 0x61a   : > { %v9588_v16 = vsel %vm9417_vm0, %v9580_v26, %v15189_v12  ;;  %v9636_v27 = vcombine.low %v14891_v8, %v9595_v22  ;;  %v9567_v58 = vsel %vm9390_vm13, %v14948_v53, %v14973_v63  ;;  %v9566_v4 = vsel %vm9390_vm13, %v14943_v34, %v14971_v59  ;;  %v15959_v26 = vld [vmem:[#allocation21_spill] sm:$0xff] }
 0x61b   : > { %v9351_v19 = vpop.permute.xlu1 %9350  ;;  %v9581_v25 = vsel %vm9408_vm15, %v9573_v51, %v15039_v5  ;;  %v9574_v12 = vsel %vm9399_vm14, %v9566_v4, %v14987_v13  ;;  %v9568_v34 = vsel %vm9390_vm13, %v14953_v17, %v14975_v14  ;;  %v9575_v59 = vsel %vm9399_vm14, %v9567_v58, %v14989_v42  ;;  %v15961_v58 = vld [vmem:[#allocation51_spill] sm:$0xff] }
 0x61c   : > { %v9596_v2 = vsel %vm9426_vm1, %v9588_v16, %v9351_v19  ;;  %v9589_v8 = vsel %vm9417_vm0, %v9581_v25, %v15207_v11  ;;  %v9650_v15 = vrot.slane %v9636_v27, %v11768_v3  ;;  %v9353_v32 = vpop.permute.xlu0 %9352  ;;  %v9582_v63 = vsel %vm9408_vm15, %v9574_v12, %v15057_v23  ;;  %v15962_v25 = vld [vmem:[#allocation24_spill] sm:$0xff] }
 0x61d   : > { %v9653_v53 = vcombine.low %v14896_v36, %v9596_v2  ;;  %v9597_v13 = vsel %vm9426_vm1, %v9589_v8, %v9353_v32  ;;  %v9590_v36 = vsel %vm9417_vm0, %v9582_v63, %v15225_v43  ;;  %v9569_v23 = vsel %vm9390_vm13, %v14958_v1, %v14977_v52  ;;  %v15952_v1 = vld [vmem:[#allocation95_spill] sm:$0xff]  ;;  %v15953_v52 = vld [vmem:[#allocation92_spill] sm:$0xff]  ;;  %v15963_v8 = vld [vmem:[#allocation89_spill] sm:$0xff] }
 0x61e   : > { %v9651_v5 = vcombine.low %v9643_v28, %v9650_v15  ;;  %v9670_v17 = vcombine.low %v14901_v0, %v9597_v13  ;;  %v9576_v11 = vsel %vm9399_vm14, %v9568_v34, %v14991_v39  ;;  %v9583_v62 = vsel %vm9408_vm15, %v9575_v59, %v15075_v56  ;;  %v15954_v28 = vld [vmem:[#allocation97_spill] sm:$0xff]  ;;  %v15964_v34 = vld [vmem:[#allocation90_spill] sm:$0xff] }
 0x61f   : > { %v9667_v14 = vrot.slane %v9653_v53, %v11768_v3  ;;  %v9355_v42 = vpop.permute.xlu1 %9354  ;;  %v9591_v43 = vsel %vm9417_vm0, %v9583_v62, %v15243_v10  ;;  %v9570_v39 = vsel %vm9390_vm13, %v15953_v52, %v15952_v1  ;;  %v9577_v56 = vsel %vm9399_vm14, %v9569_v23, %v15954_v28 }
 0x620   : > { %v9598_v49 = vsel %vm9426_vm1, %v9590_v36, %v9355_v42  ;;  %9779 = vst [vmem:[%s15360_s27] sm:$0xff] %v9651_v5  ;;  %v9684_v0 = vrot.slane %v9670_v17, %v11768_v3  ;;  %v9357_v44 = vpop.permute.xlu0 %9356  ;;  %v9584_v7 = vsel %vm9408_vm15, %v9576_v11, %v15955_v24  ;;  %v9737_v9 = vcombine.low %v15957_v33, %v15317_v61  ;;  %v15960_v61 = vld [vmem:[#allocation103_spill] sm:$0xff] }
 0x621   : > { %v9668_v37 = vcombine.low %v9660_v18, %v9667_v14  ;;  %v9687_v54 = vcombine.low %v14906_v47, %v9598_v49  ;;  %v9599_v10 = vsel %vm9426_vm1, %v9591_v43, %v9357_v44  ;;  %v9592_v35 = vsel %vm9417_vm0, %v9584_v7, %v15259_v50  ;;  %v15956_v47 = vld [vmem:[#allocation101_spill] sm:$0xff] }
 0x622   : > { %v9685_v18 = vcombine.low %v15296_v30, %v9684_v0  ;;  %v9704_v40 = vcombine.low %v15956_v47, %v9599_v10  ;;  %v9578_v21 = vsel %vm9399_vm14, %v9570_v39, %v15958_v41  ;;  %v9585_v22 = vsel %vm9408_vm15, %v9577_v56, %v15959_v26 }
 0x623   : > { %9780 = vst [vmem:[%s15360_s27 + $0x8] sm:$0xff] %v9668_v37  ;;  %v9701_v57 = vrot.slane %v9687_v54, %v11768_v3  ;;  %v9359_v29 = vpop.permute.xlu1 %9358  ;;  %v9593_v30 = vsel %vm9417_vm0, %v9585_v22, %v15274_v45  ;;  %v9728_v19 = vrot.slane %v9720_v60, %v11768_v3  ;;  %v9754_v4 = vcombine.low %v15961_v58, %v15327_v38 }
 0x624   : > { %v9600_v50 = vsel %vm9426_vm1, %v9592_v35, %v9359_v29  ;;  %9781 = vst [vmem:[%s15360_s27 + $0x10] sm:$0xff] %v9685_v18  ;;  %v9718_v6 = vrot.slane %v9704_v40, %v11768_v3  ;;  %v9361_v16 = vpop.permute.xlu0 %9360  ;;  %v9586_v45 = vsel %vm9408_vm15, %v9578_v21, %v15962_v25  ;;  %v9745_v15 = vrot.slane %v9737_v9, %v11768_v3 }
 0x625   : > { %v9702_v51 = vcombine.low %v15299_v55, %v9701_v57  ;;  %v9721_v27 = vcombine.low %v15960_v61, %v9600_v50  ;;  %v9601_v2 = vsel %vm9426_vm1, %v9593_v30, %v9361_v16  ;;  %v9594_v55 = vsel %vm9417_vm0, %v9586_v45, %v15293_v46 }
 0x626   : > { %v9719_v12 = vcombine.low %v15307_v31, %v9718_v6  ;;  %v9738_v48 = vcombine.low %v15963_v8, %v9601_v2  ;;  %v9762_v59 = vrot.slane %v9754_v4, %v11768_v3 }
 0x627   : > { %9782 = vst [vmem:[%s15360_s27 + $0x18] sm:$0xff] %v9702_v51  ;;  %v9735_v20 = vrot.slane %v9721_v27, %v11768_v3  ;;  %v9363_v60 = vpop.permute.xlu1 %9362 }
 0x628   : > { %v9602_v38 = vsel %vm9426_vm1, %v9594_v55, %v9363_v60  ;;  %9783 = vst [vmem:[%s15360_s27 + $0x20] sm:$0xff] %v9719_v12  ;;  %v9752_v32 = vrot.slane %v9738_v48, %v11768_v3 }
 0x629   : > { %v9736_v53 = vcombine.low %v9728_v19, %v9735_v20  ;;  %v9755_v46 = vcombine.low %v15964_v34, %v9602_v38 }
 0x62a   : > { %v9753_v31 = vcombine.low %v9745_v15, %v9752_v32 }
 0x62b   : > { %9784 = vst [vmem:[%s15360_s27 + $0x28] sm:$0xff] %v9736_v53  ;;  %v9769_v63 = vrot.slane %v9755_v46, %v11768_v3 }
 0x62c   : > { %9785 = vst [vmem:[%s15360_s27 + $0x30] sm:$0xff] %v9753_v31 }
 0x62d   : > { %v9770_v13 = vcombine.low %v9762_v59, %v9769_v63 }
 0x62f   : > { %9786 = vst [vmem:[%s15360_s27 + $0x38] sm:$0xff] %v9770_v13 }
 0x630 PF: > { %s15_s22 = sadd.s32 1, %s10352_s22   ;;  %s15965_s18 = smov %s10344_s20 }
 0x631   : > { %p12_p12 = scmp.ge.s32.totalorder %s15_s22, 10   ;;  %s15966_s19 = smov %s10348_s21 }
 0x632   : > { %s15967_s20 = smov %s15970_s23  ;;  %s15968_s21 = smov %s15974_s24 }
 0x633   :  { %14 = sbr.rel (!%p12_p12) target bundleno = 3 (0x3), region = 79 }

</bundles_post_ra>
